<compile_context>
chip_gen: v7x
topology: tpu7x:2x2x1
jax: 0.10.0
libtpu: 0.0.40
codegen_flags: <defaults>
</compile_context>

<pallas_src>
import functools

import jax
import jax.numpy as jnp
from jax import lax
from jax.experimental import pallas as pl
from jax.experimental.pallas import tpu as pltpu


# Fixed interior offsets inside the shared zero-padded scratch plane.
# Row offset 2 covers the largest halo (5x5 conv, pad=2); column offset 8 keeps
# the interior write aligned to the 8-sublane boundary (W is the sublane axis).
_OFF_H = 2
_OFF_W = 8


def _conv_taps(pad_ref, w_ref, b_ref, *, H, W, C, K, relu):
    """Direct KxK conv (cross-correlation, stride 1) over the padded plane.

    Per-tap whole-plane accumulation: each of the K*K taps contributes one
    (H*W, C) x (C, C) contraction. Returns the (H*W, C) float32 result with
    the bias added once and an optional fused relu.
    """
    pad = (K - 1) // 2
    acc = jnp.zeros((H * W, C), jnp.float32)
    for kh in range(K):                      # static unroll over kernel taps
        for kw in range(K):
            slab = pad_ref[pl.ds(_OFF_H - pad + kh, H),
                           pl.ds(_OFF_W - pad + kw, W), :]
            acc = acc + jnp.dot(slab.reshape(H * W, C), w_ref[kh, kw],
                                preferred_element_type=jnp.float32)
    acc = acc + b_ref[...]                   # bias added once (not per row)
    if relu:
        acc = jnp.maximum(acc, 0.0)
    return acc


def residual_block4_kernel(x_ref, w1_ref, b1_ref, w2_ref, b2_ref,
                           w3_ref, b3_ref, w4_ref, b4_ref,
                           o_ref, pad_ref):
    _, H, W, C = x_ref.shape

    # Single memset per grid step: the halo ring stays zero for the rest of the
    # block because only the (fixed-position) interior is ever rewritten.
    pad_ref[...] = jnp.zeros_like(pad_ref)

    def stage(y_hwc):
        pad_ref[pl.ds(_OFF_H, H), pl.ds(_OFF_W, W), :] = y_hwc

    conv = functools.partial(_conv_taps, pad_ref, H=H, W=W, C=C)

    # y = relu(conv1(x)), 3x3, pad 1  (padded directly from x_ref, no copy)
    stage(x_ref[0])
    y = conv(w_ref=w1_ref, b_ref=b1_ref, K=3, relu=True)
    # y = conv2(y), 3x3, pad 1
    stage(y.reshape(H, W, C))
    y = conv(w_ref=w2_ref, b_ref=b2_ref, K=3, relu=False)
    # y = conv3(y), 5x5, pad 2
    stage(y.reshape(H, W, C))
    y = conv(w_ref=w3_ref, b_ref=b3_ref, K=5, relu=False)
    # Fused epilogue: 1x1 conv (no padding/staging) + residual add + final relu.
    y = jnp.dot(y, w4_ref[0, 0], preferred_element_type=jnp.float32) + b4_ref[...]
    out = jnp.maximum(x_ref[0].reshape(H * W, C) + y, 0.0)
    o_ref[0] = out.reshape(H, W, C).astype(o_ref.dtype)


def residual_block_four(x_nchw, params):
    """x_nchw: (N, C, H, W) float32 -> (N, C, H, W) float32."""
    N, C, H, W = x_nchw.shape
    x = jnp.transpose(x_nchw, (0, 2, 3, 1)).astype(jnp.float32)  # -> NHWC
    (w1, b1), (w2, b2), (w3, b3), (w4, b4) = params

    def full(a):
        return pl.BlockSpec(a.shape, lambda n, nd=a.ndim: (0,) * nd)

    pad_h = H + 2 * _OFF_H            # 2-deep halo above/below the interior
    pad_w = _OFF_W + W + 8            # aligned interior + >=2-col right halo

    out = pl.pallas_call(
        residual_block4_kernel,
        out_shape=jax.ShapeDtypeStruct((N, H, W, C), jnp.float32),
        grid_spec=pltpu.PrefetchScalarGridSpec(
            num_scalar_prefetch=0,
            grid=(N,),
            in_specs=[pl.BlockSpec((1, H, W, C), lambda n: (n, 0, 0, 0)),
                      full(w1), full(b1), full(w2), full(b2),
                      full(w3), full(b3), full(w4), full(b4)],
            out_specs=pl.BlockSpec((1, H, W, C), lambda n: (n, 0, 0, 0)),
            scratch_shapes=[
                pltpu.VMEM((pad_h, pad_w, C), jnp.float32),  # shared padded plane
            ]),
        compiler_params=pltpu.CompilerParams(
            dimension_semantics=("parallel",)),
    )(x, w1, b1, w2, b2, w3, b3, w4, b4)
    return jnp.transpose(out, (0, 3, 1, 2))  # -> NCHW


def init_params(key, C):
    """Deterministic Conv2d-style init: uniform(-1/sqrt(fan_in), 1/sqrt(fan_in))."""
    params = []
    for k in (3, 3, 5, 1):
        key, kw_, kb_ = jax.random.split(key, 3)
        fan_in = C * k * k
        bound = 1.0 / (fan_in ** 0.5)
        w = jax.random.uniform(kw_, (k, k, C, C), jnp.float32, -bound, bound)
        b = jax.random.uniform(kb_, (1, C), jnp.float32, -bound, bound)
        params.append((w, b))
    return params


def reference(x_nchw, params):
    """Pure-JAX (XLA) reference of the PyTorch forward pass."""
    x = jnp.transpose(x_nchw, (0, 2, 3, 1)).astype(jnp.float32)
    dn = lax.conv_dimension_numbers(x.shape, params[0][0].shape,
                                    ('NHWC', 'HWIO', 'NHWC'))

    def conv(a, w, b):
        return lax.conv_general_dilated(a, w, (1, 1), 'SAME',
                                        dimension_numbers=dn) + b.reshape(1, 1, 1, -1)

    y = jax.nn.relu(conv(x, *params[0]))
    y = conv(y, *params[1])
    y = conv(y, *params[2])
    y = conv(y, *params[3])
    out = jax.nn.relu(x + y)
    return jnp.transpose(out, (0, 3, 1, 2))


if __name__ == "__main__":
    key = jax.random.PRNGKey(0)
    kx, kp = jax.random.split(key)
    N, C, H, W = 2, 4, 16, 16
    x = jax.random.normal(kx, (N, C, H, W), jnp.float32)
    params = init_params(kp, C)

    out = residual_block_four(x, params)
    out = jax.block_until_ready(out)

    ref = reference(x, params)
    assert out.shape == (N, C, H, W)
    err = float(jnp.max(jnp.abs(out - ref)))
    assert jnp.allclose(out, ref, atol=1e-4, rtol=1e-4), f"max abs err = {err}"
    print("KERNEL_OK")
</pallas_src>

<mosaic_0001>
module attributes {stable_mosaic.version = 11 : i64} {
  func.func @residual_block4_kernel(%arg0: i32, %arg1: memref<1x16x16x4xf32, #tpu.memory_space<vmem>>, %arg2: memref<3x3x4x4xf32, #tpu.memory_space<vmem>>, %arg3: memref<1x4xf32, #tpu.memory_space<vmem>>, %arg4: memref<3x3x4x4xf32, #tpu.memory_space<vmem>>, %arg5: memref<1x4xf32, #tpu.memory_space<vmem>>, %arg6: memref<5x5x4x4xf32, #tpu.memory_space<vmem>>, %arg7: memref<1x4xf32, #tpu.memory_space<vmem>>, %arg8: memref<1x1x4x4xf32, #tpu.memory_space<vmem>>, %arg9: memref<1x4xf32, #tpu.memory_space<vmem>>, %arg10: memref<1x16x16x4xf32, #tpu.memory_space<vmem>>, %arg11: memref<20x32x4xf32, #tpu.memory_space<vmem>>) attributes {dimension_semantics = [#tpu.dimension_semantics<parallel>], iteration_bounds = array<i64: 2>, scalar_prefetch = 0 : i64, scratch_operands = 1 : i64, tpu.core_type = #tpu.core_type<tc>, window_params = [{transform_indices = @transform_0, window_bounds = array<i64: 1, 16, 16, 4>}, {pipeline_mode = #tpu.pipeline_mode<synchronous>, transform_indices = @transform_1, window_bounds = array<i64: 3, 3, 4, 4>}, {pipeline_mode = #tpu.pipeline_mode<synchronous>, transform_indices = @transform_2, window_bounds = array<i64: 1, 4>}, {pipeline_mode = #tpu.pipeline_mode<synchronous>, transform_indices = @transform_3, window_bounds = array<i64: 3, 3, 4, 4>}, {pipeline_mode = #tpu.pipeline_mode<synchronous>, transform_indices = @transform_4, window_bounds = array<i64: 1, 4>}, {pipeline_mode = #tpu.pipeline_mode<synchronous>, transform_indices = @transform_5, window_bounds = array<i64: 5, 5, 4, 4>}, {pipeline_mode = #tpu.pipeline_mode<synchronous>, transform_indices = @transform_6, window_bounds = array<i64: 1, 4>}, {pipeline_mode = #tpu.pipeline_mode<synchronous>, transform_indices = @transform_7, window_bounds = array<i64: 1, 1, 4, 4>}, {pipeline_mode = #tpu.pipeline_mode<synchronous>, transform_indices = @transform_8, window_bounds = array<i64: 1, 4>}, {transform_indices = @transform_9, window_bounds = array<i64: 1, 16, 16, 4>}]} {
    %cst = arith.constant 0.000000e+00 : f32
    %0 = vector.broadcast %cst : f32 to vector<20x32x4xf32>
    %c0 = arith.constant 0 : index
    %c0_0 = arith.constant 0 : index
    %c0_1 = arith.constant 0 : index
    %1 = vector.load %arg11[%c0, %c0_0, %c0_1] : memref<20x32x4xf32, #tpu.memory_space<vmem>>, vector<20x32x4xf32>
    tpu.vector_store %arg11[%c0, %c0_0, %c0_1], %0 {strides = array<i32>} : memref<20x32x4xf32, #tpu.memory_space<vmem>>, vector<20x32x4xf32>,
    %c0_2 = arith.constant 0 : index
    %c0_3 = arith.constant 0 : index
    %c0_4 = arith.constant 0 : index
    %c0_5 = arith.constant 0 : index
    %2 = vector.load %arg1[%c0_2, %c0_3, %c0_4, %c0_5] : memref<1x16x16x4xf32, #tpu.memory_space<vmem>>, vector<1x16x16x4xf32>
    %3 = vector.shape_cast %2 : vector<1x16x16x4xf32> to vector<16x16x4xf32>
    %c2 = arith.constant 2 : index
    %c8 = arith.constant 8 : index
    %c0_6 = arith.constant 0 : index
    %4 = vector.load %arg11[%c2, %c8, %c0_6] : memref<20x32x4xf32, #tpu.memory_space<vmem>>, vector<16x16x4xf32>
    tpu.vector_store %arg11[%c2, %c8, %c0_6], %3 {strides = array<i32>} : memref<20x32x4xf32, #tpu.memory_space<vmem>>, vector<16x16x4xf32>,
    %cst_7 = arith.constant 0.000000e+00 : f32
    %5 = vector.broadcast %cst_7 : f32 to vector<256x4xf32>
    %c1 = arith.constant 1 : index
    %c7 = arith.constant 7 : index
    %c0_8 = arith.constant 0 : index
    %6 = vector.load %arg11[%c1, %c7, %c0_8] : memref<20x32x4xf32, #tpu.memory_space<vmem>>, vector<16x16x4xf32>
    %7 = vector.shape_cast %6 : vector<16x16x4xf32> to vector<256x4xf32>
    %c0_9 = arith.constant 0 : index
    %c0_10 = arith.constant 0 : index
    %c0_11 = arith.constant 0 : index
    %c0_12 = arith.constant 0 : index
    %8 = vector.load %arg2[%c0_9, %c0_10, %c0_11, %c0_12] : memref<3x3x4x4xf32, #tpu.memory_space<vmem>>, vector<1x1x4x4xf32>
    %9 = vector.shape_cast %8 : vector<1x1x4x4xf32> to vector<4x4xf32>
    %cst_13 = arith.constant dense<0.000000e+00> : vector<256x4xf32>
    %10 = tpu.matmul %7, %9, %cst_13 {dimension_numbers = #tpu.dot_dimension_numbers<[1], [0], [0], [1], [0, 0, 1, 1], [], []>} : vector<256x4xf32>, vector<4x4xf32>, vector<256x4xf32> -> vector<256x4xf32>
    %11 = arith.addf %5, %10 : vector<256x4xf32>
    %c1_14 = arith.constant 1 : index
    %c8_15 = arith.constant 8 : index
    %c0_16 = arith.constant 0 : index
    %12 = vector.load %arg11[%c1_14, %c8_15, %c0_16] : memref<20x32x4xf32, #tpu.memory_space<vmem>>, vector<16x16x4xf32>
    %13 = vector.shape_cast %12 : vector<16x16x4xf32> to vector<256x4xf32>
    %c0_17 = arith.constant 0 : index
    %c1_18 = arith.constant 1 : index
    %c0_19 = arith.constant 0 : index
    %c0_20 = arith.constant 0 : index
    %14 = vector.load %arg2[%c0_17, %c1_18, %c0_19, %c0_20] : memref<3x3x4x4xf32, #tpu.memory_space<vmem>>, vector<1x1x4x4xf32>
    %15 = vector.shape_cast %14 : vector<1x1x4x4xf32> to vector<4x4xf32>
    %cst_21 = arith.constant dense<0.000000e+00> : vector<256x4xf32>
    %16 = tpu.matmul %13, %15, %cst_21 {dimension_numbers = #tpu.dot_dimension_numbers<[1], [0], [0], [1], [0, 0, 1, 1], [], []>} : vector<256x4xf32>, vector<4x4xf32>, vector<256x4xf32> -> vector<256x4xf32>
    %17 = arith.addf %11, %16 : vector<256x4xf32>
    %c1_22 = arith.constant 1 : index
    %c9 = arith.constant 9 : index
    %c0_23 = arith.constant 0 : index
    %18 = vector.load %arg11[%c1_22, %c9, %c0_23] : memref<20x32x4xf32, #tpu.memory_space<vmem>>, vector<16x16x4xf32>
    %19 = vector.shape_cast %18 : vector<16x16x4xf32> to vector<256x4xf32>
    %c0_24 = arith.constant 0 : index
    %c2_25 = arith.constant 2 : index
    %c0_26 = arith.constant 0 : index
    %c0_27 = arith.constant 0 : index
    %20 = vector.load %arg2[%c0_24, %c2_25, %c0_26, %c0_27] : memref<3x3x4x4xf32, #tpu.memory_space<vmem>>, vector<1x1x4x4xf32>
    %21 = vector.shape_cast %20 : vector<1x1x4x4xf32> to vector<4x4xf32>
    %cst_28 = arith.constant dense<0.000000e+00> : vector<256x4xf32>
    %22 = tpu.matmul %19, %21, %cst_28 {dimension_numbers = #tpu.dot_dimension_numbers<[1], [0], [0], [1], [0, 0, 1, 1], [], []>} : vector<256x4xf32>, vector<4x4xf32>, vector<256x4xf32> -> vector<256x4xf32>
    %23 = arith.addf %17, %22 : vector<256x4xf32>
    %c2_29 = arith.constant 2 : index
    %c7_30 = arith.constant 7 : index
    %c0_31 = arith.constant 0 : index
    %24 = vector.load %arg11[%c2_29, %c7_30, %c0_31] : memref<20x32x4xf32, #tpu.memory_space<vmem>>, vector<16x16x4xf32>
    %25 = vector.shape_cast %24 : vector<16x16x4xf32> to vector<256x4xf32>
    %c1_32 = arith.constant 1 : index
    %c0_33 = arith.constant 0 : index
    %c0_34 = arith.constant 0 : index
    %c0_35 = arith.constant 0 : index
    %26 = vector.load %arg2[%c1_32, %c0_33, %c0_34, %c0_35] : memref<3x3x4x4xf32, #tpu.memory_space<vmem>>, vector<1x1x4x4xf32>
    %27 = vector.shape_cast %26 : vector<1x1x4x4xf32> to vector<4x4xf32>
    %cst_36 = arith.constant dense<0.000000e+00> : vector<256x4xf32>
    %28 = tpu.matmul %25, %27, %cst_36 {dimension_numbers = #tpu.dot_dimension_numbers<[1], [0], [0], [1], [0, 0, 1, 1], [], []>} : vector<256x4xf32>, vector<4x4xf32>, vector<256x4xf32> -> vector<256x4xf32>
    %29 = arith.addf %23, %28 : vector<256x4xf32>
    %c2_37 = arith.constant 2 : index
    %c8_38 = arith.constant 8 : index
    %c0_39 = arith.constant 0 : index
    %30 = vector.load %arg11[%c2_37, %c8_38, %c0_39] : memref<20x32x4xf32, #tpu.memory_space<vmem>>, vector<16x16x4xf32>
    %31 = vector.shape_cast %30 : vector<16x16x4xf32> to vector<256x4xf32>
    %c1_40 = arith.constant 1 : index
    %c1_41 = arith.constant 1 : index
    %c0_42 = arith.constant 0 : index
    %c0_43 = arith.constant 0 : index
    %32 = vector.load %arg2[%c1_40, %c1_41, %c0_42, %c0_43] : memref<3x3x4x4xf32, #tpu.memory_space<vmem>>, vector<1x1x4x4xf32>
    %33 = vector.shape_cast %32 : vector<1x1x4x4xf32> to vector<4x4xf32>
    %cst_44 = arith.constant dense<0.000000e+00> : vector<256x4xf32>
    %34 = tpu.matmul %31, %33, %cst_44 {dimension_numbers = #tpu.dot_dimension_numbers<[1], [0], [0], [1], [0, 0, 1, 1], [], []>} : vector<256x4xf32>, vector<4x4xf32>, vector<256x4xf32> -> vector<256x4xf32>
    %35 = arith.addf %29, %34 : vector<256x4xf32>
    %c2_45 = arith.constant 2 : index
    %c9_46 = arith.constant 9 : index
    %c0_47 = arith.constant 0 : index
    %36 = vector.load %arg11[%c2_45, %c9_46, %c0_47] : memref<20x32x4xf32, #tpu.memory_space<vmem>>, vector<16x16x4xf32>
    %37 = vector.shape_cast %36 : vector<16x16x4xf32> to vector<256x4xf32>
    %c1_48 = arith.constant 1 : index
    %c2_49 = arith.constant 2 : index
    %c0_50 = arith.constant 0 : index
    %c0_51 = arith.constant 0 : index
    %38 = vector.load %arg2[%c1_48, %c2_49, %c0_50, %c0_51] : memref<3x3x4x4xf32, #tpu.memory_space<vmem>>, vector<1x1x4x4xf32>
    %39 = vector.shape_cast %38 : vector<1x1x4x4xf32> to vector<4x4xf32>
    %cst_52 = arith.constant dense<0.000000e+00> : vector<256x4xf32>
    %40 = tpu.matmul %37, %39, %cst_52 {dimension_numbers = #tpu.dot_dimension_numbers<[1], [0], [0], [1], [0, 0, 1, 1], [], []>} : vector<256x4xf32>, vector<4x4xf32>, vector<256x4xf32> -> vector<256x4xf32>
    %41 = arith.addf %35, %40 : vector<256x4xf32>
    %c3 = arith.constant 3 : index
    %c7_53 = arith.constant 7 : index
    %c0_54 = arith.constant 0 : index
    %42 = vector.load %arg11[%c3, %c7_53, %c0_54] : memref<20x32x4xf32, #tpu.memory_space<vmem>>, vector<16x16x4xf32>
    %43 = vector.shape_cast %42 : vector<16x16x4xf32> to vector<256x4xf32>
    %c2_55 = arith.constant 2 : index
    %c0_56 = arith.constant 0 : index
    %c0_57 = arith.constant 0 : index
    %c0_58 = arith.constant 0 : index
    %44 = vector.load %arg2[%c2_55, %c0_56, %c0_57, %c0_58] : memref<3x3x4x4xf32, #tpu.memory_space<vmem>>, vector<1x1x4x4xf32>
    %45 = vector.shape_cast %44 : vector<1x1x4x4xf32> to vector<4x4xf32>
    %cst_59 = arith.constant dense<0.000000e+00> : vector<256x4xf32>
    %46 = tpu.matmul %43, %45, %cst_59 {dimension_numbers = #tpu.dot_dimension_numbers<[1], [0], [0], [1], [0, 0, 1, 1], [], []>} : vector<256x4xf32>, vector<4x4xf32>, vector<256x4xf32> -> vector<256x4xf32>
    %47 = arith.addf %41, %46 : vector<256x4xf32>
    %c3_60 = arith.constant 3 : index
    %c8_61 = arith.constant 8 : index
    %c0_62 = arith.constant 0 : index
    %48 = vector.load %arg11[%c3_60, %c8_61, %c0_62] : memref<20x32x4xf32, #tpu.memory_space<vmem>>, vector<16x16x4xf32>
    %49 = vector.shape_cast %48 : vector<16x16x4xf32> to vector<256x4xf32>
    %c2_63 = arith.constant 2 : index
    %c1_64 = arith.constant 1 : index
    %c0_65 = arith.constant 0 : index
    %c0_66 = arith.constant 0 : index
    %50 = vector.load %arg2[%c2_63, %c1_64, %c0_65, %c0_66] : memref<3x3x4x4xf32, #tpu.memory_space<vmem>>, vector<1x1x4x4xf32>
    %51 = vector.shape_cast %50 : vector<1x1x4x4xf32> to vector<4x4xf32>
    %cst_67 = arith.constant dense<0.000000e+00> : vector<256x4xf32>
    %52 = tpu.matmul %49, %51, %cst_67 {dimension_numbers = #tpu.dot_dimension_numbers<[1], [0], [0], [1], [0, 0, 1, 1], [], []>} : vector<256x4xf32>, vector<4x4xf32>, vector<256x4xf32> -> vector<256x4xf32>
    %53 = arith.addf %47, %52 : vector<256x4xf32>
    %c3_68 = arith.constant 3 : index
    %c9_69 = arith.constant 9 : index
    %c0_70 = arith.constant 0 : index
    %54 = vector.load %arg11[%c3_68, %c9_69, %c0_70] : memref<20x32x4xf32, #tpu.memory_space<vmem>>, vector<16x16x4xf32>
    %55 = vector.shape_cast %54 : vector<16x16x4xf32> to vector<256x4xf32>
    %c2_71 = arith.constant 2 : index
    %c2_72 = arith.constant 2 : index
    %c0_73 = arith.constant 0 : index
    %c0_74 = arith.constant 0 : index
    %56 = vector.load %arg2[%c2_71, %c2_72, %c0_73, %c0_74] : memref<3x3x4x4xf32, #tpu.memory_space<vmem>>, vector<1x1x4x4xf32>
    %57 = vector.shape_cast %56 : vector<1x1x4x4xf32> to vector<4x4xf32>
    %cst_75 = arith.constant dense<0.000000e+00> : vector<256x4xf32>
    %58 = tpu.matmul %55, %57, %cst_75 {dimension_numbers = #tpu.dot_dimension_numbers<[1], [0], [0], [1], [0, 0, 1, 1], [], []>} : vector<256x4xf32>, vector<4x4xf32>, vector<256x4xf32> -> vector<256x4xf32>
    %59 = arith.addf %53, %58 : vector<256x4xf32>
    %c0_76 = arith.constant 0 : index
    %c0_77 = arith.constant 0 : index
    %60 = vector.load %arg3[%c0_76, %c0_77] : memref<1x4xf32, #tpu.memory_space<vmem>>, vector<1x4xf32>
    %61 = vector.broadcast %60 : vector<1x4xf32> to vector<256x4xf32>
    %62 = arith.addf %59, %61 : vector<256x4xf32>
    %cst_78 = arith.constant 0.000000e+00 : f32
    %63 = vector.broadcast %cst_78 : f32 to vector<256x4xf32>
    %64 = arith.maximumf %62, %63 : vector<256x4xf32>
    %65 = vector.shape_cast %64 : vector<256x4xf32> to vector<16x16x4xf32>
    %c2_79 = arith.constant 2 : index
    %c8_80 = arith.constant 8 : index
    %c0_81 = arith.constant 0 : index
    %66 = vector.load %arg11[%c2_79, %c8_80, %c0_81] : memref<20x32x4xf32, #tpu.memory_space<vmem>>, vector<16x16x4xf32>
    tpu.vector_store %arg11[%c2_79, %c8_80, %c0_81], %65 {strides = array<i32>} : memref<20x32x4xf32, #tpu.memory_space<vmem>>, vector<16x16x4xf32>,
    %cst_82 = arith.constant 0.000000e+00 : f32
    %67 = vector.broadcast %cst_82 : f32 to vector<256x4xf32>
    %c1_83 = arith.constant 1 : index
    %c7_84 = arith.constant 7 : index
    %c0_85 = arith.constant 0 : index
    %68 = vector.load %arg11[%c1_83, %c7_84, %c0_85] : memref<20x32x4xf32, #tpu.memory_space<vmem>>, vector<16x16x4xf32>
    %69 = vector.shape_cast %68 : vector<16x16x4xf32> to vector<256x4xf32>
    %c0_86 = arith.constant 0 : index
    %c0_87 = arith.constant 0 : index
    %c0_88 = arith.constant 0 : index
    %c0_89 = arith.constant 0 : index
    %70 = vector.load %arg4[%c0_86, %c0_87, %c0_88, %c0_89] : memref<3x3x4x4xf32, #tpu.memory_space<vmem>>, vector<1x1x4x4xf32>
    %71 = vector.shape_cast %70 : vector<1x1x4x4xf32> to vector<4x4xf32>
    %cst_90 = arith.constant dense<0.000000e+00> : vector<256x4xf32>
    %72 = tpu.matmul %69, %71, %cst_90 {dimension_numbers = #tpu.dot_dimension_numbers<[1], [0], [0], [1], [0, 0, 1, 1], [], []>} : vector<256x4xf32>, vector<4x4xf32>, vector<256x4xf32> -> vector<256x4xf32>
    %73 = arith.addf %67, %72 : vector<256x4xf32>
    %c1_91 = arith.constant 1 : index
    %c8_92 = arith.constant 8 : index
    %c0_93 = arith.constant 0 : index
    %74 = vector.load %arg11[%c1_91, %c8_92, %c0_93] : memref<20x32x4xf32, #tpu.memory_space<vmem>>, vector<16x16x4xf32>
    %75 = vector.shape_cast %74 : vector<16x16x4xf32> to vector<256x4xf32>
    %c0_94 = arith.constant 0 : index
    %c1_95 = arith.constant 1 : index
    %c0_96 = arith.constant 0 : index
    %c0_97 = arith.constant 0 : index
    %76 = vector.load %arg4[%c0_94, %c1_95, %c0_96, %c0_97] : memref<3x3x4x4xf32, #tpu.memory_space<vmem>>, vector<1x1x4x4xf32>
    %77 = vector.shape_cast %76 : vector<1x1x4x4xf32> to vector<4x4xf32>
    %cst_98 = arith.constant dense<0.000000e+00> : vector<256x4xf32>
    %78 = tpu.matmul %75, %77, %cst_98 {dimension_numbers = #tpu.dot_dimension_numbers<[1], [0], [0], [1], [0, 0, 1, 1], [], []>} : vector<256x4xf32>, vector<4x4xf32>, vector<256x4xf32> -> vector<256x4xf32>
    %79 = arith.addf %73, %78 : vector<256x4xf32>
    %c1_99 = arith.constant 1 : index
    %c9_100 = arith.constant 9 : index
    %c0_101 = arith.constant 0 : index
    %80 = vector.load %arg11[%c1_99, %c9_100, %c0_101] : memref<20x32x4xf32, #tpu.memory_space<vmem>>, vector<16x16x4xf32>
    %81 = vector.shape_cast %80 : vector<16x16x4xf32> to vector<256x4xf32>
    %c0_102 = arith.constant 0 : index
    %c2_103 = arith.constant 2 : index
    %c0_104 = arith.constant 0 : index
    %c0_105 = arith.constant 0 : index
    %82 = vector.load %arg4[%c0_102, %c2_103, %c0_104, %c0_105] : memref<3x3x4x4xf32, #tpu.memory_space<vmem>>, vector<1x1x4x4xf32>
    %83 = vector.shape_cast %82 : vector<1x1x4x4xf32> to vector<4x4xf32>
    %cst_106 = arith.constant dense<0.000000e+00> : vector<256x4xf32>
    %84 = tpu.matmul %81, %83, %cst_106 {dimension_numbers = #tpu.dot_dimension_numbers<[1], [0], [0], [1], [0, 0, 1, 1], [], []>} : vector<256x4xf32>, vector<4x4xf32>, vector<256x4xf32> -> vector<256x4xf32>
    %85 = arith.addf %79, %84 : vector<256x4xf32>
    %c2_107 = arith.constant 2 : index
    %c7_108 = arith.constant 7 : index
    %c0_109 = arith.constant 0 : index
    %86 = vector.load %arg11[%c2_107, %c7_108, %c0_109] : memref<20x32x4xf32, #tpu.memory_space<vmem>>, vector<16x16x4xf32>
    %87 = vector.shape_cast %86 : vector<16x16x4xf32> to vector<256x4xf32>
    %c1_110 = arith.constant 1 : index
    %c0_111 = arith.constant 0 : index
    %c0_112 = arith.constant 0 : index
    %c0_113 = arith.constant 0 : index
    %88 = vector.load %arg4[%c1_110, %c0_111, %c0_112, %c0_113] : memref<3x3x4x4xf32, #tpu.memory_space<vmem>>, vector<1x1x4x4xf32>
    %89 = vector.shape_cast %88 : vector<1x1x4x4xf32> to vector<4x4xf32>
    %cst_114 = arith.constant dense<0.000000e+00> : vector<256x4xf32>
    %90 = tpu.matmul %87, %89, %cst_114 {dimension_numbers = #tpu.dot_dimension_numbers<[1], [0], [0], [1], [0, 0, 1, 1], [], []>} : vector<256x4xf32>, vector<4x4xf32>, vector<256x4xf32> -> vector<256x4xf32>
    %91 = arith.addf %85, %90 : vector<256x4xf32>
    %c2_115 = arith.constant 2 : index
    %c8_116 = arith.constant 8 : index
    %c0_117 = arith.constant 0 : index
    %92 = vector.load %arg11[%c2_115, %c8_116, %c0_117] : memref<20x32x4xf32, #tpu.memory_space<vmem>>, vector<16x16x4xf32>
    %93 = vector.shape_cast %92 : vector<16x16x4xf32> to vector<256x4xf32>
    %c1_118 = arith.constant 1 : index
    %c1_119 = arith.constant 1 : index
    %c0_120 = arith.constant 0 : index
    %c0_121 = arith.constant 0 : index
    %94 = vector.load %arg4[%c1_118, %c1_119, %c0_120, %c0_121] : memref<3x3x4x4xf32, #tpu.memory_space<vmem>>, vector<1x1x4x4xf32>
    %95 = vector.shape_cast %94 : vector<1x1x4x4xf32> to vector<4x4xf32>
    %cst_122 = arith.constant dense<0.000000e+00> : vector<256x4xf32>
    %96 = tpu.matmul %93, %95, %cst_122 {dimension_numbers = #tpu.dot_dimension_numbers<[1], [0], [0], [1], [0, 0, 1, 1], [], []>} : vector<256x4xf32>, vector<4x4xf32>, vector<256x4xf32> -> vector<256x4xf32>
    %97 = arith.addf %91, %96 : vector<256x4xf32>
    %c2_123 = arith.constant 2 : index
    %c9_124 = arith.constant 9 : index
    %c0_125 = arith.constant 0 : index
    %98 = vector.load %arg11[%c2_123, %c9_124, %c0_125] : memref<20x32x4xf32, #tpu.memory_space<vmem>>, vector<16x16x4xf32>
    %99 = vector.shape_cast %98 : vector<16x16x4xf32> to vector<256x4xf32>
    %c1_126 = arith.constant 1 : index
    %c2_127 = arith.constant 2 : index
    %c0_128 = arith.constant 0 : index
    %c0_129 = arith.constant 0 : index
    %100 = vector.load %arg4[%c1_126, %c2_127, %c0_128, %c0_129] : memref<3x3x4x4xf32, #tpu.memory_space<vmem>>, vector<1x1x4x4xf32>
    %101 = vector.shape_cast %100 : vector<1x1x4x4xf32> to vector<4x4xf32>
    %cst_130 = arith.constant dense<0.000000e+00> : vector<256x4xf32>
    %102 = tpu.matmul %99, %101, %cst_130 {dimension_numbers = #tpu.dot_dimension_numbers<[1], [0], [0], [1], [0, 0, 1, 1], [], []>} : vector<256x4xf32>, vector<4x4xf32>, vector<256x4xf32> -> vector<256x4xf32>
    %103 = arith.addf %97, %102 : vector<256x4xf32>
    %c3_131 = arith.constant 3 : index
    %c7_132 = arith.constant 7 : index
    %c0_133 = arith.constant 0 : index
    %104 = vector.load %arg11[%c3_131, %c7_132, %c0_133] : memref<20x32x4xf32, #tpu.memory_space<vmem>>, vector<16x16x4xf32>
    %105 = vector.shape_cast %104 : vector<16x16x4xf32> to vector<256x4xf32>
    %c2_134 = arith.constant 2 : index
    %c0_135 = arith.constant 0 : index
    %c0_136 = arith.constant 0 : index
    %c0_137 = arith.constant 0 : index
    %106 = vector.load %arg4[%c2_134, %c0_135, %c0_136, %c0_137] : memref<3x3x4x4xf32, #tpu.memory_space<vmem>>, vector<1x1x4x4xf32>
    %107 = vector.shape_cast %106 : vector<1x1x4x4xf32> to vector<4x4xf32>
    %cst_138 = arith.constant dense<0.000000e+00> : vector<256x4xf32>
    %108 = tpu.matmul %105, %107, %cst_138 {dimension_numbers = #tpu.dot_dimension_numbers<[1], [0], [0], [1], [0, 0, 1, 1], [], []>} : vector<256x4xf32>, vector<4x4xf32>, vector<256x4xf32> -> vector<256x4xf32>
    %109 = arith.addf %103, %108 : vector<256x4xf32>
    %c3_139 = arith.constant 3 : index
    %c8_140 = arith.constant 8 : index
    %c0_141 = arith.constant 0 : index
    %110 = vector.load %arg11[%c3_139, %c8_140, %c0_141] : memref<20x32x4xf32, #tpu.memory_space<vmem>>, vector<16x16x4xf32>
    %111 = vector.shape_cast %110 : vector<16x16x4xf32> to vector<256x4xf32>
    %c2_142 = arith.constant 2 : index
    %c1_143 = arith.constant 1 : index
    %c0_144 = arith.constant 0 : index
    %c0_145 = arith.constant 0 : index
    %112 = vector.load %arg4[%c2_142, %c1_143, %c0_144, %c0_145] : memref<3x3x4x4xf32, #tpu.memory_space<vmem>>, vector<1x1x4x4xf32>
    %113 = vector.shape_cast %112 : vector<1x1x4x4xf32> to vector<4x4xf32>
    %cst_146 = arith.constant dense<0.000000e+00> : vector<256x4xf32>
    %114 = tpu.matmul %111, %113, %cst_146 {dimension_numbers = #tpu.dot_dimension_numbers<[1], [0], [0], [1], [0, 0, 1, 1], [], []>} : vector<256x4xf32>, vector<4x4xf32>, vector<256x4xf32> -> vector<256x4xf32>
    %115 = arith.addf %109, %114 : vector<256x4xf32>
    %c3_147 = arith.constant 3 : index
    %c9_148 = arith.constant 9 : index
    %c0_149 = arith.constant 0 : index
    %116 = vector.load %arg11[%c3_147, %c9_148, %c0_149] : memref<20x32x4xf32, #tpu.memory_space<vmem>>, vector<16x16x4xf32>
    %117 = vector.shape_cast %116 : vector<16x16x4xf32> to vector<256x4xf32>
    %c2_150 = arith.constant 2 : index
    %c2_151 = arith.constant 2 : index
    %c0_152 = arith.constant 0 : index
    %c0_153 = arith.constant 0 : index
    %118 = vector.load %arg4[%c2_150, %c2_151, %c0_152, %c0_153] : memref<3x3x4x4xf32, #tpu.memory_space<vmem>>, vector<1x1x4x4xf32>
    %119 = vector.shape_cast %118 : vector<1x1x4x4xf32> to vector<4x4xf32>
    %cst_154 = arith.constant dense<0.000000e+00> : vector<256x4xf32>
    %120 = tpu.matmul %117, %119, %cst_154 {dimension_numbers = #tpu.dot_dimension_numbers<[1], [0], [0], [1], [0, 0, 1, 1], [], []>} : vector<256x4xf32>, vector<4x4xf32>, vector<256x4xf32> -> vector<256x4xf32>
    %121 = arith.addf %115, %120 : vector<256x4xf32>
    %c0_155 = arith.constant 0 : index
    %c0_156 = arith.constant 0 : index
    %122 = vector.load %arg5[%c0_155, %c0_156] : memref<1x4xf32, #tpu.memory_space<vmem>>, vector<1x4xf32>
    %123 = vector.broadcast %122 : vector<1x4xf32> to vector<256x4xf32>
    %124 = arith.addf %121, %123 : vector<256x4xf32>
    %125 = vector.shape_cast %124 : vector<256x4xf32> to vector<16x16x4xf32>
    %c2_157 = arith.constant 2 : index
    %c8_158 = arith.constant 8 : index
    %c0_159 = arith.constant 0 : index
    %126 = vector.load %arg11[%c2_157, %c8_158, %c0_159] : memref<20x32x4xf32, #tpu.memory_space<vmem>>, vector<16x16x4xf32>
    tpu.vector_store %arg11[%c2_157, %c8_158, %c0_159], %125 {strides = array<i32>} : memref<20x32x4xf32, #tpu.memory_space<vmem>>, vector<16x16x4xf32>,
    %cst_160 = arith.constant 0.000000e+00 : f32
    %127 = vector.broadcast %cst_160 : f32 to vector<256x4xf32>
    %c0_161 = arith.constant 0 : index
    %c6 = arith.constant 6 : index
    %c0_162 = arith.constant 0 : index
    %128 = vector.load %arg11[%c0_161, %c6, %c0_162] : memref<20x32x4xf32, #tpu.memory_space<vmem>>, vector<16x16x4xf32>
    %129 = vector.shape_cast %128 : vector<16x16x4xf32> to vector<256x4xf32>
    %c0_163 = arith.constant 0 : index
    %c0_164 = arith.constant 0 : index
    %c0_165 = arith.constant 0 : index
    %c0_166 = arith.constant 0 : index
    %130 = vector.load %arg6[%c0_163, %c0_164, %c0_165, %c0_166] : memref<5x5x4x4xf32, #tpu.memory_space<vmem>>, vector<1x1x4x4xf32>
    %131 = vector.shape_cast %130 : vector<1x1x4x4xf32> to vector<4x4xf32>
    %cst_167 = arith.constant dense<0.000000e+00> : vector<256x4xf32>
    %132 = tpu.matmul %129, %131, %cst_167 {dimension_numbers = #tpu.dot_dimension_numbers<[1], [0], [0], [1], [0, 0, 1, 1], [], []>} : vector<256x4xf32>, vector<4x4xf32>, vector<256x4xf32> -> vector<256x4xf32>
    %133 = arith.addf %127, %132 : vector<256x4xf32>
    %c0_168 = arith.constant 0 : index
    %c7_169 = arith.constant 7 : index
    %c0_170 = arith.constant 0 : index
    %134 = vector.load %arg11[%c0_168, %c7_169, %c0_170] : memref<20x32x4xf32, #tpu.memory_space<vmem>>, vector<16x16x4xf32>
    %135 = vector.shape_cast %134 : vector<16x16x4xf32> to vector<256x4xf32>
    %c0_171 = arith.constant 0 : index
    %c1_172 = arith.constant 1 : index
    %c0_173 = arith.constant 0 : index
    %c0_174 = arith.constant 0 : index
    %136 = vector.load %arg6[%c0_171, %c1_172, %c0_173, %c0_174] : memref<5x5x4x4xf32, #tpu.memory_space<vmem>>, vector<1x1x4x4xf32>
    %137 = vector.shape_cast %136 : vector<1x1x4x4xf32> to vector<4x4xf32>
    %cst_175 = arith.constant dense<0.000000e+00> : vector<256x4xf32>
    %138 = tpu.matmul %135, %137, %cst_175 {dimension_numbers = #tpu.dot_dimension_numbers<[1], [0], [0], [1], [0, 0, 1, 1], [], []>} : vector<256x4xf32>, vector<4x4xf32>, vector<256x4xf32> -> vector<256x4xf32>
    %139 = arith.addf %133, %138 : vector<256x4xf32>
    %c0_176 = arith.constant 0 : index
    %c8_177 = arith.constant 8 : index
    %c0_178 = arith.constant 0 : index
    %140 = vector.load %arg11[%c0_176, %c8_177, %c0_178] : memref<20x32x4xf32, #tpu.memory_space<vmem>>, vector<16x16x4xf32>
    %141 = vector.shape_cast %140 : vector<16x16x4xf32> to vector<256x4xf32>
    %c0_179 = arith.constant 0 : index
    %c2_180 = arith.constant 2 : index
    %c0_181 = arith.constant 0 : index
    %c0_182 = arith.constant 0 : index
    %142 = vector.load %arg6[%c0_179, %c2_180, %c0_181, %c0_182] : memref<5x5x4x4xf32, #tpu.memory_space<vmem>>, vector<1x1x4x4xf32>
    %143 = vector.shape_cast %142 : vector<1x1x4x4xf32> to vector<4x4xf32>
    %cst_183 = arith.constant dense<0.000000e+00> : vector<256x4xf32>
    %144 = tpu.matmul %141, %143, %cst_183 {dimension_numbers = #tpu.dot_dimension_numbers<[1], [0], [0], [1], [0, 0, 1, 1], [], []>} : vector<256x4xf32>, vector<4x4xf32>, vector<256x4xf32> -> vector<256x4xf32>
    %145 = arith.addf %139, %144 : vector<256x4xf32>
    %c0_184 = arith.constant 0 : index
    %c9_185 = arith.constant 9 : index
    %c0_186 = arith.constant 0 : index
    %146 = vector.load %arg11[%c0_184, %c9_185, %c0_186] : memref<20x32x4xf32, #tpu.memory_space<vmem>>, vector<16x16x4xf32>
    %147 = vector.shape_cast %146 : vector<16x16x4xf32> to vector<256x4xf32>
    %c0_187 = arith.constant 0 : index
    %c3_188 = arith.constant 3 : index
    %c0_189 = arith.constant 0 : index
    %c0_190 = arith.constant 0 : index
    %148 = vector.load %arg6[%c0_187, %c3_188, %c0_189, %c0_190] : memref<5x5x4x4xf32, #tpu.memory_space<vmem>>, vector<1x1x4x4xf32>
    %149 = vector.shape_cast %148 : vector<1x1x4x4xf32> to vector<4x4xf32>
    %cst_191 = arith.constant dense<0.000000e+00> : vector<256x4xf32>
    %150 = tpu.matmul %147, %149, %cst_191 {dimension_numbers = #tpu.dot_dimension_numbers<[1], [0], [0], [1], [0, 0, 1, 1], [], []>} : vector<256x4xf32>, vector<4x4xf32>, vector<256x4xf32> -> vector<256x4xf32>
    %151 = arith.addf %145, %150 : vector<256x4xf32>
    %c0_192 = arith.constant 0 : index
    %c10 = arith.constant 10 : index
    %c0_193 = arith.constant 0 : index
    %152 = vector.load %arg11[%c0_192, %c10, %c0_193] : memref<20x32x4xf32, #tpu.memory_space<vmem>>, vector<16x16x4xf32>
    %153 = vector.shape_cast %152 : vector<16x16x4xf32> to vector<256x4xf32>
    %c0_194 = arith.constant 0 : index
    %c4 = arith.constant 4 : index
    %c0_195 = arith.constant 0 : index
    %c0_196 = arith.constant 0 : index
    %154 = vector.load %arg6[%c0_194, %c4, %c0_195, %c0_196] : memref<5x5x4x4xf32, #tpu.memory_space<vmem>>, vector<1x1x4x4xf32>
    %155 = vector.shape_cast %154 : vector<1x1x4x4xf32> to vector<4x4xf32>
    %cst_197 = arith.constant dense<0.000000e+00> : vector<256x4xf32>
    %156 = tpu.matmul %153, %155, %cst_197 {dimension_numbers = #tpu.dot_dimension_numbers<[1], [0], [0], [1], [0, 0, 1, 1], [], []>} : vector<256x4xf32>, vector<4x4xf32>, vector<256x4xf32> -> vector<256x4xf32>
    %157 = arith.addf %151, %156 : vector<256x4xf32>
    %c1_198 = arith.constant 1 : index
    %c6_199 = arith.constant 6 : index
    %c0_200 = arith.constant 0 : index
    %158 = vector.load %arg11[%c1_198, %c6_199, %c0_200] : memref<20x32x4xf32, #tpu.memory_space<vmem>>, vector<16x16x4xf32>
    %159 = vector.shape_cast %158 : vector<16x16x4xf32> to vector<256x4xf32>
    %c1_201 = arith.constant 1 : index
    %c0_202 = arith.constant 0 : index
    %c0_203 = arith.constant 0 : index
    %c0_204 = arith.constant 0 : index
    %160 = vector.load %arg6[%c1_201, %c0_202, %c0_203, %c0_204] : memref<5x5x4x4xf32, #tpu.memory_space<vmem>>, vector<1x1x4x4xf32>
    %161 = vector.shape_cast %160 : vector<1x1x4x4xf32> to vector<4x4xf32>
    %cst_205 = arith.constant dense<0.000000e+00> : vector<256x4xf32>
    %162 = tpu.matmul %159, %161, %cst_205 {dimension_numbers = #tpu.dot_dimension_numbers<[1], [0], [0], [1], [0, 0, 1, 1], [], []>} : vector<256x4xf32>, vector<4x4xf32>, vector<256x4xf32> -> vector<256x4xf32>
    %163 = arith.addf %157, %162 : vector<256x4xf32>
    %c1_206 = arith.constant 1 : index
    %c7_207 = arith.constant 7 : index
    %c0_208 = arith.constant 0 : index
    %164 = vector.load %arg11[%c1_206, %c7_207, %c0_208] : memref<20x32x4xf32, #tpu.memory_space<vmem>>, vector<16x16x4xf32>
    %165 = vector.shape_cast %164 : vector<16x16x4xf32> to vector<256x4xf32>
    %c1_209 = arith.constant 1 : index
    %c1_210 = arith.constant 1 : index
    %c0_211 = arith.constant 0 : index
    %c0_212 = arith.constant 0 : index
    %166 = vector.load %arg6[%c1_209, %c1_210, %c0_211, %c0_212] : memref<5x5x4x4xf32, #tpu.memory_space<vmem>>, vector<1x1x4x4xf32>
    %167 = vector.shape_cast %166 : vector<1x1x4x4xf32> to vector<4x4xf32>
    %cst_213 = arith.constant dense<0.000000e+00> : vector<256x4xf32>
    %168 = tpu.matmul %165, %167, %cst_213 {dimension_numbers = #tpu.dot_dimension_numbers<[1], [0], [0], [1], [0, 0, 1, 1], [], []>} : vector<256x4xf32>, vector<4x4xf32>, vector<256x4xf32> -> vector<256x4xf32>
    %169 = arith.addf %163, %168 : vector<256x4xf32>
    %c1_214 = arith.constant 1 : index
    %c8_215 = arith.constant 8 : index
    %c0_216 = arith.constant 0 : index
    %170 = vector.load %arg11[%c1_214, %c8_215, %c0_216] : memref<20x32x4xf32, #tpu.memory_space<vmem>>, vector<16x16x4xf32>
    %171 = vector.shape_cast %170 : vector<16x16x4xf32> to vector<256x4xf32>
    %c1_217 = arith.constant 1 : index
    %c2_218 = arith.constant 2 : index
    %c0_219 = arith.constant 0 : index
    %c0_220 = arith.constant 0 : index
    %172 = vector.load %arg6[%c1_217, %c2_218, %c0_219, %c0_220] : memref<5x5x4x4xf32, #tpu.memory_space<vmem>>, vector<1x1x4x4xf32>
    %173 = vector.shape_cast %172 : vector<1x1x4x4xf32> to vector<4x4xf32>
    %cst_221 = arith.constant dense<0.000000e+00> : vector<256x4xf32>
    %174 = tpu.matmul %171, %173, %cst_221 {dimension_numbers = #tpu.dot_dimension_numbers<[1], [0], [0], [1], [0, 0, 1, 1], [], []>} : vector<256x4xf32>, vector<4x4xf32>, vector<256x4xf32> -> vector<256x4xf32>
    %175 = arith.addf %169, %174 : vector<256x4xf32>
    %c1_222 = arith.constant 1 : index
    %c9_223 = arith.constant 9 : index
    %c0_224 = arith.constant 0 : index
    %176 = vector.load %arg11[%c1_222, %c9_223, %c0_224] : memref<20x32x4xf32, #tpu.memory_space<vmem>>, vector<16x16x4xf32>
    %177 = vector.shape_cast %176 : vector<16x16x4xf32> to vector<256x4xf32>
    %c1_225 = arith.constant 1 : index
    %c3_226 = arith.constant 3 : index
    %c0_227 = arith.constant 0 : index
    %c0_228 = arith.constant 0 : index
    %178 = vector.load %arg6[%c1_225, %c3_226, %c0_227, %c0_228] : memref<5x5x4x4xf32, #tpu.memory_space<vmem>>, vector<1x1x4x4xf32>
    %179 = vector.shape_cast %178 : vector<1x1x4x4xf32> to vector<4x4xf32>
    %cst_229 = arith.constant dense<0.000000e+00> : vector<256x4xf32>
    %180 = tpu.matmul %177, %179, %cst_229 {dimension_numbers = #tpu.dot_dimension_numbers<[1], [0], [0], [1], [0, 0, 1, 1], [], []>} : vector<256x4xf32>, vector<4x4xf32>, vector<256x4xf32> -> vector<256x4xf32>
    %181 = arith.addf %175, %180 : vector<256x4xf32>
    %c1_230 = arith.constant 1 : index
    %c10_231 = arith.constant 10 : index
    %c0_232 = arith.constant 0 : index
    %182 = vector.load %arg11[%c1_230, %c10_231, %c0_232] : memref<20x32x4xf32, #tpu.memory_space<vmem>>, vector<16x16x4xf32>
    %183 = vector.shape_cast %182 : vector<16x16x4xf32> to vector<256x4xf32>
    %c1_233 = arith.constant 1 : index
    %c4_234 = arith.constant 4 : index
    %c0_235 = arith.constant 0 : index
    %c0_236 = arith.constant 0 : index
    %184 = vector.load %arg6[%c1_233, %c4_234, %c0_235, %c0_236] : memref<5x5x4x4xf32, #tpu.memory_space<vmem>>, vector<1x1x4x4xf32>
    %185 = vector.shape_cast %184 : vector<1x1x4x4xf32> to vector<4x4xf32>
    %cst_237 = arith.constant dense<0.000000e+00> : vector<256x4xf32>
    %186 = tpu.matmul %183, %185, %cst_237 {dimension_numbers = #tpu.dot_dimension_numbers<[1], [0], [0], [1], [0, 0, 1, 1], [], []>} : vector<256x4xf32>, vector<4x4xf32>, vector<256x4xf32> -> vector<256x4xf32>
    %187 = arith.addf %181, %186 : vector<256x4xf32>
    %c2_238 = arith.constant 2 : index
    %c6_239 = arith.constant 6 : index
    %c0_240 = arith.constant 0 : index
    %188 = vector.load %arg11[%c2_238, %c6_239, %c0_240] : memref<20x32x4xf32, #tpu.memory_space<vmem>>, vector<16x16x4xf32>
    %189 = vector.shape_cast %188 : vector<16x16x4xf32> to vector<256x4xf32>
    %c2_241 = arith.constant 2 : index
    %c0_242 = arith.constant 0 : index
    %c0_243 = arith.constant 0 : index
    %c0_244 = arith.constant 0 : index
    %190 = vector.load %arg6[%c2_241, %c0_242, %c0_243, %c0_244] : memref<5x5x4x4xf32, #tpu.memory_space<vmem>>, vector<1x1x4x4xf32>
    %191 = vector.shape_cast %190 : vector<1x1x4x4xf32> to vector<4x4xf32>
    %cst_245 = arith.constant dense<0.000000e+00> : vector<256x4xf32>
    %192 = tpu.matmul %189, %191, %cst_245 {dimension_numbers = #tpu.dot_dimension_numbers<[1], [0], [0], [1], [0, 0, 1, 1], [], []>} : vector<256x4xf32>, vector<4x4xf32>, vector<256x4xf32> -> vector<256x4xf32>
    %193 = arith.addf %187, %192 : vector<256x4xf32>
    %c2_246 = arith.constant 2 : index
    %c7_247 = arith.constant 7 : index
    %c0_248 = arith.constant 0 : index
    %194 = vector.load %arg11[%c2_246, %c7_247, %c0_248] : memref<20x32x4xf32, #tpu.memory_space<vmem>>, vector<16x16x4xf32>
    %195 = vector.shape_cast %194 : vector<16x16x4xf32> to vector<256x4xf32>
    %c2_249 = arith.constant 2 : index
    %c1_250 = arith.constant 1 : index
    %c0_251 = arith.constant 0 : index
    %c0_252 = arith.constant 0 : index
    %196 = vector.load %arg6[%c2_249, %c1_250, %c0_251, %c0_252] : memref<5x5x4x4xf32, #tpu.memory_space<vmem>>, vector<1x1x4x4xf32>
    %197 = vector.shape_cast %196 : vector<1x1x4x4xf32> to vector<4x4xf32>
    %cst_253 = arith.constant dense<0.000000e+00> : vector<256x4xf32>
    %198 = tpu.matmul %195, %197, %cst_253 {dimension_numbers = #tpu.dot_dimension_numbers<[1], [0], [0], [1], [0, 0, 1, 1], [], []>} : vector<256x4xf32>, vector<4x4xf32>, vector<256x4xf32> -> vector<256x4xf32>
    %199 = arith.addf %193, %198 : vector<256x4xf32>
    %c2_254 = arith.constant 2 : index
    %c8_255 = arith.constant 8 : index
    %c0_256 = arith.constant 0 : index
    %200 = vector.load %arg11[%c2_254, %c8_255, %c0_256] : memref<20x32x4xf32, #tpu.memory_space<vmem>>, vector<16x16x4xf32>
    %201 = vector.shape_cast %200 : vector<16x16x4xf32> to vector<256x4xf32>
    %c2_257 = arith.constant 2 : index
    %c2_258 = arith.constant 2 : index
    %c0_259 = arith.constant 0 : index
    %c0_260 = arith.constant 0 : index
    %202 = vector.load %arg6[%c2_257, %c2_258, %c0_259, %c0_260] : memref<5x5x4x4xf32, #tpu.memory_space<vmem>>, vector<1x1x4x4xf32>
    %203 = vector.shape_cast %202 : vector<1x1x4x4xf32> to vector<4x4xf32>
    %cst_261 = arith.constant dense<0.000000e+00> : vector<256x4xf32>
    %204 = tpu.matmul %201, %203, %cst_261 {dimension_numbers = #tpu.dot_dimension_numbers<[1], [0], [0], [1], [0, 0, 1, 1], [], []>} : vector<256x4xf32>, vector<4x4xf32>, vector<256x4xf32> -> vector<256x4xf32>
    %205 = arith.addf %199, %204 : vector<256x4xf32>
    %c2_262 = arith.constant 2 : index
    %c9_263 = arith.constant 9 : index
    %c0_264 = arith.constant 0 : index
    %206 = vector.load %arg11[%c2_262, %c9_263, %c0_264] : memref<20x32x4xf32, #tpu.memory_space<vmem>>, vector<16x16x4xf32>
    %207 = vector.shape_cast %206 : vector<16x16x4xf32> to vector<256x4xf32>
    %c2_265 = arith.constant 2 : index
    %c3_266 = arith.constant 3 : index
    %c0_267 = arith.constant 0 : index
    %c0_268 = arith.constant 0 : index
    %208 = vector.load %arg6[%c2_265, %c3_266, %c0_267, %c0_268] : memref<5x5x4x4xf32, #tpu.memory_space<vmem>>, vector<1x1x4x4xf32>
    %209 = vector.shape_cast %208 : vector<1x1x4x4xf32> to vector<4x4xf32>
    %cst_269 = arith.constant dense<0.000000e+00> : vector<256x4xf32>
    %210 = tpu.matmul %207, %209, %cst_269 {dimension_numbers = #tpu.dot_dimension_numbers<[1], [0], [0], [1], [0, 0, 1, 1], [], []>} : vector<256x4xf32>, vector<4x4xf32>, vector<256x4xf32> -> vector<256x4xf32>
    %211 = arith.addf %205, %210 : vector<256x4xf32>
    %c2_270 = arith.constant 2 : index
    %c10_271 = arith.constant 10 : index
    %c0_272 = arith.constant 0 : index
    %212 = vector.load %arg11[%c2_270, %c10_271, %c0_272] : memref<20x32x4xf32, #tpu.memory_space<vmem>>, vector<16x16x4xf32>
    %213 = vector.shape_cast %212 : vector<16x16x4xf32> to vector<256x4xf32>
    %c2_273 = arith.constant 2 : index
    %c4_274 = arith.constant 4 : index
    %c0_275 = arith.constant 0 : index
    %c0_276 = arith.constant 0 : index
    %214 = vector.load %arg6[%c2_273, %c4_274, %c0_275, %c0_276] : memref<5x5x4x4xf32, #tpu.memory_space<vmem>>, vector<1x1x4x4xf32>
    %215 = vector.shape_cast %214 : vector<1x1x4x4xf32> to vector<4x4xf32>
    %cst_277 = arith.constant dense<0.000000e+00> : vector<256x4xf32>
    %216 = tpu.matmul %213, %215, %cst_277 {dimension_numbers = #tpu.dot_dimension_numbers<[1], [0], [0], [1], [0, 0, 1, 1], [], []>} : vector<256x4xf32>, vector<4x4xf32>, vector<256x4xf32> -> vector<256x4xf32>
    %217 = arith.addf %211, %216 : vector<256x4xf32>
    %c3_278 = arith.constant 3 : index
    %c6_279 = arith.constant 6 : index
    %c0_280 = arith.constant 0 : index
    %218 = vector.load %arg11[%c3_278, %c6_279, %c0_280] : memref<20x32x4xf32, #tpu.memory_space<vmem>>, vector<16x16x4xf32>
    %219 = vector.shape_cast %218 : vector<16x16x4xf32> to vector<256x4xf32>
    %c3_281 = arith.constant 3 : index
    %c0_282 = arith.constant 0 : index
    %c0_283 = arith.constant 0 : index
    %c0_284 = arith.constant 0 : index
    %220 = vector.load %arg6[%c3_281, %c0_282, %c0_283, %c0_284] : memref<5x5x4x4xf32, #tpu.memory_space<vmem>>, vector<1x1x4x4xf32>
    %221 = vector.shape_cast %220 : vector<1x1x4x4xf32> to vector<4x4xf32>
    %cst_285 = arith.constant dense<0.000000e+00> : vector<256x4xf32>
    %222 = tpu.matmul %219, %221, %cst_285 {dimension_numbers = #tpu.dot_dimension_numbers<[1], [0], [0], [1], [0, 0, 1, 1], [], []>} : vector<256x4xf32>, vector<4x4xf32>, vector<256x4xf32> -> vector<256x4xf32>
    %223 = arith.addf %217, %222 : vector<256x4xf32>
    %c3_286 = arith.constant 3 : index
    %c7_287 = arith.constant 7 : index
    %c0_288 = arith.constant 0 : index
    %224 = vector.load %arg11[%c3_286, %c7_287, %c0_288] : memref<20x32x4xf32, #tpu.memory_space<vmem>>, vector<16x16x4xf32>
    %225 = vector.shape_cast %224 : vector<16x16x4xf32> to vector<256x4xf32>
    %c3_289 = arith.constant 3 : index
    %c1_290 = arith.constant 1 : index
    %c0_291 = arith.constant 0 : index
    %c0_292 = arith.constant 0 : index
    %226 = vector.load %arg6[%c3_289, %c1_290, %c0_291, %c0_292] : memref<5x5x4x4xf32, #tpu.memory_space<vmem>>, vector<1x1x4x4xf32>
    %227 = vector.shape_cast %226 : vector<1x1x4x4xf32> to vector<4x4xf32>
    %cst_293 = arith.constant dense<0.000000e+00> : vector<256x4xf32>
    %228 = tpu.matmul %225, %227, %cst_293 {dimension_numbers = #tpu.dot_dimension_numbers<[1], [0], [0], [1], [0, 0, 1, 1], [], []>} : vector<256x4xf32>, vector<4x4xf32>, vector<256x4xf32> -> vector<256x4xf32>
    %229 = arith.addf %223, %228 : vector<256x4xf32>
    %c3_294 = arith.constant 3 : index
    %c8_295 = arith.constant 8 : index
    %c0_296 = arith.constant 0 : index
    %230 = vector.load %arg11[%c3_294, %c8_295, %c0_296] : memref<20x32x4xf32, #tpu.memory_space<vmem>>, vector<16x16x4xf32>
    %231 = vector.shape_cast %230 : vector<16x16x4xf32> to vector<256x4xf32>
    %c3_297 = arith.constant 3 : index
    %c2_298 = arith.constant 2 : index
    %c0_299 = arith.constant 0 : index
    %c0_300 = arith.constant 0 : index
    %232 = vector.load %arg6[%c3_297, %c2_298, %c0_299, %c0_300] : memref<5x5x4x4xf32, #tpu.memory_space<vmem>>, vector<1x1x4x4xf32>
    %233 = vector.shape_cast %232 : vector<1x1x4x4xf32> to vector<4x4xf32>
    %cst_301 = arith.constant dense<0.000000e+00> : vector<256x4xf32>
    %234 = tpu.matmul %231, %233, %cst_301 {dimension_numbers = #tpu.dot_dimension_numbers<[1], [0], [0], [1], [0, 0, 1, 1], [], []>} : vector<256x4xf32>, vector<4x4xf32>, vector<256x4xf32> -> vector<256x4xf32>
    %235 = arith.addf %229, %234 : vector<256x4xf32>
    %c3_302 = arith.constant 3 : index
    %c9_303 = arith.constant 9 : index
    %c0_304 = arith.constant 0 : index
    %236 = vector.load %arg11[%c3_302, %c9_303, %c0_304] : memref<20x32x4xf32, #tpu.memory_space<vmem>>, vector<16x16x4xf32>
    %237 = vector.shape_cast %236 : vector<16x16x4xf32> to vector<256x4xf32>
    %c3_305 = arith.constant 3 : index
    %c3_306 = arith.constant 3 : index
    %c0_307 = arith.constant 0 : index
    %c0_308 = arith.constant 0 : index
    %238 = vector.load %arg6[%c3_305, %c3_306, %c0_307, %c0_308] : memref<5x5x4x4xf32, #tpu.memory_space<vmem>>, vector<1x1x4x4xf32>
    %239 = vector.shape_cast %238 : vector<1x1x4x4xf32> to vector<4x4xf32>
    %cst_309 = arith.constant dense<0.000000e+00> : vector<256x4xf32>
    %240 = tpu.matmul %237, %239, %cst_309 {dimension_numbers = #tpu.dot_dimension_numbers<[1], [0], [0], [1], [0, 0, 1, 1], [], []>} : vector<256x4xf32>, vector<4x4xf32>, vector<256x4xf32> -> vector<256x4xf32>
    %241 = arith.addf %235, %240 : vector<256x4xf32>
    %c3_310 = arith.constant 3 : index
    %c10_311 = arith.constant 10 : index
    %c0_312 = arith.constant 0 : index
    %242 = vector.load %arg11[%c3_310, %c10_311, %c0_312] : memref<20x32x4xf32, #tpu.memory_space<vmem>>, vector<16x16x4xf32>
    %243 = vector.shape_cast %242 : vector<16x16x4xf32> to vector<256x4xf32>
    %c3_313 = arith.constant 3 : index
    %c4_314 = arith.constant 4 : index
    %c0_315 = arith.constant 0 : index
    %c0_316 = arith.constant 0 : index
    %244 = vector.load %arg6[%c3_313, %c4_314, %c0_315, %c0_316] : memref<5x5x4x4xf32, #tpu.memory_space<vmem>>, vector<1x1x4x4xf32>
    %245 = vector.shape_cast %244 : vector<1x1x4x4xf32> to vector<4x4xf32>
    %cst_317 = arith.constant dense<0.000000e+00> : vector<256x4xf32>
    %246 = tpu.matmul %243, %245, %cst_317 {dimension_numbers = #tpu.dot_dimension_numbers<[1], [0], [0], [1], [0, 0, 1, 1], [], []>} : vector<256x4xf32>, vector<4x4xf32>, vector<256x4xf32> -> vector<256x4xf32>
    %247 = arith.addf %241, %246 : vector<256x4xf32>
    %c4_318 = arith.constant 4 : index
    %c6_319 = arith.constant 6 : index
    %c0_320 = arith.constant 0 : index
    %248 = vector.load %arg11[%c4_318, %c6_319, %c0_320] : memref<20x32x4xf32, #tpu.memory_space<vmem>>, vector<16x16x4xf32>
    %249 = vector.shape_cast %248 : vector<16x16x4xf32> to vector<256x4xf32>
    %c4_321 = arith.constant 4 : index
    %c0_322 = arith.constant 0 : index
    %c0_323 = arith.constant 0 : index
    %c0_324 = arith.constant 0 : index
    %250 = vector.load %arg6[%c4_321, %c0_322, %c0_323, %c0_324] : memref<5x5x4x4xf32, #tpu.memory_space<vmem>>, vector<1x1x4x4xf32>
    %251 = vector.shape_cast %250 : vector<1x1x4x4xf32> to vector<4x4xf32>
    %cst_325 = arith.constant dense<0.000000e+00> : vector<256x4xf32>
    %252 = tpu.matmul %249, %251, %cst_325 {dimension_numbers = #tpu.dot_dimension_numbers<[1], [0], [0], [1], [0, 0, 1, 1], [], []>} : vector<256x4xf32>, vector<4x4xf32>, vector<256x4xf32> -> vector<256x4xf32>
    %253 = arith.addf %247, %252 : vector<256x4xf32>
    %c4_326 = arith.constant 4 : index
    %c7_327 = arith.constant 7 : index
    %c0_328 = arith.constant 0 : index
    %254 = vector.load %arg11[%c4_326, %c7_327, %c0_328] : memref<20x32x4xf32, #tpu.memory_space<vmem>>, vector<16x16x4xf32>
    %255 = vector.shape_cast %254 : vector<16x16x4xf32> to vector<256x4xf32>
    %c4_329 = arith.constant 4 : index
    %c1_330 = arith.constant 1 : index
    %c0_331 = arith.constant 0 : index
    %c0_332 = arith.constant 0 : index
    %256 = vector.load %arg6[%c4_329, %c1_330, %c0_331, %c0_332] : memref<5x5x4x4xf32, #tpu.memory_space<vmem>>, vector<1x1x4x4xf32>
    %257 = vector.shape_cast %256 : vector<1x1x4x4xf32> to vector<4x4xf32>
    %cst_333 = arith.constant dense<0.000000e+00> : vector<256x4xf32>
    %258 = tpu.matmul %255, %257, %cst_333 {dimension_numbers = #tpu.dot_dimension_numbers<[1], [0], [0], [1], [0, 0, 1, 1], [], []>} : vector<256x4xf32>, vector<4x4xf32>, vector<256x4xf32> -> vector<256x4xf32>
    %259 = arith.addf %253, %258 : vector<256x4xf32>
    %c4_334 = arith.constant 4 : index
    %c8_335 = arith.constant 8 : index
    %c0_336 = arith.constant 0 : index
    %260 = vector.load %arg11[%c4_334, %c8_335, %c0_336] : memref<20x32x4xf32, #tpu.memory_space<vmem>>, vector<16x16x4xf32>
    %261 = vector.shape_cast %260 : vector<16x16x4xf32> to vector<256x4xf32>
    %c4_337 = arith.constant 4 : index
    %c2_338 = arith.constant 2 : index
    %c0_339 = arith.constant 0 : index
    %c0_340 = arith.constant 0 : index
    %262 = vector.load %arg6[%c4_337, %c2_338, %c0_339, %c0_340] : memref<5x5x4x4xf32, #tpu.memory_space<vmem>>, vector<1x1x4x4xf32>
    %263 = vector.shape_cast %262 : vector<1x1x4x4xf32> to vector<4x4xf32>
    %cst_341 = arith.constant dense<0.000000e+00> : vector<256x4xf32>
    %264 = tpu.matmul %261, %263, %cst_341 {dimension_numbers = #tpu.dot_dimension_numbers<[1], [0], [0], [1], [0, 0, 1, 1], [], []>} : vector<256x4xf32>, vector<4x4xf32>, vector<256x4xf32> -> vector<256x4xf32>
    %265 = arith.addf %259, %264 : vector<256x4xf32>
    %c4_342 = arith.constant 4 : index
    %c9_343 = arith.constant 9 : index
    %c0_344 = arith.constant 0 : index
    %266 = vector.load %arg11[%c4_342, %c9_343, %c0_344] : memref<20x32x4xf32, #tpu.memory_space<vmem>>, vector<16x16x4xf32>
    %267 = vector.shape_cast %266 : vector<16x16x4xf32> to vector<256x4xf32>
    %c4_345 = arith.constant 4 : index
    %c3_346 = arith.constant 3 : index
    %c0_347 = arith.constant 0 : index
    %c0_348 = arith.constant 0 : index
    %268 = vector.load %arg6[%c4_345, %c3_346, %c0_347, %c0_348] : memref<5x5x4x4xf32, #tpu.memory_space<vmem>>, vector<1x1x4x4xf32>
    %269 = vector.shape_cast %268 : vector<1x1x4x4xf32> to vector<4x4xf32>
    %cst_349 = arith.constant dense<0.000000e+00> : vector<256x4xf32>
    %270 = tpu.matmul %267, %269, %cst_349 {dimension_numbers = #tpu.dot_dimension_numbers<[1], [0], [0], [1], [0, 0, 1, 1], [], []>} : vector<256x4xf32>, vector<4x4xf32>, vector<256x4xf32> -> vector<256x4xf32>
    %271 = arith.addf %265, %270 : vector<256x4xf32>
    %c4_350 = arith.constant 4 : index
    %c10_351 = arith.constant 10 : index
    %c0_352 = arith.constant 0 : index
    %272 = vector.load %arg11[%c4_350, %c10_351, %c0_352] : memref<20x32x4xf32, #tpu.memory_space<vmem>>, vector<16x16x4xf32>
    %273 = vector.shape_cast %272 : vector<16x16x4xf32> to vector<256x4xf32>
    %c4_353 = arith.constant 4 : index
    %c4_354 = arith.constant 4 : index
    %c0_355 = arith.constant 0 : index
    %c0_356 = arith.constant 0 : index
    %274 = vector.load %arg6[%c4_353, %c4_354, %c0_355, %c0_356] : memref<5x5x4x4xf32, #tpu.memory_space<vmem>>, vector<1x1x4x4xf32>
    %275 = vector.shape_cast %274 : vector<1x1x4x4xf32> to vector<4x4xf32>
    %cst_357 = arith.constant dense<0.000000e+00> : vector<256x4xf32>
    %276 = tpu.matmul %273, %275, %cst_357 {dimension_numbers = #tpu.dot_dimension_numbers<[1], [0], [0], [1], [0, 0, 1, 1], [], []>} : vector<256x4xf32>, vector<4x4xf32>, vector<256x4xf32> -> vector<256x4xf32>
    %277 = arith.addf %271, %276 : vector<256x4xf32>
    %c0_358 = arith.constant 0 : index
    %c0_359 = arith.constant 0 : index
    %278 = vector.load %arg7[%c0_358, %c0_359] : memref<1x4xf32, #tpu.memory_space<vmem>>, vector<1x4xf32>
    %279 = vector.broadcast %278 : vector<1x4xf32> to vector<256x4xf32>
    %280 = arith.addf %277, %279 : vector<256x4xf32>
    %c0_360 = arith.constant 0 : index
    %c0_361 = arith.constant 0 : index
    %c0_362 = arith.constant 0 : index
    %c0_363 = arith.constant 0 : index
    %281 = vector.load %arg8[%c0_360, %c0_361, %c0_362, %c0_363] : memref<1x1x4x4xf32, #tpu.memory_space<vmem>>, vector<1x1x4x4xf32>
    %282 = vector.shape_cast %281 : vector<1x1x4x4xf32> to vector<4x4xf32>
    %cst_364 = arith.constant dense<0.000000e+00> : vector<256x4xf32>
    %283 = tpu.matmul %280, %282, %cst_364 {dimension_numbers = #tpu.dot_dimension_numbers<[1], [0], [0], [1], [0, 0, 1, 1], [], []>} : vector<256x4xf32>, vector<4x4xf32>, vector<256x4xf32> -> vector<256x4xf32>
    %c0_365 = arith.constant 0 : index
    %c0_366 = arith.constant 0 : index
    %284 = vector.load %arg9[%c0_365, %c0_366] : memref<1x4xf32, #tpu.memory_space<vmem>>, vector<1x4xf32>
    %285 = vector.broadcast %284 : vector<1x4xf32> to vector<256x4xf32>
    %286 = arith.addf %283, %285 : vector<256x4xf32>
    %c0_367 = arith.constant 0 : index
    %c0_368 = arith.constant 0 : index
    %c0_369 = arith.constant 0 : index
    %c0_370 = arith.constant 0 : index
    %287 = vector.load %arg1[%c0_367, %c0_368, %c0_369, %c0_370] : memref<1x16x16x4xf32, #tpu.memory_space<vmem>>, vector<1x16x16x4xf32>
    %288 = vector.shape_cast %287 : vector<1x16x16x4xf32> to vector<16x16x4xf32>
    %289 = vector.shape_cast %288 : vector<16x16x4xf32> to vector<256x4xf32>
    %290 = arith.addf %289, %286 : vector<256x4xf32>
    %cst_371 = arith.constant 0.000000e+00 : f32
    %291 = vector.broadcast %cst_371 : f32 to vector<256x4xf32>
    %292 = arith.maximumf %290, %291 : vector<256x4xf32>
    %293 = vector.shape_cast %292 : vector<256x4xf32> to vector<16x16x4xf32>
    %c0_372 = arith.constant 0 : index
    %c0_373 = arith.constant 0 : index
    %c0_374 = arith.constant 0 : index
    %c0_375 = arith.constant 0 : index
    %294 = vector.load %arg10[%c0_372, %c0_373, %c0_374, %c0_375] : memref<1x16x16x4xf32, #tpu.memory_space<vmem>>, vector<1x16x16x4xf32>
    %295 = vector.shape_cast %294 : vector<1x16x16x4xf32> to vector<16x16x4xf32>
    %296 = vector.shape_cast %293 : vector<16x16x4xf32> to vector<1x16x16x4xf32>
    tpu.vector_store %arg10[%c0_372, %c0_373, %c0_374, %c0_375], %296 {strides = array<i32>} : memref<1x16x16x4xf32, #tpu.memory_space<vmem>>, vector<1x16x16x4xf32>,
    return
  }
  func.func @transform_0(%arg0: i32) -> (i32, i32, i32, i32) {
    %c0_i32 = arith.constant 0 : i32
    %c0_i32_0 = arith.constant 0 : i32
    %c0_i32_1 = arith.constant 0 : i32
    %c0_i32_2 = arith.constant 0 : i32
    return %arg0, %c0_i32, %c0_i32_0, %c0_i32_1 : i32, i32, i32, i32
  }
  func.func @transform_1(%arg0: i32) -> (i32, i32, i32, i32) {
    %c0_i32 = arith.constant 0 : i32
    %c0_i32_0 = arith.constant 0 : i32
    %c0_i32_1 = arith.constant 0 : i32
    %c0_i32_2 = arith.constant 0 : i32
    %c0_i32_3 = arith.constant 0 : i32
    return %c0_i32, %c0_i32_0, %c0_i32_1, %c0_i32_2 : i32, i32, i32, i32
  }
  func.func @transform_2(%arg0: i32) -> (i32, i32) {
    %c0_i32 = arith.constant 0 : i32
    %c0_i32_0 = arith.constant 0 : i32
    %c0_i32_1 = arith.constant 0 : i32
    return %c0_i32, %c0_i32_0 : i32, i32
  }
  func.func @transform_3(%arg0: i32) -> (i32, i32, i32, i32) {
    %c0_i32 = arith.constant 0 : i32
    %c0_i32_0 = arith.constant 0 : i32
    %c0_i32_1 = arith.constant 0 : i32
    %c0_i32_2 = arith.constant 0 : i32
    %c0_i32_3 = arith.constant 0 : i32
    return %c0_i32, %c0_i32_0, %c0_i32_1, %c0_i32_2 : i32, i32, i32, i32
  }
  func.func @transform_4(%arg0: i32) -> (i32, i32) {
    %c0_i32 = arith.constant 0 : i32
    %c0_i32_0 = arith.constant 0 : i32
    %c0_i32_1 = arith.constant 0 : i32
    return %c0_i32, %c0_i32_0 : i32, i32
  }
  func.func @transform_5(%arg0: i32) -> (i32, i32, i32, i32) {
    %c0_i32 = arith.constant 0 : i32
    %c0_i32_0 = arith.constant 0 : i32
    %c0_i32_1 = arith.constant 0 : i32
    %c0_i32_2 = arith.constant 0 : i32
    %c0_i32_3 = arith.constant 0 : i32
    return %c0_i32, %c0_i32_0, %c0_i32_1, %c0_i32_2 : i32, i32, i32, i32
  }
  func.func @transform_6(%arg0: i32) -> (i32, i32) {
    %c0_i32 = arith.constant 0 : i32
    %c0_i32_0 = arith.constant 0 : i32
    %c0_i32_1 = arith.constant 0 : i32
    return %c0_i32, %c0_i32_0 : i32, i32
  }
  func.func @transform_7(%arg0: i32) -> (i32, i32, i32, i32) {
    %c0_i32 = arith.constant 0 : i32
    %c0_i32_0 = arith.constant 0 : i32
    %c0_i32_1 = arith.constant 0 : i32
    %c0_i32_2 = arith.constant 0 : i32
    %c0_i32_3 = arith.constant 0 : i32
    return %c0_i32, %c0_i32_0, %c0_i32_1, %c0_i32_2 : i32, i32, i32, i32
  }
  func.func @transform_8(%arg0: i32) -> (i32, i32) {
    %c0_i32 = arith.constant 0 : i32
    %c0_i32_0 = arith.constant 0 : i32
    %c0_i32_1 = arith.constant 0 : i32
    return %c0_i32, %c0_i32_0 : i32, i32
  }
  func.func @transform_9(%arg0: i32) -> (i32, i32, i32, i32) {
    %c0_i32 = arith.constant 0 : i32
    %c0_i32_0 = arith.constant 0 : i32
    %c0_i32_1 = arith.constant 0 : i32
    %c0_i32_2 = arith.constant 0 : i32
    return %arg0, %c0_i32, %c0_i32_0, %c0_i32_1 : i32, i32, i32, i32
  }
}

</mosaic_0001>

<bundles_post_ra>
// kernel: tpu_custom_call.1
= control target key start
LH: loop header
LB: loop body
LE: loop exit
PB: predicated region body
PF: predicated region fallthrough
CT: control target
= control target key end

     0   :  { %s24295_s30 = smov 0   ;;  %s28861_s0 = inlined_call_operand.vmem [shape: f32[2,16,16,4], index: 0, kind: input, shape index: {}]   ;;  %s28862_s1 = inlined_call_operand.vmem [shape: f32[3,3,4,4], index: 1, kind: input, shape index: {}]   ;;  %s28863_s2 = inlined_call_operand.vmem [shape: f32[1,4], index: 2, kind: input, shape index: {}]   ;;  %s28864_s3 = inlined_call_operand.vmem [shape: f32[3,3,4,4], index: 3, kind: input, shape index: {}]   ;;  %s28865_s4 = inlined_call_operand.vmem [shape: f32[1,4], index: 4, kind: input, shape index: {}]   ;;  %s28866_s5 = inlined_call_operand.vmem [shape: f32[5,5,4,4], index: 5, kind: input, shape index: {}]   ;;  %s28867_s6 = inlined_call_operand.vmem [shape: f32[1,4], index: 6, kind: input, shape index: {}]   ;;  %s28868_s7 = inlined_call_operand.vmem [shape: f32[1,1,4,4], index: 7, kind: input, shape index: {}]   ;;  %s28869_s8 = inlined_call_operand.vmem [shape: f32[1,4], index: 8, kind: input, shape index: {}]   ;;  %s28870_s9 = inlined_call_operand.vmem [shape: f32[2,16,16,4], index: 9, kind: output, shape index: {}]  }
   0x1 LB: > { %s17786_s10 = sadd.s32 4294967295, %s24242_s30   ;;  %p17790_p0 = scmp.ge.s32.totalorder %s24242_s30, 1  ;;  %s24242_s30 = sphi %s24295_s30, %s19_s30  }
   0x2   : > { %p287_p1 = scmp.lt.s32.totalorder %s24242_s30, 3 }
   0x4   : > { %p288_p2 = pnand %p17790_p0, %p287_p1 }
   0x6   : > { %291 = sbr.rel (%p288_p2) target bundleno = 3364 (0xd24), region = 56 }
   0xd   : > { %v24306_v0 = vld [vmem:[%s28862_s1 + $0x4] sm:$0xf]  ;;  %vm643_vm0 = vcmask 1043456   ;;  %vm333_vm1 = vcmask 31744   ;;  %p24310_p3 = scmp.lt.s32.totalorder %s17786_s10, 1  ;;  %v24244_v1 = vmov 0.0  }
   0xe   : > { %20747 = vmatprep.subr.msk.mxu1 %vm643_vm0, %v24306_v0  ;;  %339 = vst.msk [vmem:[#allocation2 + $0x28] sm:$0xff] %vm333_vm1, %v24244_v1  ;;  %334 = vst.msk [vmem:[#allocation2] sm:$0xff] %vm333_vm1, %v24244_v1  ;;  %v512_v2 = vld [vmem:[%s28862_s1] sm:$0xf]  ;;  %v24508_v9 = vld [vmem:[%s28862_s1 + $0x8] sm:$0xf] }
   0xf   : > { %335 = vst.msk [vmem:[#allocation2 + $0x8] sm:$0xff] %vm333_vm1, %v24244_v1  ;;  %336 = vst.msk [vmem:[#allocation2 + $0x10] sm:$0xff] %vm333_vm1, %v24244_v1  ;;  %20748 = vmatpush3.msk.msra.mxu1 %vm643_vm0, %v24306_v0  ;;  %s29527_s10 = smov (!%p24310_p3, %s17786_s10), 1 }
  0x10   : > { %337 = vst.msk [vmem:[#allocation2 + $0x18] sm:$0xff] %vm333_vm1, %v24244_v1  ;;  %338 = vst.msk [vmem:[#allocation2 + $0x20] sm:$0xff] %vm333_vm1, %v24244_v1  ;;  %20797 = vmatprep.subr.msk.mxu1 %vm643_vm0, %v512_v2  ;;  %s19293_s16 = sshll.u32 %s29527_s10, 8 }
  0x11   : > { %340 = vst.msk [vmem:[#allocation2 + $0x30] sm:$0xff] %vm333_vm1, %v24244_v1  ;;  %341 = vst.msk [vmem:[#allocation2 + $0x38] sm:$0xff] %vm333_vm1, %v24244_v1  ;;  %s24494_s19 = scalar_lea.vmem %s28861_s0, %s19293_s16  ;;  %s28732_s29 = scalar_lea.vmem %s28870_s9, %s19293_s16 }
  0x12   : > { %342 = vst.msk [vmem:[#allocation2 + $0x40] sm:$0xff] %vm333_vm1, %v24244_v1  ;;  %343 = vst.msk [vmem:[#allocation2 + $0x48] sm:$0xff] %vm333_vm1, %v24244_v1  ;;  %v414_v3 = vld [vmem:[%s24494_s19] sm:$0xff]  ;;  %v415_v4 = vld [vmem:[%s24494_s19 + $0x8] sm:$0xff] }
  0x13   : > { %344 = vst.msk [vmem:[#allocation2 + $0x50] sm:$0xff] %vm333_vm1, %v24244_v1  ;;  %345 = vst.msk [vmem:[#allocation2 + $0x58] sm:$0xff] %vm333_vm1, %v24244_v1  ;;  %v416_v5 = vld [vmem:[%s24494_s19 + $0x10] sm:$0xff]  ;;  %v417_v6 = vld [vmem:[%s24494_s19 + $0x18] sm:$0xff] }
  0x14   : > { %346 = vst.msk [vmem:[#allocation2 + $0x60] sm:$0xff] %vm333_vm1, %v24244_v1  ;;  %347 = vst.msk [vmem:[#allocation2 + $0x68] sm:$0xff] %vm333_vm1, %v24244_v1  ;;  %v418_v7 = vld [vmem:[%s24494_s19 + $0x20] sm:$0xff]  ;;  %v419_v8 = vld [vmem:[%s24494_s19 + $0x28] sm:$0xff] }
  0x15   : > { %348 = vst.msk [vmem:[#allocation2 + $0x70] sm:$0xff] %vm333_vm1, %v24244_v1  ;;  %349 = vst.msk [vmem:[#allocation2 + $0x78] sm:$0xff] %vm333_vm1, %v24244_v1  ;;  %v513_v10 = vld [vmem:[#allocation2 + $0x28] sm:$0xff]  ;;  %v420_v12 = vld [vmem:[%s24494_s19 + $0x30] sm:$0xff] }
  0x16   : > { %350 = vst.msk [vmem:[#allocation2 + $0x80] sm:$0xff] %vm333_vm1, %v24244_v1  ;;  %351 = vst.msk [vmem:[#allocation2 + $0x88] sm:$0xff] %vm333_vm1, %v24244_v1  ;;  %20749 = vmatprep.mubr.msk.f32.mxu1 %vm333_vm1, %v513_v10  ;;  %v421_v13 = vld [vmem:[%s24494_s19 + $0x38] sm:$0xff]  ;;  %v422_v14 = vld [vmem:[%s24494_s19 + $0x40] sm:$0xff] }
  0x17   : > { %352 = vst.msk [vmem:[#allocation2 + $0x90] sm:$0xff] %vm333_vm1, %v24244_v1  ;;  %353 = vst.msk [vmem:[#allocation2 + $0x98] sm:$0xff] %vm333_vm1, %v24244_v1  ;;  %v423_v15 = vld [vmem:[%s24494_s19 + $0x48] sm:$0xff]  ;;  %v424_v16 = vld [vmem:[%s24494_s19 + $0x50] sm:$0xff] }
  0x18   : > { %354 = vst.msk [vmem:[#allocation2 + $0xa0] sm:$0xff] %vm333_vm1, %v24244_v1  ;;  %355 = vst.msk [vmem:[#allocation2 + $0xa8] sm:$0xff] %vm333_vm1, %v24244_v1  ;;  %v514_v11 = vld [vmem:[#allocation2 + $0x30] sm:$0xff]  ;;  %v425_v17 = vld [vmem:[%s24494_s19 + $0x58] sm:$0xff] }
  0x19   : > { %356 = vst.msk [vmem:[#allocation2 + $0xb0] sm:$0xff] %vm333_vm1, %v24244_v1  ;;  %357 = vst.msk [vmem:[#allocation2 + $0xb8] sm:$0xff] %vm333_vm1, %v24244_v1  ;;  %20750 = vmatmul.mubr.msk.f32.vlgmr.msra.gmra.mrb[0].mxu1 %vm333_vm1, %v514_v11  ;;  %v426_v18 = vld [vmem:[%s24494_s19 + $0x60] sm:$0xff]  ;;  %v427_v19 = vld [vmem:[%s24494_s19 + $0x68] sm:$0xff] }
  0x1a   : > { %358 = vst.msk [vmem:[#allocation2 + $0xc0] sm:$0xff] %vm333_vm1, %v24244_v1  ;;  %359 = vst.msk [vmem:[#allocation2 + $0xc8] sm:$0xff] %vm333_vm1, %v24244_v1  ;;  %20798 = vmatpush3.msk.msra.mxu1 %vm643_vm0, %v512_v2  ;;  %v428_v20 = vld [vmem:[%s24494_s19 + $0x70] sm:$0xff]  ;;  %v429_v21 = vld [vmem:[%s24494_s19 + $0x78] sm:$0xff] }
  0x1b   : > { %360 = vst.msk [vmem:[#allocation2 + $0xd0] sm:$0xff] %vm333_vm1, %v24244_v1  ;;  %361 = vst.msk [vmem:[#allocation2 + $0xd8] sm:$0xff] %vm333_vm1, %v24244_v1  ;;  %v430_v22 = vld [vmem:[%s24494_s19 + $0x80] sm:$0xff]  ;;  %v431_v23 = vld [vmem:[%s24494_s19 + $0x88] sm:$0xff]  ;;  %20847 = vmatprep.subr.msk.mxu1 %vm643_vm0, %v24508_v9 }
  0x1c   : > { %362 = vst.msk [vmem:[#allocation2 + $0xe0] sm:$0xff] %vm333_vm1, %v24244_v1  ;;  %363 = vst.msk [vmem:[#allocation2 + $0xe8] sm:$0xff] %vm333_vm1, %v24244_v1  ;;  %v432_v24 = vld [vmem:[%s24494_s19 + $0x90] sm:$0xff]  ;;  %v433_v25 = vld [vmem:[%s24494_s19 + $0x98] sm:$0xff] }
  0x1d   : > { %364 = vst.msk [vmem:[#allocation2 + $0xf0] sm:$0xff] %vm333_vm1, %v24244_v1  ;;  %365 = vst.msk [vmem:[#allocation2 + $0xf8] sm:$0xff] %vm333_vm1, %v24244_v1  ;;  %v434_v26 = vld [vmem:[%s24494_s19 + $0xa0] sm:$0xff]  ;;  %v435_v27 = vld [vmem:[%s24494_s19 + $0xa8] sm:$0xff] }
  0x1e   : > { %366 = vst.msk [vmem:[#allocation2 + $0x100] sm:$0xff] %vm333_vm1, %v24244_v1  ;;  %367 = vst.msk [vmem:[#allocation2 + $0x108] sm:$0xff] %vm333_vm1, %v24244_v1  ;;  %v436_v31 = vld [vmem:[%s24494_s19 + $0xb0] sm:$0xff]  ;;  %v437_v32 = vld [vmem:[%s24494_s19 + $0xb8] sm:$0xff] }
  0x1f   : > { %368 = vst.msk [vmem:[#allocation2 + $0x110] sm:$0xff] %vm333_vm1, %v24244_v1  ;;  %369 = vst.msk [vmem:[#allocation2 + $0x118] sm:$0xff] %vm333_vm1, %v24244_v1  ;;  %v438_v37 = vld [vmem:[%s24494_s19 + $0xc0] sm:$0xff]  ;;  %v439_v38 = vld [vmem:[%s24494_s19 + $0xc8] sm:$0xff] }
  0x20   : > { %370 = vst.msk [vmem:[#allocation2 + $0x120] sm:$0xff] %vm333_vm1, %v24244_v1  ;;  %371 = vst.msk [vmem:[#allocation2 + $0x128] sm:$0xff] %vm333_vm1, %v24244_v1  ;;  %v440_v39 = vld [vmem:[%s24494_s19 + $0xd0] sm:$0xff]  ;;  %v441_v40 = vld [vmem:[%s24494_s19 + $0xd8] sm:$0xff] }
  0x21   : > { %372 = vst.msk [vmem:[#allocation2 + $0x130] sm:$0xff] %vm333_vm1, %v24244_v1  ;;  %373 = vst.msk [vmem:[#allocation2 + $0x138] sm:$0xff] %vm333_vm1, %v24244_v1  ;;  %v442_v41 = vld [vmem:[%s24494_s19 + $0xe0] sm:$0xff]  ;;  %v443_v42 = vld [vmem:[%s24494_s19 + $0xe8] sm:$0xff] }
  0x22   : > { %374 = vst.msk [vmem:[#allocation2 + $0x140] sm:$0xff] %vm333_vm1, %v24244_v1  ;;  %375 = vst.msk [vmem:[#allocation2 + $0x148] sm:$0xff] %vm333_vm1, %v24244_v1  ;;  %v480_v2 = vld [vmem:[#allocation2 + $0x27] sm:$0xff] }
  0x23   : > { %376 = vst.msk [vmem:[#allocation2 + $0x150] sm:$0xff] %vm333_vm1, %v24244_v1  ;;  %377 = vst.msk [vmem:[#allocation2 + $0x158] sm:$0xff] %vm333_vm1, %v24244_v1 }
  0x24   : > { %378 = vst.msk [vmem:[#allocation2 + $0x160] sm:$0xff] %vm333_vm1, %v24244_v1  ;;  %379 = vst.msk [vmem:[#allocation2 + $0x168] sm:$0xff] %vm333_vm1, %v24244_v1 }
  0x25   : > { %380 = vst.msk [vmem:[#allocation2 + $0x170] sm:$0xff] %vm333_vm1, %v24244_v1  ;;  %381 = vst.msk [vmem:[#allocation2 + $0x178] sm:$0xff] %vm333_vm1, %v24244_v1 }
  0x26   : > { %382 = vst.msk [vmem:[#allocation2 + $0x180] sm:$0xff] %vm333_vm1, %v24244_v1  ;;  %383 = vst.msk [vmem:[#allocation2 + $0x188] sm:$0xff] %vm333_vm1, %v24244_v1 }
  0x27   : > { %384 = vst.msk [vmem:[#allocation2 + $0x190] sm:$0xff] %vm333_vm1, %v24244_v1  ;;  %385 = vst.msk [vmem:[#allocation2 + $0x198] sm:$0xff] %vm333_vm1, %v24244_v1 }
  0x28   : > { %386 = vst.msk [vmem:[#allocation2 + $0x1a0] sm:$0xff] %vm333_vm1, %v24244_v1  ;;  %387 = vst.msk [vmem:[#allocation2 + $0x1a8] sm:$0xff] %vm333_vm1, %v24244_v1 }
  0x29   : > { %388 = vst.msk [vmem:[#allocation2 + $0x1b0] sm:$0xff] %vm333_vm1, %v24244_v1  ;;  %389 = vst.msk [vmem:[#allocation2 + $0x1b8] sm:$0xff] %vm333_vm1, %v24244_v1 }
  0x2a   : > { %390 = vst.msk [vmem:[#allocation2 + $0x1c0] sm:$0xff] %vm333_vm1, %v24244_v1  ;;  %391 = vst.msk [vmem:[#allocation2 + $0x1c8] sm:$0xff] %vm333_vm1, %v24244_v1 }
  0x2b   : > { %392 = vst.msk [vmem:[#allocation2 + $0x1d0] sm:$0xff] %vm333_vm1, %v24244_v1  ;;  %393 = vst.msk [vmem:[#allocation2 + $0x1d8] sm:$0xff] %vm333_vm1, %v24244_v1 }
  0x2c   : > { %394 = vst.msk [vmem:[#allocation2 + $0x1e0] sm:$0xff] %vm333_vm1, %v24244_v1  ;;  %395 = vst.msk [vmem:[#allocation2 + $0x1e8] sm:$0xff] %vm333_vm1, %v24244_v1 }
  0x2d   : > { %396 = vst.msk [vmem:[#allocation2 + $0x1f0] sm:$0xff] %vm333_vm1, %v24244_v1  ;;  %397 = vst.msk [vmem:[#allocation2 + $0x1f8] sm:$0xff] %vm333_vm1, %v24244_v1 }
  0x2e   : > { %398 = vst.msk [vmem:[#allocation2 + $0x200] sm:$0xff] %vm333_vm1, %v24244_v1  ;;  %399 = vst.msk [vmem:[#allocation2 + $0x208] sm:$0xff] %vm333_vm1, %v24244_v1 }
  0x2f   : > { %400 = vst.msk [vmem:[#allocation2 + $0x210] sm:$0xff] %vm333_vm1, %v24244_v1  ;;  %401 = vst.msk [vmem:[#allocation2 + $0x218] sm:$0xff] %vm333_vm1, %v24244_v1 }
  0x30   : > { %402 = vst.msk [vmem:[#allocation2 + $0x220] sm:$0xff] %vm333_vm1, %v24244_v1  ;;  %403 = vst.msk [vmem:[#allocation2 + $0x228] sm:$0xff] %vm333_vm1, %v24244_v1 }
  0x31   : > { %404 = vst.msk [vmem:[#allocation2 + $0x230] sm:$0xff] %vm333_vm1, %v24244_v1  ;;  %405 = vst.msk [vmem:[#allocation2 + $0x238] sm:$0xff] %vm333_vm1, %v24244_v1 }
  0x32   : > { %406 = vst.msk [vmem:[#allocation2 + $0x240] sm:$0xff] %vm333_vm1, %v24244_v1  ;;  %407 = vst.msk [vmem:[#allocation2 + $0x248] sm:$0xff] %vm333_vm1, %v24244_v1 }
  0x33   : > { %408 = vst.msk [vmem:[#allocation2 + $0x250] sm:$0xff] %vm333_vm1, %v24244_v1  ;;  %409 = vst.msk [vmem:[#allocation2 + $0x258] sm:$0xff] %vm333_vm1, %v24244_v1 }
  0x34   : > { %410 = vst.msk [vmem:[#allocation2 + $0x260] sm:$0xff] %vm333_vm1, %v24244_v1  ;;  %411 = vst.msk [vmem:[#allocation2 + $0x268] sm:$0xff] %vm333_vm1, %v24244_v1 }
  0x35   : > { %412 = vst.msk [vmem:[#allocation2 + $0x270] sm:$0xff] %vm333_vm1, %v24244_v1  ;;  %413 = vst.msk [vmem:[#allocation2 + $0x278] sm:$0xff] %vm333_vm1, %v24244_v1 }
  0x36   : > { %447 = vst.msk [vmem:[#allocation2 + $0x48] sm:$0xff] %vm333_vm1, %v414_v3  ;;  %448 = vst.msk [vmem:[#allocation2 + $0x50] sm:$0xff] %vm333_vm1, %v415_v4  ;;  %v481_v3 = vld [vmem:[#allocation2 + $0x2f] sm:$0xff] }
  0x37   : > { %449 = vst.msk [vmem:[#allocation2 + $0x68] sm:$0xff] %vm333_vm1, %v416_v5  ;;  %450 = vst.msk [vmem:[#allocation2 + $0x70] sm:$0xff] %vm333_vm1, %v417_v6  ;;  %v24692_v5 = vld [vmem:[%s28862_s1 + $0xc] sm:$0xf] }
  0x38   : > { %451 = vst.msk [vmem:[#allocation2 + $0x88] sm:$0xff] %vm333_vm1, %v418_v7  ;;  %452 = vst.msk [vmem:[#allocation2 + $0x90] sm:$0xff] %vm333_vm1, %v419_v8 }
  0x39   : > { %453 = vst.msk [vmem:[#allocation2 + $0xa8] sm:$0xff] %vm333_vm1, %v420_v12  ;;  %454 = vst.msk [vmem:[#allocation2 + $0xb0] sm:$0xff] %vm333_vm1, %v421_v13 }
  0x3a   : > { %455 = vst.msk [vmem:[#allocation2 + $0xc8] sm:$0xff] %vm333_vm1, %v422_v14  ;;  %456 = vst.msk [vmem:[#allocation2 + $0xd0] sm:$0xff] %vm333_vm1, %v423_v15 }
  0x3b   : > { %457 = vst.msk [vmem:[#allocation2 + $0xe8] sm:$0xff] %vm333_vm1, %v424_v16  ;;  %458 = vst.msk [vmem:[#allocation2 + $0xf0] sm:$0xff] %vm333_vm1, %v425_v17 }
  0x3c   : > { %459 = vst.msk [vmem:[#allocation2 + $0x108] sm:$0xff] %vm333_vm1, %v426_v18  ;;  %460 = vst.msk [vmem:[#allocation2 + $0x110] sm:$0xff] %vm333_vm1, %v427_v19 }
  0x3d   : > { %461 = vst.msk [vmem:[#allocation2 + $0x128] sm:$0xff] %vm333_vm1, %v428_v20  ;;  %462 = vst.msk [vmem:[#allocation2 + $0x130] sm:$0xff] %vm333_vm1, %v429_v21  ;;  %v24547_v28 = vld [vmem:[#allocation2 + $0x48] sm:$0xff]  ;;  %v24549_v29 = vld [vmem:[#allocation2 + $0x50] sm:$0xff] }
  0x3e   : > { %463 = vst.msk [vmem:[#allocation2 + $0x148] sm:$0xff] %vm333_vm1, %v430_v22  ;;  %464 = vst.msk [vmem:[#allocation2 + $0x150] sm:$0xff] %vm333_vm1, %v431_v23  ;;  %v24551_v30 = vld [vmem:[#allocation2 + $0x68] sm:$0xff]  ;;  %20752 = vmatprep.mubr.msk.f32.mxu1 %vm333_vm1, %v24547_v28  ;;  %v24564_v33 = vld [vmem:[#allocation2 + $0x70] sm:$0xff] }
  0x3f   : > { %465 = vst.msk [vmem:[#allocation2 + $0x168] sm:$0xff] %vm333_vm1, %v432_v24  ;;  %466 = vst.msk [vmem:[#allocation2 + $0x170] sm:$0xff] %vm333_vm1, %v433_v25  ;;  %20753 = vmatmul.mubr.msk.f32.gmra.mrb[2].mxu1 %vm333_vm1, %v24549_v29  ;;  %v24568_v34 = vld [vmem:[#allocation2 + $0x88] sm:$0xff]  ;;  %v24574_v35 = vld [vmem:[#allocation2 + $0x90] sm:$0xff] }
  0x40   : > { %467 = vst.msk [vmem:[#allocation2 + $0x188] sm:$0xff] %vm333_vm1, %v434_v26  ;;  %468 = vst.msk [vmem:[#allocation2 + $0x190] sm:$0xff] %vm333_vm1, %v435_v27  ;;  %20755 = vmatprep.mubr.msk.f32.mxu1 %vm333_vm1, %v24551_v30  ;;  %v24576_v36 = vld [vmem:[#allocation2 + $0xa8] sm:$0xff]  ;;  %v24594_v43 = vld [vmem:[#allocation2 + $0xb0] sm:$0xff] }
  0x41   : > { %469 = vst.msk [vmem:[#allocation2 + $0x1a8] sm:$0xff] %vm333_vm1, %v436_v31  ;;  %470 = vst.msk [vmem:[#allocation2 + $0x1b0] sm:$0xff] %vm333_vm1, %v437_v32  ;;  %v24596_v44 = vld [vmem:[#allocation2 + $0xc8] sm:$0xff]  ;;  %v24602_v45 = vld [vmem:[#allocation2 + $0xd0] sm:$0xff] }
  0x42   : > { %471 = vst.msk [vmem:[#allocation2 + $0x1c8] sm:$0xff] %vm333_vm1, %v438_v37  ;;  %472 = vst.msk [vmem:[#allocation2 + $0x1d0] sm:$0xff] %vm333_vm1, %v439_v38  ;;  %v24604_v46 = vld [vmem:[#allocation2 + $0xe8] sm:$0xff]  ;;  %v24610_v47 = vld [vmem:[#allocation2 + $0xf0] sm:$0xff] }
  0x43   : > { %20756 = vmatmul.mubr.msk.f32.gmra.mrb[4].mxu1 %vm333_vm1, %v24564_v33  ;;  %473 = vst.msk [vmem:[#allocation2 + $0x1e8] sm:$0xff] %vm333_vm1, %v440_v39  ;;  %474 = vst.msk [vmem:[#allocation2 + $0x1f0] sm:$0xff] %vm333_vm1, %v441_v40  ;;  %v24612_v48 = vld [vmem:[#allocation2 + $0x108] sm:$0xff]  ;;  %v24618_v49 = vld [vmem:[#allocation2 + $0x110] sm:$0xff] }
  0x44   : > { %20758 = vmatprep.mubr.msk.f32.mxu1 %vm333_vm1, %v24568_v34  ;;  %475 = vst.msk [vmem:[#allocation2 + $0x208] sm:$0xff] %vm333_vm1, %v442_v41  ;;  %476 = vst.msk [vmem:[#allocation2 + $0x210] sm:$0xff] %vm333_vm1, %v443_v42  ;;  %v24620_v50 = vld [vmem:[#allocation2 + $0x128] sm:$0xff]  ;;  %v24626_v51 = vld [vmem:[#allocation2 + $0x130] sm:$0xff] }
  0x45   : > { %v24628_v52 = vld [vmem:[#allocation2 + $0x148] sm:$0xff]  ;;  %v24634_v53 = vld [vmem:[#allocation2 + $0x150] sm:$0xff]  ;;  %v445_v40 = vld [vmem:[%s24494_s19 + $0xf8] sm:$0xff] }
  0x46   : > { %v24636_v54 = vld [vmem:[#allocation2 + $0x168] sm:$0xff]  ;;  %v24642_v55 = vld [vmem:[#allocation2 + $0x170] sm:$0xff]  ;;  %478 = vst.msk [vmem:[#allocation2 + $0x230] sm:$0xff] %vm333_vm1, %v445_v40 }
  0x47   : > { %20759 = vmatmul.mubr.msk.f32.gmra.mrb[6].mxu1 %vm333_vm1, %v24574_v35  ;;  %v24644_v56 = vld [vmem:[#allocation2 + $0x188] sm:$0xff]  ;;  %v24650_v57 = vld [vmem:[#allocation2 + $0x190] sm:$0xff] }
  0x48   : > { %20761 = vmatprep.mubr.msk.f32.mxu1 %vm333_vm1, %v24576_v36  ;;  %v24652_v58 = vld [vmem:[#allocation2 + $0x1a8] sm:$0xff]  ;;  %v24658_v59 = vld [vmem:[#allocation2 + $0x1b0] sm:$0xff] }
  0x49   : > { %v24660_v60 = vld [vmem:[#allocation2 + $0x1c8] sm:$0xff]  ;;  %v24666_v61 = vld [vmem:[#allocation2 + $0x1d0] sm:$0xff] }
  0x4a   : > { %v24668_v62 = vld [vmem:[#allocation2 + $0x1e8] sm:$0xff]  ;;  %v24674_v63 = vld [vmem:[#allocation2 + $0x1f0] sm:$0xff] }
  0x4b   : > { %20762 = vmatmul.mubr.msk.f32.gmra.mrb[8].mxu1 %vm333_vm1, %v24594_v43  ;;  %29091 = vst [vmem:[#allocation3_spill] sm:$0xff] %v24668_v62  ;;  %29092 = vst [vmem:[#allocation4_spill] sm:$0xff] %v24674_v63  ;;  %v24676_v0 = vld [vmem:[#allocation2 + $0x208] sm:$0xff]  ;;  %v24682_v1 = vld [vmem:[#allocation2 + $0x210] sm:$0xff] }
  0x4c   : > { %20764 = vmatprep.mubr.msk.f32.mxu1 %vm333_vm1, %v24596_v44  ;;  %29093 = vst [vmem:[#allocation5_spill] sm:$0xff] %v24676_v0  ;;  %29094 = vst [vmem:[#allocation6_spill] sm:$0xff] %v24682_v1  ;;  %v24687_v4 = vld [vmem:[#allocation2 + $0x47] sm:$0xff]  ;;  %v24699_v6 = vld [vmem:[#allocation2 + $0x4f] sm:$0xff] }
  0x4d   : > { %v24701_v7 = vld [vmem:[#allocation2 + $0x67] sm:$0xff]  ;;  %v24709_v8 = vld [vmem:[#allocation2 + $0x6f] sm:$0xff] }
  0x4e   : > { %v24711_v10 = vld [vmem:[#allocation2 + $0x87] sm:$0xff]  ;;  %v24725_v12 = vld [vmem:[#allocation2 + $0xaf] sm:$0xff] }
  0x4f   : > { %20765 = vmatmul.mubr.msk.f32.gmra.mrb[10].mxu1 %vm333_vm1, %v24602_v45  ;;  %v24719_v11 = vld [vmem:[#allocation2 + $0xa7] sm:$0xff]  ;;  %v24733_v14 = vld [vmem:[#allocation2 + $0xcf] sm:$0xff] }
  0x50   : > { %20767 = vmatprep.mubr.msk.f32.mxu1 %vm333_vm1, %v24604_v46  ;;  %v24727_v13 = vld [vmem:[#allocation2 + $0xc7] sm:$0xff]  ;;  %v24741_v16 = vld [vmem:[#allocation2 + $0xef] sm:$0xff] }
  0x51   : > { %v24735_v15 = vld [vmem:[#allocation2 + $0xe7] sm:$0xff]  ;;  %v24749_v18 = vld [vmem:[#allocation2 + $0x10f] sm:$0xff] }
  0x52   : > { %v24743_v17 = vld [vmem:[#allocation2 + $0x107] sm:$0xff]  ;;  %v24757_v20 = vld [vmem:[#allocation2 + $0x12f] sm:$0xff] }
  0x53   : > { %20768 = vmatmul.mubr.msk.f32.gmra.mrb[12].mxu1 %vm333_vm1, %v24610_v47  ;;  %v24751_v19 = vld [vmem:[#allocation2 + $0x127] sm:$0xff]  ;;  %v24765_v22 = vld [vmem:[#allocation2 + $0x14f] sm:$0xff] }
  0x54   : > { %20770 = vmatprep.mubr.msk.f32.mxu1 %vm333_vm1, %v24612_v48  ;;  %v24759_v21 = vld [vmem:[#allocation2 + $0x147] sm:$0xff]  ;;  %v24773_v24 = vld [vmem:[#allocation2 + $0x16f] sm:$0xff] }
  0x55   : > { %v24767_v23 = vld [vmem:[#allocation2 + $0x167] sm:$0xff]  ;;  %v24781_v26 = vld [vmem:[#allocation2 + $0x18f] sm:$0xff] }
  0x56   : > { %v24775_v25 = vld [vmem:[#allocation2 + $0x187] sm:$0xff]  ;;  %v24789_v31 = vld [vmem:[#allocation2 + $0x1af] sm:$0xff] }
  0x57   : > { %20771 = vmatmul.mubr.msk.f32.gmra.mrb[14].mxu1 %vm333_vm1, %v24618_v49  ;;  %v24783_v27 = vld [vmem:[#allocation2 + $0x1a7] sm:$0xff]  ;;  %v24797_v37 = vld [vmem:[#allocation2 + $0x1cf] sm:$0xff] }
  0x58   : > { %20773 = vmatprep.mubr.msk.f32.mxu1 %vm333_vm1, %v24620_v50  ;;  %v24791_v32 = vld [vmem:[#allocation2 + $0x1c7] sm:$0xff]  ;;  %v444_v39 = vld [vmem:[%s24494_s19 + $0xf0] sm:$0xff] }
  0x59   : > { %v24799_v38 = vld [vmem:[#allocation2 + $0x1e7] sm:$0xff]  ;;  %477 = vst.msk [vmem:[#allocation2 + $0x228] sm:$0xff] %vm333_vm1, %v444_v39  ;;  %v24809_v41 = vld [vmem:[#allocation2 + $0x1ef] sm:$0xff] }
  0x5a   : > { %v24811_v42 = vld [vmem:[#allocation2 + $0x207] sm:$0xff]  ;;  %v1197_v39 = vld [vmem:[#allocation2 + $0x31] sm:$0xff] }
  0x5b   : > { %20774 = vmatmul.mubr.msk.f32.gmra.mrb[16].mxu1 %vm333_vm1, %v24626_v51  ;;  %v24822_v40 = vld [vmem:[#allocation2 + $0x49] sm:$0xff] }
  0x5c   : > { %20776 = vmatprep.mubr.msk.f32.mxu1 %vm333_vm1, %v24628_v52  ;;  %29095 = vst [vmem:[#allocation7_spill] sm:$0xff] %v24822_v40 }
  0x5f   : > { %20777 = vmatmul.mubr.msk.f32.gmra.mrb[18].mxu1 %vm333_vm1, %v24634_v53 }
  0x60   : > { %20779 = vmatprep.mubr.msk.f32.mxu1 %vm333_vm1, %v24636_v54 }
  0x63   : > { %20780 = vmatmul.mubr.msk.f32.gmra.mrb[20].mxu1 %vm333_vm1, %v24642_v55 }
  0x64   : > { %20782 = vmatprep.mubr.msk.f32.mxu1 %vm333_vm1, %v24644_v56 }
  0x67   : > { %20783 = vmatmul.mubr.msk.f32.gmra.mrb[22].mxu1 %vm333_vm1, %v24650_v57 }
  0x68   : > { %20785 = vmatprep.mubr.msk.f32.mxu1 %vm333_vm1, %v24652_v58 }
  0x6b   : > { %20786 = vmatmul.mubr.msk.f32.gmra.mrb[24].mxu1 %vm333_vm1, %v24658_v59 }
  0x6c   : > { %20788 = vmatprep.mubr.msk.f32.mxu1 %vm333_vm1, %v24660_v60 }
  0x6f   : > { %20789 = vmatmul.mubr.msk.f32.gmra.mrb[26].mxu1 %vm333_vm1, %v24666_v61 }
  0x70   : > { %20791 = vmatprep.mubr.msk.f32.mxu1 %vm333_vm1, %v24668_v62 }
  0x73   : > { %20792 = vmatmul.mubr.msk.f32.gmra.mrb[28].mxu1 %vm333_vm1, %v24674_v63  ;;  %v24836_v63 = vld [vmem:[#allocation2 + $0x69] sm:$0xff] }
  0x74   : > { %20794 = vmatprep.mubr.msk.f32.mxu1 %vm333_vm1, %v24676_v0  ;;  %v24834_v0 = vld [vmem:[#allocation2 + $0x51] sm:$0xff]  ;;  %29097 = vst [vmem:[#allocation9_spill] sm:$0xff] %v24836_v63 }
  0x75   : > { %29096 = vst [vmem:[#allocation8_spill] sm:$0xff] %v24834_v0 }
  0x77   : > { %20795 = vmatmul.mubr.msk.f32.gmra.mrb[30].mxu1 %vm333_vm1, %v24682_v1  ;;  %v24827_v1 = vld [vmem:[%s28862_s1 + $0x10] sm:$0xf] }
  0x78   : > { %20799 = vmatprep.mubr.msk.f32.mxu1 %vm333_vm1, %v480_v2  ;;  %v24817_v2 = vld [vmem:[#allocation2 + $0x20f] sm:$0xff] }
  0x7b   : > { %20800 = vmatmul.mubr.msk.f32.vlgmr.msra.gmra.mrb[0].mxu1 %vm333_vm1, %v481_v3  ;;  %v1196_v3 = vld [vmem:[#allocation2 + $0x29] sm:$0xff] }
  0x7c   : > { %20848 = vmatpush3.msk.msra.mxu1 %vm643_vm0, %v24508_v9  ;;  %20802 = vmatprep.mubr.msk.f32.mxu1 %vm333_vm1, %v24687_v4  ;;  %v24717_v9 = vld [vmem:[#allocation2 + $0x8f] sm:$0xff] }
  0x7d   : > { %20897 = vmatprep.subr.msk.mxu1 %vm643_vm0, %v24692_v5 }
  0x7f   : > { %20803 = vmatmul.mubr.msk.f32.gmra.mrb[2].mxu1 %vm333_vm1, %v24699_v6 }
  0x80   : > { %20805 = vmatprep.mubr.msk.f32.mxu1 %vm333_vm1, %v24701_v7 }
  0x83   : > { %20806 = vmatmul.mubr.msk.f32.gmra.mrb[4].mxu1 %vm333_vm1, %v24709_v8 }
  0x84   : > { %20808 = vmatprep.mubr.msk.f32.mxu1 %vm333_vm1, %v24711_v10 }
  0x87   : > { %20809 = vmatmul.mubr.msk.f32.gmra.mrb[6].mxu1 %vm333_vm1, %v24717_v9 }
  0x88   : > { %20811 = vmatprep.mubr.msk.f32.mxu1 %vm333_vm1, %v24719_v11 }
  0x8b   : > { %20812 = vmatmul.mubr.msk.f32.gmra.mrb[8].mxu1 %vm333_vm1, %v24725_v12 }
  0x8c   : > { %20814 = vmatprep.mubr.msk.f32.mxu1 %vm333_vm1, %v24727_v13 }
  0x8f   : > { %20815 = vmatmul.mubr.msk.f32.gmra.mrb[10].mxu1 %vm333_vm1, %v24733_v14 }
  0x90   : > { %20817 = vmatprep.mubr.msk.f32.mxu1 %vm333_vm1, %v24735_v15 }
  0x93   : > { %20818 = vmatmul.mubr.msk.f32.gmra.mrb[12].mxu1 %vm333_vm1, %v24741_v16 }
  0x94   : > { %20820 = vmatprep.mubr.msk.f32.mxu1 %vm333_vm1, %v24743_v17 }
  0x97   : > { %20821 = vmatmul.mubr.msk.f32.gmra.mrb[14].mxu1 %vm333_vm1, %v24749_v18 }
  0x98   : > { %20823 = vmatprep.mubr.msk.f32.mxu1 %vm333_vm1, %v24751_v19 }
  0x9b   : > { %20824 = vmatmul.mubr.msk.f32.gmra.mrb[16].mxu1 %vm333_vm1, %v24757_v20 }
  0x9c   : > { %20826 = vmatprep.mubr.msk.f32.mxu1 %vm333_vm1, %v24759_v21 }
  0x9f   : > { %20827 = vmatmul.mubr.msk.f32.gmra.mrb[18].mxu1 %vm333_vm1, %v24765_v22 }
  0xa0   : > { %20829 = vmatprep.mubr.msk.f32.mxu1 %vm333_vm1, %v24767_v23 }
  0xa3   : > { %20830 = vmatmul.mubr.msk.f32.gmra.mrb[20].mxu1 %vm333_vm1, %v24773_v24 }
  0xa4   : > { %20832 = vmatprep.mubr.msk.f32.mxu1 %vm333_vm1, %v24775_v25 }
  0xa7   : > { %20833 = vmatmul.mubr.msk.f32.gmra.mrb[22].mxu1 %vm333_vm1, %v24781_v26 }
  0xa8   : > { %20835 = vmatprep.mubr.msk.f32.mxu1 %vm333_vm1, %v24783_v27 }
  0xab   : > { %20836 = vmatmul.mubr.msk.f32.gmra.mrb[24].mxu1 %vm333_vm1, %v24789_v31 }
  0xac   : > { %20838 = vmatprep.mubr.msk.f32.mxu1 %vm333_vm1, %v24791_v32 }
  0xaf   : > { %20839 = vmatmul.mubr.msk.f32.gmra.mrb[26].mxu1 %vm333_vm1, %v24797_v37 }
  0xb0   : > { %20841 = vmatprep.mubr.msk.f32.mxu1 %vm333_vm1, %v24799_v38 }
  0xb3   : > { %20842 = vmatmul.mubr.msk.f32.gmra.mrb[28].mxu1 %vm333_vm1, %v24809_v41 }
  0xb4   : > { %20844 = vmatprep.mubr.msk.f32.mxu1 %vm333_vm1, %v24811_v42 }
  0xb7   : > { %20845 = vmatmul.mubr.msk.f32.gmra.mrb[30].mxu1 %vm333_vm1, %v24817_v2 }
  0xb8   : > { %20849 = vmatprep.mubr.msk.f32.mxu1 %vm333_vm1, %v1196_v3  ;;  %v24844_v3 = vld [vmem:[#allocation2 + $0x71] sm:$0xff] }
  0xb9   : > { %29098 = vst [vmem:[#allocation10_spill] sm:$0xff] %v24844_v3 }
  0xbb   : > { %20850 = vmatmul.mubr.msk.f32.vlgmr.msra.gmra.mrb[0].mxu1 %vm333_vm1, %v1197_v39  ;;  %v24846_v39 = vld [vmem:[#allocation2 + $0x89] sm:$0xff] }
  0xbc   : > { %20898 = vmatpush3.msk.msra.mxu1 %vm643_vm0, %v24692_v5  ;;  %20852 = vmatprep.mubr.msk.f32.mxu1 %vm333_vm1, %v24822_v40  ;;  %29099 = vst [vmem:[#allocation11_spill] sm:$0xff] %v24846_v39  ;;  %v24852_v5 = vld [vmem:[#allocation2 + $0x91] sm:$0xff]  ;;  %v24854_v40 = vld [vmem:[#allocation2 + $0xa9] sm:$0xff] }
  0xbd   : > { %20947 = vmatprep.subr.msk.mxu1 %vm643_vm0, %v24827_v1  ;;  %29100 = vst [vmem:[#allocation12_spill] sm:$0xff] %v24852_v5  ;;  %29101 = vst [vmem:[#allocation13_spill] sm:$0xff] %v24854_v40 }
  0xbf   : > { %20853 = vmatmul.mubr.msk.f32.gmra.mrb[2].mxu1 %vm333_vm1, %v24834_v0  ;;  %v24862_v0 = vld [vmem:[#allocation2 + $0xc9] sm:$0xff] }
  0xc0   : > { %20855 = vmatprep.mubr.msk.f32.mxu1 %vm333_vm1, %v24836_v63  ;;  %v24860_v63 = vld [vmem:[#allocation2 + $0xb1] sm:$0xff]  ;;  %29103 = vst [vmem:[#allocation15_spill] sm:$0xff] %v24862_v0 }
  0xc1   : > { %29102 = vst [vmem:[#allocation14_spill] sm:$0xff] %v24860_v63 }
  0xc3   : > { %20856 = vmatmul.mubr.msk.f32.gmra.mrb[4].mxu1 %vm333_vm1, %v24844_v3  ;;  %v24870_v3 = vld [vmem:[#allocation2 + $0xe9] sm:$0xff] }
  0xc4   : > { %20858 = vmatprep.mubr.msk.f32.mxu1 %vm333_vm1, %v24846_v39  ;;  %v24868_v39 = vld [vmem:[#allocation2 + $0xd1] sm:$0xff]  ;;  %29105 = vst [vmem:[#allocation17_spill] sm:$0xff] %v24870_v3 }
  0xc5   : > { %29104 = vst [vmem:[#allocation16_spill] sm:$0xff] %v24868_v39 }
  0xc7   : > { %20859 = vmatmul.mubr.msk.f32.gmra.mrb[6].mxu1 %vm333_vm1, %v24852_v5  ;;  %v24878_v5 = vld [vmem:[#allocation2 + $0x109] sm:$0xff] }
  0xc8   : > { %20861 = vmatprep.mubr.msk.f32.mxu1 %vm333_vm1, %v24854_v40  ;;  %v24876_v40 = vld [vmem:[#allocation2 + $0xf1] sm:$0xff]  ;;  %29107 = vst [vmem:[#allocation19_spill] sm:$0xff] %v24878_v5 }
  0xc9   : > { %29106 = vst [vmem:[#allocation18_spill] sm:$0xff] %v24876_v40 }
  0xcb   : > { %20862 = vmatmul.mubr.msk.f32.gmra.mrb[8].mxu1 %vm333_vm1, %v24860_v63  ;;  %v24886_v63 = vld [vmem:[#allocation2 + $0x129] sm:$0xff] }
  0xcc   : > { %20864 = vmatprep.mubr.msk.f32.mxu1 %vm333_vm1, %v24862_v0  ;;  %v24884_v0 = vld [vmem:[#allocation2 + $0x111] sm:$0xff]  ;;  %29109 = vst [vmem:[#allocation21_spill] sm:$0xff] %v24886_v63 }
  0xcd   : > { %29108 = vst [vmem:[#allocation20_spill] sm:$0xff] %v24884_v0 }
  0xcf   : > { %20865 = vmatmul.mubr.msk.f32.gmra.mrb[10].mxu1 %vm333_vm1, %v24868_v39  ;;  %v24894_v39 = vld [vmem:[#allocation2 + $0x149] sm:$0xff] }
  0xd0   : > { %20867 = vmatprep.mubr.msk.f32.mxu1 %vm333_vm1, %v24870_v3  ;;  %v24892_v3 = vld [vmem:[#allocation2 + $0x131] sm:$0xff]  ;;  %29111 = vst [vmem:[#allocation23_spill] sm:$0xff] %v24894_v39 }
  0xd1   : > { %29110 = vst [vmem:[#allocation22_spill] sm:$0xff] %v24892_v3 }
  0xd3   : > { %20868 = vmatmul.mubr.msk.f32.gmra.mrb[12].mxu1 %vm333_vm1, %v24876_v40  ;;  %v24902_v40 = vld [vmem:[#allocation2 + $0x169] sm:$0xff] }
  0xd4   : > { %20870 = vmatprep.mubr.msk.f32.mxu1 %vm333_vm1, %v24878_v5  ;;  %v24900_v5 = vld [vmem:[#allocation2 + $0x151] sm:$0xff]  ;;  %29113 = vst [vmem:[#allocation25_spill] sm:$0xff] %v24902_v40 }
  0xd5   : > { %29112 = vst [vmem:[#allocation24_spill] sm:$0xff] %v24900_v5 }
  0xd7   : > { %20871 = vmatmul.mubr.msk.f32.gmra.mrb[14].mxu1 %vm333_vm1, %v24884_v0  ;;  %v24910_v0 = vld [vmem:[#allocation2 + $0x189] sm:$0xff] }
  0xd8   : > { %20873 = vmatprep.mubr.msk.f32.mxu1 %vm333_vm1, %v24886_v63  ;;  %v24908_v63 = vld [vmem:[#allocation2 + $0x171] sm:$0xff]  ;;  %29115 = vst [vmem:[#allocation27_spill] sm:$0xff] %v24910_v0 }
  0xd9   : > { %29114 = vst [vmem:[#allocation26_spill] sm:$0xff] %v24908_v63 }
  0xdb   : > { %20874 = vmatmul.mubr.msk.f32.gmra.mrb[16].mxu1 %vm333_vm1, %v24892_v3  ;;  %v24918_v3 = vld [vmem:[#allocation2 + $0x1a9] sm:$0xff] }
  0xdc   : > { %20876 = vmatprep.mubr.msk.f32.mxu1 %vm333_vm1, %v24894_v39  ;;  %v24916_v39 = vld [vmem:[#allocation2 + $0x191] sm:$0xff]  ;;  %29117 = vst [vmem:[#allocation29_spill] sm:$0xff] %v24918_v3 }
  0xdd   : > { %29116 = vst [vmem:[#allocation28_spill] sm:$0xff] %v24916_v39 }
  0xdf   : > { %20877 = vmatmul.mubr.msk.f32.gmra.mrb[18].mxu1 %vm333_vm1, %v24900_v5  ;;  %v24926_v5 = vld [vmem:[#allocation2 + $0x1c9] sm:$0xff] }
  0xe0   : > { %20879 = vmatprep.mubr.msk.f32.mxu1 %vm333_vm1, %v24902_v40  ;;  %v24924_v40 = vld [vmem:[#allocation2 + $0x1b1] sm:$0xff]  ;;  %29118 = vst [vmem:[#allocation30_spill] sm:$0xff] %v24926_v5 }
  0xe3   : > { %20880 = vmatmul.mubr.msk.f32.gmra.mrb[20].mxu1 %vm333_vm1, %v24908_v63  ;;  %v24934_v63 = vld [vmem:[#allocation2 + $0x1e9] sm:$0xff] }
  0xe4   : > { %20882 = vmatprep.mubr.msk.f32.mxu1 %vm333_vm1, %v24910_v0  ;;  %v24932_v0 = vld [vmem:[#allocation2 + $0x1d1] sm:$0xff]  ;;  %29119 = vst [vmem:[#allocation31_spill] sm:$0xff] %v24934_v63 }
  0xe7   : > { %20883 = vmatmul.mubr.msk.f32.gmra.mrb[22].mxu1 %vm333_vm1, %v24916_v39  ;;  %v24942_v39 = vld [vmem:[#allocation2 + $0x209] sm:$0xff] }
  0xe8   : > { %20885 = vmatprep.mubr.msk.f32.mxu1 %vm333_vm1, %v24918_v3  ;;  %v24940_v3 = vld [vmem:[#allocation2 + $0x1f1] sm:$0xff]  ;;  %29120 = vst [vmem:[#allocation32_spill] sm:$0xff] %v24942_v39 }
  0xeb   : > { %20886 = vmatmul.mubr.msk.f32.gmra.mrb[24].mxu1 %vm333_vm1, %v24924_v40 }
  0xec   : > { %20888 = vmatprep.mubr.msk.f32.mxu1 %vm333_vm1, %v24926_v5  ;;  %v24948_v5 = vld [vmem:[#allocation2 + $0x211] sm:$0xff] }
  0xef   : > { %20889 = vmatmul.mubr.msk.f32.gmra.mrb[26].mxu1 %vm333_vm1, %v24932_v0 }
  0xf0   : > { %20891 = vmatprep.mubr.msk.f32.mxu1 %vm333_vm1, %v24934_v63  ;;  %v17964_v63 = vld [vmem:[%s28862_s1 + $0x14] sm:$0xf] }
  0xf3   : > { %20892 = vmatmul.mubr.msk.f32.gmra.mrb[28].mxu1 %vm333_vm1, %v24940_v3 }
  0xf4   : > { %20894 = vmatprep.mubr.msk.f32.mxu1 %vm333_vm1, %v24942_v39 }
  0xf7   : > { %20895 = vmatmul.mubr.msk.f32.gmra.mrb[30].mxu1 %vm333_vm1, %v24948_v5 }
  0xf8   : > { %20899 = vmatprep.mubr.msk.f32.mxu1 %vm333_vm1, %v24687_v4  ;;  %v25022_v4 = vld [vmem:[#allocation2 + $0x22f] sm:$0xff] }
  0xfb   : > { %20900 = vmatmul.mubr.msk.f32.vlgmr.msra.gmra.mrb[0].mxu1 %vm333_vm1, %v24699_v6  ;;  %v17998_v6 = vld [vmem:[%s28862_s1 + $0x18] sm:$0xf] }
  0xfc   : > { %20948 = vmatpush3.msk.msra.mxu1 %vm643_vm0, %v24827_v1  ;;  %20902 = vmatprep.mubr.msk.f32.mxu1 %vm333_vm1, %v24701_v7  ;;  %v25016_v1 = vld [vmem:[#allocation2 + $0x227] sm:$0xff] }
  0xfd   : > { %20997 = vmatprep.subr.msk.mxu1 %vm643_vm0, %v17964_v63 }
  0xff   : > { %20903 = vmatmul.mubr.msk.f32.gmra.mrb[2].mxu1 %vm333_vm1, %v24709_v8 }
 0x100   : > { %20905 = vmatprep.mubr.msk.f32.mxu1 %vm333_vm1, %v24711_v10 }
 0x103   : > { %20906 = vmatmul.mubr.msk.f32.gmra.mrb[4].mxu1 %vm333_vm1, %v24717_v9 }
 0x104   : > { %20908 = vmatprep.mubr.msk.f32.mxu1 %vm333_vm1, %v24719_v11 }
 0x107   : > { %20909 = vmatmul.mubr.msk.f32.gmra.mrb[6].mxu1 %vm333_vm1, %v24725_v12 }
 0x108   : > { %20911 = vmatprep.mubr.msk.f32.mxu1 %vm333_vm1, %v24727_v13 }
 0x10b   : > { %20912 = vmatmul.mubr.msk.f32.gmra.mrb[8].mxu1 %vm333_vm1, %v24733_v14 }
 0x10c   : > { %20914 = vmatprep.mubr.msk.f32.mxu1 %vm333_vm1, %v24735_v15 }
 0x10f   : > { %20915 = vmatmul.mubr.msk.f32.gmra.mrb[10].mxu1 %vm333_vm1, %v24741_v16 }
 0x110   : > { %20917 = vmatprep.mubr.msk.f32.mxu1 %vm333_vm1, %v24743_v17 }
 0x113   : > { %20918 = vmatmul.mubr.msk.f32.gmra.mrb[12].mxu1 %vm333_vm1, %v24749_v18 }
 0x114   : > { %20920 = vmatprep.mubr.msk.f32.mxu1 %vm333_vm1, %v24751_v19 }
 0x117   : > { %20921 = vmatmul.mubr.msk.f32.gmra.mrb[14].mxu1 %vm333_vm1, %v24757_v20 }
 0x118   : > { %20923 = vmatprep.mubr.msk.f32.mxu1 %vm333_vm1, %v24759_v21 }
 0x11b   : > { %20924 = vmatmul.mubr.msk.f32.gmra.mrb[16].mxu1 %vm333_vm1, %v24765_v22 }
 0x11c   : > { %20926 = vmatprep.mubr.msk.f32.mxu1 %vm333_vm1, %v24767_v23 }
 0x11f   : > { %20927 = vmatmul.mubr.msk.f32.gmra.mrb[18].mxu1 %vm333_vm1, %v24773_v24 }
 0x120   : > { %20929 = vmatprep.mubr.msk.f32.mxu1 %vm333_vm1, %v24775_v25 }
 0x123   : > { %20930 = vmatmul.mubr.msk.f32.gmra.mrb[20].mxu1 %vm333_vm1, %v24781_v26 }
 0x124   : > { %20932 = vmatprep.mubr.msk.f32.mxu1 %vm333_vm1, %v24783_v27 }
 0x127   : > { %20933 = vmatmul.mubr.msk.f32.gmra.mrb[22].mxu1 %vm333_vm1, %v24789_v31 }
 0x128   : > { %20935 = vmatprep.mubr.msk.f32.mxu1 %vm333_vm1, %v24791_v32 }
 0x12b   : > { %20936 = vmatmul.mubr.msk.f32.gmra.mrb[24].mxu1 %vm333_vm1, %v24797_v37 }
 0x12c   : > { %20938 = vmatprep.mubr.msk.f32.mxu1 %vm333_vm1, %v24799_v38 }
 0x12f   : > { %20939 = vmatmul.mubr.msk.f32.gmra.mrb[26].mxu1 %vm333_vm1, %v24809_v41 }
 0x130   : > { %20941 = vmatprep.mubr.msk.f32.mxu1 %vm333_vm1, %v24811_v42 }
 0x133   : > { %20942 = vmatmul.mubr.msk.f32.gmra.mrb[28].mxu1 %vm333_vm1, %v24817_v2 }
 0x134   : > { %20944 = vmatprep.mubr.msk.f32.mxu1 %vm333_vm1, %v25016_v1 }
 0x137   : > { %20945 = vmatmul.mubr.msk.f32.gmra.mrb[30].mxu1 %vm333_vm1, %v25022_v4 }
 0x138   : > { %20949 = vmatprep.mubr.msk.f32.mxu1 %vm333_vm1, %v24547_v28  ;;  %v29121_v28 = vld [vmem:[#allocation4_spill] sm:$0xff] }
 0x13b   : > { %20950 = vmatmul.mubr.msk.f32.vlgmr.msra.gmra.mrb[0].mxu1 %vm333_vm1, %v24549_v29  ;;  %v29122_v29 = vld [vmem:[#allocation5_spill] sm:$0xff] }
 0x13c   : > { %20998 = vmatpush3.msk.msra.mxu1 %vm643_vm0, %v17964_v63  ;;  %20952 = vmatprep.mubr.msk.f32.mxu1 %vm333_vm1, %v24551_v30  ;;  %v25089_v30 = vld [vmem:[#allocation2 + $0x228] sm:$0xff]  ;;  %v18032_v63 = vld [vmem:[%s28862_s1 + $0x1c] sm:$0xf] }
 0x13d   : > { %21047 = vmatprep.subr.msk.mxu1 %vm643_vm0, %v17998_v6  ;;  %29123 = vst [vmem:[#allocation33_spill] sm:$0xff] %v25089_v30 }
 0x13f   : > { %20953 = vmatmul.mubr.msk.f32.gmra.mrb[2].mxu1 %vm333_vm1, %v24564_v33  ;;  %v29124_v33 = vld [vmem:[#allocation6_spill] sm:$0xff] }
 0x140   : > { %20955 = vmatprep.mubr.msk.f32.mxu1 %vm333_vm1, %v24568_v34  ;;  %v25095_v34 = vld [vmem:[#allocation2 + $0x230] sm:$0xff] }
 0x141   : > { %29125 = vst [vmem:[#allocation34_spill] sm:$0xff] %v25095_v34 }
 0x143   : > { %20956 = vmatmul.mubr.msk.f32.gmra.mrb[4].mxu1 %vm333_vm1, %v24574_v35  ;;  %v29126_v35 = vld [vmem:[#allocation7_spill] sm:$0xff] }
 0x144   : > { %20958 = vmatprep.mubr.msk.f32.mxu1 %vm333_vm1, %v24576_v36 }
 0x147   : > { %20959 = vmatmul.mubr.msk.f32.gmra.mrb[6].mxu1 %vm333_vm1, %v24594_v43 }
 0x148   : > { %20961 = vmatprep.mubr.msk.f32.mxu1 %vm333_vm1, %v24596_v44 }
 0x14b   : > { %20962 = vmatmul.mubr.msk.f32.gmra.mrb[8].mxu1 %vm333_vm1, %v24602_v45 }
 0x14c   : > { %20964 = vmatprep.mubr.msk.f32.mxu1 %vm333_vm1, %v24604_v46 }
 0x14f   : > { %20965 = vmatmul.mubr.msk.f32.gmra.mrb[10].mxu1 %vm333_vm1, %v24610_v47 }
 0x150   : > { %20967 = vmatprep.mubr.msk.f32.mxu1 %vm333_vm1, %v24612_v48 }
 0x153   : > { %20968 = vmatmul.mubr.msk.f32.gmra.mrb[12].mxu1 %vm333_vm1, %v24618_v49 }
 0x154   : > { %20970 = vmatprep.mubr.msk.f32.mxu1 %vm333_vm1, %v24620_v50 }
 0x157   : > { %20971 = vmatmul.mubr.msk.f32.gmra.mrb[14].mxu1 %vm333_vm1, %v24626_v51 }
 0x158   : > { %20973 = vmatprep.mubr.msk.f32.mxu1 %vm333_vm1, %v24628_v52 }
 0x15b   : > { %20974 = vmatmul.mubr.msk.f32.gmra.mrb[16].mxu1 %vm333_vm1, %v24634_v53 }
 0x15c   : > { %20976 = vmatprep.mubr.msk.f32.mxu1 %vm333_vm1, %v24636_v54 }
 0x15f   : > { %20977 = vmatmul.mubr.msk.f32.gmra.mrb[18].mxu1 %vm333_vm1, %v24642_v55 }
 0x160   : > { %20979 = vmatprep.mubr.msk.f32.mxu1 %vm333_vm1, %v24644_v56 }
 0x163   : > { %20980 = vmatmul.mubr.msk.f32.gmra.mrb[20].mxu1 %vm333_vm1, %v24650_v57 }
 0x164   : > { %20982 = vmatprep.mubr.msk.f32.mxu1 %vm333_vm1, %v24652_v58 }
 0x167   : > { %20983 = vmatmul.mubr.msk.f32.gmra.mrb[22].mxu1 %vm333_vm1, %v24658_v59 }
 0x168   : > { %20985 = vmatprep.mubr.msk.f32.mxu1 %vm333_vm1, %v24660_v60 }
 0x16b   : > { %20986 = vmatmul.mubr.msk.f32.gmra.mrb[24].mxu1 %vm333_vm1, %v24666_v61 }
 0x16c   : > { %20988 = vmatprep.mubr.msk.f32.mxu1 %vm333_vm1, %v24668_v62  ;;  %v29136_v62 = vld [vmem:[#allocation17_spill] sm:$0xff] }
 0x16f   : > { %20989 = vmatmul.mubr.msk.f32.gmra.mrb[26].mxu1 %vm333_vm1, %v29121_v28  ;;  %v29132_v28 = vld [vmem:[#allocation13_spill] sm:$0xff] }
 0x170   : > { %20991 = vmatprep.mubr.msk.f32.mxu1 %vm333_vm1, %v29122_v29  ;;  %v29127_v29 = vld [vmem:[#allocation8_spill] sm:$0xff] }
 0x173   : > { %20992 = vmatmul.mubr.msk.f32.gmra.mrb[28].mxu1 %vm333_vm1, %v29124_v33  ;;  %v29128_v33 = vld [vmem:[#allocation9_spill] sm:$0xff] }
 0x174   : > { %20994 = vmatprep.mubr.msk.f32.mxu1 %vm333_vm1, %v25089_v30  ;;  %v29129_v30 = vld [vmem:[#allocation10_spill] sm:$0xff] }
 0x177   : > { %20995 = vmatmul.mubr.msk.f32.gmra.mrb[30].mxu1 %vm333_vm1, %v25095_v34  ;;  %v29130_v34 = vld [vmem:[#allocation11_spill] sm:$0xff] }
 0x178   : > { %20999 = vmatprep.mubr.msk.f32.mxu1 %vm333_vm1, %v29126_v35  ;;  %v29131_v35 = vld [vmem:[#allocation12_spill] sm:$0xff] }
 0x17b   : > { %21000 = vmatmul.mubr.msk.f32.vlgmr.msra.gmra.mrb[0].mxu1 %vm333_vm1, %v29127_v29  ;;  %v29133_v29 = vld [vmem:[#allocation14_spill] sm:$0xff] }
 0x17c   : > { %21048 = vmatpush3.msk.msra.mxu1 %vm643_vm0, %v17998_v6  ;;  %21002 = vmatprep.mubr.msk.f32.mxu1 %vm333_vm1, %v29128_v33  ;;  %v29134_v6 = vld [vmem:[#allocation15_spill] sm:$0xff]  ;;  %v29135_v33 = vld [vmem:[#allocation16_spill] sm:$0xff] }
 0x17d   : > { %21097 = vmatprep.subr.msk.mxu1 %vm643_vm0, %v18032_v63 }
 0x17f   : > { %21003 = vmatmul.mubr.msk.f32.gmra.mrb[2].mxu1 %vm333_vm1, %v29129_v30  ;;  %v29137_v30 = vld [vmem:[#allocation18_spill] sm:$0xff] }
 0x180   : > { %21005 = vmatprep.mubr.msk.f32.mxu1 %vm333_vm1, %v29130_v34  ;;  %v29138_v34 = vld [vmem:[#allocation19_spill] sm:$0xff] }
 0x183   : > { %21006 = vmatmul.mubr.msk.f32.gmra.mrb[4].mxu1 %vm333_vm1, %v29131_v35  ;;  %v29139_v35 = vld [vmem:[#allocation20_spill] sm:$0xff] }
 0x184   : > { %21008 = vmatprep.mubr.msk.f32.mxu1 %vm333_vm1, %v29132_v28  ;;  %v29140_v28 = vld [vmem:[#allocation21_spill] sm:$0xff] }
 0x187   : > { %21009 = vmatmul.mubr.msk.f32.gmra.mrb[6].mxu1 %vm333_vm1, %v29133_v29  ;;  %v29141_v29 = vld [vmem:[#allocation22_spill] sm:$0xff] }
 0x188   : > { %21011 = vmatprep.mubr.msk.f32.mxu1 %vm333_vm1, %v29134_v6  ;;  %v29142_v6 = vld [vmem:[#allocation23_spill] sm:$0xff] }
 0x18b   : > { %21012 = vmatmul.mubr.msk.f32.gmra.mrb[8].mxu1 %vm333_vm1, %v29135_v33  ;;  %v29143_v33 = vld [vmem:[#allocation24_spill] sm:$0xff] }
 0x18c   : > { %21014 = vmatprep.mubr.msk.f32.mxu1 %vm333_vm1, %v29136_v62  ;;  %v29144_v62 = vld [vmem:[#allocation25_spill] sm:$0xff] }
 0x18f   : > { %21015 = vmatmul.mubr.msk.f32.gmra.mrb[10].mxu1 %vm333_vm1, %v29137_v30  ;;  %v29145_v30 = vld [vmem:[#allocation26_spill] sm:$0xff] }
 0x190   : > { %21017 = vmatprep.mubr.msk.f32.mxu1 %vm333_vm1, %v29138_v34  ;;  %v29146_v34 = vld [vmem:[#allocation27_spill] sm:$0xff] }
 0x193   : > { %21018 = vmatmul.mubr.msk.f32.gmra.mrb[12].mxu1 %vm333_vm1, %v29139_v35  ;;  %v29147_v35 = vld [vmem:[#allocation28_spill] sm:$0xff] }
 0x194   : > { %21020 = vmatprep.mubr.msk.f32.mxu1 %vm333_vm1, %v29140_v28  ;;  %v29148_v28 = vld [vmem:[#allocation29_spill] sm:$0xff] }
 0x197   : > { %21021 = vmatmul.mubr.msk.f32.gmra.mrb[14].mxu1 %vm333_vm1, %v29141_v29 }
 0x198   : > { %21023 = vmatprep.mubr.msk.f32.mxu1 %vm333_vm1, %v29142_v6  ;;  %v29149_v6 = vld [vmem:[#allocation30_spill] sm:$0xff] }
 0x19b   : > { %21024 = vmatmul.mubr.msk.f32.gmra.mrb[16].mxu1 %vm333_vm1, %v29143_v33 }
 0x19c   : > { %21026 = vmatprep.mubr.msk.f32.mxu1 %vm333_vm1, %v29144_v62  ;;  %v29150_v62 = vld [vmem:[#allocation31_spill] sm:$0xff] }
 0x19f   : > { %21027 = vmatmul.mubr.msk.f32.gmra.mrb[18].mxu1 %vm333_vm1, %v29145_v30 }
 0x1a0   : > { %21029 = vmatprep.mubr.msk.f32.mxu1 %vm333_vm1, %v29146_v34 }
 0x1a3   : > { %21030 = vmatmul.mubr.msk.f32.gmra.mrb[20].mxu1 %vm333_vm1, %v29147_v35  ;;  %v25162_v35 = vld [vmem:[#allocation2 + $0x229] sm:$0xff] }
 0x1a4   : > { %21032 = vmatprep.mubr.msk.f32.mxu1 %vm333_vm1, %v29148_v28 }
 0x1a7   : > { %21033 = vmatmul.mubr.msk.f32.gmra.mrb[22].mxu1 %vm333_vm1, %v24924_v40 }
 0x1a8   : > { %21035 = vmatprep.mubr.msk.f32.mxu1 %vm333_vm1, %v29149_v6  ;;  %v25168_v6 = vld [vmem:[#allocation2 + $0x231] sm:$0xff] }
 0x1ab   : > { %21036 = vmatmul.mubr.msk.f32.gmra.mrb[24].mxu1 %vm333_vm1, %v24932_v0 }
 0x1ac   : > { %21038 = vmatprep.mubr.msk.f32.mxu1 %vm333_vm1, %v29150_v62 }
 0x1af   : > { %21039 = vmatmul.mubr.msk.f32.gmra.mrb[26].mxu1 %vm333_vm1, %v24940_v3 }
 0x1b0   : > { %21041 = vmatprep.mubr.msk.f32.mxu1 %vm333_vm1, %v24942_v39  ;;  %v18066_v39 = vld [vmem:[%s28862_s1 + $0x20] sm:$0xf] }
 0x1b3   : > { %21042 = vmatmul.mubr.msk.f32.gmra.mrb[28].mxu1 %vm333_vm1, %v24948_v5 }
 0x1b4   : > { %21044 = vmatprep.mubr.msk.f32.mxu1 %vm333_vm1, %v25162_v35 }
 0x1b7   : > { %21045 = vmatmul.mubr.msk.f32.gmra.mrb[30].mxu1 %vm333_vm1, %v25168_v6 }
 0x1b8   : > { %21049 = vmatprep.mubr.msk.f32.mxu1 %vm333_vm1, %v24701_v7  ;;  %v2787_v7 = vld [vmem:[#allocation2 + $0x247] sm:$0xff] }
 0x1bb   : > { %21050 = vmatmul.mubr.msk.f32.vlgmr.msra.gmra.mrb[0].mxu1 %vm333_vm1, %v24709_v8  ;;  %v2788_v8 = vld [vmem:[#allocation2 + $0x24f] sm:$0xff] }
 0x1bc   : > { %21098 = vmatpush3.msk.msra.mxu1 %vm643_vm0, %v18032_v63  ;;  %21052 = vmatprep.mubr.msk.f32.mxu1 %vm333_vm1, %v24711_v10  ;;  %v3147_v10 = vld [vmem:[#allocation2 + $0x68] sm:$0xff] }
 0x1bd   : > { %21147 = vmatprep.subr.msk.mxu1 %vm643_vm0, %v18066_v39 }
 0x1bf   : > { %21053 = vmatmul.mubr.msk.f32.gmra.mrb[2].mxu1 %vm333_vm1, %v24717_v9  ;;  %v3148_v9 = vld [vmem:[#allocation2 + $0x70] sm:$0xff] }
 0x1c0   : > { %21055 = vmatprep.mubr.msk.f32.mxu1 %vm333_vm1, %v24719_v11  ;;  %v3149_v11 = vld [vmem:[#allocation2 + $0x88] sm:$0xff] }
 0x1c3   : > { %21056 = vmatmul.mubr.msk.f32.gmra.mrb[4].mxu1 %vm333_vm1, %v24725_v12  ;;  %v18101_v12 = vld [vmem:[%s28864_s3 + $0x4] sm:$0xf] }
 0x1c4   : > { %21058 = vmatprep.mubr.msk.f32.mxu1 %vm333_vm1, %v24727_v13  ;;  %v3150_v13 = vld [vmem:[#allocation2 + $0x90] sm:$0xff] }
 0x1c7   : > { %21059 = vmatmul.mubr.msk.f32.gmra.mrb[6].mxu1 %vm333_vm1, %v24733_v14  ;;  %v29169_v14 = vld [vmem:[#allocation21_spill] sm:$0xff] }
 0x1c8   : > { %21061 = vmatprep.mubr.msk.f32.mxu1 %vm333_vm1, %v24735_v15  ;;  %v29170_v15 = vld [vmem:[#allocation23_spill] sm:$0xff] }
 0x1cb   : > { %21062 = vmatmul.mubr.msk.f32.gmra.mrb[8].mxu1 %vm333_vm1, %v24741_v16  ;;  %v29171_v16 = vld [vmem:[#allocation25_spill] sm:$0xff] }
 0x1cc   : > { %21064 = vmatprep.mubr.msk.f32.mxu1 %vm333_vm1, %v24743_v17  ;;  %v29172_v17 = vld [vmem:[#allocation28_spill] sm:$0xff] }
 0x1cf   : > { %21065 = vmatmul.mubr.msk.f32.gmra.mrb[10].mxu1 %vm333_vm1, %v24749_v18  ;;  %v29173_v18 = vld [vmem:[#allocation30_spill] sm:$0xff] }
 0x1d0   : > { %21067 = vmatprep.mubr.msk.f32.mxu1 %vm333_vm1, %v24751_v19  ;;  %v29174_v19 = vld [vmem:[#allocation32_spill] sm:$0xff] }
 0x1d3   : > { %21068 = vmatmul.mubr.msk.f32.gmra.mrb[12].mxu1 %vm333_vm1, %v24757_v20  ;;  %v3567_v20 = vld [vmem:[#allocation2 + $0x249] sm:$0xff] }
 0x1d4   : > { %21070 = vmatprep.mubr.msk.f32.mxu1 %vm333_vm1, %v24759_v21  ;;  %v4064_v21 = vld [vmem:[#allocation2 + $0x30] sm:$0xff] }
 0x1d7   : > { %21071 = vmatmul.mubr.msk.f32.gmra.mrb[14].mxu1 %vm333_vm1, %v24765_v22  ;;  %v4062_v22 = vld [vmem:[%s28864_s3] sm:$0xf] }
 0x1d8   : > { %21073 = vmatprep.mubr.msk.f32.mxu1 %vm333_vm1, %v24767_v23  ;;  %v25375_v23 = vld [vmem:[%s28864_s3 + $0x8] sm:$0xf] }
 0x1db   : > { %21074 = vmatmul.mubr.msk.f32.gmra.mrb[16].mxu1 %vm333_vm1, %v24773_v24  ;;  %v25382_v24 = vld [vmem:[%s28863_s2] ss:$0 sm:$0xff] }
 0x1dc   : > { %21076 = vmatprep.mubr.msk.f32.mxu1 %vm333_vm1, %v24775_v25 }
 0x1df   : > { %21077 = vmatmul.mubr.msk.f32.gmra.mrb[18].mxu1 %vm333_vm1, %v24781_v26 }
 0x1e0   : > { %21079 = vmatprep.mubr.msk.f32.mxu1 %vm333_vm1, %v24783_v27 }
 0x1e3   : > { %21080 = vmatmul.mubr.msk.f32.gmra.mrb[20].mxu1 %vm333_vm1, %v24789_v31 }
 0x1e4   : > { %21082 = vmatprep.mubr.msk.f32.mxu1 %vm333_vm1, %v24791_v32 }
 0x1e7   : > { %21083 = vmatmul.mubr.msk.f32.gmra.mrb[22].mxu1 %vm333_vm1, %v24797_v37 }
 0x1e8   : > { %21085 = vmatprep.mubr.msk.f32.mxu1 %vm333_vm1, %v24799_v38 }
 0x1eb   : > { %21086 = vmatmul.mubr.msk.f32.gmra.mrb[24].mxu1 %vm333_vm1, %v24809_v41 }
 0x1ec   : > { %21088 = vmatprep.mubr.msk.f32.mxu1 %vm333_vm1, %v24811_v42 }
 0x1ef   : > { %21089 = vmatmul.mubr.msk.f32.gmra.mrb[26].mxu1 %vm333_vm1, %v24817_v2 }
 0x1f0   : > { %21091 = vmatprep.mubr.msk.f32.mxu1 %vm333_vm1, %v25016_v1 }
 0x1f3   : > { %21092 = vmatmul.mubr.msk.f32.gmra.mrb[28].mxu1 %vm333_vm1, %v25022_v4 }
 0x1f4   : > { %21094 = vmatprep.mubr.msk.f32.mxu1 %vm333_vm1, %v2787_v7 }
 0x1f7   : > { %21095 = vmatmul.mubr.msk.f32.gmra.mrb[30].mxu1 %vm333_vm1, %v2788_v8 }
 0x1f8   : > { %21099 = vmatprep.mubr.msk.f32.mxu1 %vm333_vm1, %v3147_v10 }
 0x1fb   : > { %21100 = vmatmul.mubr.msk.f32.vlgmr.msra.gmra.mrb[0].mxu1 %vm333_vm1, %v3148_v9 }
 0x1fc   : > { %21148 = vmatpush3.msk.msra.mxu1 %vm643_vm0, %v18066_v39  ;;  %21102 = vmatprep.mubr.msk.f32.mxu1 %vm333_vm1, %v3149_v11 }
 0x1fd   : > { %21197 = vmatprep.subr.msk.mxu1 %vm643_vm0, %v18101_v12 }
 0x1ff   : > { %21103 = vmatmul.mubr.msk.f32.gmra.mrb[2].mxu1 %vm333_vm1, %v3150_v13 }
 0x200   : > { %21105 = vmatprep.mubr.msk.f32.mxu1 %vm333_vm1, %v24576_v36  ;;  %v29151_v36 = vld [vmem:[#allocation3_spill] sm:$0xff] }
 0x203   : > { %21106 = vmatmul.mubr.msk.f32.gmra.mrb[4].mxu1 %vm333_vm1, %v24594_v43  ;;  %v29152_v43 = vld [vmem:[#allocation4_spill] sm:$0xff] }
 0x204   : > { %21108 = vmatprep.mubr.msk.f32.mxu1 %vm333_vm1, %v24596_v44  ;;  %v29153_v44 = vld [vmem:[#allocation5_spill] sm:$0xff] }
 0x207   : > { %21109 = vmatmul.mubr.msk.f32.gmra.mrb[6].mxu1 %vm333_vm1, %v24602_v45  ;;  %v29154_v45 = vld [vmem:[#allocation6_spill] sm:$0xff] }
 0x208   : > { %21111 = vmatprep.mubr.msk.f32.mxu1 %vm333_vm1, %v24604_v46  ;;  %v29155_v46 = vld [vmem:[#allocation33_spill] sm:$0xff] }
 0x20b   : > { %21112 = vmatmul.mubr.msk.f32.gmra.mrb[8].mxu1 %vm333_vm1, %v24610_v47  ;;  %v3177_v47 = vld [vmem:[#allocation2 + $0x248] sm:$0xff] }
 0x20c   : > { %21114 = vmatprep.mubr.msk.f32.mxu1 %vm333_vm1, %v24612_v48  ;;  %v29156_v48 = vld [vmem:[#allocation34_spill] sm:$0xff] }
 0x20f   : > { %21115 = vmatmul.mubr.msk.f32.gmra.mrb[10].mxu1 %vm333_vm1, %v24618_v49  ;;  %v3178_v49 = vld [vmem:[#allocation2 + $0x250] sm:$0xff] }
 0x210   : > { %21117 = vmatprep.mubr.msk.f32.mxu1 %vm333_vm1, %v24620_v50  ;;  %v29157_v50 = vld [vmem:[#allocation9_spill] sm:$0xff] }
 0x213   : > { %21118 = vmatmul.mubr.msk.f32.gmra.mrb[12].mxu1 %vm333_vm1, %v24626_v51  ;;  %v29158_v51 = vld [vmem:[#allocation10_spill] sm:$0xff] }
 0x214   : > { %21120 = vmatprep.mubr.msk.f32.mxu1 %vm333_vm1, %v24628_v52  ;;  %v29159_v52 = vld [vmem:[#allocation11_spill] sm:$0xff] }
 0x217   : > { %21121 = vmatmul.mubr.msk.f32.gmra.mrb[14].mxu1 %vm333_vm1, %v24634_v53  ;;  %v29160_v53 = vld [vmem:[#allocation12_spill] sm:$0xff] }
 0x218   : > { %21123 = vmatprep.mubr.msk.f32.mxu1 %vm333_vm1, %v24636_v54  ;;  %v29161_v54 = vld [vmem:[#allocation13_spill] sm:$0xff] }
 0x21b   : > { %21124 = vmatmul.mubr.msk.f32.gmra.mrb[16].mxu1 %vm333_vm1, %v24642_v55  ;;  %v29162_v55 = vld [vmem:[#allocation14_spill] sm:$0xff] }
 0x21c   : > { %21126 = vmatprep.mubr.msk.f32.mxu1 %vm333_vm1, %v24644_v56  ;;  %v29163_v56 = vld [vmem:[#allocation15_spill] sm:$0xff] }
 0x21f   : > { %21127 = vmatmul.mubr.msk.f32.gmra.mrb[18].mxu1 %vm333_vm1, %v24650_v57  ;;  %v29164_v57 = vld [vmem:[#allocation16_spill] sm:$0xff] }
 0x220   : > { %21129 = vmatprep.mubr.msk.f32.mxu1 %vm333_vm1, %v24652_v58  ;;  %v29165_v58 = vld [vmem:[#allocation17_spill] sm:$0xff] }
 0x223   : > { %21130 = vmatmul.mubr.msk.f32.gmra.mrb[20].mxu1 %vm333_vm1, %v24658_v59  ;;  %v29166_v59 = vld [vmem:[#allocation18_spill] sm:$0xff] }
 0x224   : > { %21132 = vmatprep.mubr.msk.f32.mxu1 %vm333_vm1, %v24660_v60  ;;  %v29167_v60 = vld [vmem:[#allocation19_spill] sm:$0xff] }
 0x227   : > { %21133 = vmatmul.mubr.msk.f32.gmra.mrb[22].mxu1 %vm333_vm1, %v24666_v61  ;;  %v29168_v61 = vld [vmem:[#allocation20_spill] sm:$0xff] }
 0x228   : > { %21135 = vmatprep.mubr.msk.f32.mxu1 %vm333_vm1, %v29151_v36 }
 0x22b   : > { %21136 = vmatmul.mubr.msk.f32.gmra.mrb[24].mxu1 %vm333_vm1, %v29152_v43 }
 0x22c   : > { %21138 = vmatprep.mubr.msk.f32.mxu1 %vm333_vm1, %v29153_v44 }
 0x22f   : > { %21139 = vmatmul.mubr.msk.f32.gmra.mrb[26].mxu1 %vm333_vm1, %v29154_v45 }
 0x230   : > { %21141 = vmatprep.mubr.msk.f32.mxu1 %vm333_vm1, %v29155_v46 }
 0x233   : > { %21142 = vmatmul.mubr.msk.f32.gmra.mrb[28].mxu1 %vm333_vm1, %v29156_v48 }
 0x234   : > { %21144 = vmatprep.mubr.msk.f32.mxu1 %vm333_vm1, %v3177_v47 }
 0x237   : > { %21145 = vmatmul.mubr.msk.f32.gmra.mrb[30].mxu1 %vm333_vm1, %v3178_v49 }
 0x238   : > { %21149 = vmatprep.mubr.msk.f32.mxu1 %vm333_vm1, %v29157_v50 }
 0x23b   : > { %21150 = vmatmul.mubr.msk.f32.vlgmr.msra.gmra.mrb[0].mxu1 %vm333_vm1, %v29158_v51 }
 0x23c   : > { %21152 = vmatprep.mubr.msk.f32.mxu1 %vm333_vm1, %v29159_v52  ;;  %21198 = vmatpush3.msk.msra.mxu1 %vm643_vm0, %v18101_v12 }
 0x23d   : > { %21247 = vmatprep.subr.msk.mxu1 %vm643_vm0, %v4062_v22 }
 0x23f   : > { %21153 = vmatmul.mubr.msk.f32.gmra.mrb[2].mxu1 %vm333_vm1, %v29160_v53 }
 0x240   : > { %21155 = vmatprep.mubr.msk.f32.mxu1 %vm333_vm1, %v29161_v54 }
 0x243   : > { %21156 = vmatmul.mubr.msk.f32.gmra.mrb[4].mxu1 %vm333_vm1, %v29162_v55 }
 0x244   : > { %21158 = vmatprep.mubr.msk.f32.mxu1 %vm333_vm1, %v29163_v56 }
 0x247   : > { %21159 = vmatmul.mubr.msk.f32.gmra.mrb[6].mxu1 %vm333_vm1, %v29164_v57 }
 0x248   : > { %21161 = vmatprep.mubr.msk.f32.mxu1 %vm333_vm1, %v29165_v58 }
 0x24b   : > { %21162 = vmatmul.mubr.msk.f32.gmra.mrb[8].mxu1 %vm333_vm1, %v29166_v59 }
 0x24c   : > { %21164 = vmatprep.mubr.msk.f32.mxu1 %vm333_vm1, %v29167_v60 }
 0x24f   : > { %21165 = vmatmul.mubr.msk.f32.gmra.mrb[10].mxu1 %vm333_vm1, %v29168_v61 }
 0x250   : > { %21167 = vmatprep.mubr.msk.f32.mxu1 %vm333_vm1, %v29169_v14 }
 0x253   : > { %21168 = vmatmul.mubr.msk.f32.gmra.mrb[12].mxu1 %vm333_vm1, %v29141_v29 }
 0x254   : > { %21170 = vmatprep.mubr.msk.f32.mxu1 %vm333_vm1, %v29170_v15 }
 0x257   : > { %21171 = vmatmul.mubr.msk.f32.gmra.mrb[14].mxu1 %vm333_vm1, %v29143_v33 }
 0x258   : > { %21173 = vmatprep.mubr.msk.f32.mxu1 %vm333_vm1, %v29171_v16 }
 0x25b   : > { %21174 = vmatmul.mubr.msk.f32.gmra.mrb[16].mxu1 %vm333_vm1, %v29145_v30 }
 0x25c   : > { %21176 = vmatprep.mubr.msk.f32.mxu1 %vm333_vm1, %v29146_v34 }
 0x25f   : > { %21177 = vmatmul.mubr.msk.f32.gmra.mrb[18].mxu1 %vm333_vm1, %v29172_v17 }
 0x260   : > { %21179 = vmatprep.mubr.msk.f32.mxu1 %vm333_vm1, %v29148_v28 }
 0x263   : > { %21180 = vmatmul.mubr.msk.f32.gmra.mrb[20].mxu1 %vm333_vm1, %v24924_v40 }
 0x264   : > { %21182 = vmatprep.mubr.msk.f32.mxu1 %vm333_vm1, %v29173_v18 }
 0x267   : > { %21183 = vmatmul.mubr.msk.f32.gmra.mrb[22].mxu1 %vm333_vm1, %v24932_v0  ;;  %v3568_v0 = vld [vmem:[#allocation2 + $0x251] sm:$0xff] }
 0x268   : > { %21185 = vmatprep.mubr.msk.f32.mxu1 %vm333_vm1, %v29150_v62  ;;  %v4063_v62 = vld [vmem:[#allocation2 + $0x28] sm:$0xff] }
 0x26b   : > { %21186 = vmatmul.mubr.msk.f32.gmra.mrb[24].mxu1 %vm333_vm1, %v24940_v3 }
 0x26c   : > { %21188 = vmatprep.mubr.msk.f32.mxu1 %vm333_vm1, %v29174_v19 }
 0x26f   : > { %21189 = vmatmul.mubr.msk.f32.gmra.mrb[26].mxu1 %vm333_vm1, %v24948_v5 }
 0x270   : > { %21191 = vmatprep.mubr.msk.f32.mxu1 %vm333_vm1, %v25162_v35 }
 0x273   : > { %21192 = vmatmul.mubr.msk.f32.gmra.mrb[28].mxu1 %vm333_vm1, %v25168_v6 }
 0x274   : > { %21194 = vmatprep.mubr.msk.f32.mxu1 %vm333_vm1, %v3567_v20 }
 0x277   : > { %21195 = vmatmul.mubr.msk.f32.gmra.mrb[30].mxu1 %vm333_vm1, %v3568_v0 }
 0x278   : > { %21199 = vmatprep.mubr.msk.f32.mxu1 %vm333_vm1, %v4063_v62 }
 0x27b   : > { %21200 = vmatmul.mubr.msk.f32.vlgmr.msra.gmra.mrb[32].mxu1 %vm333_vm1, %v4064_v21 }
 0x27c   : > { %21248 = vmatpush3.msk.msra.mxu1 %vm643_vm0, %v4062_v22 }
 0x27d   : > { %21297 = vmatprep.subr.msk.mxu1 %vm643_vm0, %v25375_v23 }
 0x30e   : > { %v21151_v25 = vpop.f32.mrb[0].mxu1 }
 0x30f   : > { %v3935_v26 = vadd.f32 %v21151_v25, %v25382_v24  ;;  %v3736_v27 = vpop.f32.mrb[1].mxu1 }
 0x310   : > { %v3934_v31 = vadd.f32 %v25382_v24, %v3736_v27 }
 0x311   : > { %v3967_v32 = vmax.f32 %v3935_v26, 0.0 }
 0x312   : > { %v3966_v37 = vmax.f32 %v3934_v31, 0.0  ;;  %v21154_v38 = vpop.f32.mrb[2].mxu1 }
 0x313   : > { %3999 = vst.msk [vmem:[#allocation2 + $0x50] sm:$0xff] %vm333_vm1, %v3967_v32  ;;  %v3937_v41 = vadd.f32 %v21154_v38, %v25382_v24  ;;  %v3746_v42 = vpop.f32.mrb[3].mxu1 }
 0x314   : > { %3998 = vst.msk [vmem:[#allocation2 + $0x48] sm:$0xff] %vm333_vm1, %v3966_v37  ;;  %v3936_v2 = vadd.f32 %v25382_v24, %v3746_v42 }
 0x315   : > { %v3969_v40 = vmax.f32 %v3937_v41, 0.0 }
 0x316   : > { %v3968_v3 = vmax.f32 %v3936_v2, 0.0  ;;  %v21157_v39 = vpop.f32.mrb[4].mxu1 }
 0x317   : > { %4001 = vst.msk [vmem:[#allocation2 + $0x70] sm:$0xff] %vm333_vm1, %v3969_v40  ;;  %v3939_v5 = vadd.f32 %v21157_v39, %v25382_v24  ;;  %v3756_v1 = vpop.f32.mrb[5].mxu1 }
 0x318   : > { %4000 = vst.msk [vmem:[#allocation2 + $0x68] sm:$0xff] %vm333_vm1, %v3968_v3  ;;  %v3938_v4 = vadd.f32 %v25382_v24, %v3756_v1 }
 0x319   : > { %v3971_v28 = vmax.f32 %v3939_v5, 0.0 }
 0x31a   : > { %v3970_v30 = vmax.f32 %v3938_v4, 0.0  ;;  %v21160_v33 = vpop.f32.mrb[6].mxu1  ;;  %v25402_v6 = vld [vmem:[#allocation2 + $0x50] sm:$0xff] }
 0x31b   : > { %4003 = vst.msk [vmem:[#allocation2 + $0x90] sm:$0xff] %vm333_vm1, %v3971_v28  ;;  %v3941_v34 = vadd.f32 %v21160_v33, %v25382_v24  ;;  %v3766_v63 = vpop.f32.mrb[7].mxu1  ;;  %v25396_v35 = vld [vmem:[#allocation2 + $0x48] sm:$0xff] }
 0x31c   : > { %4002 = vst.msk [vmem:[#allocation2 + $0x88] sm:$0xff] %vm333_vm1, %v3970_v30  ;;  %v3940_v29 = vadd.f32 %v25382_v24, %v3766_v63  ;;  %21202 = vmatprep.mubr.msk.f32.mxu1 %vm333_vm1, %v25396_v35 }
 0x31d   : > { %v3973_v7 = vmax.f32 %v3941_v34, 0.0  ;;  %21203 = vmatmul.mubr.msk.f32.gmra.mrb[34].mxu1 %vm333_vm1, %v25402_v6 }
 0x31e   : > { %v3972_v8 = vmax.f32 %v3940_v29, 0.0  ;;  %v21163_v10 = vpop.f32.mrb[8].mxu1  ;;  %v25414_v36 = vld [vmem:[#allocation2 + $0x70] sm:$0xff] }
 0x31f   : > { %4005 = vst.msk [vmem:[#allocation2 + $0xb0] sm:$0xff] %vm333_vm1, %v3973_v7  ;;  %v3943_v9 = vadd.f32 %v21163_v10, %v25382_v24  ;;  %v3776_v11 = vpop.f32.mrb[9].mxu1  ;;  %v25408_v12 = vld [vmem:[#allocation2 + $0x68] sm:$0xff] }
 0x320   : > { %4004 = vst.msk [vmem:[#allocation2 + $0xa8] sm:$0xff] %vm333_vm1, %v3972_v8  ;;  %v3942_v13 = vadd.f32 %v25382_v24, %v3776_v11  ;;  %21205 = vmatprep.mubr.msk.f32.mxu1 %vm333_vm1, %v25408_v12 }
 0x321   : > { %v3975_v43 = vmax.f32 %v3943_v9, 0.0  ;;  %21206 = vmatmul.mubr.msk.f32.gmra.mrb[36].mxu1 %vm333_vm1, %v25414_v36 }
 0x322   : > { %v3974_v44 = vmax.f32 %v3942_v13, 0.0  ;;  %v21166_v45 = vpop.f32.mrb[10].mxu1  ;;  %v25426_v50 = vld [vmem:[#allocation2 + $0x90] sm:$0xff] }
 0x323   : > { %4007 = vst.msk [vmem:[#allocation2 + $0xd0] sm:$0xff] %vm333_vm1, %v3975_v43  ;;  %v3945_v46 = vadd.f32 %v21166_v45, %v25382_v24  ;;  %v3786_v47 = vpop.f32.mrb[11].mxu1  ;;  %v25420_v48 = vld [vmem:[#allocation2 + $0x88] sm:$0xff] }
 0x324   : > { %4006 = vst.msk [vmem:[#allocation2 + $0xc8] sm:$0xff] %vm333_vm1, %v3974_v44  ;;  %v3944_v49 = vadd.f32 %v25382_v24, %v3786_v47  ;;  %21208 = vmatprep.mubr.msk.f32.mxu1 %vm333_vm1, %v25420_v48 }
 0x325   : > { %v3977_v51 = vmax.f32 %v3945_v46, 0.0  ;;  %21209 = vmatmul.mubr.msk.f32.gmra.mrb[38].mxu1 %vm333_vm1, %v25426_v50 }
 0x326   : > { %v3976_v52 = vmax.f32 %v3944_v49, 0.0  ;;  %v21169_v53 = vpop.f32.mrb[12].mxu1  ;;  %v25438_v58 = vld [vmem:[#allocation2 + $0xb0] sm:$0xff] }
 0x327   : > { %4009 = vst.msk [vmem:[#allocation2 + $0xf0] sm:$0xff] %vm333_vm1, %v3977_v51  ;;  %v3947_v54 = vadd.f32 %v21169_v53, %v25382_v24  ;;  %v3796_v55 = vpop.f32.mrb[13].mxu1  ;;  %v25432_v56 = vld [vmem:[#allocation2 + $0xa8] sm:$0xff] }
 0x328   : > { %4008 = vst.msk [vmem:[#allocation2 + $0xe8] sm:$0xff] %vm333_vm1, %v3976_v52  ;;  %v3946_v57 = vadd.f32 %v25382_v24, %v3796_v55  ;;  %21211 = vmatprep.mubr.msk.f32.mxu1 %vm333_vm1, %v25432_v56 }
 0x329   : > { %v3979_v59 = vmax.f32 %v3947_v54, 0.0  ;;  %21212 = vmatmul.mubr.msk.f32.gmra.mrb[40].mxu1 %vm333_vm1, %v25438_v58 }
 0x32a   : > { %v3978_v60 = vmax.f32 %v3946_v57, 0.0  ;;  %v21172_v61 = vpop.f32.mrb[14].mxu1  ;;  %v25450_v18 = vld [vmem:[#allocation2 + $0xd0] sm:$0xff] }
 0x32b   : > { %4011 = vst.msk [vmem:[#allocation2 + $0x110] sm:$0xff] %vm333_vm1, %v3979_v59  ;;  %v3949_v14 = vadd.f32 %v21172_v61, %v25382_v24  ;;  %v3806_v15 = vpop.f32.mrb[15].mxu1  ;;  %v25444_v16 = vld [vmem:[#allocation2 + $0xc8] sm:$0xff] }
 0x32c   : > { %4010 = vst.msk [vmem:[#allocation2 + $0x108] sm:$0xff] %vm333_vm1, %v3978_v60  ;;  %v3948_v17 = vadd.f32 %v25382_v24, %v3806_v15  ;;  %21214 = vmatprep.mubr.msk.f32.mxu1 %vm333_vm1, %v25444_v16 }
 0x32d   : > { %v3981_v19 = vmax.f32 %v3949_v14, 0.0  ;;  %21215 = vmatmul.mubr.msk.f32.gmra.mrb[42].mxu1 %vm333_vm1, %v25450_v18 }
 0x32e   : > { %v3980_v20 = vmax.f32 %v3948_v17, 0.0  ;;  %v21175_v0 = vpop.f32.mrb[16].mxu1  ;;  %v25462_v26 = vld [vmem:[#allocation2 + $0xf0] sm:$0xff] }
 0x32f   : > { %4013 = vst.msk [vmem:[#allocation2 + $0x130] sm:$0xff] %vm333_vm1, %v3981_v19  ;;  %v3951_v62 = vadd.f32 %v21175_v0, %v25382_v24  ;;  %v3816_v21 = vpop.f32.mrb[17].mxu1  ;;  %v25456_v22 = vld [vmem:[#allocation2 + $0xe8] sm:$0xff] }
 0x330   : > { %4012 = vst.msk [vmem:[#allocation2 + $0x128] sm:$0xff] %vm333_vm1, %v3980_v20  ;;  %v3950_v25 = vadd.f32 %v25382_v24, %v3816_v21  ;;  %21217 = vmatprep.mubr.msk.f32.mxu1 %vm333_vm1, %v25456_v22 }
 0x331   : > { %v3983_v27 = vmax.f32 %v3951_v62, 0.0  ;;  %21218 = vmatmul.mubr.msk.f32.gmra.mrb[44].mxu1 %vm333_vm1, %v25462_v26 }
 0x332   : > { %v3982_v31 = vmax.f32 %v3950_v25, 0.0  ;;  %v21178_v32 = vpop.f32.mrb[18].mxu1  ;;  %v25474_v2 = vld [vmem:[#allocation2 + $0x110] sm:$0xff] }
 0x333   : > { %4015 = vst.msk [vmem:[#allocation2 + $0x150] sm:$0xff] %vm333_vm1, %v3983_v27  ;;  %v3953_v37 = vadd.f32 %v21178_v32, %v25382_v24  ;;  %v3826_v38 = vpop.f32.mrb[19].mxu1  ;;  %v25468_v41 = vld [vmem:[#allocation2 + $0x108] sm:$0xff] }
 0x334   : > { %4014 = vst.msk [vmem:[#allocation2 + $0x148] sm:$0xff] %vm333_vm1, %v3982_v31  ;;  %v3952_v42 = vadd.f32 %v25382_v24, %v3826_v38  ;;  %21220 = vmatprep.mubr.msk.f32.mxu1 %vm333_vm1, %v25468_v41 }
 0x335   : > { %v3985_v40 = vmax.f32 %v3953_v37, 0.0  ;;  %21221 = vmatmul.mubr.msk.f32.gmra.mrb[46].mxu1 %vm333_vm1, %v25474_v2 }
 0x336   : > { %v3984_v3 = vmax.f32 %v3952_v42, 0.0  ;;  %v21181_v39 = vpop.f32.mrb[20].mxu1  ;;  %v25486_v30 = vld [vmem:[#allocation2 + $0x130] sm:$0xff] }
 0x337   : > { %4017 = vst.msk [vmem:[#allocation2 + $0x170] sm:$0xff] %vm333_vm1, %v3985_v40  ;;  %v3955_v5 = vadd.f32 %v21181_v39, %v25382_v24  ;;  %v3836_v1 = vpop.f32.mrb[21].mxu1  ;;  %v25480_v4 = vld [vmem:[#allocation2 + $0x128] sm:$0xff] }
 0x338   : > { %4016 = vst.msk [vmem:[#allocation2 + $0x168] sm:$0xff] %vm333_vm1, %v3984_v3  ;;  %v3954_v28 = vadd.f32 %v25382_v24, %v3836_v1  ;;  %21223 = vmatprep.mubr.msk.f32.mxu1 %vm333_vm1, %v25480_v4  ;;  %v4030_v1 = vld [vmem:[#allocation2 + $0x27] sm:$0xff] }
 0x339   : > { %v3987_v33 = vmax.f32 %v3955_v5, 0.0  ;;  %21224 = vmatmul.mubr.msk.f32.gmra.mrb[48].mxu1 %vm333_vm1, %v25486_v30 }
 0x33a   : > { %v3986_v34 = vmax.f32 %v3954_v28, 0.0  ;;  %v21184_v63 = vpop.f32.mrb[22].mxu1  ;;  %v25498_v9 = vld [vmem:[#allocation2 + $0x150] sm:$0xff] }
 0x33b   : > { %4019 = vst.msk [vmem:[#allocation2 + $0x190] sm:$0xff] %vm333_vm1, %v3987_v33  ;;  %v3957_v29 = vadd.f32 %v21184_v63, %v25382_v24  ;;  %v3846_v7 = vpop.f32.mrb[23].mxu1  ;;  %v25492_v8 = vld [vmem:[#allocation2 + $0x148] sm:$0xff] }
 0x33c   : > { %4018 = vst.msk [vmem:[#allocation2 + $0x188] sm:$0xff] %vm333_vm1, %v3986_v34  ;;  %v3956_v10 = vadd.f32 %v25382_v24, %v3846_v7  ;;  %21226 = vmatprep.mubr.msk.f32.mxu1 %vm333_vm1, %v25492_v8  ;;  %v4031_v33 = vld [vmem:[#allocation2 + $0x2f] sm:$0xff]  ;;  %v25575_v63 = vld [vmem:[#allocation2 + $0x47] sm:$0xff] }
 0x33d   : > { %v3989_v11 = vmax.f32 %v3957_v29, 0.0  ;;  %21227 = vmatmul.mubr.msk.f32.gmra.mrb[50].mxu1 %vm333_vm1, %v25498_v9  ;;  %v25572_v34 = vld [vmem:[%s28864_s3 + $0xc] sm:$0xf] }
 0x33e   : > { %v3988_v13 = vmax.f32 %v3956_v10, 0.0  ;;  %v21187_v43 = vpop.f32.mrb[24].mxu1  ;;  %v25510_v49 = vld [vmem:[#allocation2 + $0x170] sm:$0xff]  ;;  %v25587_v7 = vld [vmem:[#allocation2 + $0x67] sm:$0xff] }
 0x33f   : > { %4021 = vst.msk [vmem:[#allocation2 + $0x1b0] sm:$0xff] %vm333_vm1, %v3989_v11  ;;  %v3959_v44 = vadd.f32 %v21187_v43, %v25382_v24  ;;  %v3856_v45 = vpop.f32.mrb[25].mxu1  ;;  %v25504_v46 = vld [vmem:[#allocation2 + $0x168] sm:$0xff] }
 0x340   : > { %4020 = vst.msk [vmem:[#allocation2 + $0x1a8] sm:$0xff] %vm333_vm1, %v3988_v13  ;;  %v3958_v47 = vadd.f32 %v25382_v24, %v3856_v45  ;;  %21229 = vmatprep.mubr.msk.f32.mxu1 %vm333_vm1, %v25504_v46  ;;  %v25583_v29 = vld [vmem:[#allocation2 + $0x4f] sm:$0xff]  ;;  %v25603_v13 = vld [vmem:[#allocation2 + $0xa7] sm:$0xff] }
 0x341   : > { %v3991_v51 = vmax.f32 %v3959_v44, 0.0  ;;  %21230 = vmatmul.mubr.msk.f32.gmra.mrb[52].mxu1 %vm333_vm1, %v25510_v49  ;;  %v25591_v10 = vld [vmem:[#allocation2 + $0x6f] sm:$0xff]  ;;  %v25611_v44 = vld [vmem:[#allocation2 + $0xc7] sm:$0xff] }
 0x342   : > { %v3990_v52 = vmax.f32 %v3958_v47, 0.0  ;;  %v21190_v53 = vpop.f32.mrb[26].mxu1  ;;  %v25522_v60 = vld [vmem:[#allocation2 + $0x190] sm:$0xff]  ;;  %v25619_v47 = vld [vmem:[#allocation2 + $0xe7] sm:$0xff] }
 0x343   : > { %4023 = vst.msk [vmem:[#allocation2 + $0x1d0] sm:$0xff] %vm333_vm1, %v3991_v51  ;;  %v3961_v54 = vadd.f32 %v21190_v53, %v25382_v24  ;;  %v3866_v55 = vpop.f32.mrb[27].mxu1  ;;  %v25516_v57 = vld [vmem:[#allocation2 + $0x188] sm:$0xff] }
 0x344   : > { %4022 = vst.msk [vmem:[#allocation2 + $0x1c8] sm:$0xff] %vm333_vm1, %v3990_v52  ;;  %v3960_v59 = vadd.f32 %v25382_v24, %v3866_v55  ;;  %21232 = vmatprep.mubr.msk.f32.mxu1 %vm333_vm1, %v25516_v57  ;;  %v25599_v11 = vld [vmem:[#allocation2 + $0x8f] sm:$0xff]  ;;  %v25627_v52 = vld [vmem:[#allocation2 + $0x107] sm:$0xff] }
 0x345   : > { %v3993_v61 = vmax.f32 %v3961_v54, 0.0  ;;  %21233 = vmatmul.mubr.msk.f32.gmra.mrb[54].mxu1 %vm333_vm1, %v25522_v60  ;;  %v25607_v43 = vld [vmem:[#allocation2 + $0xaf] sm:$0xff]  ;;  %v25635_v54 = vld [vmem:[#allocation2 + $0x127] sm:$0xff] }
 0x346   : > { %v3992_v14 = vmax.f32 %v3960_v59, 0.0  ;;  %v21193_v15 = vpop.f32.mrb[28].mxu1  ;;  %v25534_v62 = vld [vmem:[#allocation2 + $0x1b0] sm:$0xff]  ;;  %v25643_v59 = vld [vmem:[#allocation2 + $0x147] sm:$0xff] }
 0x347   : > { %4025 = vst.msk [vmem:[#allocation2 + $0x1f0] sm:$0xff] %vm333_vm1, %v3993_v61  ;;  %v3963_v17 = vadd.f32 %v21193_v15, %v25382_v24  ;;  %v3876_v19 = vpop.f32.mrb[29].mxu1  ;;  %v25528_v20 = vld [vmem:[#allocation2 + $0x1a8] sm:$0xff] }
 0x348   : > { %4024 = vst.msk [vmem:[#allocation2 + $0x1e8] sm:$0xff] %vm333_vm1, %v3992_v14  ;;  %v3962_v0 = vadd.f32 %v25382_v24, %v3876_v19  ;;  %21235 = vmatprep.mubr.msk.f32.mxu1 %vm333_vm1, %v25528_v20  ;;  %v25615_v45 = vld [vmem:[#allocation2 + $0xcf] sm:$0xff]  ;;  %v25651_v14 = vld [vmem:[#allocation2 + $0x167] sm:$0xff] }
 0x349   : > { %v3995_v21 = vmax.f32 %v3963_v17, 0.0  ;;  %21236 = vmatmul.mubr.msk.f32.gmra.mrb[56].mxu1 %vm333_vm1, %v25534_v62  ;;  %v25623_v51 = vld [vmem:[#allocation2 + $0xef] sm:$0xff]  ;;  %v25659_v17 = vld [vmem:[#allocation2 + $0x187] sm:$0xff] }
 0x34a   : > { %v3994_v25 = vmax.f32 %v3962_v0, 0.0  ;;  %v21196_v27 = vpop.f32.mrb[30].mxu1  ;;  %v25546_v42 = vld [vmem:[#allocation2 + $0x1d0] sm:$0xff]  ;;  %v25667_v0 = vld [vmem:[#allocation2 + $0x1a7] sm:$0xff] }
 0x34b   : > { %4027 = vst.msk [vmem:[#allocation2 + $0x210] sm:$0xff] %vm333_vm1, %v3995_v21  ;;  %v3965_v31 = vadd.f32 %v21196_v27, %v25382_v24  ;;  %v3886_v32 = vpop.f32.mrb[31].mxu1  ;;  %v25540_v37 = vld [vmem:[#allocation2 + $0x1c8] sm:$0xff] }
 0x34c   : > { %4026 = vst.msk [vmem:[#allocation2 + $0x208] sm:$0xff] %vm333_vm1, %v3994_v25  ;;  %v3964_v38 = vadd.f32 %v25382_v24, %v3886_v32  ;;  %21238 = vmatprep.mubr.msk.f32.mxu1 %vm333_vm1, %v25540_v37  ;;  %v25631_v53 = vld [vmem:[#allocation2 + $0x10f] sm:$0xff]  ;;  %v25675_v25 = vld [vmem:[#allocation2 + $0x1c7] sm:$0xff] }
 0x34d   : > { %v3997_v40 = vmax.f32 %v3965_v31, 0.0  ;;  %21239 = vmatmul.mubr.msk.f32.gmra.mrb[58].mxu1 %vm333_vm1, %v25546_v42  ;;  %v25639_v55 = vld [vmem:[#allocation2 + $0x12f] sm:$0xff] }
 0x34e   : > { %v3996_v3 = vmax.f32 %v3964_v38, 0.0  ;;  %v25556_v24 = vld [vmem:[#allocation2 + $0x1f0] sm:$0xff] }
 0x34f   : > { %4029 = vst.msk [vmem:[#allocation2 + $0x230] sm:$0xff] %vm333_vm1, %v3997_v40  ;;  %v25551_v39 = vld [vmem:[#allocation2 + $0x1e8] sm:$0xff] }
 0x350   : > { %4028 = vst.msk [vmem:[#allocation2 + $0x228] sm:$0xff] %vm333_vm1, %v3996_v3  ;;  %21241 = vmatprep.mubr.msk.f32.mxu1 %vm333_vm1, %v25551_v39  ;;  %v25647_v61 = vld [vmem:[#allocation2 + $0x14f] sm:$0xff]  ;;  %v25683_v31 = vld [vmem:[#allocation2 + $0x1e7] sm:$0xff] }
 0x351   : > { %21242 = vmatmul.mubr.msk.f32.gmra.mrb[60].mxu1 %vm333_vm1, %v25556_v24  ;;  %v25655_v15 = vld [vmem:[#allocation2 + $0x16f] sm:$0xff] }
 0x352   : > { %v25564_v28 = vld [vmem:[#allocation2 + $0x210] sm:$0xff] }
 0x353   : > { %v25560_v5 = vld [vmem:[#allocation2 + $0x208] sm:$0xff]  ;;  %29176 = vst [vmem:[#allocation8_spill] sm:$0xff] %v25564_v28 }
 0x354   : > { %29175 = vst [vmem:[#allocation7_spill] sm:$0xff] %v25560_v5  ;;  %21244 = vmatprep.mubr.msk.f32.mxu1 %vm333_vm1, %v25560_v5  ;;  %v25663_v19 = vld [vmem:[#allocation2 + $0x18f] sm:$0xff]  ;;  %v25691_v38 = vld [vmem:[#allocation2 + $0x207] sm:$0xff] }
 0x355   : > { %21245 = vmatmul.mubr.msk.f32.gmra.mrb[62].mxu1 %vm333_vm1, %v25564_v28  ;;  %v25671_v21 = vld [vmem:[#allocation2 + $0x1af] sm:$0xff] }
 0x356   : > { %21249 = vmatprep.mubr.msk.f32.mxu1 %vm333_vm1, %v4030_v1  ;;  %v25679_v27 = vld [vmem:[#allocation2 + $0x1cf] sm:$0xff] }
 0x357   : > { %v25687_v32 = vld [vmem:[#allocation2 + $0x1ef] sm:$0xff] }
 0x358   : > { %v25695_v40 = vld [vmem:[#allocation2 + $0x29] sm:$0xff]  ;;  %v25703_v1 = vld [vmem:[#allocation2 + $0x31] sm:$0xff] }
 0x359   : > { %21250 = vmatmul.mubr.msk.f32.vlgmr.msra.gmra.mrb[32].mxu1 %vm333_vm1, %v4031_v33  ;;  %29177 = vst [vmem:[#allocation22_spill] sm:$0xff] %v25695_v40  ;;  %v25697_v3 = vld [vmem:[#allocation2 + $0x20f] sm:$0xff]  ;;  %29178 = vst [vmem:[#allocation24_spill] sm:$0xff] %v25703_v1 }
 0x35a   : > { %21298 = vmatpush3.msk.msra.mxu1 %vm643_vm0, %v25375_v23  ;;  %21252 = vmatprep.mubr.msk.f32.mxu1 %vm333_vm1, %v25575_v63  ;;  %v25595_v23 = vld [vmem:[#allocation2 + $0x87] sm:$0xff]  ;;  %v25708_v33 = vld [vmem:[%s28864_s3 + $0x10] sm:$0xf] }
 0x35b   : > { %21347 = vmatprep.subr.msk.mxu1 %vm643_vm0, %v25572_v34  ;;  %v25712_v28 = vld [vmem:[#allocation2 + $0x49] sm:$0xff] }
 0x35c   : > { %29179 = vst [vmem:[#allocation26_spill] sm:$0xff] %v25712_v28  ;;  %v25724_v5 = vld [vmem:[#allocation2 + $0x69] sm:$0xff] }
 0x35d   : > { %21253 = vmatmul.mubr.msk.f32.gmra.mrb[34].mxu1 %vm333_vm1, %v25583_v29  ;;  %29181 = vst [vmem:[#allocation29_spill] sm:$0xff] %v25724_v5 }
 0x35e   : > { %21255 = vmatprep.mubr.msk.f32.mxu1 %vm333_vm1, %v25587_v7 }
 0x361   : > { %21256 = vmatmul.mubr.msk.f32.gmra.mrb[36].mxu1 %vm333_vm1, %v25591_v10 }
 0x362   : > { %21258 = vmatprep.mubr.msk.f32.mxu1 %vm333_vm1, %v25595_v23 }
 0x365   : > { %21259 = vmatmul.mubr.msk.f32.gmra.mrb[38].mxu1 %vm333_vm1, %v25599_v11 }
 0x366   : > { %21261 = vmatprep.mubr.msk.f32.mxu1 %vm333_vm1, %v25603_v13 }
 0x369   : > { %21262 = vmatmul.mubr.msk.f32.gmra.mrb[40].mxu1 %vm333_vm1, %v25607_v43 }
 0x36a   : > { %21264 = vmatprep.mubr.msk.f32.mxu1 %vm333_vm1, %v25611_v44 }
 0x36d   : > { %21265 = vmatmul.mubr.msk.f32.gmra.mrb[42].mxu1 %vm333_vm1, %v25615_v45 }
 0x36e   : > { %21267 = vmatprep.mubr.msk.f32.mxu1 %vm333_vm1, %v25619_v47 }
 0x371   : > { %21268 = vmatmul.mubr.msk.f32.gmra.mrb[44].mxu1 %vm333_vm1, %v25623_v51 }
 0x372   : > { %21270 = vmatprep.mubr.msk.f32.mxu1 %vm333_vm1, %v25627_v52 }
 0x375   : > { %21271 = vmatmul.mubr.msk.f32.gmra.mrb[46].mxu1 %vm333_vm1, %v25631_v53 }
 0x376   : > { %21273 = vmatprep.mubr.msk.f32.mxu1 %vm333_vm1, %v25635_v54 }
 0x379   : > { %21274 = vmatmul.mubr.msk.f32.gmra.mrb[48].mxu1 %vm333_vm1, %v25639_v55 }
 0x37a   : > { %21276 = vmatprep.mubr.msk.f32.mxu1 %vm333_vm1, %v25643_v59 }
 0x37d   : > { %21277 = vmatmul.mubr.msk.f32.gmra.mrb[50].mxu1 %vm333_vm1, %v25647_v61 }
 0x37e   : > { %21279 = vmatprep.mubr.msk.f32.mxu1 %vm333_vm1, %v25651_v14 }
 0x381   : > { %21280 = vmatmul.mubr.msk.f32.gmra.mrb[52].mxu1 %vm333_vm1, %v25655_v15 }
 0x382   : > { %21282 = vmatprep.mubr.msk.f32.mxu1 %vm333_vm1, %v25659_v17 }
 0x385   : > { %21283 = vmatmul.mubr.msk.f32.gmra.mrb[54].mxu1 %vm333_vm1, %v25663_v19 }
 0x386   : > { %21285 = vmatprep.mubr.msk.f32.mxu1 %vm333_vm1, %v25667_v0 }
 0x389   : > { %21286 = vmatmul.mubr.msk.f32.gmra.mrb[56].mxu1 %vm333_vm1, %v25671_v21 }
 0x38a   : > { %21288 = vmatprep.mubr.msk.f32.mxu1 %vm333_vm1, %v25675_v25 }
 0x38d   : > { %21289 = vmatmul.mubr.msk.f32.gmra.mrb[58].mxu1 %vm333_vm1, %v25679_v27 }
 0x38e   : > { %21291 = vmatprep.mubr.msk.f32.mxu1 %vm333_vm1, %v25683_v31 }
 0x391   : > { %21292 = vmatmul.mubr.msk.f32.gmra.mrb[60].mxu1 %vm333_vm1, %v25687_v32 }
 0x392   : > { %21294 = vmatprep.mubr.msk.f32.mxu1 %vm333_vm1, %v25691_v38 }
 0x395   : > { %21295 = vmatmul.mubr.msk.f32.gmra.mrb[62].mxu1 %vm333_vm1, %v25697_v3 }
 0x396   : > { %21299 = vmatprep.mubr.msk.f32.mxu1 %vm333_vm1, %v25695_v40  ;;  %v25720_v40 = vld [vmem:[#allocation2 + $0x51] sm:$0xff] }
 0x397   : > { %29180 = vst [vmem:[#allocation27_spill] sm:$0xff] %v25720_v40 }
 0x399   : > { %21300 = vmatmul.mubr.msk.f32.vlgmr.msra.gmra.mrb[32].mxu1 %vm333_vm1, %v25703_v1  ;;  %v25728_v1 = vld [vmem:[#allocation2 + $0x71] sm:$0xff] }
 0x39a   : > { %21348 = vmatpush3.msk.msra.mxu1 %vm643_vm0, %v25572_v34  ;;  %21302 = vmatprep.mubr.msk.f32.mxu1 %vm333_vm1, %v25712_v28  ;;  %29182 = vst [vmem:[#allocation31_spill] sm:$0xff] %v25728_v1  ;;  %v25732_v34 = vld [vmem:[#allocation2 + $0x89] sm:$0xff]  ;;  %v25736_v28 = vld [vmem:[#allocation2 + $0x91] sm:$0xff] }
 0x39b   : > { %21397 = vmatprep.subr.msk.mxu1 %vm643_vm0, %v25708_v33  ;;  %29183 = vst [vmem:[#allocation3_spill] sm:$0xff] %v25732_v34  ;;  %29184 = vst [vmem:[#allocation4_spill] sm:$0xff] %v25736_v28 }
 0x39d   : > { %21303 = vmatmul.mubr.msk.f32.gmra.mrb[34].mxu1 %vm333_vm1, %v25720_v40  ;;  %v25740_v40 = vld [vmem:[#allocation2 + $0xa9] sm:$0xff] }
 0x39e   : > { %21305 = vmatprep.mubr.msk.f32.mxu1 %vm333_vm1, %v25724_v5  ;;  %29185 = vst [vmem:[#allocation5_spill] sm:$0xff] %v25740_v40  ;;  %v25744_v5 = vld [vmem:[#allocation2 + $0xb1] sm:$0xff] }
 0x39f   : > { %29186 = vst [vmem:[#allocation6_spill] sm:$0xff] %v25744_v5 }
 0x3a1   : > { %21306 = vmatmul.mubr.msk.f32.gmra.mrb[36].mxu1 %vm333_vm1, %v25728_v1  ;;  %v25748_v1 = vld [vmem:[#allocation2 + $0xc9] sm:$0xff] }
 0x3a2   : > { %21308 = vmatprep.mubr.msk.f32.mxu1 %vm333_vm1, %v25732_v34  ;;  %29187 = vst [vmem:[#allocation33_spill] sm:$0xff] %v25748_v1  ;;  %v25752_v34 = vld [vmem:[#allocation2 + $0xd1] sm:$0xff] }
 0x3a3   : > { %29188 = vst [vmem:[#allocation34_spill] sm:$0xff] %v25752_v34 }
 0x3a5   : > { %21309 = vmatmul.mubr.msk.f32.gmra.mrb[38].mxu1 %vm333_vm1, %v25736_v28  ;;  %v25756_v28 = vld [vmem:[#allocation2 + $0xe9] sm:$0xff] }
 0x3a6   : > { %21311 = vmatprep.mubr.msk.f32.mxu1 %vm333_vm1, %v25740_v40  ;;  %29189 = vst [vmem:[#allocation9_spill] sm:$0xff] %v25756_v28  ;;  %v25760_v40 = vld [vmem:[#allocation2 + $0xf1] sm:$0xff] }
 0x3a7   : > { %29190 = vst [vmem:[#allocation10_spill] sm:$0xff] %v25760_v40 }
 0x3a9   : > { %21312 = vmatmul.mubr.msk.f32.gmra.mrb[40].mxu1 %vm333_vm1, %v25744_v5  ;;  %v25764_v5 = vld [vmem:[#allocation2 + $0x109] sm:$0xff] }
 0x3aa   : > { %21314 = vmatprep.mubr.msk.f32.mxu1 %vm333_vm1, %v25748_v1  ;;  %29191 = vst [vmem:[#allocation11_spill] sm:$0xff] %v25764_v5  ;;  %v25768_v1 = vld [vmem:[#allocation2 + $0x111] sm:$0xff] }
 0x3ab   : > { %29192 = vst [vmem:[#allocation12_spill] sm:$0xff] %v25768_v1 }
 0x3ad   : > { %21315 = vmatmul.mubr.msk.f32.gmra.mrb[42].mxu1 %vm333_vm1, %v25752_v34  ;;  %v25772_v34 = vld [vmem:[#allocation2 + $0x129] sm:$0xff] }
 0x3ae   : > { %21317 = vmatprep.mubr.msk.f32.mxu1 %vm333_vm1, %v25756_v28  ;;  %29193 = vst [vmem:[#allocation13_spill] sm:$0xff] %v25772_v34  ;;  %v25776_v28 = vld [vmem:[#allocation2 + $0x131] sm:$0xff] }
 0x3af   : > { %29194 = vst [vmem:[#allocation14_spill] sm:$0xff] %v25776_v28 }
 0x3b1   : > { %21318 = vmatmul.mubr.msk.f32.gmra.mrb[44].mxu1 %vm333_vm1, %v25760_v40  ;;  %v25780_v40 = vld [vmem:[#allocation2 + $0x149] sm:$0xff] }
 0x3b2   : > { %21320 = vmatprep.mubr.msk.f32.mxu1 %vm333_vm1, %v25764_v5  ;;  %29195 = vst [vmem:[#allocation15_spill] sm:$0xff] %v25780_v40  ;;  %v25784_v5 = vld [vmem:[#allocation2 + $0x151] sm:$0xff] }
 0x3b3   : > { %29196 = vst [vmem:[#allocation16_spill] sm:$0xff] %v25784_v5 }
 0x3b5   : > { %21321 = vmatmul.mubr.msk.f32.gmra.mrb[46].mxu1 %vm333_vm1, %v25768_v1  ;;  %v25788_v1 = vld [vmem:[#allocation2 + $0x169] sm:$0xff] }
 0x3b6   : > { %21323 = vmatprep.mubr.msk.f32.mxu1 %vm333_vm1, %v25772_v34  ;;  %29197 = vst [vmem:[#allocation17_spill] sm:$0xff] %v25788_v1  ;;  %v25792_v34 = vld [vmem:[#allocation2 + $0x171] sm:$0xff] }
 0x3b7   : > { %29198 = vst [vmem:[#allocation18_spill] sm:$0xff] %v25792_v34 }
 0x3b9   : > { %21324 = vmatmul.mubr.msk.f32.gmra.mrb[48].mxu1 %vm333_vm1, %v25776_v28  ;;  %v25796_v28 = vld [vmem:[#allocation2 + $0x189] sm:$0xff] }
 0x3ba   : > { %21326 = vmatprep.mubr.msk.f32.mxu1 %vm333_vm1, %v25780_v40  ;;  %29199 = vst [vmem:[#allocation19_spill] sm:$0xff] %v25796_v28  ;;  %v25800_v40 = vld [vmem:[#allocation2 + $0x191] sm:$0xff] }
 0x3bb   : > { %29200 = vst [vmem:[#allocation20_spill] sm:$0xff] %v25800_v40 }
 0x3bd   : > { %21327 = vmatmul.mubr.msk.f32.gmra.mrb[50].mxu1 %vm333_vm1, %v25784_v5  ;;  %v25804_v5 = vld [vmem:[#allocation2 + $0x1a9] sm:$0xff] }
 0x3be   : > { %21329 = vmatprep.mubr.msk.f32.mxu1 %vm333_vm1, %v25788_v1  ;;  %29201 = vst [vmem:[#allocation21_spill] sm:$0xff] %v25804_v5  ;;  %v25808_v1 = vld [vmem:[#allocation2 + $0x1b1] sm:$0xff] }
 0x3bf   : > { %29202 = vst [vmem:[#allocation23_spill] sm:$0xff] %v25808_v1 }
 0x3c1   : > { %21330 = vmatmul.mubr.msk.f32.gmra.mrb[52].mxu1 %vm333_vm1, %v25792_v34  ;;  %v25812_v34 = vld [vmem:[#allocation2 + $0x1c9] sm:$0xff] }
 0x3c2   : > { %21332 = vmatprep.mubr.msk.f32.mxu1 %vm333_vm1, %v25796_v28  ;;  %29203 = vst [vmem:[#allocation25_spill] sm:$0xff] %v25812_v34  ;;  %v25816_v28 = vld [vmem:[#allocation2 + $0x1d1] sm:$0xff] }
 0x3c5   : > { %21333 = vmatmul.mubr.msk.f32.gmra.mrb[54].mxu1 %vm333_vm1, %v25800_v40  ;;  %v25820_v40 = vld [vmem:[#allocation2 + $0x1e9] sm:$0xff] }
 0x3c6   : > { %21335 = vmatprep.mubr.msk.f32.mxu1 %vm333_vm1, %v25804_v5  ;;  %29204 = vst [vmem:[#allocation28_spill] sm:$0xff] %v25820_v40  ;;  %v25824_v5 = vld [vmem:[#allocation2 + $0x1f1] sm:$0xff] }
 0x3c9   : > { %21336 = vmatmul.mubr.msk.f32.gmra.mrb[56].mxu1 %vm333_vm1, %v25808_v1  ;;  %v25828_v1 = vld [vmem:[#allocation2 + $0x209] sm:$0xff] }
 0x3ca   : > { %21338 = vmatprep.mubr.msk.f32.mxu1 %vm333_vm1, %v25812_v34  ;;  %29205 = vst [vmem:[#allocation30_spill] sm:$0xff] %v25828_v1  ;;  %v25832_v34 = vld [vmem:[#allocation2 + $0x211] sm:$0xff] }
 0x3cd   : > { %21339 = vmatmul.mubr.msk.f32.gmra.mrb[58].mxu1 %vm333_vm1, %v25816_v28 }
 0x3ce   : > { %21341 = vmatprep.mubr.msk.f32.mxu1 %vm333_vm1, %v25820_v40  ;;  %v18270_v40 = vld [vmem:[%s28864_s3 + $0x14] sm:$0xf] }
 0x3d1   : > { %21342 = vmatmul.mubr.msk.f32.gmra.mrb[60].mxu1 %vm333_vm1, %v25824_v5 }
 0x3d2   : > { %21344 = vmatprep.mubr.msk.f32.mxu1 %vm333_vm1, %v25828_v1 }
 0x3d5   : > { %21345 = vmatmul.mubr.msk.f32.gmra.mrb[62].mxu1 %vm333_vm1, %v25832_v34 }
 0x3d6   : > { %21349 = vmatprep.mubr.msk.f32.mxu1 %vm333_vm1, %v25575_v63  ;;  %v25902_v63 = vld [vmem:[#allocation2 + $0x227] sm:$0xff] }
 0x3d9   : > { %21350 = vmatmul.mubr.msk.f32.vlgmr.msra.gmra.mrb[32].mxu1 %vm333_vm1, %v25583_v29  ;;  %v25906_v29 = vld [vmem:[#allocation2 + $0x22f] sm:$0xff] }
 0x3da   : > { %21398 = vmatpush3.msk.msra.mxu1 %vm643_vm0, %v25708_v33  ;;  %21352 = vmatprep.mubr.msk.f32.mxu1 %vm333_vm1, %v25587_v7  ;;  %v18304_v33 = vld [vmem:[%s28864_s3 + $0x18] sm:$0xf] }
 0x3db   : > { %21447 = vmatprep.subr.msk.mxu1 %vm643_vm0, %v18270_v40 }
 0x3dd   : > { %21353 = vmatmul.mubr.msk.f32.gmra.mrb[34].mxu1 %vm333_vm1, %v25591_v10 }
 0x3de   : > { %21355 = vmatprep.mubr.msk.f32.mxu1 %vm333_vm1, %v25595_v23 }
 0x3e1   : > { %21356 = vmatmul.mubr.msk.f32.gmra.mrb[36].mxu1 %vm333_vm1, %v25599_v11 }
 0x3e2   : > { %21358 = vmatprep.mubr.msk.f32.mxu1 %vm333_vm1, %v25603_v13 }
 0x3e5   : > { %21359 = vmatmul.mubr.msk.f32.gmra.mrb[38].mxu1 %vm333_vm1, %v25607_v43 }
 0x3e6   : > { %21361 = vmatprep.mubr.msk.f32.mxu1 %vm333_vm1, %v25611_v44 }
 0x3e9   : > { %21362 = vmatmul.mubr.msk.f32.gmra.mrb[40].mxu1 %vm333_vm1, %v25615_v45 }
 0x3ea   : > { %21364 = vmatprep.mubr.msk.f32.mxu1 %vm333_vm1, %v25619_v47 }
 0x3ed   : > { %21365 = vmatmul.mubr.msk.f32.gmra.mrb[42].mxu1 %vm333_vm1, %v25623_v51 }
 0x3ee   : > { %21367 = vmatprep.mubr.msk.f32.mxu1 %vm333_vm1, %v25627_v52 }
 0x3f1   : > { %21368 = vmatmul.mubr.msk.f32.gmra.mrb[44].mxu1 %vm333_vm1, %v25631_v53 }
 0x3f2   : > { %21370 = vmatprep.mubr.msk.f32.mxu1 %vm333_vm1, %v25635_v54 }
 0x3f5   : > { %21371 = vmatmul.mubr.msk.f32.gmra.mrb[46].mxu1 %vm333_vm1, %v25639_v55 }
 0x3f6   : > { %21373 = vmatprep.mubr.msk.f32.mxu1 %vm333_vm1, %v25643_v59 }
 0x3f9   : > { %21374 = vmatmul.mubr.msk.f32.gmra.mrb[48].mxu1 %vm333_vm1, %v25647_v61 }
 0x3fa   : > { %21376 = vmatprep.mubr.msk.f32.mxu1 %vm333_vm1, %v25651_v14 }
 0x3fd   : > { %21377 = vmatmul.mubr.msk.f32.gmra.mrb[50].mxu1 %vm333_vm1, %v25655_v15 }
 0x3fe   : > { %21379 = vmatprep.mubr.msk.f32.mxu1 %vm333_vm1, %v25659_v17 }
 0x401   : > { %21380 = vmatmul.mubr.msk.f32.gmra.mrb[52].mxu1 %vm333_vm1, %v25663_v19 }
 0x402   : > { %21382 = vmatprep.mubr.msk.f32.mxu1 %vm333_vm1, %v25667_v0 }
 0x405   : > { %21383 = vmatmul.mubr.msk.f32.gmra.mrb[54].mxu1 %vm333_vm1, %v25671_v21 }
 0x406   : > { %21385 = vmatprep.mubr.msk.f32.mxu1 %vm333_vm1, %v25675_v25 }
 0x409   : > { %21386 = vmatmul.mubr.msk.f32.gmra.mrb[56].mxu1 %vm333_vm1, %v25679_v27 }
 0x40a   : > { %21388 = vmatprep.mubr.msk.f32.mxu1 %vm333_vm1, %v25683_v31 }
 0x40d   : > { %21389 = vmatmul.mubr.msk.f32.gmra.mrb[58].mxu1 %vm333_vm1, %v25687_v32 }
 0x40e   : > { %21391 = vmatprep.mubr.msk.f32.mxu1 %vm333_vm1, %v25691_v38 }
 0x411   : > { %21392 = vmatmul.mubr.msk.f32.gmra.mrb[60].mxu1 %vm333_vm1, %v25697_v3 }
 0x412   : > { %21394 = vmatprep.mubr.msk.f32.mxu1 %vm333_vm1, %v25902_v63 }
 0x415   : > { %21395 = vmatmul.mubr.msk.f32.gmra.mrb[62].mxu1 %vm333_vm1, %v25906_v29 }
 0x416   : > { %21399 = vmatprep.mubr.msk.f32.mxu1 %vm333_vm1, %v25396_v35  ;;  %v29206_v35 = vld [vmem:[#allocation7_spill] sm:$0xff] }
 0x419   : > { %21400 = vmatmul.mubr.msk.f32.vlgmr.msra.gmra.mrb[32].mxu1 %vm333_vm1, %v25402_v6  ;;  %v29207_v6 = vld [vmem:[#allocation8_spill] sm:$0xff] }
 0x41a   : > { %21448 = vmatpush3.msk.msra.mxu1 %vm643_vm0, %v18270_v40  ;;  %21402 = vmatprep.mubr.msk.f32.mxu1 %vm333_vm1, %v25408_v12  ;;  %v25975_v12 = vld [vmem:[#allocation2 + $0x228] sm:$0xff]  ;;  %v29215_v40 = vld [vmem:[#allocation6_spill] sm:$0xff] }
 0x41b   : > { %21497 = vmatprep.subr.msk.mxu1 %vm643_vm0, %v18304_v33 }
 0x41d   : > { %21403 = vmatmul.mubr.msk.f32.gmra.mrb[34].mxu1 %vm333_vm1, %v25414_v36  ;;  %v25979_v36 = vld [vmem:[#allocation2 + $0x230] sm:$0xff] }
 0x41e   : > { %21405 = vmatprep.mubr.msk.f32.mxu1 %vm333_vm1, %v25420_v48  ;;  %v29208_v48 = vld [vmem:[#allocation26_spill] sm:$0xff] }
 0x421   : > { %21406 = vmatmul.mubr.msk.f32.gmra.mrb[36].mxu1 %vm333_vm1, %v25426_v50  ;;  %v18338_v50 = vld [vmem:[%s28864_s3 + $0x1c] sm:$0xf] }
 0x422   : > { %21408 = vmatprep.mubr.msk.f32.mxu1 %vm333_vm1, %v25432_v56  ;;  %v29209_v56 = vld [vmem:[#allocation27_spill] sm:$0xff] }
 0x425   : > { %21409 = vmatmul.mubr.msk.f32.gmra.mrb[38].mxu1 %vm333_vm1, %v25438_v58  ;;  %v29210_v58 = vld [vmem:[#allocation29_spill] sm:$0xff] }
 0x426   : > { %21411 = vmatprep.mubr.msk.f32.mxu1 %vm333_vm1, %v25444_v16  ;;  %v29211_v16 = vld [vmem:[#allocation31_spill] sm:$0xff] }
 0x429   : > { %21412 = vmatmul.mubr.msk.f32.gmra.mrb[40].mxu1 %vm333_vm1, %v25450_v18  ;;  %v29212_v18 = vld [vmem:[#allocation3_spill] sm:$0xff] }
 0x42a   : > { %21414 = vmatprep.mubr.msk.f32.mxu1 %vm333_vm1, %v25456_v22  ;;  %v29213_v22 = vld [vmem:[#allocation4_spill] sm:$0xff] }
 0x42d   : > { %21415 = vmatmul.mubr.msk.f32.gmra.mrb[42].mxu1 %vm333_vm1, %v25462_v26  ;;  %v29214_v26 = vld [vmem:[#allocation5_spill] sm:$0xff] }
 0x42e   : > { %21417 = vmatprep.mubr.msk.f32.mxu1 %vm333_vm1, %v25468_v41 }
 0x431   : > { %21418 = vmatmul.mubr.msk.f32.gmra.mrb[44].mxu1 %vm333_vm1, %v25474_v2 }
 0x432   : > { %21420 = vmatprep.mubr.msk.f32.mxu1 %vm333_vm1, %v25480_v4 }
 0x435   : > { %21421 = vmatmul.mubr.msk.f32.gmra.mrb[46].mxu1 %vm333_vm1, %v25486_v30 }
 0x436   : > { %21423 = vmatprep.mubr.msk.f32.mxu1 %vm333_vm1, %v25492_v8 }
 0x439   : > { %21424 = vmatmul.mubr.msk.f32.gmra.mrb[48].mxu1 %vm333_vm1, %v25498_v9 }
 0x43a   : > { %21426 = vmatprep.mubr.msk.f32.mxu1 %vm333_vm1, %v25504_v46 }
 0x43d   : > { %21427 = vmatmul.mubr.msk.f32.gmra.mrb[50].mxu1 %vm333_vm1, %v25510_v49 }
 0x43e   : > { %21429 = vmatprep.mubr.msk.f32.mxu1 %vm333_vm1, %v25516_v57 }
 0x441   : > { %21430 = vmatmul.mubr.msk.f32.gmra.mrb[52].mxu1 %vm333_vm1, %v25522_v60 }
 0x442   : > { %21432 = vmatprep.mubr.msk.f32.mxu1 %vm333_vm1, %v25528_v20 }
 0x445   : > { %21433 = vmatmul.mubr.msk.f32.gmra.mrb[54].mxu1 %vm333_vm1, %v25534_v62 }
 0x446   : > { %21435 = vmatprep.mubr.msk.f32.mxu1 %vm333_vm1, %v25540_v37 }
 0x449   : > { %21436 = vmatmul.mubr.msk.f32.gmra.mrb[56].mxu1 %vm333_vm1, %v25546_v42 }
 0x44a   : > { %21438 = vmatprep.mubr.msk.f32.mxu1 %vm333_vm1, %v25551_v39 }
 0x44d   : > { %21439 = vmatmul.mubr.msk.f32.gmra.mrb[58].mxu1 %vm333_vm1, %v25556_v24 }
 0x44e   : > { %21441 = vmatprep.mubr.msk.f32.mxu1 %vm333_vm1, %v29206_v35 }
 0x451   : > { %21442 = vmatmul.mubr.msk.f32.gmra.mrb[60].mxu1 %vm333_vm1, %v29207_v6 }
 0x452   : > { %21444 = vmatprep.mubr.msk.f32.mxu1 %vm333_vm1, %v25975_v12 }
 0x455   : > { %21445 = vmatmul.mubr.msk.f32.gmra.mrb[62].mxu1 %vm333_vm1, %v25979_v36 }
 0x456   : > { %21449 = vmatprep.mubr.msk.f32.mxu1 %vm333_vm1, %v29208_v48  ;;  %v29217_v48 = vld [vmem:[#allocation34_spill] sm:$0xff] }
 0x459   : > { %21450 = vmatmul.mubr.msk.f32.vlgmr.msra.gmra.mrb[32].mxu1 %vm333_vm1, %v29209_v56  ;;  %v29218_v56 = vld [vmem:[#allocation9_spill] sm:$0xff] }
 0x45a   : > { %21498 = vmatpush3.msk.msra.mxu1 %vm643_vm0, %v18304_v33  ;;  %21452 = vmatprep.mubr.msk.f32.mxu1 %vm333_vm1, %v29210_v58  ;;  %v29216_v33 = vld [vmem:[#allocation33_spill] sm:$0xff] }
 0x45b   : > { %21547 = vmatprep.subr.msk.mxu1 %vm643_vm0, %v18338_v50 }
 0x45d   : > { %21453 = vmatmul.mubr.msk.f32.gmra.mrb[34].mxu1 %vm333_vm1, %v29211_v16  ;;  %v29219_v16 = vld [vmem:[#allocation10_spill] sm:$0xff] }
 0x45e   : > { %21455 = vmatprep.mubr.msk.f32.mxu1 %vm333_vm1, %v29212_v18  ;;  %v29220_v18 = vld [vmem:[#allocation11_spill] sm:$0xff] }
 0x461   : > { %21456 = vmatmul.mubr.msk.f32.gmra.mrb[36].mxu1 %vm333_vm1, %v29213_v22  ;;  %v29221_v22 = vld [vmem:[#allocation12_spill] sm:$0xff] }
 0x462   : > { %21458 = vmatprep.mubr.msk.f32.mxu1 %vm333_vm1, %v29214_v26  ;;  %v29222_v26 = vld [vmem:[#allocation13_spill] sm:$0xff] }
 0x465   : > { %21459 = vmatmul.mubr.msk.f32.gmra.mrb[38].mxu1 %vm333_vm1, %v29215_v40  ;;  %v29223_v40 = vld [vmem:[#allocation14_spill] sm:$0xff] }
 0x466   : > { %21461 = vmatprep.mubr.msk.f32.mxu1 %vm333_vm1, %v29216_v33  ;;  %v29224_v33 = vld [vmem:[#allocation15_spill] sm:$0xff] }
 0x469   : > { %21462 = vmatmul.mubr.msk.f32.gmra.mrb[40].mxu1 %vm333_vm1, %v29217_v48  ;;  %v29225_v48 = vld [vmem:[#allocation16_spill] sm:$0xff] }
 0x46a   : > { %21464 = vmatprep.mubr.msk.f32.mxu1 %vm333_vm1, %v29218_v56  ;;  %v29226_v56 = vld [vmem:[#allocation17_spill] sm:$0xff] }
 0x46d   : > { %21465 = vmatmul.mubr.msk.f32.gmra.mrb[42].mxu1 %vm333_vm1, %v29219_v16  ;;  %v29227_v16 = vld [vmem:[#allocation18_spill] sm:$0xff] }
 0x46e   : > { %21467 = vmatprep.mubr.msk.f32.mxu1 %vm333_vm1, %v29220_v18  ;;  %v29228_v18 = vld [vmem:[#allocation19_spill] sm:$0xff] }
 0x471   : > { %21468 = vmatmul.mubr.msk.f32.gmra.mrb[44].mxu1 %vm333_vm1, %v29221_v22  ;;  %v29229_v22 = vld [vmem:[#allocation20_spill] sm:$0xff] }
 0x472   : > { %21470 = vmatprep.mubr.msk.f32.mxu1 %vm333_vm1, %v29222_v26  ;;  %v29230_v26 = vld [vmem:[#allocation21_spill] sm:$0xff] }
 0x475   : > { %21471 = vmatmul.mubr.msk.f32.gmra.mrb[46].mxu1 %vm333_vm1, %v29223_v40  ;;  %v29231_v40 = vld [vmem:[#allocation23_spill] sm:$0xff] }
 0x476   : > { %21473 = vmatprep.mubr.msk.f32.mxu1 %vm333_vm1, %v29224_v33  ;;  %v29232_v33 = vld [vmem:[#allocation25_spill] sm:$0xff] }
 0x479   : > { %21474 = vmatmul.mubr.msk.f32.gmra.mrb[48].mxu1 %vm333_vm1, %v29225_v48 }
 0x47a   : > { %21476 = vmatprep.mubr.msk.f32.mxu1 %vm333_vm1, %v29226_v56  ;;  %v29233_v56 = vld [vmem:[#allocation28_spill] sm:$0xff] }
 0x47d   : > { %21477 = vmatmul.mubr.msk.f32.gmra.mrb[50].mxu1 %vm333_vm1, %v29227_v16 }
 0x47e   : > { %21479 = vmatprep.mubr.msk.f32.mxu1 %vm333_vm1, %v29228_v18 }
 0x481   : > { %21480 = vmatmul.mubr.msk.f32.gmra.mrb[52].mxu1 %vm333_vm1, %v29229_v22 }
 0x482   : > { %21482 = vmatprep.mubr.msk.f32.mxu1 %vm333_vm1, %v29230_v26  ;;  %v26048_v26 = vld [vmem:[#allocation2 + $0x229] sm:$0xff] }
 0x485   : > { %21483 = vmatmul.mubr.msk.f32.gmra.mrb[54].mxu1 %vm333_vm1, %v29231_v40 }
 0x486   : > { %21485 = vmatprep.mubr.msk.f32.mxu1 %vm333_vm1, %v29232_v33  ;;  %v26052_v33 = vld [vmem:[#allocation2 + $0x231] sm:$0xff] }
 0x489   : > { %21486 = vmatmul.mubr.msk.f32.gmra.mrb[56].mxu1 %vm333_vm1, %v25816_v28 }
 0x48a   : > { %21488 = vmatprep.mubr.msk.f32.mxu1 %vm333_vm1, %v29233_v56 }
 0x48d   : > { %21489 = vmatmul.mubr.msk.f32.gmra.mrb[58].mxu1 %vm333_vm1, %v25824_v5 }
 0x48e   : > { %21491 = vmatprep.mubr.msk.f32.mxu1 %vm333_vm1, %v25828_v1  ;;  %v18372_v1 = vld [vmem:[%s28864_s3 + $0x20] sm:$0xf] }
 0x491   : > { %21492 = vmatmul.mubr.msk.f32.gmra.mrb[60].mxu1 %vm333_vm1, %v25832_v34 }
 0x492   : > { %21494 = vmatprep.mubr.msk.f32.mxu1 %vm333_vm1, %v26048_v26 }
 0x495   : > { %21495 = vmatmul.mubr.msk.f32.gmra.mrb[62].mxu1 %vm333_vm1, %v26052_v33 }
 0x496   : > { %21499 = vmatprep.mubr.msk.f32.mxu1 %vm333_vm1, %v25587_v7  ;;  %v6335_v7 = vld [vmem:[#allocation2 + $0x247] sm:$0xff] }
 0x499   : > { %21500 = vmatmul.mubr.msk.f32.vlgmr.msra.gmra.mrb[32].mxu1 %vm333_vm1, %v25591_v10  ;;  %v6336_v10 = vld [vmem:[#allocation2 + $0x24f] sm:$0xff] }
 0x49a   : > { %21548 = vmatpush3.msk.msra.mxu1 %vm643_vm0, %v18338_v50  ;;  %21502 = vmatprep.mubr.msk.f32.mxu1 %vm333_vm1, %v25595_v23  ;;  %v6695_v23 = vld [vmem:[#allocation2 + $0x68] sm:$0xff] }
 0x49b   : > { %21597 = vmatprep.subr.msk.mxu1 %vm643_vm0, %v18372_v1 }
 0x49d   : > { %21503 = vmatmul.mubr.msk.f32.gmra.mrb[34].mxu1 %vm333_vm1, %v25599_v11  ;;  %v6696_v11 = vld [vmem:[#allocation2 + $0x70] sm:$0xff] }
 0x49e   : > { %21505 = vmatprep.mubr.msk.f32.mxu1 %vm333_vm1, %v25603_v13  ;;  %v6697_v13 = vld [vmem:[#allocation2 + $0x88] sm:$0xff] }
 0x4a1   : > { %21506 = vmatmul.mubr.msk.f32.gmra.mrb[36].mxu1 %vm333_vm1, %v25607_v43  ;;  %v6698_v43 = vld [vmem:[#allocation2 + $0x90] sm:$0xff] }
 0x4a2   : > { %21508 = vmatprep.mubr.msk.f32.mxu1 %vm333_vm1, %v25611_v44  ;;  %v6699_v44 = vld [vmem:[#allocation2 + $0xa8] sm:$0xff] }
 0x4a5   : > { %21509 = vmatmul.mubr.msk.f32.gmra.mrb[38].mxu1 %vm333_vm1, %v25615_v45  ;;  %v6700_v45 = vld [vmem:[#allocation2 + $0xb0] sm:$0xff] }
 0x4a6   : > { %21511 = vmatprep.mubr.msk.f32.mxu1 %vm333_vm1, %v25619_v47  ;;  %v6701_v47 = vld [vmem:[#allocation2 + $0xc8] sm:$0xff] }
 0x4a9   : > { %21512 = vmatmul.mubr.msk.f32.gmra.mrb[40].mxu1 %vm333_vm1, %v25623_v51  ;;  %v6702_v51 = vld [vmem:[#allocation2 + $0xd0] sm:$0xff] }
 0x4aa   : > { %21514 = vmatprep.mubr.msk.f32.mxu1 %vm333_vm1, %v25627_v52  ;;  %v6703_v52 = vld [vmem:[#allocation2 + $0xe8] sm:$0xff] }
 0x4ad   : > { %21515 = vmatmul.mubr.msk.f32.gmra.mrb[42].mxu1 %vm333_vm1, %v25631_v53  ;;  %v6704_v53 = vld [vmem:[#allocation2 + $0xf0] sm:$0xff] }
 0x4ae   : > { %21517 = vmatprep.mubr.msk.f32.mxu1 %vm333_vm1, %v25635_v54  ;;  %v29248_v54 = vld [vmem:[#allocation17_spill] sm:$0xff] }
 0x4b1   : > { %21518 = vmatmul.mubr.msk.f32.gmra.mrb[44].mxu1 %vm333_vm1, %v25639_v55  ;;  %v29249_v55 = vld [vmem:[#allocation21_spill] sm:$0xff] }
 0x4b2   : > { %21520 = vmatprep.mubr.msk.f32.mxu1 %vm333_vm1, %v25643_v59  ;;  %v29250_v59 = vld [vmem:[#allocation25_spill] sm:$0xff] }
 0x4b5   : > { %21521 = vmatmul.mubr.msk.f32.gmra.mrb[46].mxu1 %vm333_vm1, %v25647_v61  ;;  %v29251_v61 = vld [vmem:[#allocation30_spill] sm:$0xff] }
 0x4b6   : > { %21523 = vmatprep.mubr.msk.f32.mxu1 %vm333_vm1, %v25651_v14  ;;  %v7115_v14 = vld [vmem:[#allocation2 + $0x249] sm:$0xff] }
 0x4b9   : > { %21524 = vmatmul.mubr.msk.f32.gmra.mrb[48].mxu1 %vm333_vm1, %v25655_v15  ;;  %v18407_v15 = vld [vmem:[%s28866_s5 + $0x4] sm:$0xf] }
 0x4ba   : > { %21526 = vmatprep.mubr.msk.f32.mxu1 %vm333_vm1, %v25659_v17  ;;  %v7579_v17 = vld [vmem:[#allocation2 + $0x7] sm:$0xff] }
 0x4bd   : > { %21527 = vmatmul.mubr.msk.f32.gmra.mrb[50].mxu1 %vm333_vm1, %v25663_v19  ;;  %v8651_v19 = vld [vmem:[#allocation2 + $0x9] sm:$0xff] }
 0x4be   : > { %21529 = vmatprep.mubr.msk.f32.mxu1 %vm333_vm1, %v25667_v0  ;;  %v7580_v0 = vld [vmem:[#allocation2 + $0xf] sm:$0xff]  ;;  %21799 = vmatprep.mubr.msk.f32.mxu0 %vm333_vm1, %v8651_v19 }
 0x4c1   : > { %21530 = vmatmul.mubr.msk.f32.gmra.mrb[52].mxu1 %vm333_vm1, %v25671_v21  ;;  %v8652_v21 = vld [vmem:[#allocation2 + $0x11] sm:$0xff] }
 0x4c2   : > { %21532 = vmatprep.mubr.msk.f32.mxu1 %vm333_vm1, %v25675_v25  ;;  %v18542_v25 = vld [vmem:[%s28866_s5 + $0x10] sm:$0xf] }
 0x4c5   : > { %21533 = vmatmul.mubr.msk.f32.gmra.mrb[54].mxu1 %vm333_vm1, %v25679_v27  ;;  %v26256_v27 = vld [vmem:[#allocation2 + $0x27] sm:$0xff] }
 0x4c6   : > { %21535 = vmatprep.mubr.msk.f32.mxu1 %vm333_vm1, %v25683_v31  ;;  %v29252_v31 = vld [vmem:[#allocation22_spill] sm:$0xff] }
 0x4c9   : > { %21536 = vmatmul.mubr.msk.f32.gmra.mrb[56].mxu1 %vm333_vm1, %v25687_v32  ;;  %v26263_v32 = vld [vmem:[#allocation2 + $0x2f] sm:$0xff] }
 0x4ca   : > { %21538 = vmatprep.mubr.msk.f32.mxu1 %vm333_vm1, %v25691_v38  ;;  %v29253_v38 = vld [vmem:[#allocation24_spill] sm:$0xff] }
 0x4cd   : > { %21539 = vmatmul.mubr.msk.f32.gmra.mrb[58].mxu1 %vm333_vm1, %v25697_v3  ;;  %v7578_v3 = vld [vmem:[%s28866_s5] sm:$0xf] }
 0x4ce   : > { %21541 = vmatprep.mubr.msk.f32.mxu1 %vm333_vm1, %v25902_v63 }
 0x4d1   : > { %21542 = vmatmul.mubr.msk.f32.gmra.mrb[60].mxu1 %vm333_vm1, %v25906_v29 }
 0x4d2   : > { %21544 = vmatprep.mubr.msk.f32.mxu1 %vm333_vm1, %v6335_v7 }
 0x4d5   : > { %21545 = vmatmul.mubr.msk.f32.gmra.mrb[62].mxu1 %vm333_vm1, %v6336_v10 }
 0x4d6   : > { %21549 = vmatprep.mubr.msk.f32.mxu1 %vm333_vm1, %v6695_v23 }
 0x4d9   : > { %21550 = vmatmul.mubr.msk.f32.vlgmr.msra.gmra.mrb[32].mxu1 %vm333_vm1, %v6696_v11 }
 0x4da   : > { %21598 = vmatpush3.msk.msra.mxu1 %vm643_vm0, %v18372_v1  ;;  %21552 = vmatprep.mubr.msk.f32.mxu1 %vm333_vm1, %v6697_v13  ;;  %v26276_v1 = vld [vmem:[%s28866_s5 + $0x14] sm:$0xf] }
 0x4db   : > { %21647 = vmatprep.subr.msk.mxu1 %vm643_vm0, %v18407_v15 }
 0x4dd   : > { %21553 = vmatmul.mubr.msk.f32.gmra.mrb[34].mxu1 %vm333_vm1, %v6698_v43 }
 0x4de   : > { %21555 = vmatprep.mubr.msk.f32.mxu1 %vm333_vm1, %v6699_v44 }
 0x4e1   : > { %21556 = vmatmul.mubr.msk.f32.gmra.mrb[36].mxu1 %vm333_vm1, %v6700_v45 }
 0x4e2   : > { %21558 = vmatprep.mubr.msk.f32.mxu1 %vm333_vm1, %v6701_v47 }
 0x4e5   : > { %21559 = vmatmul.mubr.msk.f32.gmra.mrb[38].mxu1 %vm333_vm1, %v6702_v51 }
 0x4e6   : > { %21561 = vmatprep.mubr.msk.f32.mxu1 %vm333_vm1, %v6703_v52 }
 0x4e9   : > { %21562 = vmatmul.mubr.msk.f32.gmra.mrb[40].mxu1 %vm333_vm1, %v6704_v53 }
 0x4ea   : > { %21564 = vmatprep.mubr.msk.f32.mxu1 %vm333_vm1, %v25468_v41  ;;  %v6725_v41 = vld [vmem:[#allocation2 + $0x248] sm:$0xff] }
 0x4ed   : > { %21565 = vmatmul.mubr.msk.f32.gmra.mrb[42].mxu1 %vm333_vm1, %v25474_v2  ;;  %v6726_v2 = vld [vmem:[#allocation2 + $0x250] sm:$0xff] }
 0x4ee   : > { %21567 = vmatprep.mubr.msk.f32.mxu1 %vm333_vm1, %v25480_v4  ;;  %v29234_v4 = vld [vmem:[#allocation31_spill] sm:$0xff] }
 0x4f1   : > { %21568 = vmatmul.mubr.msk.f32.gmra.mrb[44].mxu1 %vm333_vm1, %v25486_v30  ;;  %v29235_v30 = vld [vmem:[#allocation3_spill] sm:$0xff] }
 0x4f2   : > { %21570 = vmatprep.mubr.msk.f32.mxu1 %vm333_vm1, %v25492_v8  ;;  %v29236_v8 = vld [vmem:[#allocation4_spill] sm:$0xff] }
 0x4f5   : > { %21571 = vmatmul.mubr.msk.f32.gmra.mrb[46].mxu1 %vm333_vm1, %v25498_v9  ;;  %v29237_v9 = vld [vmem:[#allocation5_spill] sm:$0xff] }
 0x4f6   : > { %21573 = vmatprep.mubr.msk.f32.mxu1 %vm333_vm1, %v25504_v46  ;;  %v29238_v46 = vld [vmem:[#allocation6_spill] sm:$0xff] }
 0x4f9   : > { %21574 = vmatmul.mubr.msk.f32.gmra.mrb[48].mxu1 %vm333_vm1, %v25510_v49  ;;  %v29239_v49 = vld [vmem:[#allocation33_spill] sm:$0xff] }
 0x4fa   : > { %21576 = vmatprep.mubr.msk.f32.mxu1 %vm333_vm1, %v25516_v57  ;;  %v29240_v57 = vld [vmem:[#allocation34_spill] sm:$0xff] }
 0x4fd   : > { %21577 = vmatmul.mubr.msk.f32.gmra.mrb[50].mxu1 %vm333_vm1, %v25522_v60  ;;  %v29241_v60 = vld [vmem:[#allocation9_spill] sm:$0xff] }
 0x4fe   : > { %21579 = vmatprep.mubr.msk.f32.mxu1 %vm333_vm1, %v25528_v20  ;;  %v29242_v20 = vld [vmem:[#allocation10_spill] sm:$0xff] }
 0x501   : > { %21580 = vmatmul.mubr.msk.f32.gmra.mrb[52].mxu1 %vm333_vm1, %v25534_v62  ;;  %v29243_v62 = vld [vmem:[#allocation11_spill] sm:$0xff] }
 0x502   : > { %21582 = vmatprep.mubr.msk.f32.mxu1 %vm333_vm1, %v25540_v37  ;;  %v29244_v37 = vld [vmem:[#allocation12_spill] sm:$0xff] }
 0x505   : > { %21583 = vmatmul.mubr.msk.f32.gmra.mrb[54].mxu1 %vm333_vm1, %v25546_v42  ;;  %v29245_v42 = vld [vmem:[#allocation13_spill] sm:$0xff] }
 0x506   : > { %21585 = vmatprep.mubr.msk.f32.mxu1 %vm333_vm1, %v25551_v39  ;;  %v29246_v39 = vld [vmem:[#allocation14_spill] sm:$0xff] }
 0x509   : > { %21586 = vmatmul.mubr.msk.f32.gmra.mrb[56].mxu1 %vm333_vm1, %v25556_v24  ;;  %v29247_v24 = vld [vmem:[#allocation15_spill] sm:$0xff] }
 0x50a   : > { %21588 = vmatprep.mubr.msk.f32.mxu1 %vm333_vm1, %v29206_v35 }
 0x50d   : > { %21589 = vmatmul.mubr.msk.f32.gmra.mrb[58].mxu1 %vm333_vm1, %v29207_v6  ;;  %v26290_v6 = vld [vmem:[%s28866_s5 + $0x8] sm:$0xf] }
 0x50e   : > { %21591 = vmatprep.mubr.msk.f32.mxu1 %vm333_vm1, %v25975_v12 }
 0x511   : > { %21592 = vmatmul.mubr.msk.f32.gmra.mrb[60].mxu1 %vm333_vm1, %v25979_v36 }
 0x512   : > { %21594 = vmatprep.mubr.msk.f32.mxu1 %vm333_vm1, %v6725_v41 }
 0x515   : > { %21595 = vmatmul.mubr.msk.f32.gmra.mrb[62].mxu1 %vm333_vm1, %v6726_v2 }
 0x516   : > { %21599 = vmatprep.mubr.msk.f32.mxu1 %vm333_vm1, %v29210_v58 }
 0x519   : > { %21600 = vmatmul.mubr.msk.f32.vlgmr.msra.gmra.mrb[32].mxu1 %vm333_vm1, %v29234_v4 }
 0x51a   : > { %21602 = vmatprep.mubr.msk.f32.mxu1 %vm333_vm1, %v29235_v30  ;;  %21648 = vmatpush3.msk.msra.mxu1 %vm643_vm0, %v18407_v15 }
 0x51b   : > { %21697 = vmatprep.subr.msk.mxu1 %vm643_vm0, %v7578_v3 }
 0x51d   : > { %21603 = vmatmul.mubr.msk.f32.gmra.mrb[34].mxu1 %vm333_vm1, %v29236_v8 }
 0x51e   : > { %21605 = vmatprep.mubr.msk.f32.mxu1 %vm333_vm1, %v29237_v9 }
 0x521   : > { %21606 = vmatmul.mubr.msk.f32.gmra.mrb[36].mxu1 %vm333_vm1, %v29238_v46 }
 0x522   : > { %21608 = vmatprep.mubr.msk.f32.mxu1 %vm333_vm1, %v29239_v49 }
 0x525   : > { %21609 = vmatmul.mubr.msk.f32.gmra.mrb[38].mxu1 %vm333_vm1, %v29240_v57 }
 0x526   : > { %21611 = vmatprep.mubr.msk.f32.mxu1 %vm333_vm1, %v29241_v60 }
 0x529   : > { %21612 = vmatmul.mubr.msk.f32.gmra.mrb[40].mxu1 %vm333_vm1, %v29242_v20 }
 0x52a   : > { %21614 = vmatprep.mubr.msk.f32.mxu1 %vm333_vm1, %v29243_v62 }
 0x52d   : > { %21615 = vmatmul.mubr.msk.f32.gmra.mrb[42].mxu1 %vm333_vm1, %v29244_v37 }
 0x52e   : > { %21617 = vmatprep.mubr.msk.f32.mxu1 %vm333_vm1, %v29245_v42 }
 0x531   : > { %21618 = vmatmul.mubr.msk.f32.gmra.mrb[44].mxu1 %vm333_vm1, %v29246_v39 }
 0x532   : > { %21620 = vmatprep.mubr.msk.f32.mxu1 %vm333_vm1, %v29247_v24 }
 0x535   : > { %21621 = vmatmul.mubr.msk.f32.gmra.mrb[46].mxu1 %vm333_vm1, %v29225_v48 }
 0x536   : > { %21623 = vmatprep.mubr.msk.f32.mxu1 %vm333_vm1, %v29248_v54 }
 0x539   : > { %21624 = vmatmul.mubr.msk.f32.gmra.mrb[48].mxu1 %vm333_vm1, %v29227_v16 }
 0x53a   : > { %21626 = vmatprep.mubr.msk.f32.mxu1 %vm333_vm1, %v29228_v18 }
 0x53d   : > { %21627 = vmatmul.mubr.msk.f32.gmra.mrb[50].mxu1 %vm333_vm1, %v29229_v22 }
 0x53e   : > { %21629 = vmatprep.mubr.msk.f32.mxu1 %vm333_vm1, %v29249_v55 }
 0x541   : > { %21630 = vmatmul.mubr.msk.f32.gmra.mrb[52].mxu1 %vm333_vm1, %v29231_v40 }
 0x542   : > { %21632 = vmatprep.mubr.msk.f32.mxu1 %vm333_vm1, %v29250_v59 }
 0x545   : > { %21633 = vmatmul.mubr.msk.f32.gmra.mrb[54].mxu1 %vm333_vm1, %v25816_v28  ;;  %v7116_v28 = vld [vmem:[#allocation2 + $0x251] sm:$0xff] }
 0x546   : > { %21635 = vmatprep.mubr.msk.f32.mxu1 %vm333_vm1, %v29233_v56 }
 0x549   : > { %21636 = vmatmul.mubr.msk.f32.gmra.mrb[56].mxu1 %vm333_vm1, %v25824_v5  ;;  %v18508_v5 = vld [vmem:[%s28866_s5 + $0xc] sm:$0xf] }
 0x54a   : > { %21638 = vmatprep.mubr.msk.f32.mxu1 %vm333_vm1, %v29251_v61  ;;  %21797 = vmatprep.subr.msk.mxu0 %vm643_vm0, %v18508_v5 }
 0x54b   : > { %21798 = vmatpush3.msk.msra.mxu0 %vm643_vm0, %v18508_v5 }
 0x54c   : > { %21800 = vmatmul.mubr.msk.f32.vlgmr.msra.gmra.mrb[0].mxu0 %vm333_vm1, %v8652_v21  ;;  %21847 = vmatprep.subr.msk.mxu0 %vm643_vm0, %v18542_v25 }
 0x54d   : > { %21639 = vmatmul.mubr.msk.f32.gmra.mrb[58].mxu1 %vm333_vm1, %v25832_v34  ;;  %21802 = vmatprep.mubr.msk.f32.mxu0 %vm333_vm1, %v29252_v31  ;;  %v26284_v34 = vld [vmem:[%s28865_s4] ss:$0 sm:$0xff] }
 0x54e   : > { %21641 = vmatprep.mubr.msk.f32.mxu1 %vm333_vm1, %v26048_v26  ;;  %21848 = vmatpush3.msk.msra.mxu0 %vm643_vm0, %v18542_v25 }
 0x54f   : > { %21897 = vmatprep.subr.msk.mxu0 %vm643_vm0, %v26276_v1 }
 0x550   : > { %21803 = vmatmul.mubr.msk.f32.gmra.mrb[2].mxu0 %vm333_vm1, %v29253_v38 }
 0x551   : > { %21642 = vmatmul.mubr.msk.f32.gmra.mrb[60].mxu1 %vm333_vm1, %v26052_v33 }
 0x552   : > { %21644 = vmatprep.mubr.msk.f32.mxu1 %vm333_vm1, %v7115_v14 }
 0x555   : > { %21645 = vmatmul.mubr.msk.f32.gmra.mrb[62].mxu1 %vm333_vm1, %v7116_v28 }
 0x556   : > { %21649 = vmatprep.mubr.msk.f32.mxu1 %vm333_vm1, %v7579_v17 }
 0x559   : > { %21650 = vmatmul.mubr.msk.f32.vlgmr.msra.gmra.mrb[64].mxu1 %vm333_vm1, %v7580_v0 }
 0x55a   : > { %21652 = vmatprep.mubr.msk.f32.mxu1 %vm333_vm1, %v26256_v27  ;;  %21698 = vmatpush3.msk.msra.mxu1 %vm643_vm0, %v7578_v3 }
 0x55b   : > { %21747 = vmatprep.subr.msk.mxu1 %vm643_vm0, %v26290_v6 }
 0x55d   : > { %21653 = vmatmul.mubr.msk.f32.gmra.mrb[66].mxu1 %vm333_vm1, %v26263_v32 }
 0x5ec   : > { %v21601_v63 = vpop.f32.mrb[32].mxu1 }
 0x5ed   : > { %v7483_v29 = vadd.f32 %v21601_v63, %v26284_v34  ;;  %v7284_v35 = vpop.f32.mrb[33].mxu1 }
 0x5ee   : > { %v7482_v12 = vadd.f32 %v26284_v34, %v7284_v35 }
 0x5ef   : > { %7515 = vst.msk [vmem:[#allocation2 + $0x50] sm:$0xff] %vm333_vm1, %v7483_v29 }
 0x5f0   : > { %7514 = vst.msk [vmem:[#allocation2 + $0x48] sm:$0xff] %vm333_vm1, %v7482_v12  ;;  %v21604_v36 = vpop.f32.mrb[34].mxu1 }
 0x5f1   : > { %v7485_v50 = vadd.f32 %v21604_v36, %v26284_v34  ;;  %v7294_v58 = vpop.f32.mrb[35].mxu1 }
 0x5f2   : > { %v7484_v16 = vadd.f32 %v26284_v34, %v7294_v58 }
 0x5f3   : > { %7517 = vst.msk [vmem:[#allocation2 + $0x70] sm:$0xff] %vm333_vm1, %v7485_v50 }
 0x5f4   : > { %7516 = vst.msk [vmem:[#allocation2 + $0x68] sm:$0xff] %vm333_vm1, %v7484_v16  ;;  %v21607_v18 = vpop.f32.mrb[36].mxu1 }
 0x5f5   : > { %v7487_v22 = vadd.f32 %v21607_v18, %v26284_v34  ;;  %v7304_v26 = vpop.f32.mrb[37].mxu1 }
 0x5f6   : > { %v7486_v40 = vadd.f32 %v26284_v34, %v7304_v26  ;;  %v8656_v10 = vld [vmem:[#allocation2 + $0x51] sm:$0xff] }
 0x5f7   : > { %7519 = vst.msk [vmem:[#allocation2 + $0x90] sm:$0xff] %vm333_vm1, %v7487_v22  ;;  %v26304_v33 = vld [vmem:[#allocation2 + $0x47] sm:$0xff]  ;;  %v26306_v56 = vld [vmem:[#allocation2 + $0x4f] sm:$0xff] }
 0x5f8   : > { %v8655_v48 = vld [vmem:[#allocation2 + $0x49] sm:$0xff]  ;;  %7518 = vst.msk [vmem:[#allocation2 + $0x88] sm:$0xff] %vm333_vm1, %v7486_v40  ;;  %v21610_v7 = vpop.f32.mrb[38].mxu1  ;;  %21655 = vmatprep.mubr.msk.f32.mxu1 %vm333_vm1, %v26304_v33 }
 0x5f9   : > { %21805 = vmatprep.mubr.msk.f32.mxu0 %vm333_vm1, %v8655_v48  ;;  %v7489_v23 = vadd.f32 %v21610_v7, %v26284_v34  ;;  %v7314_v11 = vpop.f32.mrb[39].mxu1  ;;  %21656 = vmatmul.mubr.msk.f32.gmra.mrb[68].mxu1 %vm333_vm1, %v26306_v56 }
 0x5fa   : > { %21806 = vmatmul.mubr.msk.f32.gmra.mrb[4].mxu0 %vm333_vm1, %v8656_v10  ;;  %v7488_v13 = vadd.f32 %v26284_v34, %v7314_v11  ;;  %v8658_v51 = vld [vmem:[#allocation2 + $0x71] sm:$0xff] }
 0x5fb   : > { %7521 = vst.msk [vmem:[#allocation2 + $0xb0] sm:$0xff] %vm333_vm1, %v7489_v23  ;;  %v26318_v43 = vld [vmem:[#allocation2 + $0x67] sm:$0xff]  ;;  %v26320_v45 = vld [vmem:[#allocation2 + $0x6f] sm:$0xff] }
 0x5fc   : > { %v8657_v44 = vld [vmem:[#allocation2 + $0x69] sm:$0xff]  ;;  %7520 = vst.msk [vmem:[#allocation2 + $0xa8] sm:$0xff] %vm333_vm1, %v7488_v13  ;;  %v21613_v47 = vpop.f32.mrb[40].mxu1  ;;  %21658 = vmatprep.mubr.msk.f32.mxu1 %vm333_vm1, %v26318_v43 }
 0x5fd   : > { %21808 = vmatprep.mubr.msk.f32.mxu0 %vm333_vm1, %v8657_v44  ;;  %v7491_v52 = vadd.f32 %v21613_v47, %v26284_v34  ;;  %v7324_v53 = vpop.f32.mrb[41].mxu1  ;;  %21659 = vmatmul.mubr.msk.f32.gmra.mrb[70].mxu1 %vm333_vm1, %v26320_v45 }
 0x5fe   : > { %21809 = vmatmul.mubr.msk.f32.gmra.mrb[6].mxu0 %vm333_vm1, %v8658_v51  ;;  %v7490_v41 = vadd.f32 %v26284_v34, %v7324_v53  ;;  %v8660_v9 = vld [vmem:[#allocation2 + $0x91] sm:$0xff] }
 0x5ff   : > { %7523 = vst.msk [vmem:[#allocation2 + $0xd0] sm:$0xff] %vm333_vm1, %v7491_v52  ;;  %v26332_v2 = vld [vmem:[#allocation2 + $0x87] sm:$0xff]  ;;  %v26334_v30 = vld [vmem:[#allocation2 + $0x8f] sm:$0xff] }
 0x600   : > { %v8659_v4 = vld [vmem:[#allocation2 + $0x89] sm:$0xff]  ;;  %7522 = vst.msk [vmem:[#allocation2 + $0xc8] sm:$0xff] %vm333_vm1, %v7490_v41  ;;  %v21616_v8 = vpop.f32.mrb[42].mxu1  ;;  %21661 = vmatprep.mubr.msk.f32.mxu1 %vm333_vm1, %v26332_v2 }
 0x601   : > { %21811 = vmatprep.mubr.msk.f32.mxu0 %vm333_vm1, %v8659_v4  ;;  %v7493_v46 = vadd.f32 %v21616_v8, %v26284_v34  ;;  %v7334_v49 = vpop.f32.mrb[43].mxu1  ;;  %21662 = vmatmul.mubr.msk.f32.gmra.mrb[72].mxu1 %vm333_vm1, %v26334_v30 }
 0x602   : > { %21812 = vmatmul.mubr.msk.f32.gmra.mrb[8].mxu0 %vm333_vm1, %v8660_v9  ;;  %v7492_v57 = vadd.f32 %v26284_v34, %v7334_v49  ;;  %v8662_v42 = vld [vmem:[#allocation2 + $0xb1] sm:$0xff] }
 0x603   : > { %7525 = vst.msk [vmem:[#allocation2 + $0xf0] sm:$0xff] %vm333_vm1, %v7493_v46  ;;  %v26346_v60 = vld [vmem:[#allocation2 + $0xa7] sm:$0xff]  ;;  %v26348_v62 = vld [vmem:[#allocation2 + $0xaf] sm:$0xff] }
 0x604   : > { %v8661_v20 = vld [vmem:[#allocation2 + $0xa9] sm:$0xff]  ;;  %7524 = vst.msk [vmem:[#allocation2 + $0xe8] sm:$0xff] %vm333_vm1, %v7492_v57  ;;  %v21619_v37 = vpop.f32.mrb[44].mxu1  ;;  %21664 = vmatprep.mubr.msk.f32.mxu1 %vm333_vm1, %v26346_v60 }
 0x605   : > { %21814 = vmatprep.mubr.msk.f32.mxu0 %vm333_vm1, %v8661_v20  ;;  %v7495_v39 = vadd.f32 %v21619_v37, %v26284_v34  ;;  %v7344_v24 = vpop.f32.mrb[45].mxu1  ;;  %21665 = vmatmul.mubr.msk.f32.gmra.mrb[74].mxu1 %vm333_vm1, %v26348_v62 }
 0x606   : > { %21815 = vmatmul.mubr.msk.f32.gmra.mrb[10].mxu0 %vm333_vm1, %v8662_v42  ;;  %v7494_v54 = vadd.f32 %v26284_v34, %v7344_v24  ;;  %v8664_v28 = vld [vmem:[#allocation2 + $0xd1] sm:$0xff] }
 0x607   : > { %7527 = vst.msk [vmem:[#allocation2 + $0x110] sm:$0xff] %vm333_vm1, %v7495_v39  ;;  %v26360_v55 = vld [vmem:[#allocation2 + $0xc7] sm:$0xff]  ;;  %v26362_v61 = vld [vmem:[#allocation2 + $0xcf] sm:$0xff] }
 0x608   : > { %v8663_v59 = vld [vmem:[#allocation2 + $0xc9] sm:$0xff]  ;;  %7526 = vst.msk [vmem:[#allocation2 + $0x108] sm:$0xff] %vm333_vm1, %v7494_v54  ;;  %v21622_v14 = vpop.f32.mrb[46].mxu1  ;;  %21667 = vmatprep.mubr.msk.f32.mxu1 %vm333_vm1, %v26360_v55 }
 0x609   : > { %21817 = vmatprep.mubr.msk.f32.mxu0 %vm333_vm1, %v8663_v59  ;;  %v7497_v5 = vadd.f32 %v21622_v14, %v26284_v34  ;;  %v7354_v15 = vpop.f32.mrb[47].mxu1  ;;  %21668 = vmatmul.mubr.msk.f32.gmra.mrb[76].mxu1 %vm333_vm1, %v26362_v61 }
 0x60a   : > { %21818 = vmatmul.mubr.msk.f32.gmra.mrb[12].mxu0 %vm333_vm1, %v8664_v28  ;;  %v7496_v17 = vadd.f32 %v26284_v34, %v7354_v15  ;;  %v8666_v31 = vld [vmem:[#allocation2 + $0xf1] sm:$0xff] }
 0x60b   : > { %7529 = vst.msk [vmem:[#allocation2 + $0x130] sm:$0xff] %vm333_vm1, %v7497_v5  ;;  %v26374_v19 = vld [vmem:[#allocation2 + $0xe7] sm:$0xff]  ;;  %v26376_v21 = vld [vmem:[#allocation2 + $0xef] sm:$0xff] }
 0x60c   : > { %v8665_v0 = vld [vmem:[#allocation2 + $0xe9] sm:$0xff]  ;;  %7528 = vst.msk [vmem:[#allocation2 + $0x128] sm:$0xff] %vm333_vm1, %v7496_v17  ;;  %v21625_v25 = vpop.f32.mrb[48].mxu1  ;;  %21670 = vmatprep.mubr.msk.f32.mxu1 %vm333_vm1, %v26374_v19 }
 0x60d   : > { %21820 = vmatprep.mubr.msk.f32.mxu0 %vm333_vm1, %v8665_v0  ;;  %v7499_v38 = vadd.f32 %v21625_v25, %v26284_v34  ;;  %v7364_v3 = vpop.f32.mrb[49].mxu1  ;;  %21671 = vmatmul.mubr.msk.f32.gmra.mrb[78].mxu1 %vm333_vm1, %v26376_v21 }
 0x60e   : > { %21821 = vmatmul.mubr.msk.f32.gmra.mrb[14].mxu0 %vm333_vm1, %v8666_v31  ;;  %v7498_v63 = vadd.f32 %v26284_v34, %v7364_v3  ;;  %v8668_v50 = vld [vmem:[#allocation2 + $0x111] sm:$0xff] }
 0x60f   : > { %7531 = vst.msk [vmem:[#allocation2 + $0x150] sm:$0xff] %vm333_vm1, %v7499_v38  ;;  %v26388_v29 = vld [vmem:[#allocation2 + $0x107] sm:$0xff]  ;;  %v26390_v12 = vld [vmem:[#allocation2 + $0x10f] sm:$0xff] }
 0x610   : > { %v8667_v35 = vld [vmem:[#allocation2 + $0x109] sm:$0xff]  ;;  %7530 = vst.msk [vmem:[#allocation2 + $0x148] sm:$0xff] %vm333_vm1, %v7498_v63  ;;  %v21628_v36 = vpop.f32.mrb[50].mxu1  ;;  %21673 = vmatprep.mubr.msk.f32.mxu1 %vm333_vm1, %v26388_v29 }
 0x611   : > { %21823 = vmatprep.mubr.msk.f32.mxu0 %vm333_vm1, %v8667_v35  ;;  %v7501_v58 = vadd.f32 %v21628_v36, %v26284_v34  ;;  %v7374_v16 = vpop.f32.mrb[51].mxu1  ;;  %21674 = vmatmul.mubr.msk.f32.gmra.mrb[80].mxu1 %vm333_vm1, %v26390_v12 }
 0x612   : > { %21824 = vmatmul.mubr.msk.f32.gmra.mrb[16].mxu0 %vm333_vm1, %v8668_v50  ;;  %v7500_v18 = vadd.f32 %v26284_v34, %v7374_v16  ;;  %v8670_v7 = vld [vmem:[#allocation2 + $0x131] sm:$0xff] }
 0x613   : > { %7533 = vst.msk [vmem:[#allocation2 + $0x170] sm:$0xff] %vm333_vm1, %v7501_v58  ;;  %v26402_v22 = vld [vmem:[#allocation2 + $0x127] sm:$0xff]  ;;  %v26404_v40 = vld [vmem:[#allocation2 + $0x12f] sm:$0xff] }
 0x614   : > { %v8669_v26 = vld [vmem:[#allocation2 + $0x129] sm:$0xff]  ;;  %7532 = vst.msk [vmem:[#allocation2 + $0x168] sm:$0xff] %vm333_vm1, %v7500_v18  ;;  %v21631_v48 = vpop.f32.mrb[52].mxu1  ;;  %21676 = vmatprep.mubr.msk.f32.mxu1 %vm333_vm1, %v26402_v22 }
 0x615   : > { %21826 = vmatprep.mubr.msk.f32.mxu0 %vm333_vm1, %v8669_v26  ;;  %v7503_v10 = vadd.f32 %v21631_v48, %v26284_v34  ;;  %v7384_v23 = vpop.f32.mrb[53].mxu1  ;;  %21677 = vmatmul.mubr.msk.f32.gmra.mrb[82].mxu1 %vm333_vm1, %v26404_v40 }
 0x616   : > { %21827 = vmatmul.mubr.msk.f32.gmra.mrb[18].mxu0 %vm333_vm1, %v8670_v7  ;;  %v7502_v11 = vadd.f32 %v26284_v34, %v7384_v23  ;;  %v8672_v52 = vld [vmem:[#allocation2 + $0x151] sm:$0xff] }
 0x617   : > { %7535 = vst.msk [vmem:[#allocation2 + $0x190] sm:$0xff] %vm333_vm1, %v7503_v10  ;;  %v26416_v13 = vld [vmem:[#allocation2 + $0x147] sm:$0xff]  ;;  %v26418_v47 = vld [vmem:[#allocation2 + $0x14f] sm:$0xff] }
 0x618   : > { %v8671_v44 = vld [vmem:[#allocation2 + $0x149] sm:$0xff]  ;;  %7534 = vst.msk [vmem:[#allocation2 + $0x188] sm:$0xff] %vm333_vm1, %v7502_v11  ;;  %v21634_v51 = vpop.f32.mrb[54].mxu1  ;;  %21679 = vmatprep.mubr.msk.f32.mxu1 %vm333_vm1, %v26416_v13 }
 0x619   : > { %21829 = vmatprep.mubr.msk.f32.mxu0 %vm333_vm1, %v8671_v44  ;;  %v7505_v53 = vadd.f32 %v21634_v51, %v26284_v34  ;;  %v7394_v41 = vpop.f32.mrb[55].mxu1  ;;  %21680 = vmatmul.mubr.msk.f32.gmra.mrb[84].mxu1 %vm333_vm1, %v26418_v47  ;;  %v7546_v10 = vld [vmem:[#allocation2 + $0x6] sm:$0xff] }
 0x61a   : > { %21830 = vmatmul.mubr.msk.f32.gmra.mrb[20].mxu0 %vm333_vm1, %v8672_v52  ;;  %v7504_v4 = vadd.f32 %v26284_v34, %v7394_v41  ;;  %v26438_v57 = vld [vmem:[#allocation2 + $0x171] sm:$0xff]  ;;  %v26526_v41 = vld [vmem:[#allocation2 + $0x26] sm:$0xff] }
 0x61b   : > { %7537 = vst.msk [vmem:[#allocation2 + $0x1b0] sm:$0xff] %vm333_vm1, %v7505_v53  ;;  %v26430_v8 = vld [vmem:[#allocation2 + $0x167] sm:$0xff]  ;;  %v26432_v46 = vld [vmem:[#allocation2 + $0x16f] sm:$0xff]  ;;  %29254 = vst [vmem:[#allocation32_spill] sm:$0xff] %v26438_v57 }
 0x61c   : > { %v8673_v9 = vld [vmem:[#allocation2 + $0x169] sm:$0xff]  ;;  %7536 = vst.msk [vmem:[#allocation2 + $0x1a8] sm:$0xff] %vm333_vm1, %v7504_v4  ;;  %v21637_v49 = vpop.f32.mrb[56].mxu1  ;;  %21682 = vmatprep.mubr.msk.f32.mxu1 %vm333_vm1, %v26430_v8  ;;  %v9042_v53 = vld [vmem:[#allocation2 + $0x12] sm:$0xff] }
 0x61d   : > { %21832 = vmatprep.mubr.msk.f32.mxu0 %vm333_vm1, %v8673_v9  ;;  %v7507_v20 = vadd.f32 %v21637_v49, %v26284_v34  ;;  %v7404_v37 = vpop.f32.mrb[57].mxu1  ;;  %21683 = vmatmul.mubr.msk.f32.gmra.mrb[86].mxu1 %vm333_vm1, %v26432_v46  ;;  %v9041_v23 = vld [vmem:[#allocation2 + $0xa] sm:$0xff]  ;;  %v26535_v9 = vld [vmem:[%s28866_s5 + $0x18] sm:$0xf] }
 0x61e   : > { %21833 = vmatmul.mubr.msk.f32.gmra.mrb[22].mxu0 %vm333_vm1, %v26438_v57  ;;  %v7506_v42 = vadd.f32 %v26284_v34, %v7404_v37  ;;  %v26458_v14 = vld [vmem:[#allocation2 + $0x191] sm:$0xff] }
 0x61f   : > { %7539 = vst.msk [vmem:[#allocation2 + $0x1d0] sm:$0xff] %vm333_vm1, %v7507_v20  ;;  %v26447_v39 = vld [vmem:[#allocation2 + $0x187] sm:$0xff]  ;;  %v26451_v54 = vld [vmem:[#allocation2 + $0x18f] sm:$0xff]  ;;  %29256 = vst [vmem:[#allocation8_spill] sm:$0xff] %v26458_v14 }
 0x620   : > { %v26449_v24 = vld [vmem:[#allocation2 + $0x189] sm:$0xff]  ;;  %7538 = vst.msk [vmem:[#allocation2 + $0x1c8] sm:$0xff] %vm333_vm1, %v7506_v42  ;;  %v21640_v59 = vpop.f32.mrb[58].mxu1  ;;  %21685 = vmatprep.mubr.msk.f32.mxu1 %vm333_vm1, %v26447_v39  ;;  %v26543_v20 = vld [vmem:[#allocation2 + $0x32] sm:$0xff] }
 0x621   : > { %29255 = vst [vmem:[#allocation7_spill] sm:$0xff] %v26449_v24  ;;  %21835 = vmatprep.mubr.msk.f32.mxu0 %vm333_vm1, %v26449_v24  ;;  %v7509_v28 = vadd.f32 %v21640_v59, %v26284_v34  ;;  %v7414_v5 = vpop.f32.mrb[59].mxu1  ;;  %21686 = vmatmul.mubr.msk.f32.gmra.mrb[88].mxu1 %vm333_vm1, %v26451_v54  ;;  %v26528_v4 = vld [vmem:[#allocation2 + $0x2a] sm:$0xff]  ;;  %29266 = vst [vmem:[#allocation31_spill] sm:$0xff] %v26543_v20  ;;  %v26565_v42 = vld [vmem:[#allocation2 + $0x52] sm:$0xff] }
 0x622   : > { %21836 = vmatmul.mubr.msk.f32.gmra.mrb[24].mxu0 %vm333_vm1, %v26458_v14  ;;  %v7508_v15 = vadd.f32 %v26284_v34, %v7414_v5  ;;  %v26478_v38 = vld [vmem:[#allocation2 + $0x1b1] sm:$0xff]  ;;  %29265 = vst [vmem:[#allocation28_spill] sm:$0xff] %v26528_v4  ;;  %29268 = vst [vmem:[#allocation4_spill] sm:$0xff] %v26565_v42  ;;  %v26571_v59 = vld [vmem:[#allocation2 + $0x66] sm:$0xff] }
 0x623   : > { %7541 = vst.msk [vmem:[#allocation2 + $0x1f0] sm:$0xff] %vm333_vm1, %v7509_v28  ;;  %v26467_v17 = vld [vmem:[#allocation2 + $0x1a7] sm:$0xff]  ;;  %v26471_v25 = vld [vmem:[#allocation2 + $0x1af] sm:$0xff]  ;;  %29258 = vst [vmem:[#allocation27_spill] sm:$0xff] %v26478_v38 }
 0x624   : > { %v26469_v0 = vld [vmem:[#allocation2 + $0x1a9] sm:$0xff]  ;;  %7540 = vst.msk [vmem:[#allocation2 + $0x1e8] sm:$0xff] %vm333_vm1, %v7508_v15  ;;  %v21643_v31 = vpop.f32.mrb[60].mxu1  ;;  %21688 = vmatprep.mubr.msk.f32.mxu1 %vm333_vm1, %v26467_v17  ;;  %v26581_v15 = vld [vmem:[#allocation2 + $0x72] sm:$0xff] }
 0x625   : > { %29257 = vst [vmem:[#allocation26_spill] sm:$0xff] %v26469_v0  ;;  %21838 = vmatprep.mubr.msk.f32.mxu0 %vm333_vm1, %v26469_v0  ;;  %v7511_v3 = vadd.f32 %v21643_v31, %v26284_v34  ;;  %v7424_v63 = vpop.f32.mrb[61].mxu1  ;;  %21689 = vmatmul.mubr.msk.f32.gmra.mrb[90].mxu1 %vm333_vm1, %v26471_v25  ;;  %v26541_v49 = vld [vmem:[#allocation2 + $0x2e] sm:$0xff]  ;;  %29270 = vst [vmem:[#allocation6_spill] sm:$0xff] %v26581_v15  ;;  %v26587_v31 = vld [vmem:[#allocation2 + $0x86] sm:$0xff] }
 0x626   : > { %21839 = vmatmul.mubr.msk.f32.gmra.mrb[26].mxu0 %vm333_vm1, %v26478_v38  ;;  %v7510_v35 = vadd.f32 %v26284_v34, %v7424_v63  ;;  %v26498_v18 = vld [vmem:[#allocation2 + $0x1d1] sm:$0xff] }
 0x627   : > { %7543 = vst.msk [vmem:[#allocation2 + $0x210] sm:$0xff] %vm333_vm1, %v7511_v3  ;;  %v26487_v36 = vld [vmem:[#allocation2 + $0x1c7] sm:$0xff]  ;;  %v26491_v58 = vld [vmem:[#allocation2 + $0x1cf] sm:$0xff]  ;;  %29260 = vst [vmem:[#allocation16_spill] sm:$0xff] %v26498_v18 }
 0x628   : > { %v26489_v50 = vld [vmem:[#allocation2 + $0x1c9] sm:$0xff]  ;;  %7542 = vst.msk [vmem:[#allocation2 + $0x208] sm:$0xff] %vm333_vm1, %v7510_v35  ;;  %v21646_v16 = vpop.f32.mrb[62].mxu1  ;;  %21691 = vmatprep.mubr.msk.f32.mxu1 %vm333_vm1, %v26487_v36  ;;  %v26597_v35 = vld [vmem:[#allocation2 + $0x92] sm:$0xff] }
 0x629   : > { %29259 = vst [vmem:[#allocation29_spill] sm:$0xff] %v26489_v50  ;;  %21841 = vmatprep.mubr.msk.f32.mxu0 %vm333_vm1, %v26489_v50  ;;  %v7513_v26 = vadd.f32 %v21646_v16, %v26284_v34  ;;  %v7434_v48 = vpop.f32.mrb[63].mxu1  ;;  %21692 = vmatmul.mubr.msk.f32.gmra.mrb[92].mxu1 %vm333_vm1, %v26491_v58  ;;  %v26557_v37 = vld [vmem:[#allocation2 + $0x4a] sm:$0xff]  ;;  %29272 = vst [vmem:[#allocation34_spill] sm:$0xff] %v26597_v35  ;;  %v26741_v38 = vld [vmem:[#allocation2 + $0x1b2] sm:$0xff] }
 0x62a   : > { %21842 = vmatmul.mubr.msk.f32.gmra.mrb[28].mxu0 %vm333_vm1, %v26498_v18  ;;  %v7512_v7 = vadd.f32 %v26284_v34, %v7434_v48  ;;  %v26518_v52 = vld [vmem:[#allocation2 + $0x1f1] sm:$0xff]  ;;  %29267 = vst [vmem:[#allocation3_spill] sm:$0xff] %v26557_v37  ;;  %v26603_v16 = vld [vmem:[#allocation2 + $0xa6] sm:$0xff]  ;;  %29294 = vst [vmem:[#allocation43_spill] sm:$0xff] %v26741_v38 }
 0x62b   : > { %7545 = vst.msk [vmem:[#allocation2 + $0x230] sm:$0xff] %vm333_vm1, %v7513_v26  ;;  %v26507_v11 = vld [vmem:[#allocation2 + $0x1e7] sm:$0xff]  ;;  %v26511_v51 = vld [vmem:[#allocation2 + $0x1ef] sm:$0xff]  ;;  %29264 = vst [vmem:[#allocation23_spill] sm:$0xff] %v26518_v52 }
 0x62c   : > { %29261 = vst [vmem:[#allocation18_spill] sm:$0xff] %v26507_v11  ;;  %v26509_v44 = vld [vmem:[#allocation2 + $0x1e9] sm:$0xff]  ;;  %29263 = vst [vmem:[#allocation20_spill] sm:$0xff] %v26511_v51  ;;  %21694 = vmatprep.mubr.msk.f32.mxu1 %vm333_vm1, %v26507_v11  ;;  %v26725_v18 = vld [vmem:[#allocation2 + $0x192] sm:$0xff] }
 0x62d   : > { %29262 = vst [vmem:[#allocation19_spill] sm:$0xff] %v26509_v44  ;;  %7544 = vst.msk [vmem:[#allocation2 + $0x228] sm:$0xff] %vm333_vm1, %v7512_v7  ;;  %21844 = vmatprep.mubr.msk.f32.mxu0 %vm333_vm1, %v26509_v44  ;;  %21695 = vmatmul.mubr.msk.f32.gmra.mrb[94].mxu1 %vm333_vm1, %v26511_v51  ;;  %v7547_v34 = vld [vmem:[#allocation2 + $0xe] sm:$0xff] }
 0x62e   : > { %21845 = vmatmul.mubr.msk.f32.gmra.mrb[30].mxu0 %vm333_vm1, %v26518_v52  ;;  %21699 = vmatprep.mubr.msk.f32.mxu1 %vm333_vm1, %v7546_v10  ;;  %v26573_v28 = vld [vmem:[#allocation2 + $0x6a] sm:$0xff]  ;;  %v26613_v7 = vld [vmem:[#allocation2 + $0xb2] sm:$0xff]  ;;  %29290 = vst [vmem:[#allocation39_spill] sm:$0xff] %v26725_v18 }
 0x62f   : > { %21849 = vmatprep.mubr.msk.f32.mxu0 %vm333_vm1, %v9041_v23  ;;  %29269 = vst [vmem:[#allocation5_spill] sm:$0xff] %v26573_v28  ;;  %v26579_v5 = vld [vmem:[#allocation2 + $0x6e] sm:$0xff]  ;;  %29274 = vst [vmem:[#allocation10_spill] sm:$0xff] %v26613_v7  ;;  %v26619_v10 = vld [vmem:[#allocation2 + $0xc6] sm:$0xff] }
 0x630   : > { %v26589_v3 = vld [vmem:[#allocation2 + $0x8a] sm:$0xff]  ;;  %v26709_v52 = vld [vmem:[#allocation2 + $0x172] sm:$0xff] }
 0x631   : > { %21700 = vmatmul.mubr.msk.f32.vlgmr.msra.gmra.mrb[64].mxu1 %vm333_vm1, %v7547_v34  ;;  %29271 = vst [vmem:[#allocation33_spill] sm:$0xff] %v26589_v3  ;;  %v26595_v63 = vld [vmem:[#allocation2 + $0x8e] sm:$0xff]  ;;  %29286 = vst [vmem:[#allocation35_spill] sm:$0xff] %v26709_v52 }
 0x632   : > { %21850 = vmatmul.mubr.msk.f32.vlgmr.msra.gmra.mrb[0].mxu0 %vm333_vm1, %v9042_v53  ;;  %21702 = vmatprep.mubr.msk.f32.mxu1 %vm333_vm1, %v26526_v41  ;;  %v26605_v26 = vld [vmem:[#allocation2 + $0xaa] sm:$0xff]  ;;  %v26629_v53 = vld [vmem:[#allocation2 + $0xd2] sm:$0xff] }
 0x633   : > { %21898 = vmatpush3.msk.msra.mxu0 %vm643_vm0, %v26276_v1  ;;  %21852 = vmatprep.mubr.msk.f32.mxu0 %vm333_vm1, %v26528_v4  ;;  %v26555_v1 = vld [vmem:[#allocation2 + $0x46] sm:$0xff]  ;;  %29273 = vst [vmem:[#allocation9_spill] sm:$0xff] %v26605_v26  ;;  %v26611_v48 = vld [vmem:[#allocation2 + $0xae] sm:$0xff]  ;;  %29276 = vst [vmem:[#allocation12_spill] sm:$0xff] %v26629_v53 }
 0x634   : > { %21748 = vmatpush3.msk.msra.mxu1 %vm643_vm0, %v26290_v6  ;;  %21947 = vmatprep.subr.msk.mxu0 %vm643_vm0, %v26535_v9  ;;  %v26563_v6 = vld [vmem:[#allocation2 + $0x4e] sm:$0xff] }
 0x635   : > { %21703 = vmatmul.mubr.msk.f32.gmra.mrb[66].mxu1 %vm333_vm1, %v26541_v49  ;;  %v26621_v23 = vld [vmem:[#allocation2 + $0xca] sm:$0xff]  ;;  %v26757_v14 = vld [vmem:[#allocation2 + $0x1d2] sm:$0xff] }
 0x636   : > { %21853 = vmatmul.mubr.msk.f32.gmra.mrb[2].mxu0 %vm333_vm1, %v26543_v20  ;;  %21705 = vmatprep.mubr.msk.f32.mxu1 %vm333_vm1, %v26555_v1  ;;  %29275 = vst [vmem:[#allocation11_spill] sm:$0xff] %v26621_v23  ;;  %v26627_v34 = vld [vmem:[#allocation2 + $0xce] sm:$0xff]  ;;  %29298 = vst [vmem:[#allocation47_spill] sm:$0xff] %v26757_v14 }
 0x637   : > { %21855 = vmatprep.mubr.msk.f32.mxu0 %vm333_vm1, %v26557_v37  ;;  %v26685_v37 = vld [vmem:[#allocation2 + $0x14a] sm:$0xff]  ;;  %v26693_v20 = vld [vmem:[#allocation2 + $0x152] sm:$0xff] }
 0x638   : > { %29283 = vst [vmem:[#allocation30_spill] sm:$0xff] %v26685_v37  ;;  %29284 = vst [vmem:[#allocation22_spill] sm:$0xff] %v26693_v20  ;;  %v26701_v4 = vld [vmem:[#allocation2 + $0x16a] sm:$0xff]  ;;  %v26773_v51 = vld [vmem:[#allocation2 + $0x1f2] sm:$0xff] }
 0x639   : > { %21706 = vmatmul.mubr.msk.f32.gmra.mrb[68].mxu1 %vm333_vm1, %v26563_v6  ;;  %29285 = vst [vmem:[#allocation24_spill] sm:$0xff] %v26701_v4  ;;  %v26717_v44 = vld [vmem:[#allocation2 + $0x18a] sm:$0xff] }
 0x63a   : > { %21856 = vmatmul.mubr.msk.f32.gmra.mrb[4].mxu0 %vm333_vm1, %v26565_v42  ;;  %21708 = vmatprep.mubr.msk.f32.mxu1 %vm333_vm1, %v26571_v59  ;;  %v26677_v42 = vld [vmem:[#allocation2 + $0x132] sm:$0xff]  ;;  %29288 = vst [vmem:[#allocation37_spill] sm:$0xff] %v26717_v44  ;;  %v26733_v50 = vld [vmem:[#allocation2 + $0x1aa] sm:$0xff] }
 0x63b   : > { %21858 = vmatprep.mubr.msk.f32.mxu0 %vm333_vm1, %v26573_v28  ;;  %v26669_v28 = vld [vmem:[#allocation2 + $0x12a] sm:$0xff]  ;;  %29282 = vst [vmem:[#allocation25_spill] sm:$0xff] %v26677_v42  ;;  %29292 = vst [vmem:[#allocation41_spill] sm:$0xff] %v26733_v50 }
 0x63c   : > { %29281 = vst [vmem:[#allocation21_spill] sm:$0xff] %v26669_v28  ;;  %v26749_v0 = vld [vmem:[#allocation2 + $0x1ca] sm:$0xff] }
 0x63d   : > { %21709 = vmatmul.mubr.msk.f32.gmra.mrb[70].mxu1 %vm333_vm1, %v26579_v5  ;;  %29296 = vst [vmem:[#allocation45_spill] sm:$0xff] %v26749_v0  ;;  %v26765_v24 = vld [vmem:[#allocation2 + $0x1ea] sm:$0xff] }
 0x63e   : > { %21859 = vmatmul.mubr.msk.f32.gmra.mrb[6].mxu0 %vm333_vm1, %v26581_v15  ;;  %21711 = vmatprep.mubr.msk.f32.mxu1 %vm333_vm1, %v26587_v31  ;;  %v26661_v15 = vld [vmem:[#allocation2 + $0x112] sm:$0xff]  ;;  %29300 = vst [vmem:[#allocation49_spill] sm:$0xff] %v26765_v24  ;;  %v26782_v11 = vld [vmem:[#allocation2 + $0x28] sm:$0xff] }
 0x63f   : > { %21861 = vmatprep.mubr.msk.f32.mxu0 %vm333_vm1, %v26589_v3  ;;  %v26653_v3 = vld [vmem:[#allocation2 + $0x10a] sm:$0xff]  ;;  %29280 = vst [vmem:[#allocation17_spill] sm:$0xff] %v26661_v15 }
 0x640   : > { %29279 = vst [vmem:[#allocation15_spill] sm:$0xff] %v26653_v3  ;;  %v26771_v57 = vld [vmem:[#allocation2 + $0x1ee] sm:$0xff] }
 0x641   : > { %21712 = vmatmul.mubr.msk.f32.gmra.mrb[72].mxu1 %vm333_vm1, %v26595_v63  ;;  %29301 = vst [vmem:[#allocation50_spill] sm:$0xff] %v26771_v57 }
 0x642   : > { %21862 = vmatmul.mubr.msk.f32.gmra.mrb[8].mxu0 %vm333_vm1, %v26597_v35  ;;  %21714 = vmatprep.mubr.msk.f32.mxu1 %vm333_vm1, %v26603_v16  ;;  %v26645_v35 = vld [vmem:[#allocation2 + $0xf2] sm:$0xff] }
 0x643   : > { %21864 = vmatprep.mubr.msk.f32.mxu0 %vm333_vm1, %v26605_v26  ;;  %v26637_v26 = vld [vmem:[#allocation2 + $0xea] sm:$0xff]  ;;  %29278 = vst [vmem:[#allocation14_spill] sm:$0xff] %v26645_v35 }
 0x644   : > { %29277 = vst [vmem:[#allocation13_spill] sm:$0xff] %v26637_v26 }
 0x645   : > { %21715 = vmatmul.mubr.msk.f32.gmra.mrb[74].mxu1 %vm333_vm1, %v26611_v48 }
 0x646   : > { %21865 = vmatmul.mubr.msk.f32.gmra.mrb[10].mxu0 %vm333_vm1, %v26613_v7  ;;  %21717 = vmatprep.mubr.msk.f32.mxu1 %vm333_vm1, %v26619_v10  ;;  %v26635_v7 = vld [vmem:[#allocation2 + $0xe6] sm:$0xff] }
 0x647   : > { %21867 = vmatprep.mubr.msk.f32.mxu0 %vm333_vm1, %v26621_v23  ;;  %v26643_v23 = vld [vmem:[#allocation2 + $0xee] sm:$0xff] }
 0x649   : > { %21718 = vmatmul.mubr.msk.f32.gmra.mrb[76].mxu1 %vm333_vm1, %v26627_v34 }
 0x64a   : > { %21868 = vmatmul.mubr.msk.f32.gmra.mrb[12].mxu0 %vm333_vm1, %v26629_v53  ;;  %21720 = vmatprep.mubr.msk.f32.mxu1 %vm333_vm1, %v26635_v7  ;;  %v26651_v53 = vld [vmem:[#allocation2 + $0x106] sm:$0xff] }
 0x64b   : > { %21870 = vmatprep.mubr.msk.f32.mxu0 %vm333_vm1, %v26637_v26  ;;  %v26659_v26 = vld [vmem:[#allocation2 + $0x10e] sm:$0xff] }
 0x64d   : > { %21721 = vmatmul.mubr.msk.f32.gmra.mrb[78].mxu1 %vm333_vm1, %v26643_v23 }
 0x64e   : > { %21871 = vmatmul.mubr.msk.f32.gmra.mrb[14].mxu0 %vm333_vm1, %v26645_v35  ;;  %21723 = vmatprep.mubr.msk.f32.mxu1 %vm333_vm1, %v26651_v53  ;;  %v26667_v35 = vld [vmem:[#allocation2 + $0x126] sm:$0xff] }
 0x64f   : > { %21873 = vmatprep.mubr.msk.f32.mxu0 %vm333_vm1, %v26653_v3  ;;  %v26675_v3 = vld [vmem:[#allocation2 + $0x12e] sm:$0xff] }
 0x651   : > { %21724 = vmatmul.mubr.msk.f32.gmra.mrb[80].mxu1 %vm333_vm1, %v26659_v26 }
 0x652   : > { %21874 = vmatmul.mubr.msk.f32.gmra.mrb[16].mxu0 %vm333_vm1, %v26661_v15  ;;  %21726 = vmatprep.mubr.msk.f32.mxu1 %vm333_vm1, %v26667_v35  ;;  %v26683_v15 = vld [vmem:[#allocation2 + $0x146] sm:$0xff] }
 0x653   : > { %21876 = vmatprep.mubr.msk.f32.mxu0 %vm333_vm1, %v26669_v28  ;;  %v26691_v28 = vld [vmem:[#allocation2 + $0x14e] sm:$0xff] }
 0x655   : > { %21727 = vmatmul.mubr.msk.f32.gmra.mrb[82].mxu1 %vm333_vm1, %v26675_v3 }
 0x656   : > { %21877 = vmatmul.mubr.msk.f32.gmra.mrb[18].mxu0 %vm333_vm1, %v26677_v42  ;;  %21729 = vmatprep.mubr.msk.f32.mxu1 %vm333_vm1, %v26683_v15  ;;  %v26699_v42 = vld [vmem:[#allocation2 + $0x166] sm:$0xff] }
 0x657   : > { %21879 = vmatprep.mubr.msk.f32.mxu0 %vm333_vm1, %v26685_v37  ;;  %v26707_v37 = vld [vmem:[#allocation2 + $0x16e] sm:$0xff] }
 0x659   : > { %21730 = vmatmul.mubr.msk.f32.gmra.mrb[84].mxu1 %vm333_vm1, %v26691_v28 }
 0x65a   : > { %21880 = vmatmul.mubr.msk.f32.gmra.mrb[20].mxu0 %vm333_vm1, %v26693_v20  ;;  %21732 = vmatprep.mubr.msk.f32.mxu1 %vm333_vm1, %v26699_v42  ;;  %v26715_v20 = vld [vmem:[#allocation2 + $0x186] sm:$0xff] }
 0x65b   : > { %21882 = vmatprep.mubr.msk.f32.mxu0 %vm333_vm1, %v26701_v4  ;;  %29287 = vst [vmem:[#allocation36_spill] sm:$0xff] %v26715_v20  ;;  %v26723_v4 = vld [vmem:[#allocation2 + $0x18e] sm:$0xff] }
 0x65c   : > { %29289 = vst [vmem:[#allocation38_spill] sm:$0xff] %v26723_v4 }
 0x65d   : > { %21733 = vmatmul.mubr.msk.f32.gmra.mrb[86].mxu1 %vm333_vm1, %v26707_v37 }
 0x65e   : > { %21883 = vmatmul.mubr.msk.f32.gmra.mrb[22].mxu0 %vm333_vm1, %v26709_v52  ;;  %21735 = vmatprep.mubr.msk.f32.mxu1 %vm333_vm1, %v26715_v20  ;;  %v26731_v52 = vld [vmem:[#allocation2 + $0x1a6] sm:$0xff] }
 0x65f   : > { %21885 = vmatprep.mubr.msk.f32.mxu0 %vm333_vm1, %v26717_v44  ;;  %29291 = vst [vmem:[#allocation40_spill] sm:$0xff] %v26731_v52  ;;  %v26739_v44 = vld [vmem:[#allocation2 + $0x1ae] sm:$0xff] }
 0x660   : > { %29293 = vst [vmem:[#allocation42_spill] sm:$0xff] %v26739_v44 }
 0x661   : > { %21736 = vmatmul.mubr.msk.f32.gmra.mrb[88].mxu1 %vm333_vm1, %v26723_v4 }
 0x662   : > { %21886 = vmatmul.mubr.msk.f32.gmra.mrb[24].mxu0 %vm333_vm1, %v26725_v18  ;;  %21738 = vmatprep.mubr.msk.f32.mxu1 %vm333_vm1, %v26731_v52  ;;  %v26747_v18 = vld [vmem:[#allocation2 + $0x1c6] sm:$0xff] }
 0x663   : > { %21888 = vmatprep.mubr.msk.f32.mxu0 %vm333_vm1, %v26733_v50  ;;  %29295 = vst [vmem:[#allocation44_spill] sm:$0xff] %v26747_v18  ;;  %v26755_v50 = vld [vmem:[#allocation2 + $0x1ce] sm:$0xff] }
 0x664   : > { %29297 = vst [vmem:[#allocation46_spill] sm:$0xff] %v26755_v50 }
 0x665   : > { %21739 = vmatmul.mubr.msk.f32.gmra.mrb[90].mxu1 %vm333_vm1, %v26739_v44 }
 0x666   : > { %21889 = vmatmul.mubr.msk.f32.gmra.mrb[26].mxu0 %vm333_vm1, %v26741_v38  ;;  %21741 = vmatprep.mubr.msk.f32.mxu1 %vm333_vm1, %v26747_v18  ;;  %v26763_v38 = vld [vmem:[#allocation2 + $0x1e6] sm:$0xff] }
 0x667   : > { %21891 = vmatprep.mubr.msk.f32.mxu0 %vm333_vm1, %v26749_v0  ;;  %29299 = vst [vmem:[#allocation48_spill] sm:$0xff] %v26763_v38  ;;  %v8261_v0 = vld [vmem:[#allocation2 + $0x8] sm:$0xff] }
 0x669   : > { %21742 = vmatmul.mubr.msk.f32.gmra.mrb[92].mxu1 %vm333_vm1, %v26755_v50 }
 0x66a   : > { %21892 = vmatmul.mubr.msk.f32.gmra.mrb[28].mxu0 %vm333_vm1, %v26757_v14  ;;  %21744 = vmatprep.mubr.msk.f32.mxu1 %vm333_vm1, %v26763_v38  ;;  %v8262_v14 = vld [vmem:[#allocation2 + $0x10] sm:$0xff] }
 0x66b   : > { %21894 = vmatprep.mubr.msk.f32.mxu0 %vm333_vm1, %v26765_v24  ;;  %v26787_v24 = vld [vmem:[%s28866_s5 + $0x1c] sm:$0xf] }
 0x66d   : > { %21745 = vmatmul.mubr.msk.f32.gmra.mrb[94].mxu1 %vm333_vm1, %v26771_v57 }
 0x66e   : > { %21895 = vmatmul.mubr.msk.f32.gmra.mrb[30].mxu0 %vm333_vm1, %v26773_v51  ;;  %21749 = vmatprep.mubr.msk.f32.mxu1 %vm333_vm1, %v8261_v0  ;;  %v26796_v0 = vld [vmem:[#allocation2 + $0x30] sm:$0xff] }
 0x66f   : > { %21899 = vmatprep.mubr.msk.f32.mxu0 %vm333_vm1, %v26526_v41  ;;  %v26812_v41 = vld [vmem:[#allocation2 + $0x50] sm:$0xff] }
 0x671   : > { %21750 = vmatmul.mubr.msk.f32.vlgmr.msra.gmra.mrb[64].mxu1 %vm333_vm1, %v8262_v14  ;;  %v26806_v14 = vld [vmem:[#allocation2 + $0x48] sm:$0xff] }
 0x672   : > { %21900 = vmatmul.mubr.msk.f32.vlgmr.msra.gmra.mrb[0].mxu0 %vm333_vm1, %v26541_v49  ;;  %21752 = vmatprep.mubr.msk.f32.mxu1 %vm333_vm1, %v26782_v11  ;;  %v26824_v49 = vld [vmem:[#allocation2 + $0x70] sm:$0xff] }
 0x673   : > { %21948 = vmatpush3.msk.msra.mxu0 %vm643_vm0, %v26535_v9  ;;  %21902 = vmatprep.mubr.msk.f32.mxu0 %vm333_vm1, %v26555_v1  ;;  %v26818_v9 = vld [vmem:[#allocation2 + $0x68] sm:$0xff] }
 0x674   : > { %21997 = vmatprep.subr.msk.mxu0 %vm643_vm0, %v26787_v24  ;;  %v26830_v1 = vld [vmem:[#allocation2 + $0x88] sm:$0xff] }
 0x675   : > { %21753 = vmatmul.mubr.msk.f32.gmra.mrb[66].mxu1 %vm333_vm1, %v26796_v0 }
 0x676   : > { %21903 = vmatmul.mubr.msk.f32.gmra.mrb[2].mxu0 %vm333_vm1, %v26563_v6  ;;  %21755 = vmatprep.mubr.msk.f32.mxu1 %vm333_vm1, %v26806_v14  ;;  %v26836_v6 = vld [vmem:[#allocation2 + $0x90] sm:$0xff] }
 0x677   : > { %21905 = vmatprep.mubr.msk.f32.mxu0 %vm333_vm1, %v26571_v59  ;;  %v26842_v59 = vld [vmem:[#allocation2 + $0xa8] sm:$0xff] }
 0x679   : > { %21756 = vmatmul.mubr.msk.f32.gmra.mrb[68].mxu1 %vm333_vm1, %v26812_v41 }
 0x67a   : > { %21906 = vmatmul.mubr.msk.f32.gmra.mrb[4].mxu0 %vm333_vm1, %v26579_v5  ;;  %21758 = vmatprep.mubr.msk.f32.mxu1 %vm333_vm1, %v26818_v9  ;;  %v26848_v5 = vld [vmem:[#allocation2 + $0xb0] sm:$0xff] }
 0x67b   : > { %21908 = vmatprep.mubr.msk.f32.mxu0 %vm333_vm1, %v26587_v31  ;;  %v26854_v31 = vld [vmem:[#allocation2 + $0xc8] sm:$0xff] }
 0x67d   : > { %21759 = vmatmul.mubr.msk.f32.gmra.mrb[70].mxu1 %vm333_vm1, %v26824_v49 }
 0x67e   : > { %21909 = vmatmul.mubr.msk.f32.gmra.mrb[6].mxu0 %vm333_vm1, %v26595_v63  ;;  %21761 = vmatprep.mubr.msk.f32.mxu1 %vm333_vm1, %v26830_v1  ;;  %v26860_v63 = vld [vmem:[#allocation2 + $0xd0] sm:$0xff] }
 0x67f   : > { %21911 = vmatprep.mubr.msk.f32.mxu0 %vm333_vm1, %v26603_v16  ;;  %v26866_v16 = vld [vmem:[#allocation2 + $0xe8] sm:$0xff] }
 0x681   : > { %21762 = vmatmul.mubr.msk.f32.gmra.mrb[72].mxu1 %vm333_vm1, %v26836_v6 }
 0x682   : > { %21912 = vmatmul.mubr.msk.f32.gmra.mrb[8].mxu0 %vm333_vm1, %v26611_v48  ;;  %21764 = vmatprep.mubr.msk.f32.mxu1 %vm333_vm1, %v26842_v59  ;;  %v26872_v48 = vld [vmem:[#allocation2 + $0xf0] sm:$0xff] }
 0x683   : > { %21914 = vmatprep.mubr.msk.f32.mxu0 %vm333_vm1, %v26619_v10  ;;  %v26884_v10 = vld [vmem:[#allocation2 + $0x110] sm:$0xff] }
 0x685   : > { %21765 = vmatmul.mubr.msk.f32.gmra.mrb[74].mxu1 %vm333_vm1, %v26848_v5 }
 0x686   : > { %21915 = vmatmul.mubr.msk.f32.gmra.mrb[10].mxu0 %vm333_vm1, %v26627_v34  ;;  %21767 = vmatprep.mubr.msk.f32.mxu1 %vm333_vm1, %v26854_v31  ;;  %v26932_v34 = vld [vmem:[#allocation2 + $0x190] sm:$0xff] }
 0x687   : > { %21917 = vmatprep.mubr.msk.f32.mxu0 %vm333_vm1, %v26635_v7  ;;  %v26878_v7 = vld [vmem:[#allocation2 + $0x108] sm:$0xff] }
 0x689   : > { %21768 = vmatmul.mubr.msk.f32.gmra.mrb[76].mxu1 %vm333_vm1, %v26860_v63 }
 0x68a   : > { %21918 = vmatmul.mubr.msk.f32.gmra.mrb[12].mxu0 %vm333_vm1, %v26643_v23  ;;  %21770 = vmatprep.mubr.msk.f32.mxu1 %vm333_vm1, %v26866_v16  ;;  %v26890_v23 = vld [vmem:[#allocation2 + $0x128] sm:$0xff] }
 0x68b   : > { %21920 = vmatprep.mubr.msk.f32.mxu0 %vm333_vm1, %v26651_v53  ;;  %v26938_v53 = vld [vmem:[#allocation2 + $0x1a8] sm:$0xff] }
 0x68d   : > { %21771 = vmatmul.mubr.msk.f32.gmra.mrb[78].mxu1 %vm333_vm1, %v26872_v48 }
 0x68e   : > { %21921 = vmatmul.mubr.msk.f32.gmra.mrb[14].mxu0 %vm333_vm1, %v26659_v26  ;;  %21773 = vmatprep.mubr.msk.f32.mxu1 %vm333_vm1, %v26878_v7  ;;  %v26896_v26 = vld [vmem:[#allocation2 + $0x130] sm:$0xff] }
 0x68f   : > { %21923 = vmatprep.mubr.msk.f32.mxu0 %vm333_vm1, %v26667_v35  ;;  %v26902_v35 = vld [vmem:[#allocation2 + $0x148] sm:$0xff] }
 0x691   : > { %21774 = vmatmul.mubr.msk.f32.gmra.mrb[80].mxu1 %vm333_vm1, %v26884_v10 }
 0x692   : > { %21924 = vmatmul.mubr.msk.f32.gmra.mrb[16].mxu0 %vm333_vm1, %v26675_v3  ;;  %21776 = vmatprep.mubr.msk.f32.mxu1 %vm333_vm1, %v26890_v23  ;;  %v26908_v3 = vld [vmem:[#allocation2 + $0x150] sm:$0xff] }
 0x693   : > { %21926 = vmatprep.mubr.msk.f32.mxu0 %vm333_vm1, %v26683_v15  ;;  %v26914_v15 = vld [vmem:[#allocation2 + $0x168] sm:$0xff] }
 0x695   : > { %21777 = vmatmul.mubr.msk.f32.gmra.mrb[82].mxu1 %vm333_vm1, %v26896_v26 }
 0x696   : > { %21927 = vmatmul.mubr.msk.f32.gmra.mrb[18].mxu0 %vm333_vm1, %v26691_v28  ;;  %21779 = vmatprep.mubr.msk.f32.mxu1 %vm333_vm1, %v26902_v35  ;;  %v26920_v28 = vld [vmem:[#allocation2 + $0x170] sm:$0xff] }
 0x697   : > { %21929 = vmatprep.mubr.msk.f32.mxu0 %vm333_vm1, %v26699_v42  ;;  %v26926_v42 = vld [vmem:[#allocation2 + $0x188] sm:$0xff] }
 0x699   : > { %21780 = vmatmul.mubr.msk.f32.gmra.mrb[84].mxu1 %vm333_vm1, %v26908_v3 }
 0x69a   : > { %21930 = vmatmul.mubr.msk.f32.gmra.mrb[20].mxu0 %vm333_vm1, %v26707_v37  ;;  %21782 = vmatprep.mubr.msk.f32.mxu1 %vm333_vm1, %v26914_v15 }
 0x69b   : > { %21932 = vmatprep.mubr.msk.f32.mxu0 %vm333_vm1, %v26715_v20  ;;  %v26964_v20 = vld [vmem:[#allocation2 + $0x206] sm:$0xff] }
 0x69d   : > { %21783 = vmatmul.mubr.msk.f32.gmra.mrb[86].mxu1 %vm333_vm1, %v26920_v28 }
 0x69e   : > { %21933 = vmatmul.mubr.msk.f32.gmra.mrb[22].mxu0 %vm333_vm1, %v26723_v4  ;;  %21785 = vmatprep.mubr.msk.f32.mxu1 %vm333_vm1, %v26926_v42  ;;  %v26944_v4 = vld [vmem:[#allocation2 + $0x1b0] sm:$0xff] }
 0x69f   : > { %21935 = vmatprep.mubr.msk.f32.mxu0 %vm333_vm1, %v26731_v52  ;;  %v26950_v52 = vld [vmem:[#allocation2 + $0x1c8] sm:$0xff] }
 0x6a1   : > { %21786 = vmatmul.mubr.msk.f32.gmra.mrb[88].mxu1 %vm333_vm1, %v26932_v34 }
 0x6a2   : > { %21936 = vmatmul.mubr.msk.f32.gmra.mrb[24].mxu0 %vm333_vm1, %v26739_v44  ;;  %21788 = vmatprep.mubr.msk.f32.mxu1 %vm333_vm1, %v26938_v53  ;;  %v26956_v44 = vld [vmem:[#allocation2 + $0x1d0] sm:$0xff] }
 0x6a3   : > { %21938 = vmatprep.mubr.msk.f32.mxu0 %vm333_vm1, %v26747_v18  ;;  %v26962_v18 = vld [vmem:[#allocation2 + $0x1e8] sm:$0xff] }
 0x6a5   : > { %21789 = vmatmul.mubr.msk.f32.gmra.mrb[90].mxu1 %vm333_vm1, %v26944_v4 }
 0x6a6   : > { %21939 = vmatmul.mubr.msk.f32.gmra.mrb[26].mxu0 %vm333_vm1, %v26755_v50  ;;  %21791 = vmatprep.mubr.msk.f32.mxu1 %vm333_vm1, %v26950_v52  ;;  %v26970_v50 = vld [vmem:[#allocation2 + $0x1f0] sm:$0xff] }
 0x6a7   : > { %21941 = vmatprep.mubr.msk.f32.mxu0 %vm333_vm1, %v26763_v38  ;;  %v26972_v38 = vld [vmem:[#allocation2 + $0x20e] sm:$0xff] }
 0x6a9   : > { %21792 = vmatmul.mubr.msk.f32.gmra.mrb[92].mxu1 %vm333_vm1, %v26956_v44 }
 0x6aa   : > { %21942 = vmatmul.mubr.msk.f32.gmra.mrb[28].mxu0 %vm333_vm1, %v26771_v57  ;;  %21794 = vmatprep.mubr.msk.f32.mxu1 %vm333_vm1, %v26962_v18  ;;  %v18678_v57 = vld [vmem:[%s28866_s5 + $0x20] sm:$0xf] }
 0x6ab   : > { %21944 = vmatprep.mubr.msk.f32.mxu0 %vm333_vm1, %v26964_v20 }
 0x6ad   : > { %21795 = vmatmul.mubr.msk.f32.gmra.mrb[94].mxu1 %vm333_vm1, %v26970_v50 }
 0x6ae   : > { %21945 = vmatmul.mubr.msk.f32.gmra.mrb[30].mxu0 %vm333_vm1, %v26972_v38 }
 0x6af   : > { %21949 = vmatprep.mubr.msk.f32.mxu0 %vm333_vm1, %v26256_v27  ;;  %v29302_v27 = vld [vmem:[#allocation18_spill] sm:$0xff] }
 0x6b2   : > { %21950 = vmatmul.mubr.msk.f32.vlgmr.msra.gmra.mrb[0].mxu0 %vm333_vm1, %v26263_v32  ;;  %v29303_v32 = vld [vmem:[#allocation20_spill] sm:$0xff] }
 0x6b3   : > { %21998 = vmatpush3.msk.msra.mxu0 %vm643_vm0, %v26787_v24  ;;  %21952 = vmatprep.mubr.msk.f32.mxu0 %vm333_vm1, %v26304_v33  ;;  %v27044_v33 = vld [vmem:[#allocation2 + $0x207] sm:$0xff] }
 0x6b4   : > { %22047 = vmatprep.subr.msk.mxu0 %vm643_vm0, %v18678_v57 }
 0x6b6   : > { %21953 = vmatmul.mubr.msk.f32.gmra.mrb[2].mxu0 %vm333_vm1, %v26306_v56  ;;  %v27048_v56 = vld [vmem:[#allocation2 + $0x20f] sm:$0xff] }
 0x6b7   : > { %21955 = vmatprep.mubr.msk.f32.mxu0 %vm333_vm1, %v26318_v43  ;;  %v18712_v43 = vld [vmem:[%s28866_s5 + $0x24] sm:$0xf] }
 0x6ba   : > { %21956 = vmatmul.mubr.msk.f32.gmra.mrb[4].mxu0 %vm333_vm1, %v26320_v45  ;;  %v27117_v45 = vld [vmem:[#allocation2 + $0x208] sm:$0xff] }
 0x6bb   : > { %21958 = vmatprep.mubr.msk.f32.mxu0 %vm333_vm1, %v26332_v2  ;;  %v10601_v2 = vld [vmem:[#allocation2 + $0x29] sm:$0xff] }
 0x6be   : > { %21959 = vmatmul.mubr.msk.f32.gmra.mrb[6].mxu0 %vm333_vm1, %v26334_v30  ;;  %v27121_v30 = vld [vmem:[#allocation2 + $0x210] sm:$0xff] }
 0x6bf   : > { %21961 = vmatprep.mubr.msk.f32.mxu0 %vm333_vm1, %v26346_v60  ;;  %v10602_v60 = vld [vmem:[#allocation2 + $0x31] sm:$0xff] }
 0x6c2   : > { %21962 = vmatmul.mubr.msk.f32.gmra.mrb[8].mxu0 %vm333_vm1, %v26348_v62  ;;  %v27129_v62 = vld [vmem:[%s28866_s5 + $0x28] sm:$0xf] }
 0x6c3   : > { %21964 = vmatprep.mubr.msk.f32.mxu0 %vm333_vm1, %v26360_v55  ;;  %v27132_v55 = vld [vmem:[#allocation2 + $0x49] sm:$0xff] }
 0x6c6   : > { %21965 = vmatmul.mubr.msk.f32.gmra.mrb[10].mxu0 %vm333_vm1, %v26362_v61  ;;  %v27139_v61 = vld [vmem:[#allocation2 + $0x51] sm:$0xff] }
 0x6c7   : > { %21967 = vmatprep.mubr.msk.f32.mxu0 %vm333_vm1, %v26374_v19  ;;  %v27143_v19 = vld [vmem:[#allocation2 + $0x69] sm:$0xff] }
 0x6ca   : > { %21968 = vmatmul.mubr.msk.f32.gmra.mrb[12].mxu0 %vm333_vm1, %v26376_v21  ;;  %v27147_v21 = vld [vmem:[#allocation2 + $0x71] sm:$0xff] }
 0x6cb   : > { %21970 = vmatprep.mubr.msk.f32.mxu0 %vm333_vm1, %v26388_v29  ;;  %v27151_v29 = vld [vmem:[#allocation2 + $0x89] sm:$0xff] }
 0x6ce   : > { %21971 = vmatmul.mubr.msk.f32.gmra.mrb[14].mxu0 %vm333_vm1, %v26390_v12  ;;  %v27155_v12 = vld [vmem:[#allocation2 + $0x91] sm:$0xff] }
 0x6cf   : > { %21973 = vmatprep.mubr.msk.f32.mxu0 %vm333_vm1, %v26402_v22  ;;  %v27159_v22 = vld [vmem:[#allocation2 + $0xa9] sm:$0xff] }
 0x6d2   : > { %21974 = vmatmul.mubr.msk.f32.gmra.mrb[16].mxu0 %vm333_vm1, %v26404_v40  ;;  %v27163_v40 = vld [vmem:[#allocation2 + $0xb1] sm:$0xff] }
 0x6d3   : > { %21976 = vmatprep.mubr.msk.f32.mxu0 %vm333_vm1, %v26416_v13  ;;  %v27167_v13 = vld [vmem:[#allocation2 + $0xc9] sm:$0xff] }
 0x6d6   : > { %21977 = vmatmul.mubr.msk.f32.gmra.mrb[18].mxu0 %vm333_vm1, %v26418_v47  ;;  %v27171_v47 = vld [vmem:[#allocation2 + $0xd1] sm:$0xff] }
 0x6d7   : > { %21979 = vmatprep.mubr.msk.f32.mxu0 %vm333_vm1, %v26430_v8 }
 0x6da   : > { %21980 = vmatmul.mubr.msk.f32.gmra.mrb[20].mxu0 %vm333_vm1, %v26432_v46  ;;  %v27177_v46 = vld [vmem:[#allocation2 + $0xe9] sm:$0xff] }
 0x6db   : > { %21982 = vmatprep.mubr.msk.f32.mxu0 %vm333_vm1, %v26447_v39  ;;  %v27183_v39 = vld [vmem:[#allocation2 + $0xf1] sm:$0xff] }
 0x6de   : > { %21983 = vmatmul.mubr.msk.f32.gmra.mrb[22].mxu0 %vm333_vm1, %v26451_v54  ;;  %v27189_v54 = vld [vmem:[#allocation2 + $0x109] sm:$0xff] }
 0x6df   : > { %21985 = vmatprep.mubr.msk.f32.mxu0 %vm333_vm1, %v26467_v17 }
 0x6e2   : > { %21986 = vmatmul.mubr.msk.f32.gmra.mrb[24].mxu0 %vm333_vm1, %v26471_v25 }
 0x6e3   : > { %21988 = vmatprep.mubr.msk.f32.mxu0 %vm333_vm1, %v26487_v36  ;;  %v27197_v36 = vld [vmem:[#allocation2 + $0x111] sm:$0xff] }
 0x6e6   : > { %21989 = vmatmul.mubr.msk.f32.gmra.mrb[26].mxu0 %vm333_vm1, %v26491_v58 }
 0x6e7   : > { %21991 = vmatprep.mubr.msk.f32.mxu0 %vm333_vm1, %v29302_v27 }
 0x6ea   : > { %21992 = vmatmul.mubr.msk.f32.gmra.mrb[28].mxu0 %vm333_vm1, %v29303_v32 }
 0x6eb   : > { %21994 = vmatprep.mubr.msk.f32.mxu0 %vm333_vm1, %v27044_v33 }
 0x6ee   : > { %21995 = vmatmul.mubr.msk.f32.gmra.mrb[30].mxu0 %vm333_vm1, %v27048_v56 }
 0x6ef   : > { %21999 = vmatprep.mubr.msk.f32.mxu0 %vm333_vm1, %v26782_v11  ;;  %v27203_v11 = vld [vmem:[#allocation2 + $0x129] sm:$0xff] }
 0x6f2   : > { %22000 = vmatmul.mubr.msk.f32.vlgmr.msra.gmra.mrb[0].mxu0 %vm333_vm1, %v26796_v0 }
 0x6f3   : > { %22048 = vmatpush3.msk.msra.mxu0 %vm643_vm0, %v18678_v57  ;;  %22002 = vmatprep.mubr.msk.f32.mxu0 %vm333_vm1, %v26806_v14  ;;  %v27209_v14 = vld [vmem:[#allocation2 + $0x131] sm:$0xff] }
 0x6f4   : > { %22097 = vmatprep.subr.msk.mxu0 %vm643_vm0, %v18712_v43 }
 0x6f6   : > { %22003 = vmatmul.mubr.msk.f32.gmra.mrb[2].mxu0 %vm333_vm1, %v26812_v41 }
 0x6f7   : > { %22005 = vmatprep.mubr.msk.f32.mxu0 %vm333_vm1, %v26818_v9  ;;  %v27215_v9 = vld [vmem:[#allocation2 + $0x149] sm:$0xff] }
 0x6fa   : > { %22006 = vmatmul.mubr.msk.f32.gmra.mrb[4].mxu0 %vm333_vm1, %v26824_v49 }
 0x6fb   : > { %22008 = vmatprep.mubr.msk.f32.mxu0 %vm333_vm1, %v26830_v1  ;;  %v27221_v1 = vld [vmem:[#allocation2 + $0x151] sm:$0xff] }
 0x6fe   : > { %22009 = vmatmul.mubr.msk.f32.gmra.mrb[6].mxu0 %vm333_vm1, %v26836_v6 }
 0x6ff   : > { %22011 = vmatprep.mubr.msk.f32.mxu0 %vm333_vm1, %v26842_v59  ;;  %v27227_v59 = vld [vmem:[#allocation2 + $0x169] sm:$0xff] }
 0x702   : > { %22012 = vmatmul.mubr.msk.f32.gmra.mrb[8].mxu0 %vm333_vm1, %v26848_v5 }
 0x703   : > { %22014 = vmatprep.mubr.msk.f32.mxu0 %vm333_vm1, %v26854_v31 }
 0x706   : > { %22015 = vmatmul.mubr.msk.f32.gmra.mrb[10].mxu0 %vm333_vm1, %v26860_v63  ;;  %v29316_v63 = vld [vmem:[#allocation32_spill] sm:$0xff] }
 0x707   : > { %22017 = vmatprep.mubr.msk.f32.mxu0 %vm333_vm1, %v26866_v16  ;;  %v29317_v16 = vld [vmem:[#allocation7_spill] sm:$0xff] }
 0x70a   : > { %22018 = vmatmul.mubr.msk.f32.gmra.mrb[12].mxu0 %vm333_vm1, %v26872_v48 }
 0x70b   : > { %22020 = vmatprep.mubr.msk.f32.mxu0 %vm333_vm1, %v26878_v7 }
 0x70e   : > { %22021 = vmatmul.mubr.msk.f32.gmra.mrb[14].mxu0 %vm333_vm1, %v26884_v10  ;;  %v29320_v10 = vld [vmem:[#allocation8_spill] sm:$0xff] }
 0x70f   : > { %22023 = vmatprep.mubr.msk.f32.mxu0 %vm333_vm1, %v26890_v23  ;;  %v29321_v23 = vld [vmem:[#allocation26_spill] sm:$0xff] }
 0x712   : > { %22024 = vmatmul.mubr.msk.f32.gmra.mrb[16].mxu0 %vm333_vm1, %v26896_v26 }
 0x713   : > { %22026 = vmatprep.mubr.msk.f32.mxu0 %vm333_vm1, %v26902_v35 }
 0x716   : > { %22027 = vmatmul.mubr.msk.f32.gmra.mrb[18].mxu0 %vm333_vm1, %v26908_v3  ;;  %v29324_v3 = vld [vmem:[#allocation27_spill] sm:$0xff] }
 0x717   : > { %22029 = vmatprep.mubr.msk.f32.mxu0 %vm333_vm1, %v26914_v15  ;;  %v29325_v15 = vld [vmem:[#allocation29_spill] sm:$0xff] }
 0x71a   : > { %22030 = vmatmul.mubr.msk.f32.gmra.mrb[20].mxu0 %vm333_vm1, %v26920_v28 }
 0x71b   : > { %22032 = vmatprep.mubr.msk.f32.mxu0 %vm333_vm1, %v26926_v42 }
 0x71e   : > { %22033 = vmatmul.mubr.msk.f32.gmra.mrb[22].mxu0 %vm333_vm1, %v26932_v34 }
 0x71f   : > { %22035 = vmatprep.mubr.msk.f32.mxu0 %vm333_vm1, %v26938_v53 }
 0x722   : > { %22036 = vmatmul.mubr.msk.f32.gmra.mrb[24].mxu0 %vm333_vm1, %v26944_v4 }
 0x723   : > { %22038 = vmatprep.mubr.msk.f32.mxu0 %vm333_vm1, %v26950_v52 }
 0x726   : > { %22039 = vmatmul.mubr.msk.f32.gmra.mrb[26].mxu0 %vm333_vm1, %v26956_v44 }
 0x727   : > { %22041 = vmatprep.mubr.msk.f32.mxu0 %vm333_vm1, %v26962_v18 }
 0x72a   : > { %22042 = vmatmul.mubr.msk.f32.gmra.mrb[28].mxu0 %vm333_vm1, %v26970_v50 }
 0x72b   : > { %22044 = vmatprep.mubr.msk.f32.mxu0 %vm333_vm1, %v27117_v45 }
 0x72e   : > { %22045 = vmatmul.mubr.msk.f32.gmra.mrb[30].mxu0 %vm333_vm1, %v27121_v30 }
 0x72f   : > { %22049 = vmatprep.mubr.msk.f32.mxu0 %vm333_vm1, %v10601_v2  ;;  %v29329_v2 = vld [vmem:[#allocation19_spill] sm:$0xff] }
 0x732   : > { %22050 = vmatmul.mubr.msk.f32.vlgmr.msra.gmra.mrb[0].mxu0 %vm333_vm1, %v10602_v60 }
 0x733   : > { %22098 = vmatpush3.msk.msra.mxu0 %vm643_vm0, %v18712_v43  ;;  %22052 = vmatprep.mubr.msk.f32.mxu0 %vm333_vm1, %v27132_v55  ;;  %v29328_v43 = vld [vmem:[#allocation16_spill] sm:$0xff] }
 0x734   : > { %22147 = vmatprep.subr.msk.mxu0 %vm643_vm0, %v27129_v62 }
 0x736   : > { %22053 = vmatmul.mubr.msk.f32.gmra.mrb[2].mxu0 %vm333_vm1, %v27139_v61 }
 0x737   : > { %22055 = vmatprep.mubr.msk.f32.mxu0 %vm333_vm1, %v27143_v19 }
 0x73a   : > { %22056 = vmatmul.mubr.msk.f32.gmra.mrb[4].mxu0 %vm333_vm1, %v27147_v21 }
 0x73b   : > { %22058 = vmatprep.mubr.msk.f32.mxu0 %vm333_vm1, %v27151_v29 }
 0x73e   : > { %22059 = vmatmul.mubr.msk.f32.gmra.mrb[6].mxu0 %vm333_vm1, %v27155_v12 }
 0x73f   : > { %22061 = vmatprep.mubr.msk.f32.mxu0 %vm333_vm1, %v27159_v22 }
 0x742   : > { %22062 = vmatmul.mubr.msk.f32.gmra.mrb[8].mxu0 %vm333_vm1, %v27163_v40 }
 0x743   : > { %22064 = vmatprep.mubr.msk.f32.mxu0 %vm333_vm1, %v27167_v13 }
 0x744   : > { %v27173_v8 = vpop.f32.mrb[64].mxu1 }
 0x745   : > { %29304 = vst [vmem:[#allocation18_spill] sm:$0xff] %v27173_v8  ;;  %v27179_v57 = vpop.f32.mrb[65].mxu1  ;;  %v29380_v8 = vld [vmem:[#allocation48_spill] sm:$0xff] }
 0x746   : > { %22065 = vmatmul.mubr.msk.f32.gmra.mrb[10].mxu0 %vm333_vm1, %v27171_v47  ;;  %29305 = vst [vmem:[#allocation20_spill] sm:$0xff] %v27179_v57  ;;  %v29379_v57 = vld [vmem:[#allocation46_spill] sm:$0xff] }
 0x747   : > { %22067 = vmatprep.mubr.msk.f32.mxu0 %vm333_vm1, %v27177_v46 }
 0x748   : > { %v27185_v24 = vpop.f32.mrb[66].mxu1 }
 0x749   : > { %29306 = vst [vmem:[#allocation51_spill] sm:$0xff] %v27185_v24  ;;  %v27191_v17 = vpop.f32.mrb[67].mxu1  ;;  %v29378_v24 = vld [vmem:[#allocation44_spill] sm:$0xff] }
 0x74a   : > { %22068 = vmatmul.mubr.msk.f32.gmra.mrb[12].mxu0 %vm333_vm1, %v27183_v39  ;;  %29307 = vst [vmem:[#allocation52_spill] sm:$0xff] %v27191_v17  ;;  %v29377_v17 = vld [vmem:[#allocation42_spill] sm:$0xff] }
 0x74b   : > { %22070 = vmatprep.mubr.msk.f32.mxu0 %vm333_vm1, %v27189_v54 }
 0x74c   : > { %v27195_v25 = vpop.f32.mrb[68].mxu1 }
 0x74d   : > { %29308 = vst [vmem:[#allocation53_spill] sm:$0xff] %v27195_v25  ;;  %v27199_v58 = vpop.f32.mrb[69].mxu1  ;;  %v29376_v25 = vld [vmem:[#allocation40_spill] sm:$0xff] }
 0x74e   : > { %29309 = vst [vmem:[#allocation54_spill] sm:$0xff] %v27199_v58  ;;  %22071 = vmatmul.mubr.msk.f32.gmra.mrb[14].mxu0 %vm333_vm1, %v27197_v36  ;;  %v29375_v58 = vld [vmem:[#allocation38_spill] sm:$0xff] }
 0x74f   : > { %22073 = vmatprep.mubr.msk.f32.mxu0 %vm333_vm1, %v27203_v11 }
 0x750   : > { %v27207_v0 = vpop.f32.mrb[70].mxu1 }
 0x751   : > { %29310 = vst [vmem:[#allocation55_spill] sm:$0xff] %v27207_v0  ;;  %v27211_v41 = vpop.f32.mrb[71].mxu1  ;;  %v29374_v0 = vld [vmem:[#allocation36_spill] sm:$0xff] }
 0x752   : > { %29311 = vst [vmem:[#allocation56_spill] sm:$0xff] %v27211_v41  ;;  %22074 = vmatmul.mubr.msk.f32.gmra.mrb[16].mxu0 %vm333_vm1, %v27209_v14  ;;  %v27446_v41 = vld [vmem:[#allocation2 + $0x166] sm:$0xff] }
 0x753   : > { %22076 = vmatprep.mubr.msk.f32.mxu0 %vm333_vm1, %v27215_v9 }
 0x754   : > { %v27219_v49 = vpop.f32.mrb[72].mxu1 }
 0x755   : > { %29312 = vst [vmem:[#allocation57_spill] sm:$0xff] %v27219_v49  ;;  %v27223_v6 = vpop.f32.mrb[73].mxu1  ;;  %v27442_v49 = vld [vmem:[#allocation2 + $0x14e] sm:$0xff] }
 0x756   : > { %29313 = vst [vmem:[#allocation58_spill] sm:$0xff] %v27223_v6  ;;  %22077 = vmatmul.mubr.msk.f32.gmra.mrb[18].mxu0 %vm333_vm1, %v27221_v1  ;;  %v27438_v6 = vld [vmem:[#allocation2 + $0x146] sm:$0xff] }
 0x757   : > { %22079 = vmatprep.mubr.msk.f32.mxu0 %vm333_vm1, %v27227_v59 }
 0x758   : > { %v27231_v5 = vpop.f32.mrb[74].mxu1 }
 0x759   : > { %29314 = vst [vmem:[#allocation59_spill] sm:$0xff] %v27231_v5  ;;  %v27233_v31 = vpop.f32.mrb[75].mxu1  ;;  %v27434_v5 = vld [vmem:[#allocation2 + $0x12e] sm:$0xff] }
 0x75a   : > { %29315 = vst [vmem:[#allocation60_spill] sm:$0xff] %v27233_v31  ;;  %22080 = vmatmul.mubr.msk.f32.gmra.mrb[20].mxu0 %vm333_vm1, %v29316_v63  ;;  %v27430_v31 = vld [vmem:[#allocation2 + $0x126] sm:$0xff] }
 0x75b   : > { %22082 = vmatprep.mubr.msk.f32.mxu0 %vm333_vm1, %v29317_v16  ;;  %v29332_v16 = vld [vmem:[#allocation23_spill] sm:$0xff] }
 0x75c   : > { %v27239_v48 = vpop.f32.mrb[76].mxu1 }
 0x75d   : > { %29318 = vst [vmem:[#allocation32_spill] sm:$0xff] %v27239_v48  ;;  %v27241_v7 = vpop.f32.mrb[77].mxu1  ;;  %v27426_v48 = vld [vmem:[#allocation2 + $0x10e] sm:$0xff] }
 0x75e   : > { %29319 = vst [vmem:[#allocation7_spill] sm:$0xff] %v27241_v7  ;;  %22083 = vmatmul.mubr.msk.f32.gmra.mrb[22].mxu0 %vm333_vm1, %v29320_v10  ;;  %v27269_v10 = vld [vmem:[#allocation2 + $0x209] sm:$0xff] }
 0x75f   : > { %22085 = vmatprep.mubr.msk.f32.mxu0 %vm333_vm1, %v29321_v23  ;;  %v27422_v7 = vld [vmem:[#allocation2 + $0x106] sm:$0xff] }
 0x760   : > { %v27247_v26 = vpop.f32.mrb[78].mxu1 }
 0x761   : > { %29322 = vst [vmem:[#allocation8_spill] sm:$0xff] %v27247_v26  ;;  %v27249_v35 = vpop.f32.mrb[79].mxu1  ;;  %v27418_v26 = vld [vmem:[#allocation2 + $0xee] sm:$0xff] }
 0x762   : > { %29323 = vst [vmem:[#allocation26_spill] sm:$0xff] %v27249_v35  ;;  %22086 = vmatmul.mubr.msk.f32.gmra.mrb[24].mxu0 %vm333_vm1, %v29324_v3  ;;  %v27275_v3 = vld [vmem:[#allocation2 + $0x211] sm:$0xff]  ;;  %v27414_v35 = vld [vmem:[#allocation2 + $0xe6] sm:$0xff] }
 0x763   : > { %22088 = vmatprep.mubr.msk.f32.mxu0 %vm333_vm1, %v29325_v15 }
 0x764   : > { %v27255_v27 = vpop.f32.mrb[80].mxu1 }
 0x765   : > { %29326 = vst [vmem:[#allocation27_spill] sm:$0xff] %v27255_v27  ;;  %v27257_v32 = vpop.f32.mrb[81].mxu1 }
 0x766   : > { %29327 = vst [vmem:[#allocation29_spill] sm:$0xff] %v27257_v32  ;;  %22089 = vmatmul.mubr.msk.f32.gmra.mrb[26].mxu0 %vm333_vm1, %v29328_v43  ;;  %v29335_v43 = vld [vmem:[#allocation28_spill] sm:$0xff]  ;;  %v29343_v32 = vld [vmem:[#allocation5_spill] sm:$0xff] }
 0x767   : > { %22091 = vmatprep.mubr.msk.f32.mxu0 %vm333_vm1, %v29329_v2 }
 0x768   : > { %v27263_v60 = vpop.f32.mrb[82].mxu1 }
 0x769   : > { %29330 = vst [vmem:[#allocation16_spill] sm:$0xff] %v27263_v60  ;;  %v27265_v63 = vpop.f32.mrb[83].mxu1  ;;  %v29338_v60 = vld [vmem:[#allocation31_spill] sm:$0xff] }
 0x76a   : > { %29331 = vst [vmem:[#allocation19_spill] sm:$0xff] %v27265_v63  ;;  %22092 = vmatmul.mubr.msk.f32.gmra.mrb[28].mxu0 %vm333_vm1, %v29332_v16  ;;  %v18780_v16 = vld [vmem:[%s28866_s5 + $0x2c] sm:$0xf] }
 0x76b   : > { %22094 = vmatprep.mubr.msk.f32.mxu0 %vm333_vm1, %v27269_v10 }
 0x76c   : > { %v27273_v23 = vpop.f32.mrb[84].mxu1 }
 0x76d   : > { %29333 = vst [vmem:[#allocation23_spill] sm:$0xff] %v27273_v23  ;;  %v27277_v15 = vpop.f32.mrb[85].mxu1  ;;  %v29342_v23 = vld [vmem:[#allocation4_spill] sm:$0xff] }
 0x76e   : > { %29334 = vst [vmem:[#allocation61_spill] sm:$0xff] %v27277_v15  ;;  %22095 = vmatmul.mubr.msk.f32.gmra.mrb[30].mxu0 %vm333_vm1, %v27275_v3  ;;  %v29339_v15 = vld [vmem:[#allocation3_spill] sm:$0xff] }
 0x76f   : > { %22099 = vmatprep.mubr.msk.f32.mxu0 %vm333_vm1, %v29335_v43 }
 0x770   : > { %v27283_v2 = vpop.f32.mrb[86].mxu1 }
 0x771   : > { %29336 = vst [vmem:[#allocation28_spill] sm:$0xff] %v27283_v2  ;;  %v27288_v63 = vpop.f32.mrb[87].mxu1 }
 0x772   : > { %29337 = vst [vmem:[#allocation62_spill] sm:$0xff] %v27288_v63  ;;  %22100 = vmatmul.mubr.msk.f32.vlgmr.msra.gmra.mrb[0].mxu0 %vm333_vm1, %v29338_v60 }
 0x773   : > { %22148 = vmatpush3.msk.msra.mxu0 %vm643_vm0, %v27129_v62  ;;  %22102 = vmatprep.mubr.msk.f32.mxu0 %vm333_vm1, %v29339_v15  ;;  %v29346_v62 = vld [vmem:[#allocation6_spill] sm:$0xff]  ;;  %v29347_v15 = vld [vmem:[#allocation33_spill] sm:$0xff] }
 0x774   : > { %22197 = vmatprep.subr.msk.mxu0 %vm643_vm0, %v18780_v16  ;;  %v27297_v43 = vpop.f32.mrb[88].mxu1 }
 0x775   : > { %29340 = vst [vmem:[#allocation31_spill] sm:$0xff] %v27297_v43  ;;  %v27299_v2 = vpop.f32.mrb[89].mxu1 }
 0x776   : > { %29341 = vst [vmem:[#allocation3_spill] sm:$0xff] %v27299_v2  ;;  %22103 = vmatmul.mubr.msk.f32.gmra.mrb[2].mxu0 %vm333_vm1, %v29342_v23  ;;  %v29350_v2 = vld [vmem:[#allocation34_spill] sm:$0xff]  ;;  %v29351_v23 = vld [vmem:[#allocation9_spill] sm:$0xff] }
 0x777   : > { %22105 = vmatprep.mubr.msk.f32.mxu0 %vm333_vm1, %v29343_v32 }
 0x778   : > { %v27305_v63 = vpop.f32.mrb[90].mxu1 }
 0x779   : > { %29344 = vst [vmem:[#allocation4_spill] sm:$0xff] %v27305_v63  ;;  %v27307_v60 = vpop.f32.mrb[91].mxu1 }
 0x77a   : > { %29345 = vst [vmem:[#allocation5_spill] sm:$0xff] %v27307_v60  ;;  %22106 = vmatmul.mubr.msk.f32.gmra.mrb[4].mxu0 %vm333_vm1, %v29346_v62  ;;  %v29354_v60 = vld [vmem:[#allocation10_spill] sm:$0xff]  ;;  %v29355_v62 = vld [vmem:[#allocation11_spill] sm:$0xff] }
 0x77b   : > { %22108 = vmatprep.mubr.msk.f32.mxu0 %vm333_vm1, %v29347_v15  ;;  %v29356_v15 = vld [vmem:[#allocation12_spill] sm:$0xff] }
 0x77c   : > { %v27313_v27 = vpop.f32.mrb[92].mxu1 }
 0x77d   : > { %29348 = vst [vmem:[#allocation6_spill] sm:$0xff] %v27313_v27  ;;  %v27315_v43 = vpop.f32.mrb[93].mxu1  ;;  %v27410_v27 = vld [vmem:[#allocation2 + $0xce] sm:$0xff] }
 0x77e   : > { %29349 = vst [vmem:[#allocation33_spill] sm:$0xff] %v27315_v43  ;;  %22109 = vmatmul.mubr.msk.f32.gmra.mrb[6].mxu0 %vm333_vm1, %v29350_v2  ;;  %v29357_v43 = vld [vmem:[#allocation13_spill] sm:$0xff]  ;;  %v29358_v2 = vld [vmem:[#allocation14_spill] sm:$0xff] }
 0x77f   : > { %22111 = vmatprep.mubr.msk.f32.mxu0 %vm333_vm1, %v29351_v23  ;;  %v29359_v23 = vld [vmem:[#allocation15_spill] sm:$0xff] }
 0x780   : > { %v27321_v32 = vpop.f32.mrb[94].mxu1 }
 0x781   : > { %29352 = vst [vmem:[#allocation34_spill] sm:$0xff] %v27321_v32  ;;  %v27323_v63 = vpop.f32.mrb[95].mxu1  ;;  %v29360_v32 = vld [vmem:[#allocation17_spill] sm:$0xff] }
 0x782   : > { %29353 = vst [vmem:[#allocation9_spill] sm:$0xff] %v27323_v63  ;;  %22112 = vmatmul.mubr.msk.f32.gmra.mrb[8].mxu0 %vm333_vm1, %v29354_v60  ;;  %v29361_v63 = vld [vmem:[#allocation21_spill] sm:$0xff] }
 0x783   : > { %22114 = vmatprep.mubr.msk.f32.mxu0 %vm333_vm1, %v29355_v62  ;;  %v29362_v60 = vld [vmem:[#allocation25_spill] sm:$0xff]  ;;  %v29363_v62 = vld [vmem:[#allocation30_spill] sm:$0xff] }
 0x786   : > { %22115 = vmatmul.mubr.msk.f32.gmra.mrb[10].mxu0 %vm333_vm1, %v29356_v15  ;;  %v29364_v15 = vld [vmem:[#allocation22_spill] sm:$0xff] }
 0x787   : > { %22117 = vmatprep.mubr.msk.f32.mxu0 %vm333_vm1, %v29357_v43  ;;  %v29365_v43 = vld [vmem:[#allocation24_spill] sm:$0xff] }
 0x78a   : > { %22118 = vmatmul.mubr.msk.f32.gmra.mrb[12].mxu0 %vm333_vm1, %v29358_v2  ;;  %v29366_v2 = vld [vmem:[#allocation35_spill] sm:$0xff] }
 0x78b   : > { %22120 = vmatprep.mubr.msk.f32.mxu0 %vm333_vm1, %v29359_v23  ;;  %v29367_v23 = vld [vmem:[#allocation37_spill] sm:$0xff] }
 0x78e   : > { %22121 = vmatmul.mubr.msk.f32.gmra.mrb[14].mxu0 %vm333_vm1, %v29360_v32  ;;  %v29368_v32 = vld [vmem:[#allocation39_spill] sm:$0xff] }
 0x78f   : > { %22123 = vmatprep.mubr.msk.f32.mxu0 %vm333_vm1, %v29361_v63  ;;  %v29369_v63 = vld [vmem:[#allocation41_spill] sm:$0xff] }
 0x792   : > { %22124 = vmatmul.mubr.msk.f32.gmra.mrb[16].mxu0 %vm333_vm1, %v29362_v60  ;;  %v29370_v60 = vld [vmem:[#allocation43_spill] sm:$0xff] }
 0x793   : > { %22126 = vmatprep.mubr.msk.f32.mxu0 %vm333_vm1, %v29363_v62  ;;  %v29371_v62 = vld [vmem:[#allocation45_spill] sm:$0xff] }
 0x796   : > { %22127 = vmatmul.mubr.msk.f32.gmra.mrb[18].mxu0 %vm333_vm1, %v29364_v15  ;;  %v29372_v15 = vld [vmem:[#allocation47_spill] sm:$0xff] }
 0x797   : > { %22129 = vmatprep.mubr.msk.f32.mxu0 %vm333_vm1, %v29365_v43  ;;  %v29373_v43 = vld [vmem:[#allocation49_spill] sm:$0xff] }
 0x79a   : > { %22130 = vmatmul.mubr.msk.f32.gmra.mrb[20].mxu0 %vm333_vm1, %v29366_v2  ;;  %v27367_v2 = vld [vmem:[#allocation2 + $0x20a] sm:$0xff] }
 0x79b   : > { %22132 = vmatprep.mubr.msk.f32.mxu0 %vm333_vm1, %v29367_v23  ;;  %v27371_v23 = vld [vmem:[#allocation2 + $0x212] sm:$0xff] }
 0x79e   : > { %22133 = vmatmul.mubr.msk.f32.gmra.mrb[22].mxu0 %vm333_vm1, %v29368_v32  ;;  %v11381_v32 = vld [vmem:[#allocation2 + $0x46] sm:$0xff] }
 0x79f   : > { %22135 = vmatprep.mubr.msk.f32.mxu0 %vm333_vm1, %v29369_v63  ;;  %v11382_v63 = vld [vmem:[#allocation2 + $0x4e] sm:$0xff] }
 0x7a2   : > { %22136 = vmatmul.mubr.msk.f32.gmra.mrb[24].mxu0 %vm333_vm1, %v29370_v60  ;;  %v18814_v60 = vld [vmem:[%s28866_s5 + $0x30] sm:$0xf] }
 0x7a3   : > { %22138 = vmatprep.mubr.msk.f32.mxu0 %vm333_vm1, %v29371_v62  ;;  %v27386_v62 = vld [vmem:[#allocation2 + $0x6e] sm:$0xff] }
 0x7a6   : > { %22139 = vmatmul.mubr.msk.f32.gmra.mrb[26].mxu0 %vm333_vm1, %v29372_v15  ;;  %v27390_v15 = vld [vmem:[#allocation2 + $0x86] sm:$0xff] }
 0x7a7   : > { %22141 = vmatprep.mubr.msk.f32.mxu0 %vm333_vm1, %v29373_v43  ;;  %v27394_v43 = vld [vmem:[#allocation2 + $0x8e] sm:$0xff] }
 0x7aa   : > { %22142 = vmatmul.mubr.msk.f32.gmra.mrb[28].mxu0 %vm333_vm1, %v26773_v51  ;;  %v27380_v51 = vld [vmem:[#allocation2 + $0x66] sm:$0xff] }
 0x7ab   : > { %22144 = vmatprep.mubr.msk.f32.mxu0 %vm333_vm1, %v27367_v2 }
 0x7ae   : > { %22145 = vmatmul.mubr.msk.f32.gmra.mrb[30].mxu0 %vm333_vm1, %v27371_v23 }
 0x7af   : > { %22149 = vmatprep.mubr.msk.f32.mxu0 %vm333_vm1, %v11381_v32  ;;  %v27402_v32 = vld [vmem:[#allocation2 + $0xae] sm:$0xff] }
 0x7b2   : > { %22150 = vmatmul.mubr.msk.f32.vlgmr.msra.gmra.mrb[0].mxu0 %vm333_vm1, %v11382_v63  ;;  %v27406_v63 = vld [vmem:[#allocation2 + $0xc6] sm:$0xff] }
 0x7b3   : > { %22198 = vmatpush3.msk.msra.mxu0 %vm643_vm0, %v18780_v16  ;;  %22152 = vmatprep.mubr.msk.f32.mxu0 %vm333_vm1, %v27380_v51  ;;  %v27398_v16 = vld [vmem:[#allocation2 + $0xa6] sm:$0xff] }
 0x7b4   : > { %22247 = vmatprep.subr.msk.mxu0 %vm643_vm0, %v18814_v60 }
 0x7b6   : > { %22153 = vmatmul.mubr.msk.f32.gmra.mrb[2].mxu0 %vm333_vm1, %v27386_v62 }
 0x7b7   : > { %22155 = vmatprep.mubr.msk.f32.mxu0 %vm333_vm1, %v27390_v15 }
 0x7ba   : > { %22156 = vmatmul.mubr.msk.f32.gmra.mrb[4].mxu0 %vm333_vm1, %v27394_v43 }
 0x7bb   : > { %22158 = vmatprep.mubr.msk.f32.mxu0 %vm333_vm1, %v27398_v16 }
 0x7be   : > { %22159 = vmatmul.mubr.msk.f32.gmra.mrb[6].mxu0 %vm333_vm1, %v27402_v32 }
 0x7bf   : > { %22161 = vmatprep.mubr.msk.f32.mxu0 %vm333_vm1, %v27406_v63 }
 0x7c2   : > { %22162 = vmatmul.mubr.msk.f32.gmra.mrb[8].mxu0 %vm333_vm1, %v27410_v27 }
 0x7c3   : > { %22164 = vmatprep.mubr.msk.f32.mxu0 %vm333_vm1, %v27414_v35 }
 0x7c6   : > { %22165 = vmatmul.mubr.msk.f32.gmra.mrb[10].mxu0 %vm333_vm1, %v27418_v26 }
 0x7c7   : > { %22167 = vmatprep.mubr.msk.f32.mxu0 %vm333_vm1, %v27422_v7 }
 0x7ca   : > { %22168 = vmatmul.mubr.msk.f32.gmra.mrb[12].mxu0 %vm333_vm1, %v27426_v48 }
 0x7cb   : > { %22170 = vmatprep.mubr.msk.f32.mxu0 %vm333_vm1, %v27430_v31 }
 0x7ce   : > { %22171 = vmatmul.mubr.msk.f32.gmra.mrb[14].mxu0 %vm333_vm1, %v27434_v5 }
 0x7cf   : > { %22173 = vmatprep.mubr.msk.f32.mxu0 %vm333_vm1, %v27438_v6 }
 0x7d2   : > { %22174 = vmatmul.mubr.msk.f32.gmra.mrb[16].mxu0 %vm333_vm1, %v27442_v49 }
 0x7d3   : > { %22176 = vmatprep.mubr.msk.f32.mxu0 %vm333_vm1, %v27446_v41 }
 0x7d6   : > { %22177 = vmatmul.mubr.msk.f32.gmra.mrb[18].mxu0 %vm333_vm1, %v26707_v37  ;;  %v29381_v37 = vld [vmem:[#allocation50_spill] sm:$0xff] }
 0x7d7   : > { %22179 = vmatprep.mubr.msk.f32.mxu0 %vm333_vm1, %v29374_v0  ;;  %v27502_v0 = vld [vmem:[#allocation2 + $0x8f] sm:$0xff] }
 0x7d8   : > { %29382 = vst [vmem:[#allocation10_spill] sm:$0xff] %v27502_v0 }
 0x7da   : > { %22180 = vmatmul.mubr.msk.f32.gmra.mrb[20].mxu0 %vm333_vm1, %v29375_v58  ;;  %v27498_v58 = vld [vmem:[#allocation2 + $0x87] sm:$0xff] }
 0x7db   : > { %22182 = vmatprep.mubr.msk.f32.mxu0 %vm333_vm1, %v29376_v25  ;;  %v27472_v25 = vld [vmem:[#allocation2 + $0x226] sm:$0xff] }
 0x7de   : > { %22183 = vmatmul.mubr.msk.f32.gmra.mrb[22].mxu0 %vm333_vm1, %v29377_v17  ;;  %v27494_v17 = vld [vmem:[#allocation2 + $0x6f] sm:$0xff] }
 0x7df   : > { %22185 = vmatprep.mubr.msk.f32.mxu0 %vm333_vm1, %v29378_v24  ;;  %v27476_v24 = vld [vmem:[#allocation2 + $0x22e] sm:$0xff] }
 0x7e2   : > { %22186 = vmatmul.mubr.msk.f32.gmra.mrb[24].mxu0 %vm333_vm1, %v29379_v57  ;;  %v11772_v57 = vld [vmem:[#allocation2 + $0x4f] sm:$0xff] }
 0x7e3   : > { %22188 = vmatprep.mubr.msk.f32.mxu0 %vm333_vm1, %v29380_v8  ;;  %v11771_v8 = vld [vmem:[#allocation2 + $0x47] sm:$0xff] }
 0x7e6   : > { %22189 = vmatmul.mubr.msk.f32.gmra.mrb[26].mxu0 %vm333_vm1, %v29381_v37  ;;  %v27510_v37 = vld [vmem:[#allocation2 + $0xaf] sm:$0xff] }
 0x7e7   : > { %22191 = vmatprep.mubr.msk.f32.mxu0 %vm333_vm1, %v26964_v20  ;;  %v27484_v20 = vld [vmem:[%s28866_s5 + $0x34] sm:$0xf]  ;;  %29384 = vst [vmem:[#allocation12_spill] sm:$0xff] %v27510_v37 }
 0x7ea   : > { %22192 = vmatmul.mubr.msk.f32.gmra.mrb[28].mxu0 %vm333_vm1, %v26972_v38  ;;  %v27487_v38 = vld [vmem:[#allocation2 + $0x67] sm:$0xff] }
 0x7eb   : > { %22194 = vmatprep.mubr.msk.f32.mxu0 %vm333_vm1, %v27472_v25 }
 0x7ee   : > { %22195 = vmatmul.mubr.msk.f32.gmra.mrb[30].mxu0 %vm333_vm1, %v27476_v24 }
 0x7ef   : > { %22199 = vmatprep.mubr.msk.f32.mxu0 %vm333_vm1, %v11771_v8  ;;  %v27514_v8 = vld [vmem:[#allocation2 + $0xc7] sm:$0xff] }
 0x7f0   : > { %29385 = vst [vmem:[#allocation13_spill] sm:$0xff] %v27514_v8 }
 0x7f2   : > { %22200 = vmatmul.mubr.msk.f32.vlgmr.msra.gmra.mrb[0].mxu0 %vm333_vm1, %v11772_v57  ;;  %v27518_v57 = vld [vmem:[#allocation2 + $0xcf] sm:$0xff] }
 0x7f3   : > { %22248 = vmatpush3.msk.msra.mxu0 %vm643_vm0, %v18814_v60  ;;  %22202 = vmatprep.mubr.msk.f32.mxu0 %vm333_vm1, %v27487_v38  ;;  %v27506_v60 = vld [vmem:[#allocation2 + $0xa7] sm:$0xff]  ;;  %29386 = vst [vmem:[#allocation14_spill] sm:$0xff] %v27518_v57 }
 0x7f4   : > { %22297 = vmatprep.subr.msk.mxu0 %vm643_vm0, %v27484_v20  ;;  %29383 = vst [vmem:[#allocation11_spill] sm:$0xff] %v27506_v60 }
 0x7f6   : > { %22203 = vmatmul.mubr.msk.f32.gmra.mrb[2].mxu0 %vm333_vm1, %v27494_v17 }
 0x7f7   : > { %22205 = vmatprep.mubr.msk.f32.mxu0 %vm333_vm1, %v27498_v58 }
 0x7fa   : > { %22206 = vmatmul.mubr.msk.f32.gmra.mrb[4].mxu0 %vm333_vm1, %v27502_v0  ;;  %v27522_v0 = vld [vmem:[#allocation2 + $0xe7] sm:$0xff] }
 0x7fb   : > { %22208 = vmatprep.mubr.msk.f32.mxu0 %vm333_vm1, %v27506_v60  ;;  %29387 = vst [vmem:[#allocation15_spill] sm:$0xff] %v27522_v0  ;;  %v27526_v60 = vld [vmem:[#allocation2 + $0xef] sm:$0xff] }
 0x7fc   : > { %29388 = vst [vmem:[#allocation17_spill] sm:$0xff] %v27526_v60 }
 0x7fe   : > { %22209 = vmatmul.mubr.msk.f32.gmra.mrb[6].mxu0 %vm333_vm1, %v27510_v37  ;;  %v27530_v37 = vld [vmem:[#allocation2 + $0x107] sm:$0xff] }
 0x7ff   : > { %22211 = vmatprep.mubr.msk.f32.mxu0 %vm333_vm1, %v27514_v8  ;;  %29389 = vst [vmem:[#allocation21_spill] sm:$0xff] %v27530_v37  ;;  %v27534_v8 = vld [vmem:[#allocation2 + $0x10f] sm:$0xff] }
 0x800   : > { %29390 = vst [vmem:[#allocation25_spill] sm:$0xff] %v27534_v8 }
 0x802   : > { %22212 = vmatmul.mubr.msk.f32.gmra.mrb[8].mxu0 %vm333_vm1, %v27518_v57  ;;  %v27538_v57 = vld [vmem:[#allocation2 + $0x127] sm:$0xff] }
 0x803   : > { %22214 = vmatprep.mubr.msk.f32.mxu0 %vm333_vm1, %v27522_v0  ;;  %29391 = vst [vmem:[#allocation30_spill] sm:$0xff] %v27538_v57  ;;  %v27542_v0 = vld [vmem:[#allocation2 + $0x12f] sm:$0xff] }
 0x804   : > { %29392 = vst [vmem:[#allocation22_spill] sm:$0xff] %v27542_v0 }
 0x806   : > { %22215 = vmatmul.mubr.msk.f32.gmra.mrb[10].mxu0 %vm333_vm1, %v27526_v60  ;;  %v27546_v60 = vld [vmem:[#allocation2 + $0x147] sm:$0xff] }
 0x807   : > { %22217 = vmatprep.mubr.msk.f32.mxu0 %vm333_vm1, %v27530_v37  ;;  %29393 = vst [vmem:[#allocation24_spill] sm:$0xff] %v27546_v60  ;;  %v27550_v37 = vld [vmem:[#allocation2 + $0x14f] sm:$0xff] }
 0x808   : > { %29394 = vst [vmem:[#allocation35_spill] sm:$0xff] %v27550_v37 }
 0x80a   : > { %22218 = vmatmul.mubr.msk.f32.gmra.mrb[12].mxu0 %vm333_vm1, %v27534_v8  ;;  %v27554_v8 = vld [vmem:[#allocation2 + $0x167] sm:$0xff] }
 0x80b   : > { %22220 = vmatprep.mubr.msk.f32.mxu0 %vm333_vm1, %v27538_v57  ;;  %29395 = vst [vmem:[#allocation37_spill] sm:$0xff] %v27554_v8  ;;  %v27558_v57 = vld [vmem:[#allocation2 + $0x16f] sm:$0xff] }
 0x80c   : > { %29396 = vst [vmem:[#allocation39_spill] sm:$0xff] %v27558_v57 }
 0x80e   : > { %22221 = vmatmul.mubr.msk.f32.gmra.mrb[14].mxu0 %vm333_vm1, %v27542_v0  ;;  %v27562_v0 = vld [vmem:[#allocation2 + $0x187] sm:$0xff] }
 0x80f   : > { %22223 = vmatprep.mubr.msk.f32.mxu0 %vm333_vm1, %v27546_v60  ;;  %29397 = vst [vmem:[#allocation41_spill] sm:$0xff] %v27562_v0  ;;  %v27566_v60 = vld [vmem:[#allocation2 + $0x18f] sm:$0xff] }
 0x810   : > { %29398 = vst [vmem:[#allocation43_spill] sm:$0xff] %v27566_v60 }
 0x812   : > { %22224 = vmatmul.mubr.msk.f32.gmra.mrb[16].mxu0 %vm333_vm1, %v27550_v37  ;;  %v27570_v37 = vld [vmem:[#allocation2 + $0x1a7] sm:$0xff] }
 0x813   : > { %22226 = vmatprep.mubr.msk.f32.mxu0 %vm333_vm1, %v27554_v8  ;;  %29399 = vst [vmem:[#allocation45_spill] sm:$0xff] %v27570_v37  ;;  %v27574_v8 = vld [vmem:[#allocation2 + $0x1af] sm:$0xff] }
 0x816   : > { %22227 = vmatmul.mubr.msk.f32.gmra.mrb[18].mxu0 %vm333_vm1, %v27558_v57  ;;  %v27578_v57 = vld [vmem:[#allocation2 + $0x1c7] sm:$0xff] }
 0x817   : > { %22229 = vmatprep.mubr.msk.f32.mxu0 %vm333_vm1, %v27562_v0  ;;  %29400 = vst [vmem:[#allocation47_spill] sm:$0xff] %v27578_v57  ;;  %v27582_v0 = vld [vmem:[#allocation2 + $0x1cf] sm:$0xff] }
 0x818   : > { %29401 = vst [vmem:[#allocation49_spill] sm:$0xff] %v27582_v0 }
 0x81a   : > { %22230 = vmatmul.mubr.msk.f32.gmra.mrb[20].mxu0 %vm333_vm1, %v27566_v60  ;;  %v27586_v60 = vld [vmem:[#allocation2 + $0x1e7] sm:$0xff] }
 0x81b   : > { %22232 = vmatprep.mubr.msk.f32.mxu0 %vm333_vm1, %v27570_v37  ;;  %29402 = vst [vmem:[#allocation36_spill] sm:$0xff] %v27586_v60  ;;  %v27590_v37 = vld [vmem:[#allocation2 + $0x1ef] sm:$0xff] }
 0x81c   : > { %29403 = vst [vmem:[#allocation38_spill] sm:$0xff] %v27590_v37 }
 0x81e   : > { %22233 = vmatmul.mubr.msk.f32.gmra.mrb[22].mxu0 %vm333_vm1, %v27574_v8 }
 0x81f   : > { %22235 = vmatprep.mubr.msk.f32.mxu0 %vm333_vm1, %v27578_v57  ;;  %v27598_v57 = vld [vmem:[#allocation2 + $0x227] sm:$0xff] }
 0x822   : > { %22236 = vmatmul.mubr.msk.f32.gmra.mrb[24].mxu0 %vm333_vm1, %v27582_v0  ;;  %v27602_v0 = vld [vmem:[#allocation2 + $0x22f] sm:$0xff] }
 0x823   : > { %22238 = vmatprep.mubr.msk.f32.mxu0 %vm333_vm1, %v27586_v60  ;;  %29404 = vst [vmem:[#allocation40_spill] sm:$0xff] %v27602_v0  ;;  %v12161_v60 = vld [vmem:[#allocation2 + $0x48] sm:$0xff] }
 0x826   : > { %22239 = vmatmul.mubr.msk.f32.gmra.mrb[26].mxu0 %vm333_vm1, %v27590_v37  ;;  %v12162_v37 = vld [vmem:[#allocation2 + $0x50] sm:$0xff] }
 0x827   : > { %22241 = vmatprep.mubr.msk.f32.mxu0 %vm333_vm1, %v27044_v33  ;;  %v18882_v33 = vld [vmem:[%s28866_s5 + $0x38] sm:$0xf] }
 0x82a   : > { %22242 = vmatmul.mubr.msk.f32.gmra.mrb[28].mxu0 %vm333_vm1, %v27048_v56  ;;  %v27611_v56 = vld [vmem:[#allocation2 + $0x68] sm:$0xff] }
 0x82b   : > { %22244 = vmatprep.mubr.msk.f32.mxu0 %vm333_vm1, %v27598_v57  ;;  %29405 = vst [vmem:[#allocation42_spill] sm:$0xff] %v27611_v56 }
 0x82e   : > { %22245 = vmatmul.mubr.msk.f32.gmra.mrb[30].mxu0 %vm333_vm1, %v27602_v0  ;;  %v27618_v0 = vld [vmem:[#allocation2 + $0x70] sm:$0xff] }
 0x82f   : > { %22249 = vmatprep.mubr.msk.f32.mxu0 %vm333_vm1, %v12161_v60  ;;  %29406 = vst [vmem:[#allocation44_spill] sm:$0xff] %v27618_v0  ;;  %v27622_v60 = vld [vmem:[#allocation2 + $0x88] sm:$0xff] }
 0x830   : > { %29407 = vst [vmem:[#allocation46_spill] sm:$0xff] %v27622_v60 }
 0x832   : > { %22250 = vmatmul.mubr.msk.f32.vlgmr.msra.gmra.mrb[0].mxu0 %vm333_vm1, %v12162_v37  ;;  %v27626_v37 = vld [vmem:[#allocation2 + $0x90] sm:$0xff] }
 0x833   : > { %22298 = vmatpush3.msk.msra.mxu0 %vm643_vm0, %v27484_v20  ;;  %22252 = vmatprep.mubr.msk.f32.mxu0 %vm333_vm1, %v27611_v56  ;;  %29408 = vst [vmem:[#allocation48_spill] sm:$0xff] %v27626_v37  ;;  %v27630_v20 = vld [vmem:[#allocation2 + $0xa8] sm:$0xff]  ;;  %v27634_v56 = vld [vmem:[#allocation2 + $0xb0] sm:$0xff] }
 0x834   : > { %22347 = vmatprep.subr.msk.mxu0 %vm643_vm0, %v18882_v33  ;;  %29409 = vst [vmem:[#allocation50_spill] sm:$0xff] %v27630_v20  ;;  %29410 = vst [vmem:[#allocation63_spill] sm:$0xff] %v27634_v56 }
 0x836   : > { %22253 = vmatmul.mubr.msk.f32.gmra.mrb[2].mxu0 %vm333_vm1, %v27618_v0  ;;  %v27638_v0 = vld [vmem:[#allocation2 + $0xc8] sm:$0xff] }
 0x837   : > { %22255 = vmatprep.mubr.msk.f32.mxu0 %vm333_vm1, %v27622_v60  ;;  %29411 = vst [vmem:[#allocation64_spill] sm:$0xff] %v27638_v0  ;;  %v27642_v60 = vld [vmem:[#allocation2 + $0xd0] sm:$0xff] }
 0x838   : > { %29412 = vst [vmem:[#allocation65_spill] sm:$0xff] %v27642_v60 }
 0x83a   : > { %22256 = vmatmul.mubr.msk.f32.gmra.mrb[4].mxu0 %vm333_vm1, %v27626_v37  ;;  %v27646_v37 = vld [vmem:[#allocation2 + $0xe8] sm:$0xff] }
 0x83b   : > { %22258 = vmatprep.mubr.msk.f32.mxu0 %vm333_vm1, %v27630_v20  ;;  %29413 = vst [vmem:[#allocation66_spill] sm:$0xff] %v27646_v37  ;;  %v27650_v20 = vld [vmem:[#allocation2 + $0xf0] sm:$0xff] }
 0x83c   : > { %29414 = vst [vmem:[#allocation67_spill] sm:$0xff] %v27650_v20 }
 0x83e   : > { %22259 = vmatmul.mubr.msk.f32.gmra.mrb[6].mxu0 %vm333_vm1, %v27634_v56  ;;  %v27654_v56 = vld [vmem:[#allocation2 + $0x108] sm:$0xff] }
 0x83f   : > { %22261 = vmatprep.mubr.msk.f32.mxu0 %vm333_vm1, %v27638_v0  ;;  %29415 = vst [vmem:[#allocation68_spill] sm:$0xff] %v27654_v56  ;;  %v27658_v0 = vld [vmem:[#allocation2 + $0x110] sm:$0xff] }
 0x840   : > { %29416 = vst [vmem:[#allocation69_spill] sm:$0xff] %v27658_v0 }
 0x842   : > { %22262 = vmatmul.mubr.msk.f32.gmra.mrb[8].mxu0 %vm333_vm1, %v27642_v60  ;;  %v27662_v60 = vld [vmem:[#allocation2 + $0x128] sm:$0xff] }
 0x843   : > { %22264 = vmatprep.mubr.msk.f32.mxu0 %vm333_vm1, %v27646_v37  ;;  %v27666_v37 = vld [vmem:[#allocation2 + $0x130] sm:$0xff] }
 0x846   : > { %22265 = vmatmul.mubr.msk.f32.gmra.mrb[10].mxu0 %vm333_vm1, %v27650_v20  ;;  %v27670_v20 = vld [vmem:[#allocation2 + $0x148] sm:$0xff] }
 0x847   : > { %22267 = vmatprep.mubr.msk.f32.mxu0 %vm333_vm1, %v27654_v56  ;;  %v27674_v56 = vld [vmem:[#allocation2 + $0x150] sm:$0xff] }
 0x84a   : > { %22268 = vmatmul.mubr.msk.f32.gmra.mrb[12].mxu0 %vm333_vm1, %v27658_v0  ;;  %v27678_v0 = vld [vmem:[#allocation2 + $0x168] sm:$0xff] }
 0x84b   : > { %22270 = vmatprep.mubr.msk.f32.mxu0 %vm333_vm1, %v27662_v60 }
 0x84e   : > { %22271 = vmatmul.mubr.msk.f32.gmra.mrb[14].mxu0 %vm333_vm1, %v27666_v37 }
 0x84f   : > { %22273 = vmatprep.mubr.msk.f32.mxu0 %vm333_vm1, %v27670_v20 }
 0x852   : > { %22274 = vmatmul.mubr.msk.f32.gmra.mrb[16].mxu0 %vm333_vm1, %v27674_v56 }
 0x853   : > { %22276 = vmatprep.mubr.msk.f32.mxu0 %vm333_vm1, %v27678_v0 }
 0x856   : > { %22277 = vmatmul.mubr.msk.f32.gmra.mrb[18].mxu0 %vm333_vm1, %v26920_v28  ;;  %v27704_v28 = vld [vmem:[#allocation2 + $0x228] sm:$0xff] }
 0x857   : > { %22279 = vmatprep.mubr.msk.f32.mxu0 %vm333_vm1, %v26926_v42  ;;  %v27767_v42 = vld [vmem:[#allocation2 + $0x1a9] sm:$0xff] }
 0x85a   : > { %22280 = vmatmul.mubr.msk.f32.gmra.mrb[20].mxu0 %vm333_vm1, %v26932_v34  ;;  %v27771_v34 = vld [vmem:[#allocation2 + $0x1b1] sm:$0xff] }
 0x85b   : > { %22282 = vmatprep.mubr.msk.f32.mxu0 %vm333_vm1, %v26938_v53  ;;  %v27775_v53 = vld [vmem:[#allocation2 + $0x1c9] sm:$0xff] }
 0x85e   : > { %22283 = vmatmul.mubr.msk.f32.gmra.mrb[22].mxu0 %vm333_vm1, %v26944_v4  ;;  %v27763_v4 = vld [vmem:[#allocation2 + $0x191] sm:$0xff] }
 0x85f   : > { %22285 = vmatprep.mubr.msk.f32.mxu0 %vm333_vm1, %v26950_v52  ;;  %v27708_v52 = vld [vmem:[#allocation2 + $0x230] sm:$0xff] }
 0x862   : > { %22286 = vmatmul.mubr.msk.f32.gmra.mrb[24].mxu0 %vm333_vm1, %v26956_v44  ;;  %v27759_v44 = vld [vmem:[#allocation2 + $0x189] sm:$0xff] }
 0x863   : > { %22288 = vmatprep.mubr.msk.f32.mxu0 %vm333_vm1, %v26962_v18  ;;  %v27755_v18 = vld [vmem:[#allocation2 + $0x171] sm:$0xff] }
 0x866   : > { %22289 = vmatmul.mubr.msk.f32.gmra.mrb[26].mxu0 %vm333_vm1, %v26970_v50  ;;  %v18916_v50 = vld [vmem:[%s28866_s5 + $0x3c] sm:$0xf] }
 0x867   : > { %22291 = vmatprep.mubr.msk.f32.mxu0 %vm333_vm1, %v27117_v45  ;;  %v27779_v45 = vld [vmem:[#allocation2 + $0x1d1] sm:$0xff] }
 0x86a   : > { %22292 = vmatmul.mubr.msk.f32.gmra.mrb[28].mxu0 %vm333_vm1, %v27121_v30  ;;  %v27783_v30 = vld [vmem:[#allocation2 + $0x1e9] sm:$0xff] }
 0x86b   : > { %22294 = vmatprep.mubr.msk.f32.mxu0 %vm333_vm1, %v27704_v28 }
 0x86e   : > { %22295 = vmatmul.mubr.msk.f32.gmra.mrb[30].mxu0 %vm333_vm1, %v27708_v52 }
 0x86f   : > { %22299 = vmatprep.mubr.msk.f32.mxu0 %vm333_vm1, %v27132_v55  ;;  %v27787_v55 = vld [vmem:[#allocation2 + $0x1f1] sm:$0xff] }
 0x872   : > { %22300 = vmatmul.mubr.msk.f32.vlgmr.msra.gmra.mrb[0].mxu0 %vm333_vm1, %v27139_v61  ;;  %v27795_v61 = vld [vmem:[#allocation2 + $0x229] sm:$0xff] }
 0x873   : > { %22348 = vmatpush3.msk.msra.mxu0 %vm643_vm0, %v18882_v33  ;;  %22302 = vmatprep.mubr.msk.f32.mxu0 %vm333_vm1, %v27143_v19  ;;  %v27799_v19 = vld [vmem:[#allocation2 + $0x231] sm:$0xff] }
 0x874   : > { %22397 = vmatprep.subr.msk.mxu0 %vm643_vm0, %v18916_v50  ;;  %v27873_v33 = vld [vmem:[#allocation2 + $0x152] sm:$0xff] }
 0x875   : > { %29418 = vst [vmem:[#allocation71_spill] sm:$0xff] %v27873_v33 }
 0x876   : > { %22303 = vmatmul.mubr.msk.f32.gmra.mrb[2].mxu0 %vm333_vm1, %v27147_v21  ;;  %v12941_v21 = vld [vmem:[#allocation2 + $0x4a] sm:$0xff] }
 0x877   : > { %22305 = vmatprep.mubr.msk.f32.mxu0 %vm333_vm1, %v27151_v29  ;;  %v12942_v29 = vld [vmem:[#allocation2 + $0x52] sm:$0xff] }
 0x87a   : > { %22306 = vmatmul.mubr.msk.f32.gmra.mrb[4].mxu0 %vm333_vm1, %v27155_v12  ;;  %v27807_v12 = vld [vmem:[%s28866_s5 + $0x40] sm:$0xf] }
 0x87b   : > { %22308 = vmatprep.mubr.msk.f32.mxu0 %vm333_vm1, %v27159_v22  ;;  %v27810_v22 = vld [vmem:[#allocation2 + $0x6a] sm:$0xff] }
 0x87e   : > { %22309 = vmatmul.mubr.msk.f32.gmra.mrb[6].mxu0 %vm333_vm1, %v27163_v40  ;;  %v27817_v40 = vld [vmem:[#allocation2 + $0x72] sm:$0xff] }
 0x87f   : > { %22311 = vmatprep.mubr.msk.f32.mxu0 %vm333_vm1, %v27167_v13  ;;  %v27821_v13 = vld [vmem:[#allocation2 + $0x8a] sm:$0xff] }
 0x882   : > { %22312 = vmatmul.mubr.msk.f32.gmra.mrb[8].mxu0 %vm333_vm1, %v27171_v47  ;;  %v27825_v47 = vld [vmem:[#allocation2 + $0x92] sm:$0xff] }
 0x883   : > { %22314 = vmatprep.mubr.msk.f32.mxu0 %vm333_vm1, %v27177_v46  ;;  %v27829_v46 = vld [vmem:[#allocation2 + $0xaa] sm:$0xff] }
 0x886   : > { %22315 = vmatmul.mubr.msk.f32.gmra.mrb[10].mxu0 %vm333_vm1, %v27183_v39  ;;  %v27833_v39 = vld [vmem:[#allocation2 + $0xb2] sm:$0xff] }
 0x887   : > { %22317 = vmatprep.mubr.msk.f32.mxu0 %vm333_vm1, %v27189_v54  ;;  %v27837_v54 = vld [vmem:[#allocation2 + $0xca] sm:$0xff] }
 0x88a   : > { %22318 = vmatmul.mubr.msk.f32.gmra.mrb[12].mxu0 %vm333_vm1, %v27197_v36  ;;  %v27841_v36 = vld [vmem:[#allocation2 + $0xd2] sm:$0xff] }
 0x88b   : > { %22320 = vmatprep.mubr.msk.f32.mxu0 %vm333_vm1, %v27203_v11  ;;  %v27845_v11 = vld [vmem:[#allocation2 + $0xea] sm:$0xff] }
 0x88e   : > { %22321 = vmatmul.mubr.msk.f32.gmra.mrb[14].mxu0 %vm333_vm1, %v27209_v14  ;;  %v27849_v14 = vld [vmem:[#allocation2 + $0xf2] sm:$0xff] }
 0x88f   : > { %22323 = vmatprep.mubr.msk.f32.mxu0 %vm333_vm1, %v27215_v9  ;;  %v27853_v9 = vld [vmem:[#allocation2 + $0x10a] sm:$0xff] }
 0x892   : > { %22324 = vmatmul.mubr.msk.f32.gmra.mrb[16].mxu0 %vm333_vm1, %v27221_v1  ;;  %v27857_v1 = vld [vmem:[#allocation2 + $0x112] sm:$0xff] }
 0x893   : > { %22326 = vmatprep.mubr.msk.f32.mxu0 %vm333_vm1, %v27227_v59  ;;  %v27861_v59 = vld [vmem:[#allocation2 + $0x12a] sm:$0xff] }
 0x896   : > { %22327 = vmatmul.mubr.msk.f32.gmra.mrb[18].mxu0 %vm333_vm1, %v27755_v18 }
 0x897   : > { %22329 = vmatprep.mubr.msk.f32.mxu0 %vm333_vm1, %v27759_v44 }
 0x89a   : > { %22330 = vmatmul.mubr.msk.f32.gmra.mrb[20].mxu0 %vm333_vm1, %v27763_v4 }
 0x89b   : > { %22332 = vmatprep.mubr.msk.f32.mxu0 %vm333_vm1, %v27767_v42 }
 0x89e   : > { %22333 = vmatmul.mubr.msk.f32.gmra.mrb[22].mxu0 %vm333_vm1, %v27771_v34 }
 0x89f   : > { %22335 = vmatprep.mubr.msk.f32.mxu0 %vm333_vm1, %v27775_v53 }
 0x8a2   : > { %22336 = vmatmul.mubr.msk.f32.gmra.mrb[24].mxu0 %vm333_vm1, %v27779_v45 }
 0x8a3   : > { %22338 = vmatprep.mubr.msk.f32.mxu0 %vm333_vm1, %v27783_v30 }
 0x8a6   : > { %22339 = vmatmul.mubr.msk.f32.gmra.mrb[26].mxu0 %vm333_vm1, %v27787_v55 }
 0x8a7   : > { %22341 = vmatprep.mubr.msk.f32.mxu0 %vm333_vm1, %v27269_v10  ;;  %v27865_v10 = vld [vmem:[#allocation2 + $0x132] sm:$0xff] }
 0x8aa   : > { %22342 = vmatmul.mubr.msk.f32.gmra.mrb[28].mxu0 %vm333_vm1, %v27275_v3  ;;  %v27869_v3 = vld [vmem:[#allocation2 + $0x14a] sm:$0xff] }
 0x8ab   : > { %22344 = vmatprep.mubr.msk.f32.mxu0 %vm333_vm1, %v27795_v61  ;;  %29417 = vst [vmem:[#allocation70_spill] sm:$0xff] %v27869_v3 }
 0x8ae   : > { %22345 = vmatmul.mubr.msk.f32.gmra.mrb[30].mxu0 %vm333_vm1, %v27799_v19 }
 0x8af   : > { %22349 = vmatprep.mubr.msk.f32.mxu0 %vm333_vm1, %v12941_v21  ;;  %v27881_v21 = vld [vmem:[#allocation2 + $0x172] sm:$0xff] }
 0x8b0   : > { %29420 = vst [vmem:[#allocation73_spill] sm:$0xff] %v27881_v21 }
 0x8b2   : > { %22350 = vmatmul.mubr.msk.f32.vlgmr.msra.gmra.mrb[0].mxu0 %vm333_vm1, %v12942_v29  ;;  %v27885_v29 = vld [vmem:[#allocation2 + $0x18a] sm:$0xff] }
 0x8b3   : > { %22398 = vmatpush3.msk.msra.mxu0 %vm643_vm0, %v18916_v50  ;;  %22352 = vmatprep.mubr.msk.f32.mxu0 %vm333_vm1, %v27810_v22  ;;  %v27877_v50 = vld [vmem:[#allocation2 + $0x16a] sm:$0xff]  ;;  %29421 = vst [vmem:[#allocation74_spill] sm:$0xff] %v27885_v29 }
 0x8b4   : > { %22447 = vmatprep.subr.msk.mxu0 %vm643_vm0, %v27807_v12  ;;  %29419 = vst [vmem:[#allocation72_spill] sm:$0xff] %v27877_v50 }
 0x8b6   : > { %22353 = vmatmul.mubr.msk.f32.gmra.mrb[2].mxu0 %vm333_vm1, %v27817_v40 }
 0x8b7   : > { %22355 = vmatprep.mubr.msk.f32.mxu0 %vm333_vm1, %v27821_v13 }
 0x8ba   : > { %22356 = vmatmul.mubr.msk.f32.gmra.mrb[4].mxu0 %vm333_vm1, %v27825_v47 }
 0x8bb   : > { %22358 = vmatprep.mubr.msk.f32.mxu0 %vm333_vm1, %v27829_v46 }
 0x8be   : > { %22359 = vmatmul.mubr.msk.f32.gmra.mrb[6].mxu0 %vm333_vm1, %v27833_v39 }
 0x8bf   : > { %22361 = vmatprep.mubr.msk.f32.mxu0 %vm333_vm1, %v27837_v54 }
 0x8c2   : > { %22362 = vmatmul.mubr.msk.f32.gmra.mrb[8].mxu0 %vm333_vm1, %v27841_v36 }
 0x8c3   : > { %22364 = vmatprep.mubr.msk.f32.mxu0 %vm333_vm1, %v27845_v11 }
 0x8c6   : > { %22365 = vmatmul.mubr.msk.f32.gmra.mrb[10].mxu0 %vm333_vm1, %v27849_v14 }
 0x8c7   : > { %22367 = vmatprep.mubr.msk.f32.mxu0 %vm333_vm1, %v27853_v9 }
 0x8ca   : > { %22368 = vmatmul.mubr.msk.f32.gmra.mrb[12].mxu0 %vm333_vm1, %v27857_v1 }
 0x8cb   : > { %22370 = vmatprep.mubr.msk.f32.mxu0 %vm333_vm1, %v27861_v59 }
 0x8ce   : > { %22371 = vmatmul.mubr.msk.f32.gmra.mrb[14].mxu0 %vm333_vm1, %v27865_v10 }
 0x8cf   : > { %22373 = vmatprep.mubr.msk.f32.mxu0 %vm333_vm1, %v27869_v3  ;;  %v27889_v3 = vld [vmem:[#allocation2 + $0x192] sm:$0xff] }
 0x8d0   : > { %29422 = vst [vmem:[#allocation75_spill] sm:$0xff] %v27889_v3 }
 0x8d2   : > { %22374 = vmatmul.mubr.msk.f32.gmra.mrb[16].mxu0 %vm333_vm1, %v27873_v33  ;;  %v27893_v33 = vld [vmem:[#allocation2 + $0x1aa] sm:$0xff] }
 0x8d3   : > { %22376 = vmatprep.mubr.msk.f32.mxu0 %vm333_vm1, %v27877_v50  ;;  %29423 = vst [vmem:[#allocation76_spill] sm:$0xff] %v27893_v33  ;;  %v27897_v50 = vld [vmem:[#allocation2 + $0x1b2] sm:$0xff] }
 0x8d6   : > { %22377 = vmatmul.mubr.msk.f32.gmra.mrb[18].mxu0 %vm333_vm1, %v27881_v21  ;;  %v27901_v21 = vld [vmem:[#allocation2 + $0x1ca] sm:$0xff] }
 0x8d7   : > { %22379 = vmatprep.mubr.msk.f32.mxu0 %vm333_vm1, %v27885_v29  ;;  %29424 = vst [vmem:[#allocation77_spill] sm:$0xff] %v27901_v21  ;;  %v27905_v29 = vld [vmem:[#allocation2 + $0x1d2] sm:$0xff] }
 0x8d8   : > { %29425 = vst [vmem:[#allocation78_spill] sm:$0xff] %v27905_v29 }
 0x8da   : > { %22380 = vmatmul.mubr.msk.f32.gmra.mrb[20].mxu0 %vm333_vm1, %v27889_v3  ;;  %v27909_v3 = vld [vmem:[#allocation2 + $0x1ea] sm:$0xff] }
 0x8db   : > { %22382 = vmatprep.mubr.msk.f32.mxu0 %vm333_vm1, %v27893_v33  ;;  %v27913_v33 = vld [vmem:[#allocation2 + $0x1f2] sm:$0xff] }
 0x8de   : > { %22383 = vmatmul.mubr.msk.f32.gmra.mrb[22].mxu0 %vm333_vm1, %v27897_v50 }
 0x8df   : > { %22385 = vmatprep.mubr.msk.f32.mxu0 %vm333_vm1, %v27901_v21  ;;  %v27921_v21 = vld [vmem:[#allocation2 + $0x22a] sm:$0xff] }
 0x8e2   : > { %22386 = vmatmul.mubr.msk.f32.gmra.mrb[24].mxu0 %vm333_vm1, %v27905_v29  ;;  %v27925_v29 = vld [vmem:[#allocation2 + $0x232] sm:$0xff] }
 0x8e3   : > { %22388 = vmatprep.mubr.msk.f32.mxu0 %vm333_vm1, %v27909_v3 }
 0x8e6   : > { %22389 = vmatmul.mubr.msk.f32.gmra.mrb[26].mxu0 %vm333_vm1, %v27913_v33 }
 0x8e7   : > { %22391 = vmatprep.mubr.msk.f32.mxu0 %vm333_vm1, %v27367_v2  ;;  %v18984_v2 = vld [vmem:[%s28866_s5 + $0x44] sm:$0xf] }
 0x8ea   : > { %22392 = vmatmul.mubr.msk.f32.gmra.mrb[28].mxu0 %vm333_vm1, %v27371_v23  ;;  %v28009_v23 = vld [vmem:[#allocation2 + $0x20e] sm:$0xff] }
 0x8eb   : > { %22394 = vmatprep.mubr.msk.f32.mxu0 %vm333_vm1, %v27921_v21 }
 0x8ee   : > { %22395 = vmatmul.mubr.msk.f32.gmra.mrb[30].mxu0 %vm333_vm1, %v27925_v29 }
 0x8ef   : > { %22399 = vmatprep.mubr.msk.f32.mxu0 %vm333_vm1, %v27380_v51  ;;  %v28015_v51 = vld [vmem:[#allocation2 + $0x246] sm:$0xff] }
 0x8f2   : > { %22400 = vmatmul.mubr.msk.f32.vlgmr.msra.gmra.mrb[0].mxu0 %vm333_vm1, %v27386_v62  ;;  %v28021_v62 = vld [vmem:[#allocation2 + $0x24e] sm:$0xff] }
 0x8f3   : > { %22448 = vmatpush3.msk.msra.mxu0 %vm643_vm0, %v27807_v12  ;;  %22402 = vmatprep.mubr.msk.f32.mxu0 %vm333_vm1, %v27390_v15  ;;  %v19018_v15 = vld [vmem:[%s28866_s5 + $0x48] sm:$0xf]  ;;  %v29435_v12 = vld [vmem:[#allocation30_spill] sm:$0xff] }
 0x8f4   : > { %22497 = vmatprep.subr.msk.mxu0 %vm643_vm0, %v18984_v2 }
 0x8f6   : > { %22403 = vmatmul.mubr.msk.f32.gmra.mrb[2].mxu0 %vm333_vm1, %v27394_v43  ;;  %v29426_v43 = vld [vmem:[#allocation10_spill] sm:$0xff] }
 0x8f7   : > { %22405 = vmatprep.mubr.msk.f32.mxu0 %vm333_vm1, %v27398_v16  ;;  %v29427_v16 = vld [vmem:[#allocation11_spill] sm:$0xff] }
 0x8fa   : > { %22406 = vmatmul.mubr.msk.f32.gmra.mrb[4].mxu0 %vm333_vm1, %v27402_v32  ;;  %v29428_v32 = vld [vmem:[#allocation12_spill] sm:$0xff] }
 0x8fb   : > { %22408 = vmatprep.mubr.msk.f32.mxu0 %vm333_vm1, %v27406_v63  ;;  %v29429_v63 = vld [vmem:[#allocation13_spill] sm:$0xff] }
 0x8fe   : > { %22409 = vmatmul.mubr.msk.f32.gmra.mrb[6].mxu0 %vm333_vm1, %v27410_v27  ;;  %v28005_v27 = vld [vmem:[#allocation2 + $0x206] sm:$0xff] }
 0x8ff   : > { %22411 = vmatprep.mubr.msk.f32.mxu0 %vm333_vm1, %v27414_v35  ;;  %v28001_v35 = vld [vmem:[#allocation2 + $0x1ee] sm:$0xff] }
 0x902   : > { %22412 = vmatmul.mubr.msk.f32.gmra.mrb[8].mxu0 %vm333_vm1, %v27418_v26  ;;  %v27969_v26 = vld [vmem:[#allocation2 + $0x16e] sm:$0xff] }
 0x903   : > { %22414 = vmatprep.mubr.msk.f32.mxu0 %vm333_vm1, %v27422_v7  ;;  %v27997_v7 = vld [vmem:[#allocation2 + $0x1e6] sm:$0xff] }
 0x906   : > { %22415 = vmatmul.mubr.msk.f32.gmra.mrb[10].mxu0 %vm333_vm1, %v27426_v48  ;;  %v27973_v48 = vld [vmem:[#allocation2 + $0x186] sm:$0xff] }
 0x907   : > { %22417 = vmatprep.mubr.msk.f32.mxu0 %vm333_vm1, %v27430_v31  ;;  %v27993_v31 = vld [vmem:[#allocation2 + $0x1ce] sm:$0xff] }
 0x90a   : > { %22418 = vmatmul.mubr.msk.f32.gmra.mrb[12].mxu0 %vm333_vm1, %v27434_v5  ;;  %v27977_v5 = vld [vmem:[#allocation2 + $0x18e] sm:$0xff] }
 0x90b   : > { %22420 = vmatprep.mubr.msk.f32.mxu0 %vm333_vm1, %v27438_v6  ;;  %v27981_v6 = vld [vmem:[#allocation2 + $0x1a6] sm:$0xff] }
 0x90e   : > { %22421 = vmatmul.mubr.msk.f32.gmra.mrb[14].mxu0 %vm333_vm1, %v27442_v49  ;;  %v27989_v49 = vld [vmem:[#allocation2 + $0x1c6] sm:$0xff] }
 0x90f   : > { %22423 = vmatprep.mubr.msk.f32.mxu0 %vm333_vm1, %v27446_v41  ;;  %v27985_v41 = vld [vmem:[#allocation2 + $0x1ae] sm:$0xff] }
 0x912   : > { %22424 = vmatmul.mubr.msk.f32.gmra.mrb[16].mxu0 %vm333_vm1, %v27969_v26 }
 0x913   : > { %22426 = vmatprep.mubr.msk.f32.mxu0 %vm333_vm1, %v27973_v48 }
 0x916   : > { %22427 = vmatmul.mubr.msk.f32.gmra.mrb[18].mxu0 %vm333_vm1, %v27977_v5 }
 0x917   : > { %22429 = vmatprep.mubr.msk.f32.mxu0 %vm333_vm1, %v27981_v6 }
 0x91a   : > { %22430 = vmatmul.mubr.msk.f32.gmra.mrb[20].mxu0 %vm333_vm1, %v27985_v41 }
 0x91b   : > { %22432 = vmatprep.mubr.msk.f32.mxu0 %vm333_vm1, %v27989_v49 }
 0x91e   : > { %22433 = vmatmul.mubr.msk.f32.gmra.mrb[22].mxu0 %vm333_vm1, %v27993_v31 }
 0x91f   : > { %22435 = vmatprep.mubr.msk.f32.mxu0 %vm333_vm1, %v27997_v7 }
 0x922   : > { %22436 = vmatmul.mubr.msk.f32.gmra.mrb[24].mxu0 %vm333_vm1, %v28001_v35 }
 0x923   : > { %22438 = vmatprep.mubr.msk.f32.mxu0 %vm333_vm1, %v28005_v27 }
 0x926   : > { %22439 = vmatmul.mubr.msk.f32.gmra.mrb[26].mxu0 %vm333_vm1, %v28009_v23 }
 0x927   : > { %22441 = vmatprep.mubr.msk.f32.mxu0 %vm333_vm1, %v27472_v25  ;;  %v29430_v25 = vld [vmem:[#allocation14_spill] sm:$0xff] }
 0x92a   : > { %22442 = vmatmul.mubr.msk.f32.gmra.mrb[28].mxu0 %vm333_vm1, %v27476_v24  ;;  %v29431_v24 = vld [vmem:[#allocation15_spill] sm:$0xff] }
 0x92b   : > { %22444 = vmatprep.mubr.msk.f32.mxu0 %vm333_vm1, %v28015_v51 }
 0x92e   : > { %22445 = vmatmul.mubr.msk.f32.gmra.mrb[30].mxu0 %vm333_vm1, %v28021_v62 }
 0x92f   : > { %22449 = vmatprep.mubr.msk.f32.mxu0 %vm333_vm1, %v27487_v38  ;;  %v29432_v38 = vld [vmem:[#allocation17_spill] sm:$0xff] }
 0x932   : > { %22450 = vmatmul.mubr.msk.f32.vlgmr.msra.gmra.mrb[0].mxu0 %vm333_vm1, %v27494_v17  ;;  %v29433_v17 = vld [vmem:[#allocation21_spill] sm:$0xff] }
 0x933   : > { %22498 = vmatpush3.msk.msra.mxu0 %vm643_vm0, %v18984_v2  ;;  %22452 = vmatprep.mubr.msk.f32.mxu0 %vm333_vm1, %v27498_v58  ;;  %v29434_v58 = vld [vmem:[#allocation25_spill] sm:$0xff]  ;;  %v29436_v2 = vld [vmem:[#allocation22_spill] sm:$0xff] }
 0x934   : > { %22547 = vmatprep.subr.msk.mxu0 %vm643_vm0, %v19018_v15 }
 0x936   : > { %22453 = vmatmul.mubr.msk.f32.gmra.mrb[2].mxu0 %vm333_vm1, %v29426_v43  ;;  %v29437_v43 = vld [vmem:[#allocation24_spill] sm:$0xff] }
 0x937   : > { %22455 = vmatprep.mubr.msk.f32.mxu0 %vm333_vm1, %v29427_v16  ;;  %v29438_v16 = vld [vmem:[#allocation35_spill] sm:$0xff] }
 0x93a   : > { %22456 = vmatmul.mubr.msk.f32.gmra.mrb[4].mxu0 %vm333_vm1, %v29428_v32  ;;  %v29439_v32 = vld [vmem:[#allocation37_spill] sm:$0xff] }
 0x93b   : > { %22458 = vmatprep.mubr.msk.f32.mxu0 %vm333_vm1, %v29429_v63  ;;  %v29440_v63 = vld [vmem:[#allocation39_spill] sm:$0xff] }
 0x93e   : > { %22459 = vmatmul.mubr.msk.f32.gmra.mrb[6].mxu0 %vm333_vm1, %v29430_v25  ;;  %v29441_v25 = vld [vmem:[#allocation41_spill] sm:$0xff] }
 0x93f   : > { %22461 = vmatprep.mubr.msk.f32.mxu0 %vm333_vm1, %v29431_v24  ;;  %v29442_v24 = vld [vmem:[#allocation43_spill] sm:$0xff] }
 0x942   : > { %22462 = vmatmul.mubr.msk.f32.gmra.mrb[8].mxu0 %vm333_vm1, %v29432_v38  ;;  %v29443_v38 = vld [vmem:[#allocation45_spill] sm:$0xff] }
 0x943   : > { %22464 = vmatprep.mubr.msk.f32.mxu0 %vm333_vm1, %v29433_v17  ;;  %v29444_v17 = vld [vmem:[#allocation47_spill] sm:$0xff] }
 0x946   : > { %22465 = vmatmul.mubr.msk.f32.gmra.mrb[10].mxu0 %vm333_vm1, %v29434_v58  ;;  %v29445_v58 = vld [vmem:[#allocation49_spill] sm:$0xff] }
 0x947   : > { %22467 = vmatprep.mubr.msk.f32.mxu0 %vm333_vm1, %v29435_v12  ;;  %v29446_v12 = vld [vmem:[#allocation36_spill] sm:$0xff] }
 0x94a   : > { %22468 = vmatmul.mubr.msk.f32.gmra.mrb[12].mxu0 %vm333_vm1, %v29436_v2  ;;  %v29447_v2 = vld [vmem:[#allocation38_spill] sm:$0xff] }
 0x94b   : > { %22470 = vmatprep.mubr.msk.f32.mxu0 %vm333_vm1, %v29437_v43  ;;  %v28082_v43 = vld [vmem:[#allocation2 + $0x207] sm:$0xff] }
 0x94e   : > { %22471 = vmatmul.mubr.msk.f32.gmra.mrb[14].mxu0 %vm333_vm1, %v29438_v16  ;;  %v28086_v16 = vld [vmem:[#allocation2 + $0x20f] sm:$0xff] }
 0x94f   : > { %22473 = vmatprep.mubr.msk.f32.mxu0 %vm333_vm1, %v29439_v32  ;;  %v29448_v32 = vld [vmem:[#allocation40_spill] sm:$0xff] }
 0x952   : > { %22474 = vmatmul.mubr.msk.f32.gmra.mrb[16].mxu0 %vm333_vm1, %v29440_v63  ;;  %v28098_v63 = vld [vmem:[#allocation2 + $0x24f] sm:$0xff] }
 0x953   : > { %22476 = vmatprep.mubr.msk.f32.mxu0 %vm333_vm1, %v29441_v25  ;;  %v29449_v25 = vld [vmem:[#allocation42_spill] sm:$0xff] }
 0x956   : > { %22477 = vmatmul.mubr.msk.f32.gmra.mrb[18].mxu0 %vm333_vm1, %v29442_v24  ;;  %v29450_v24 = vld [vmem:[#allocation44_spill] sm:$0xff] }
 0x957   : > { %22479 = vmatprep.mubr.msk.f32.mxu0 %vm333_vm1, %v29443_v38  ;;  %v29451_v38 = vld [vmem:[#allocation46_spill] sm:$0xff] }
 0x95a   : > { %22480 = vmatmul.mubr.msk.f32.gmra.mrb[20].mxu0 %vm333_vm1, %v27574_v8  ;;  %v28092_v8 = vld [vmem:[#allocation2 + $0x247] sm:$0xff] }
 0x95b   : > { %22482 = vmatprep.mubr.msk.f32.mxu0 %vm333_vm1, %v29444_v17  ;;  %v29452_v17 = vld [vmem:[#allocation48_spill] sm:$0xff] }
 0x95e   : > { %22483 = vmatmul.mubr.msk.f32.gmra.mrb[22].mxu0 %vm333_vm1, %v29445_v58  ;;  %v29453_v58 = vld [vmem:[#allocation50_spill] sm:$0xff] }
 0x95f   : > { %22485 = vmatprep.mubr.msk.f32.mxu0 %vm333_vm1, %v29446_v12  ;;  %v29454_v12 = vld [vmem:[#allocation63_spill] sm:$0xff] }
 0x962   : > { %22486 = vmatmul.mubr.msk.f32.gmra.mrb[24].mxu0 %vm333_vm1, %v29447_v2  ;;  %v29455_v2 = vld [vmem:[#allocation64_spill] sm:$0xff] }
 0x963   : > { %22488 = vmatprep.mubr.msk.f32.mxu0 %vm333_vm1, %v28082_v43 }
 0x966   : > { %22489 = vmatmul.mubr.msk.f32.gmra.mrb[26].mxu0 %vm333_vm1, %v28086_v16 }
 0x967   : > { %22491 = vmatprep.mubr.msk.f32.mxu0 %vm333_vm1, %v27598_v57  ;;  %v19052_v57 = vld [vmem:[%s28866_s5 + $0x4c] sm:$0xf] }
 0x96a   : > { %22492 = vmatmul.mubr.msk.f32.gmra.mrb[28].mxu0 %vm333_vm1, %v29448_v32  ;;  %v29456_v32 = vld [vmem:[#allocation65_spill] sm:$0xff] }
 0x96b   : > { %22494 = vmatprep.mubr.msk.f32.mxu0 %vm333_vm1, %v28092_v8 }
 0x96e   : > { %22495 = vmatmul.mubr.msk.f32.gmra.mrb[30].mxu0 %vm333_vm1, %v28098_v63 }
 0x96f   : > { %22499 = vmatprep.mubr.msk.f32.mxu0 %vm333_vm1, %v29449_v25  ;;  %v29458_v25 = vld [vmem:[#allocation67_spill] sm:$0xff] }
 0x972   : > { %22500 = vmatmul.mubr.msk.f32.vlgmr.msra.gmra.mrb[0].mxu0 %vm333_vm1, %v29450_v24  ;;  %v29459_v24 = vld [vmem:[#allocation68_spill] sm:$0xff] }
 0x973   : > { %22548 = vmatpush3.msk.msra.mxu0 %vm643_vm0, %v19018_v15  ;;  %22502 = vmatprep.mubr.msk.f32.mxu0 %vm333_vm1, %v29451_v38  ;;  %v29457_v15 = vld [vmem:[#allocation66_spill] sm:$0xff]  ;;  %v29460_v38 = vld [vmem:[#allocation69_spill] sm:$0xff] }
 0x974   : > { %22597 = vmatprep.subr.msk.mxu0 %vm643_vm0, %v19052_v57 }
 0x976   : > { %22503 = vmatmul.mubr.msk.f32.gmra.mrb[2].mxu0 %vm333_vm1, %v29452_v17  ;;  %v28141_v17 = vld [vmem:[#allocation2 + $0x170] sm:$0xff] }
 0x977   : > { %22505 = vmatprep.mubr.msk.f32.mxu0 %vm333_vm1, %v29453_v58  ;;  %v28145_v58 = vld [vmem:[#allocation2 + $0x188] sm:$0xff] }
 0x97a   : > { %22506 = vmatmul.mubr.msk.f32.gmra.mrb[4].mxu0 %vm333_vm1, %v29454_v12  ;;  %v28169_v12 = vld [vmem:[#allocation2 + $0x1e8] sm:$0xff] }
 0x97b   : > { %22508 = vmatprep.mubr.msk.f32.mxu0 %vm333_vm1, %v29455_v2  ;;  %v28173_v2 = vld [vmem:[#allocation2 + $0x1f0] sm:$0xff] }
 0x97e   : > { %22509 = vmatmul.mubr.msk.f32.gmra.mrb[6].mxu0 %vm333_vm1, %v29456_v32  ;;  %v28177_v32 = vld [vmem:[#allocation2 + $0x208] sm:$0xff] }
 0x97f   : > { %22511 = vmatprep.mubr.msk.f32.mxu0 %vm333_vm1, %v29457_v15  ;;  %29461 = vst [vmem:[#allocation10_spill] sm:$0xff] %v28177_v32  ;;  %v28181_v15 = vld [vmem:[#allocation2 + $0x210] sm:$0xff] }
 0x980   : > { %29462 = vst [vmem:[#allocation11_spill] sm:$0xff] %v28181_v15 }
 0x982   : > { %22512 = vmatmul.mubr.msk.f32.gmra.mrb[8].mxu0 %vm333_vm1, %v29458_v25  ;;  %v28187_v25 = vld [vmem:[#allocation2 + $0x248] sm:$0xff] }
 0x983   : > { %22514 = vmatprep.mubr.msk.f32.mxu0 %vm333_vm1, %v29459_v24  ;;  %v28193_v24 = vld [vmem:[#allocation2 + $0x250] sm:$0xff] }
 0x986   : > { %22515 = vmatmul.mubr.msk.f32.gmra.mrb[10].mxu0 %vm333_vm1, %v29460_v38  ;;  %v14501_v38 = vld [vmem:[#allocation2 + $0x69] sm:$0xff] }
 0x987   : > { %22517 = vmatprep.mubr.msk.f32.mxu0 %vm333_vm1, %v27662_v60  ;;  %v28149_v60 = vld [vmem:[#allocation2 + $0x190] sm:$0xff] }
 0x98a   : > { %22518 = vmatmul.mubr.msk.f32.gmra.mrb[12].mxu0 %vm333_vm1, %v27666_v37  ;;  %v28153_v37 = vld [vmem:[#allocation2 + $0x1a8] sm:$0xff] }
 0x98b   : > { %22520 = vmatprep.mubr.msk.f32.mxu0 %vm333_vm1, %v27670_v20  ;;  %v28165_v20 = vld [vmem:[#allocation2 + $0x1d0] sm:$0xff] }
 0x98e   : > { %22521 = vmatmul.mubr.msk.f32.gmra.mrb[14].mxu0 %vm333_vm1, %v27674_v56  ;;  %v28161_v56 = vld [vmem:[#allocation2 + $0x1c8] sm:$0xff] }
 0x98f   : > { %22523 = vmatprep.mubr.msk.f32.mxu0 %vm333_vm1, %v27678_v0  ;;  %v28157_v0 = vld [vmem:[#allocation2 + $0x1b0] sm:$0xff] }
 0x992   : > { %22524 = vmatmul.mubr.msk.f32.gmra.mrb[16].mxu0 %vm333_vm1, %v28141_v17 }
 0x993   : > { %22526 = vmatprep.mubr.msk.f32.mxu0 %vm333_vm1, %v28145_v58 }
 0x996   : > { %22527 = vmatmul.mubr.msk.f32.gmra.mrb[18].mxu0 %vm333_vm1, %v28149_v60 }
 0x997   : > { %22529 = vmatprep.mubr.msk.f32.mxu0 %vm333_vm1, %v28153_v37 }
 0x99a   : > { %22530 = vmatmul.mubr.msk.f32.gmra.mrb[20].mxu0 %vm333_vm1, %v28157_v0 }
 0x99b   : > { %22532 = vmatprep.mubr.msk.f32.mxu0 %vm333_vm1, %v28161_v56 }
 0x99e   : > { %22533 = vmatmul.mubr.msk.f32.gmra.mrb[22].mxu0 %vm333_vm1, %v28165_v20 }
 0x99f   : > { %22535 = vmatprep.mubr.msk.f32.mxu0 %vm333_vm1, %v28169_v12 }
 0x9a2   : > { %22536 = vmatmul.mubr.msk.f32.gmra.mrb[24].mxu0 %vm333_vm1, %v28173_v2 }
 0x9a3   : > { %22538 = vmatprep.mubr.msk.f32.mxu0 %vm333_vm1, %v28177_v32  ;;  %v28202_v32 = vld [vmem:[#allocation2 + $0x89] sm:$0xff] }
 0x9a4   : > { %29463 = vst [vmem:[#allocation12_spill] sm:$0xff] %v28202_v32 }
 0x9a6   : > { %22539 = vmatmul.mubr.msk.f32.gmra.mrb[26].mxu0 %vm333_vm1, %v28181_v15  ;;  %v14502_v15 = vld [vmem:[#allocation2 + $0x71] sm:$0xff] }
 0x9a7   : > { %22541 = vmatprep.mubr.msk.f32.mxu0 %vm333_vm1, %v27704_v28  ;;  %v19086_v28 = vld [vmem:[%s28866_s5 + $0x50] sm:$0xf] }
 0x9aa   : > { %22542 = vmatmul.mubr.msk.f32.gmra.mrb[28].mxu0 %vm333_vm1, %v27708_v52  ;;  %v28208_v52 = vld [vmem:[#allocation2 + $0x91] sm:$0xff] }
 0x9ab   : > { %22544 = vmatprep.mubr.msk.f32.mxu0 %vm333_vm1, %v28187_v25  ;;  %29464 = vst [vmem:[#allocation13_spill] sm:$0xff] %v28208_v52 }
 0x9ae   : > { %22545 = vmatmul.mubr.msk.f32.gmra.mrb[30].mxu0 %vm333_vm1, %v28193_v24 }
 0x9af   : > { %22549 = vmatprep.mubr.msk.f32.mxu0 %vm333_vm1, %v14501_v38  ;;  %v28212_v38 = vld [vmem:[#allocation2 + $0xa9] sm:$0xff] }
 0x9b0   : > { %29465 = vst [vmem:[#allocation14_spill] sm:$0xff] %v28212_v38 }
 0x9b2   : > { %22550 = vmatmul.mubr.msk.f32.vlgmr.msra.gmra.mrb[0].mxu0 %vm333_vm1, %v14502_v15  ;;  %v28216_v15 = vld [vmem:[#allocation2 + $0xb1] sm:$0xff] }
 0x9b3   : > { %22598 = vmatpush3.msk.msra.mxu0 %vm643_vm0, %v19052_v57  ;;  %22552 = vmatprep.mubr.msk.f32.mxu0 %vm333_vm1, %v28202_v32  ;;  %29466 = vst [vmem:[#allocation15_spill] sm:$0xff] %v28216_v15  ;;  %v28220_v57 = vld [vmem:[#allocation2 + $0xc9] sm:$0xff]  ;;  %v28224_v32 = vld [vmem:[#allocation2 + $0xd1] sm:$0xff] }
 0x9b4   : > { %22647 = vmatprep.subr.msk.mxu0 %vm643_vm0, %v19086_v28  ;;  %29467 = vst [vmem:[#allocation17_spill] sm:$0xff] %v28220_v57  ;;  %29468 = vst [vmem:[#allocation21_spill] sm:$0xff] %v28224_v32 }
 0x9b6   : > { %22553 = vmatmul.mubr.msk.f32.gmra.mrb[2].mxu0 %vm333_vm1, %v28208_v52  ;;  %v28228_v52 = vld [vmem:[#allocation2 + $0xe9] sm:$0xff] }
 0x9b7   : > { %22555 = vmatprep.mubr.msk.f32.mxu0 %vm333_vm1, %v28212_v38  ;;  %29469 = vst [vmem:[#allocation25_spill] sm:$0xff] %v28228_v52  ;;  %v28232_v38 = vld [vmem:[#allocation2 + $0xf1] sm:$0xff] }
 0x9b8   : > { %29470 = vst [vmem:[#allocation30_spill] sm:$0xff] %v28232_v38 }
 0x9ba   : > { %22556 = vmatmul.mubr.msk.f32.gmra.mrb[4].mxu0 %vm333_vm1, %v28216_v15  ;;  %v28236_v15 = vld [vmem:[#allocation2 + $0x109] sm:$0xff] }
 0x9bb   : > { %22558 = vmatprep.mubr.msk.f32.mxu0 %vm333_vm1, %v28220_v57  ;;  %29471 = vst [vmem:[#allocation22_spill] sm:$0xff] %v28236_v15  ;;  %v28240_v57 = vld [vmem:[#allocation2 + $0x111] sm:$0xff] }
 0x9bc   : > { %29472 = vst [vmem:[#allocation24_spill] sm:$0xff] %v28240_v57 }
 0x9be   : > { %22559 = vmatmul.mubr.msk.f32.gmra.mrb[6].mxu0 %vm333_vm1, %v28224_v32  ;;  %v28244_v32 = vld [vmem:[#allocation2 + $0x129] sm:$0xff] }
 0x9bf   : > { %22561 = vmatprep.mubr.msk.f32.mxu0 %vm333_vm1, %v28228_v52  ;;  %v28248_v52 = vld [vmem:[#allocation2 + $0x131] sm:$0xff] }
 0x9c2   : > { %22562 = vmatmul.mubr.msk.f32.gmra.mrb[8].mxu0 %vm333_vm1, %v28232_v38  ;;  %v28252_v38 = vld [vmem:[#allocation2 + $0x149] sm:$0xff] }
 0x9c3   : > { %22564 = vmatprep.mubr.msk.f32.mxu0 %vm333_vm1, %v28236_v15  ;;  %v28256_v15 = vld [vmem:[#allocation2 + $0x151] sm:$0xff] }
 0x9c6   : > { %22565 = vmatmul.mubr.msk.f32.gmra.mrb[10].mxu0 %vm333_vm1, %v28240_v57  ;;  %v28260_v57 = vld [vmem:[#allocation2 + $0x169] sm:$0xff] }
 0x9c7   : > { %22567 = vmatprep.mubr.msk.f32.mxu0 %vm333_vm1, %v28244_v32 }
 0x9ca   : > { %22568 = vmatmul.mubr.msk.f32.gmra.mrb[12].mxu0 %vm333_vm1, %v28248_v52 }
 0x9cb   : > { %22570 = vmatprep.mubr.msk.f32.mxu0 %vm333_vm1, %v28252_v38 }
 0x9ce   : > { %22571 = vmatmul.mubr.msk.f32.gmra.mrb[14].mxu0 %vm333_vm1, %v28256_v15 }
 0x9cf   : > { %22573 = vmatprep.mubr.msk.f32.mxu0 %vm333_vm1, %v28260_v57 }
 0x9d2   : > { %22574 = vmatmul.mubr.msk.f32.gmra.mrb[16].mxu0 %vm333_vm1, %v27755_v18  ;;  %v28282_v18 = vld [vmem:[#allocation2 + $0x209] sm:$0xff] }
 0x9d3   : > { %22576 = vmatprep.mubr.msk.f32.mxu0 %vm333_vm1, %v27759_v44  ;;  %v28286_v44 = vld [vmem:[#allocation2 + $0x211] sm:$0xff] }
 0x9d6   : > { %22577 = vmatmul.mubr.msk.f32.gmra.mrb[18].mxu0 %vm333_vm1, %v27763_v4  ;;  %v28292_v4 = vld [vmem:[#allocation2 + $0x249] sm:$0xff] }
 0x9d7   : > { %22579 = vmatprep.mubr.msk.f32.mxu0 %vm333_vm1, %v27767_v42  ;;  %v28298_v42 = vld [vmem:[#allocation2 + $0x251] sm:$0xff] }
 0x9da   : > { %22580 = vmatmul.mubr.msk.f32.gmra.mrb[20].mxu0 %vm333_vm1, %v27771_v34  ;;  %v19120_v34 = vld [vmem:[%s28866_s5 + $0x54] sm:$0xf] }
 0x9db   : > { %22582 = vmatprep.mubr.msk.f32.mxu0 %vm333_vm1, %v27775_v53  ;;  %v29473_v53 = vld [vmem:[#allocation70_spill] sm:$0xff] }
 0x9de   : > { %22583 = vmatmul.mubr.msk.f32.gmra.mrb[22].mxu0 %vm333_vm1, %v27779_v45  ;;  %v29474_v45 = vld [vmem:[#allocation71_spill] sm:$0xff] }
 0x9df   : > { %22585 = vmatprep.mubr.msk.f32.mxu0 %vm333_vm1, %v27783_v30  ;;  %v29475_v30 = vld [vmem:[#allocation72_spill] sm:$0xff] }
 0x9e2   : > { %22586 = vmatmul.mubr.msk.f32.gmra.mrb[24].mxu0 %vm333_vm1, %v27787_v55  ;;  %v29476_v55 = vld [vmem:[#allocation73_spill] sm:$0xff] }
 0x9e3   : > { %22588 = vmatprep.mubr.msk.f32.mxu0 %vm333_vm1, %v28282_v18 }
 0x9e6   : > { %22589 = vmatmul.mubr.msk.f32.gmra.mrb[26].mxu0 %vm333_vm1, %v28286_v44 }
 0x9e7   : > { %22591 = vmatprep.mubr.msk.f32.mxu0 %vm333_vm1, %v27795_v61  ;;  %v29477_v61 = vld [vmem:[#allocation74_spill] sm:$0xff] }
 0x9ea   : > { %22592 = vmatmul.mubr.msk.f32.gmra.mrb[28].mxu0 %vm333_vm1, %v27799_v19  ;;  %v29478_v19 = vld [vmem:[#allocation75_spill] sm:$0xff] }
 0x9eb   : > { %22594 = vmatprep.mubr.msk.f32.mxu0 %vm333_vm1, %v28292_v4 }
 0x9ee   : > { %22595 = vmatmul.mubr.msk.f32.gmra.mrb[30].mxu0 %vm333_vm1, %v28298_v42 }
 0x9ef   : > { %22599 = vmatprep.mubr.msk.f32.mxu0 %vm333_vm1, %v27810_v22  ;;  %v29479_v22 = vld [vmem:[#allocation76_spill] sm:$0xff] }
 0x9f2   : > { %22600 = vmatmul.mubr.msk.f32.vlgmr.msra.gmra.mrb[0].mxu0 %vm333_vm1, %v27817_v40  ;;  %v29480_v40 = vld [vmem:[#allocation77_spill] sm:$0xff] }
 0x9f3   : > { %22648 = vmatpush3.msk.msra.mxu0 %vm643_vm0, %v19086_v28  ;;  %22602 = vmatprep.mubr.msk.f32.mxu0 %vm333_vm1, %v27821_v13  ;;  %v29481_v13 = vld [vmem:[#allocation78_spill] sm:$0xff]  ;;  %v15293_v28 = vld [vmem:[#allocation2 + $0x12e] sm:$0xff] }
 0x9f4   : > { %22697 = vmatprep.subr.msk.mxu0 %vm643_vm0, %v19120_v34 }
 0x9f6   : > { %22603 = vmatmul.mubr.msk.f32.gmra.mrb[2].mxu0 %vm333_vm1, %v27825_v47  ;;  %v28359_v47 = vld [vmem:[#allocation2 + $0x20a] sm:$0xff] }
 0x9f7   : > { %22605 = vmatprep.mubr.msk.f32.mxu0 %vm333_vm1, %v27829_v46  ;;  %v28363_v46 = vld [vmem:[#allocation2 + $0x212] sm:$0xff] }
 0x9fa   : > { %22606 = vmatmul.mubr.msk.f32.gmra.mrb[4].mxu0 %vm333_vm1, %v27833_v39  ;;  %v28369_v39 = vld [vmem:[#allocation2 + $0x24a] sm:$0xff] }
 0x9fb   : > { %22608 = vmatprep.mubr.msk.f32.mxu0 %vm333_vm1, %v27837_v54  ;;  %v28375_v54 = vld [vmem:[#allocation2 + $0x252] sm:$0xff] }
 0x9fe   : > { %22609 = vmatmul.mubr.msk.f32.gmra.mrb[6].mxu0 %vm333_vm1, %v27841_v36  ;;  %v15282_v36 = vld [vmem:[#allocation2 + $0x86] sm:$0xff] }
 0x9ff   : > { %22611 = vmatprep.mubr.msk.f32.mxu0 %vm333_vm1, %v27845_v11  ;;  %v15283_v11 = vld [vmem:[#allocation2 + $0x8e] sm:$0xff] }
 0xa02   : > { %22612 = vmatmul.mubr.msk.f32.gmra.mrb[8].mxu0 %vm333_vm1, %v27849_v14  ;;  %v19154_v14 = vld [vmem:[%s28866_s5 + $0x58] sm:$0xf] }
 0xa03   : > { %22614 = vmatprep.mubr.msk.f32.mxu0 %vm333_vm1, %v27853_v9  ;;  %v15284_v9 = vld [vmem:[#allocation2 + $0xa6] sm:$0xff] }
 0xa06   : > { %22615 = vmatmul.mubr.msk.f32.gmra.mrb[10].mxu0 %vm333_vm1, %v27857_v1  ;;  %v15285_v1 = vld [vmem:[#allocation2 + $0xae] sm:$0xff] }
 0xa07   : > { %22617 = vmatprep.mubr.msk.f32.mxu0 %vm333_vm1, %v27861_v59  ;;  %v15286_v59 = vld [vmem:[#allocation2 + $0xc6] sm:$0xff] }
 0xa0a   : > { %22618 = vmatmul.mubr.msk.f32.gmra.mrb[12].mxu0 %vm333_vm1, %v27865_v10  ;;  %v15287_v10 = vld [vmem:[#allocation2 + $0xce] sm:$0xff] }
 0xa0b   : > { %22620 = vmatprep.mubr.msk.f32.mxu0 %vm333_vm1, %v29473_v53  ;;  %v15295_v53 = vld [vmem:[#allocation2 + $0x14e] sm:$0xff] }
 0xa0e   : > { %22621 = vmatmul.mubr.msk.f32.gmra.mrb[14].mxu0 %vm333_vm1, %v29474_v45  ;;  %v15296_v45 = vld [vmem:[#allocation2 + $0x166] sm:$0xff] }
 0xa0f   : > { %22623 = vmatprep.mubr.msk.f32.mxu0 %vm333_vm1, %v29475_v30  ;;  %v15680_v30 = vld [vmem:[#allocation2 + $0x107] sm:$0xff] }
 0xa12   : > { %22624 = vmatmul.mubr.msk.f32.gmra.mrb[16].mxu0 %vm333_vm1, %v29476_v55  ;;  %v15681_v55 = vld [vmem:[#allocation2 + $0x10f] sm:$0xff] }
 0xa13   : > { %22626 = vmatprep.mubr.msk.f32.mxu0 %vm333_vm1, %v29477_v61  ;;  %v15682_v61 = vld [vmem:[#allocation2 + $0x127] sm:$0xff] }
 0xa16   : > { %22627 = vmatmul.mubr.msk.f32.gmra.mrb[18].mxu0 %vm333_vm1, %v29478_v19  ;;  %v15683_v19 = vld [vmem:[#allocation2 + $0x12f] sm:$0xff] }
 0xa17   : > { %22629 = vmatprep.mubr.msk.f32.mxu0 %vm333_vm1, %v29479_v22  ;;  %v15684_v22 = vld [vmem:[#allocation2 + $0x147] sm:$0xff] }
 0xa1a   : > { %22630 = vmatmul.mubr.msk.f32.gmra.mrb[20].mxu0 %vm333_vm1, %v27897_v50  ;;  %v15290_v50 = vld [vmem:[#allocation2 + $0x106] sm:$0xff] }
 0xa1b   : > { %22632 = vmatprep.mubr.msk.f32.mxu0 %vm333_vm1, %v29480_v40  ;;  %v15685_v40 = vld [vmem:[#allocation2 + $0x14f] sm:$0xff] }
 0xa1e   : > { %22633 = vmatmul.mubr.msk.f32.gmra.mrb[22].mxu0 %vm333_vm1, %v29481_v13  ;;  %v15686_v13 = vld [vmem:[#allocation2 + $0x167] sm:$0xff] }
 0xa1f   : > { %22635 = vmatprep.mubr.msk.f32.mxu0 %vm333_vm1, %v27909_v3  ;;  %v15288_v3 = vld [vmem:[#allocation2 + $0xe6] sm:$0xff] }
 0xa22   : > { %22636 = vmatmul.mubr.msk.f32.gmra.mrb[24].mxu0 %vm333_vm1, %v27913_v33  ;;  %v15289_v33 = vld [vmem:[#allocation2 + $0xee] sm:$0xff] }
 0xa23   : > { %22638 = vmatprep.mubr.msk.f32.mxu0 %vm333_vm1, %v28359_v47 }
 0xa26   : > { %22639 = vmatmul.mubr.msk.f32.gmra.mrb[26].mxu0 %vm333_vm1, %v28363_v46 }
 0xa27   : > { %22641 = vmatprep.mubr.msk.f32.mxu0 %vm333_vm1, %v27921_v21  ;;  %v15291_v21 = vld [vmem:[#allocation2 + $0x10e] sm:$0xff] }
 0xa2a   : > { %22642 = vmatmul.mubr.msk.f32.gmra.mrb[28].mxu0 %vm333_vm1, %v27925_v29  ;;  %v15292_v29 = vld [vmem:[#allocation2 + $0x126] sm:$0xff] }
 0xa2b   : > { %22644 = vmatprep.mubr.msk.f32.mxu0 %vm333_vm1, %v28369_v39 }
 0xa2e   : > { %22645 = vmatmul.mubr.msk.f32.gmra.mrb[30].mxu0 %vm333_vm1, %v28375_v54 }
 0xa2f   : > { %22649 = vmatprep.mubr.msk.f32.mxu0 %vm333_vm1, %v15282_v36  ;;  %v15687_v36 = vld [vmem:[#allocation2 + $0x16f] sm:$0xff] }
 0xa32   : > { %22650 = vmatmul.mubr.msk.f32.vlgmr.msra.gmra.mrb[0].mxu0 %vm333_vm1, %v15283_v11  ;;  %v15688_v11 = vld [vmem:[#allocation2 + $0x187] sm:$0xff] }
 0xa33   : > { %22698 = vmatpush3.msk.msra.mxu0 %vm643_vm0, %v19120_v34  ;;  %22652 = vmatprep.mubr.msk.f32.mxu0 %vm333_vm1, %v15284_v9  ;;  %v15294_v34 = vld [vmem:[#allocation2 + $0x146] sm:$0xff] }
 0xa34   : > { %22747 = vmatprep.subr.msk.mxu0 %vm643_vm0, %v19154_v14  ;;  %v15690_v9 = vld [vmem:[#allocation2 + $0x1a7] sm:$0xff] }
 0xa36   : > { %22653 = vmatmul.mubr.msk.f32.gmra.mrb[2].mxu0 %vm333_vm1, %v15285_v1  ;;  %v15691_v1 = vld [vmem:[#allocation2 + $0x1af] sm:$0xff] }
 0xa37   : > { %22655 = vmatprep.mubr.msk.f32.mxu0 %vm333_vm1, %v15286_v59  ;;  %v15692_v59 = vld [vmem:[#allocation2 + $0x1c7] sm:$0xff] }
 0xa3a   : > { %22656 = vmatmul.mubr.msk.f32.gmra.mrb[4].mxu0 %vm333_vm1, %v15287_v10  ;;  %v15693_v10 = vld [vmem:[#allocation2 + $0x1cf] sm:$0xff] }
 0xa3b   : > { %22658 = vmatprep.mubr.msk.f32.mxu0 %vm333_vm1, %v15288_v3  ;;  %v15694_v3 = vld [vmem:[#allocation2 + $0x1e7] sm:$0xff] }
 0xa3e   : > { %22659 = vmatmul.mubr.msk.f32.gmra.mrb[6].mxu0 %vm333_vm1, %v15289_v33  ;;  %v15695_v33 = vld [vmem:[#allocation2 + $0x1ef] sm:$0xff] }
 0xa3f   : > { %22661 = vmatprep.mubr.msk.f32.mxu0 %vm333_vm1, %v15290_v50  ;;  %v15698_v50 = vld [vmem:[#allocation2 + $0x227] sm:$0xff] }
 0xa42   : > { %22662 = vmatmul.mubr.msk.f32.gmra.mrb[8].mxu0 %vm333_vm1, %v15291_v21  ;;  %v15699_v21 = vld [vmem:[#allocation2 + $0x22f] sm:$0xff] }
 0xa43   : > { %22664 = vmatprep.mubr.msk.f32.mxu0 %vm333_vm1, %v15292_v29  ;;  %v15702_v29 = vld [vmem:[#allocation2 + $0x267] sm:$0xff] }
 0xa46   : > { %22665 = vmatmul.mubr.msk.f32.gmra.mrb[10].mxu0 %vm333_vm1, %v15293_v28  ;;  %v15703_v28 = vld [vmem:[#allocation2 + $0x26f] sm:$0xff] }
 0xa47   : > { %22667 = vmatprep.mubr.msk.f32.mxu0 %vm333_vm1, %v15294_v34  ;;  %v19222_v34 = vld [vmem:[%s28866_s5 + $0x60] sm:$0xf] }
 0xa4a   : > { %22668 = vmatmul.mubr.msk.f32.gmra.mrb[12].mxu0 %vm333_vm1, %v15295_v53  ;;  %v16066_v53 = vld [vmem:[#allocation2 + $0xc8] sm:$0xff] }
 0xa4b   : > { %22670 = vmatprep.mubr.msk.f32.mxu0 %vm333_vm1, %v15296_v45  ;;  %v16067_v45 = vld [vmem:[#allocation2 + $0xd0] sm:$0xff] }
 0xa4e   : > { %22671 = vmatmul.mubr.msk.f32.gmra.mrb[14].mxu0 %vm333_vm1, %v27969_v26  ;;  %v15308_v26 = vld [vmem:[#allocation2 + $0x226] sm:$0xff] }
 0xa4f   : > { %22673 = vmatprep.mubr.msk.f32.mxu0 %vm333_vm1, %v27973_v48  ;;  %v15309_v48 = vld [vmem:[#allocation2 + $0x22e] sm:$0xff] }
 0xa52   : > { %22674 = vmatmul.mubr.msk.f32.gmra.mrb[16].mxu0 %vm333_vm1, %v27977_v5  ;;  %v15312_v5 = vld [vmem:[#allocation2 + $0x266] sm:$0xff] }
 0xa53   : > { %22676 = vmatprep.mubr.msk.f32.mxu0 %vm333_vm1, %v27981_v6  ;;  %v15313_v6 = vld [vmem:[#allocation2 + $0x26e] sm:$0xff] }
 0xa56   : > { %22677 = vmatmul.mubr.msk.f32.gmra.mrb[18].mxu0 %vm333_vm1, %v27985_v41  ;;  %v15672_v41 = vld [vmem:[#allocation2 + $0x87] sm:$0xff] }
 0xa57   : > { %22679 = vmatprep.mubr.msk.f32.mxu0 %vm333_vm1, %v27989_v49  ;;  %v15673_v49 = vld [vmem:[#allocation2 + $0x8f] sm:$0xff] }
 0xa5a   : > { %22680 = vmatmul.mubr.msk.f32.gmra.mrb[20].mxu0 %vm333_vm1, %v27993_v31  ;;  %v28433_v31 = vld [vmem:[%s28866_s5 + $0x5c] sm:$0xf] }
 0xa5b   : > { %22682 = vmatprep.mubr.msk.f32.mxu0 %vm333_vm1, %v27997_v7  ;;  %v15674_v7 = vld [vmem:[#allocation2 + $0xa7] sm:$0xff] }
 0xa5e   : > { %22683 = vmatmul.mubr.msk.f32.gmra.mrb[22].mxu0 %vm333_vm1, %v28001_v35  ;;  %v15675_v35 = vld [vmem:[#allocation2 + $0xaf] sm:$0xff] }
 0xa5f   : > { %22685 = vmatprep.mubr.msk.f32.mxu0 %vm333_vm1, %v28005_v27  ;;  %v15676_v27 = vld [vmem:[#allocation2 + $0xc7] sm:$0xff] }
 0xa62   : > { %22686 = vmatmul.mubr.msk.f32.gmra.mrb[24].mxu0 %vm333_vm1, %v28009_v23  ;;  %v15677_v23 = vld [vmem:[#allocation2 + $0xcf] sm:$0xff] }
 0xa63   : > { %22688 = vmatprep.mubr.msk.f32.mxu0 %vm333_vm1, %v15308_v26  ;;  %v16068_v26 = vld [vmem:[#allocation2 + $0xe8] sm:$0xff] }
 0xa66   : > { %22689 = vmatmul.mubr.msk.f32.gmra.mrb[26].mxu0 %vm333_vm1, %v15309_v48  ;;  %v16069_v48 = vld [vmem:[#allocation2 + $0xf0] sm:$0xff] }
 0xa67   : > { %22691 = vmatprep.mubr.msk.f32.mxu0 %vm333_vm1, %v28015_v51  ;;  %v15678_v51 = vld [vmem:[#allocation2 + $0xe7] sm:$0xff] }
 0xa6a   : > { %22692 = vmatmul.mubr.msk.f32.gmra.mrb[28].mxu0 %vm333_vm1, %v28021_v62  ;;  %v15679_v62 = vld [vmem:[#allocation2 + $0xef] sm:$0xff] }
 0xa6b   : > { %22694 = vmatprep.mubr.msk.f32.mxu0 %vm333_vm1, %v15312_v5  ;;  %v16070_v5 = vld [vmem:[#allocation2 + $0x108] sm:$0xff] }
 0xa6e   : > { %22695 = vmatmul.mubr.msk.f32.gmra.mrb[30].mxu0 %vm333_vm1, %v15313_v6  ;;  %v16071_v6 = vld [vmem:[#allocation2 + $0x110] sm:$0xff] }
 0xa6f   : > { %22699 = vmatprep.mubr.msk.f32.mxu0 %vm333_vm1, %v15672_v41  ;;  %v16072_v41 = vld [vmem:[#allocation2 + $0x128] sm:$0xff] }
 0xa72   : > { %22700 = vmatmul.mubr.msk.f32.vlgmr.msra.gmra.mrb[0].mxu0 %vm333_vm1, %v15673_v49  ;;  %v16073_v49 = vld [vmem:[#allocation2 + $0x130] sm:$0xff] }
 0xa73   : > { %22748 = vmatpush3.msk.msra.mxu0 %vm643_vm0, %v19154_v14  ;;  %22702 = vmatprep.mubr.msk.f32.mxu0 %vm333_vm1, %v15674_v7  ;;  %v15689_v14 = vld [vmem:[#allocation2 + $0x18f] sm:$0xff] }
 0xa74   : > { %22797 = vmatprep.subr.msk.mxu0 %vm643_vm0, %v28433_v31  ;;  %v16075_v7 = vld [vmem:[#allocation2 + $0x150] sm:$0xff] }
 0xa76   : > { %22703 = vmatmul.mubr.msk.f32.gmra.mrb[2].mxu0 %vm333_vm1, %v15675_v35  ;;  %v16076_v35 = vld [vmem:[#allocation2 + $0x168] sm:$0xff] }
 0xa77   : > { %22705 = vmatprep.mubr.msk.f32.mxu0 %vm333_vm1, %v15676_v27  ;;  %v29488_v27 = vld [vmem:[#allocation17_spill] sm:$0xff] }
 0xa7a   : > { %22706 = vmatmul.mubr.msk.f32.gmra.mrb[4].mxu0 %vm333_vm1, %v15677_v23  ;;  %v29489_v23 = vld [vmem:[#allocation21_spill] sm:$0xff] }
 0xa7b   : > { %22708 = vmatprep.mubr.msk.f32.mxu0 %vm333_vm1, %v15678_v51  ;;  %v29490_v51 = vld [vmem:[#allocation25_spill] sm:$0xff] }
 0xa7e   : > { %22709 = vmatmul.mubr.msk.f32.gmra.mrb[6].mxu0 %vm333_vm1, %v15679_v62  ;;  %v29491_v62 = vld [vmem:[#allocation30_spill] sm:$0xff] }
 0xa7f   : > { %22711 = vmatprep.mubr.msk.f32.mxu0 %vm333_vm1, %v15680_v30  ;;  %v29492_v30 = vld [vmem:[#allocation22_spill] sm:$0xff] }
 0xa82   : > { %22712 = vmatmul.mubr.msk.f32.gmra.mrb[8].mxu0 %vm333_vm1, %v15681_v55  ;;  %v29493_v55 = vld [vmem:[#allocation24_spill] sm:$0xff] }
 0xa83   : > { %22714 = vmatprep.mubr.msk.f32.mxu0 %vm333_vm1, %v15682_v61  ;;  %v16467_v61 = vld [vmem:[#allocation2 + $0x171] sm:$0xff] }
 0xa86   : > { %22715 = vmatmul.mubr.msk.f32.gmra.mrb[10].mxu0 %vm333_vm1, %v15683_v19  ;;  %v16468_v19 = vld [vmem:[#allocation2 + $0x189] sm:$0xff] }
 0xa87   : > { %22717 = vmatprep.mubr.msk.f32.mxu0 %vm333_vm1, %v15684_v22  ;;  %v16469_v22 = vld [vmem:[#allocation2 + $0x191] sm:$0xff] }
 0xa8a   : > { %22718 = vmatmul.mubr.msk.f32.gmra.mrb[12].mxu0 %vm333_vm1, %v15685_v40  ;;  %v16475_v40 = vld [vmem:[#allocation2 + $0x1f1] sm:$0xff] }
 0xa8b   : > { %22720 = vmatprep.mubr.msk.f32.mxu0 %vm333_vm1, %v15686_v13  ;;  %v16478_v13 = vld [vmem:[#allocation2 + $0x229] sm:$0xff] }
 0xa8e   : > { %22721 = vmatmul.mubr.msk.f32.gmra.mrb[14].mxu0 %vm333_vm1, %v15687_v36  ;;  %v16479_v36 = vld [vmem:[#allocation2 + $0x231] sm:$0xff] }
 0xa8f   : > { %22723 = vmatprep.mubr.msk.f32.mxu0 %vm333_vm1, %v15688_v11  ;;  %v16482_v11 = vld [vmem:[#allocation2 + $0x269] sm:$0xff] }
 0xa92   : > { %22724 = vmatmul.mubr.msk.f32.gmra.mrb[16].mxu0 %vm333_vm1, %v15689_v14  ;;  %v16483_v14 = vld [vmem:[#allocation2 + $0x271] sm:$0xff] }
 0xa93   : > { %22726 = vmatprep.mubr.msk.f32.mxu0 %vm333_vm1, %v15690_v9  ;;  %v16844_v9 = vld [vmem:[#allocation2 + $0xaa] sm:$0xff] }
 0xa96   : > { %22727 = vmatmul.mubr.msk.f32.gmra.mrb[18].mxu0 %vm333_vm1, %v15691_v1  ;;  %v16845_v1 = vld [vmem:[#allocation2 + $0xb2] sm:$0xff] }
 0xa97   : > { %22729 = vmatprep.mubr.msk.f32.mxu0 %vm333_vm1, %v15692_v59  ;;  %v16848_v59 = vld [vmem:[#allocation2 + $0xea] sm:$0xff] }
 0xa9a   : > { %22730 = vmatmul.mubr.msk.f32.gmra.mrb[20].mxu0 %vm333_vm1, %v15693_v10  ;;  %v16849_v10 = vld [vmem:[#allocation2 + $0xf2] sm:$0xff] }
 0xa9b   : > { %22732 = vmatprep.mubr.msk.f32.mxu0 %vm333_vm1, %v15694_v3  ;;  %v16850_v3 = vld [vmem:[#allocation2 + $0x10a] sm:$0xff] }
 0xa9e   : > { %22733 = vmatmul.mubr.msk.f32.gmra.mrb[22].mxu0 %vm333_vm1, %v15695_v33  ;;  %v16851_v33 = vld [vmem:[#allocation2 + $0x112] sm:$0xff] }
 0xa9f   : > { %22735 = vmatprep.mubr.msk.f32.mxu0 %vm333_vm1, %v28082_v43  ;;  %v16062_v43 = vld [vmem:[#allocation2 + $0x88] sm:$0xff] }
 0xaa2   : > { %22736 = vmatmul.mubr.msk.f32.gmra.mrb[24].mxu0 %vm333_vm1, %v28086_v16  ;;  %v16063_v16 = vld [vmem:[#allocation2 + $0x90] sm:$0xff] }
 0xaa3   : > { %22738 = vmatprep.mubr.msk.f32.mxu0 %vm333_vm1, %v15698_v50  ;;  %v16852_v50 = vld [vmem:[#allocation2 + $0x12a] sm:$0xff] }
 0xaa6   : > { %22739 = vmatmul.mubr.msk.f32.gmra.mrb[26].mxu0 %vm333_vm1, %v15699_v21  ;;  %v16853_v21 = vld [vmem:[#allocation2 + $0x132] sm:$0xff] }
 0xaa7   : > { %22741 = vmatprep.mubr.msk.f32.mxu0 %vm333_vm1, %v28092_v8  ;;  %v16064_v8 = vld [vmem:[#allocation2 + $0xa8] sm:$0xff] }
 0xaaa   : > { %22742 = vmatmul.mubr.msk.f32.gmra.mrb[28].mxu0 %vm333_vm1, %v28098_v63  ;;  %v16065_v63 = vld [vmem:[#allocation2 + $0xb0] sm:$0xff] }
 0xaab   : > { %22744 = vmatprep.mubr.msk.f32.mxu0 %vm333_vm1, %v15702_v29  ;;  %v16854_v29 = vld [vmem:[#allocation2 + $0x14a] sm:$0xff] }
 0xaae   : > { %22745 = vmatmul.mubr.msk.f32.gmra.mrb[30].mxu0 %vm333_vm1, %v15703_v28  ;;  %v16855_v28 = vld [vmem:[#allocation2 + $0x152] sm:$0xff] }
 0xaaf   : > { %22749 = vmatprep.mubr.msk.f32.mxu0 %vm333_vm1, %v16062_v43  ;;  %v16856_v43 = vld [vmem:[#allocation2 + $0x16a] sm:$0xff] }
 0xab2   : > { %22750 = vmatmul.mubr.msk.f32.vlgmr.msra.gmra.mrb[0].mxu0 %vm333_vm1, %v16063_v16  ;;  %v16857_v16 = vld [vmem:[#allocation2 + $0x172] sm:$0xff] }
 0xab3   : > { %22798 = vmatpush3.msk.msra.mxu0 %vm643_vm0, %v28433_v31  ;;  %22752 = vmatprep.mubr.msk.f32.mxu0 %vm333_vm1, %v16064_v8  ;;  %v16074_v31 = vld [vmem:[#allocation2 + $0x148] sm:$0xff]  ;;  %v16859_v8 = vld [vmem:[#allocation2 + $0x192] sm:$0xff] }
 0xab4   : > { %22847 = vmatprep.subr.msk.mxu0 %vm643_vm0, %v19222_v34 }
 0xab6   : > { %22753 = vmatmul.mubr.msk.f32.gmra.mrb[2].mxu0 %vm333_vm1, %v16065_v63  ;;  %v16860_v63 = vld [vmem:[#allocation2 + $0x1aa] sm:$0xff] }
 0xab7   : > { %22755 = vmatprep.mubr.msk.f32.mxu0 %vm333_vm1, %v16066_v53  ;;  %v16861_v53 = vld [vmem:[#allocation2 + $0x1b2] sm:$0xff] }
 0xaba   : > { %22756 = vmatmul.mubr.msk.f32.gmra.mrb[4].mxu0 %vm333_vm1, %v16067_v45  ;;  %v16862_v45 = vld [vmem:[#allocation2 + $0x1ca] sm:$0xff] }
 0xabb   : > { %22758 = vmatprep.mubr.msk.f32.mxu0 %vm333_vm1, %v16068_v26  ;;  %v16863_v26 = vld [vmem:[#allocation2 + $0x1d2] sm:$0xff] }
 0xabe   : > { %22759 = vmatmul.mubr.msk.f32.gmra.mrb[6].mxu0 %vm333_vm1, %v16069_v48  ;;  %v16864_v48 = vld [vmem:[#allocation2 + $0x1ea] sm:$0xff] }
 0xabf   : > { %22761 = vmatprep.mubr.msk.f32.mxu0 %vm333_vm1, %v16070_v5  ;;  %v16865_v5 = vld [vmem:[#allocation2 + $0x1f2] sm:$0xff] }
 0xac2   : > { %22762 = vmatmul.mubr.msk.f32.gmra.mrb[8].mxu0 %vm333_vm1, %v16071_v6  ;;  %v16868_v6 = vld [vmem:[#allocation2 + $0x22a] sm:$0xff] }
 0xac3   : > { %22764 = vmatprep.mubr.msk.f32.mxu0 %vm333_vm1, %v16072_v41  ;;  %v16869_v41 = vld [vmem:[#allocation2 + $0x232] sm:$0xff] }
 0xac6   : > { %22765 = vmatmul.mubr.msk.f32.gmra.mrb[10].mxu0 %vm333_vm1, %v16073_v49  ;;  %v16872_v49 = vld [vmem:[#allocation2 + $0x26a] sm:$0xff] }
 0xac7   : > { %22767 = vmatprep.mubr.msk.f32.mxu0 %vm333_vm1, %v16074_v31  ;;  %v16873_v31 = vld [vmem:[#allocation2 + $0x272] sm:$0xff] }
 0xaca   : > { %22768 = vmatmul.mubr.msk.f32.gmra.mrb[12].mxu0 %vm333_vm1, %v16075_v7 }
 0xacb   : > { %22770 = vmatprep.mubr.msk.f32.mxu0 %vm333_vm1, %v16076_v35  ;;  %v28621_v35 = vld [vmem:[%s28867_s6] ss:$0 sm:$0xff] }
 0xace   : > { %22771 = vmatmul.mubr.msk.f32.gmra.mrb[14].mxu0 %vm333_vm1, %v28141_v17  ;;  %v29482_v17 = vld [vmem:[#allocation10_spill] sm:$0xff] }
 0xacf   : > { %22773 = vmatprep.mubr.msk.f32.mxu0 %vm333_vm1, %v28145_v58  ;;  %v29483_v58 = vld [vmem:[#allocation11_spill] sm:$0xff] }
 0xad2   : > { %22774 = vmatmul.mubr.msk.f32.gmra.mrb[16].mxu0 %vm333_vm1, %v28149_v60  ;;  %v16088_v60 = vld [vmem:[#allocation2 + $0x228] sm:$0xff] }
 0xad3   : > { %22776 = vmatprep.mubr.msk.f32.mxu0 %vm333_vm1, %v28153_v37  ;;  %v16089_v37 = vld [vmem:[#allocation2 + $0x230] sm:$0xff] }
 0xad6   : > { %22777 = vmatmul.mubr.msk.f32.gmra.mrb[18].mxu0 %vm333_vm1, %v28157_v0  ;;  %v16092_v0 = vld [vmem:[#allocation2 + $0x268] sm:$0xff] }
 0xad7   : > { %22779 = vmatprep.mubr.msk.f32.mxu0 %vm333_vm1, %v28161_v56  ;;  %v16093_v56 = vld [vmem:[#allocation2 + $0x270] sm:$0xff] }
 0xada   : > { %22780 = vmatmul.mubr.msk.f32.gmra.mrb[20].mxu0 %vm333_vm1, %v28165_v20  ;;  %v17271_v20 = vld [vmem:[%s28868_s7] sm:$0xf] }
 0xadb   : > { %22782 = vmatprep.mubr.msk.f32.mxu0 %vm333_vm1, %v28169_v12  ;;  %v29484_v12 = vld [vmem:[#allocation12_spill] sm:$0xff]  ;;  %22897 = vmatprep.subr.msk.mxu1 %vm643_vm0, %v17271_v20 }
 0xadc   : > { %22898 = vmatpush3.msk.msra.mxu1 %vm643_vm0, %v17271_v20 }
 0xade   : > { %22783 = vmatmul.mubr.msk.f32.gmra.mrb[22].mxu0 %vm333_vm1, %v28173_v2  ;;  %v29485_v2 = vld [vmem:[#allocation13_spill] sm:$0xff] }
 0xadf   : > { %22785 = vmatprep.mubr.msk.f32.mxu0 %vm333_vm1, %v29482_v17 }
 0xae2   : > { %22786 = vmatmul.mubr.msk.f32.gmra.mrb[24].mxu0 %vm333_vm1, %v29483_v58  ;;  %v29495_v58 = vld [vmem:[#allocation20_spill] sm:$0xff] }
 0xae3   : > { %22788 = vmatprep.mubr.msk.f32.mxu0 %vm333_vm1, %v16088_v60 }
 0xae6   : > { %22789 = vmatmul.mubr.msk.f32.gmra.mrb[26].mxu0 %vm333_vm1, %v16089_v37 }
 0xae7   : > { %22791 = vmatprep.mubr.msk.f32.mxu0 %vm333_vm1, %v28187_v25  ;;  %v29486_v25 = vld [vmem:[#allocation14_spill] sm:$0xff] }
 0xaea   : > { %22792 = vmatmul.mubr.msk.f32.gmra.mrb[28].mxu0 %vm333_vm1, %v28193_v24  ;;  %v29487_v24 = vld [vmem:[#allocation15_spill] sm:$0xff] }
 0xaeb   : > { %22794 = vmatprep.mubr.msk.f32.mxu0 %vm333_vm1, %v16092_v0  ;;  %v29496_v0 = vld [vmem:[#allocation51_spill] sm:$0xff] }
 0xaee   : > { %22795 = vmatmul.mubr.msk.f32.gmra.mrb[30].mxu0 %vm333_vm1, %v16093_v56 }
 0xaef   : > { %22799 = vmatprep.mubr.msk.f32.mxu0 %vm333_vm1, %v29484_v12  ;;  %v29497_v12 = vld [vmem:[#allocation52_spill] sm:$0xff] }
 0xaf2   : > { %22800 = vmatmul.mubr.msk.f32.vlgmr.msra.gmra.mrb[0].mxu0 %vm333_vm1, %v29485_v2 }
 0xaf3   : > { %22848 = vmatpush3.msk.msra.mxu0 %vm643_vm0, %v19222_v34  ;;  %22802 = vmatprep.mubr.msk.f32.mxu0 %vm333_vm1, %v29486_v25  ;;  %v16858_v34 = vld [vmem:[#allocation2 + $0x18a] sm:$0xff] }
 0xaf6   : > { %22803 = vmatmul.mubr.msk.f32.gmra.mrb[2].mxu0 %vm333_vm1, %v29487_v24 }
 0xaf7   : > { %22805 = vmatprep.mubr.msk.f32.mxu0 %vm333_vm1, %v29488_v27 }
 0xafa   : > { %22806 = vmatmul.mubr.msk.f32.gmra.mrb[4].mxu0 %vm333_vm1, %v29489_v23  ;;  %v29498_v23 = vld [vmem:[#allocation53_spill] sm:$0xff] }
 0xafb   : > { %22808 = vmatprep.mubr.msk.f32.mxu0 %vm333_vm1, %v29490_v51 }
 0xafe   : > { %22809 = vmatmul.mubr.msk.f32.gmra.mrb[6].mxu0 %vm333_vm1, %v29491_v62 }
 0xaff   : > { %22811 = vmatprep.mubr.msk.f32.mxu0 %vm333_vm1, %v29492_v30  ;;  %v29499_v30 = vld [vmem:[#allocation54_spill] sm:$0xff] }
 0xb02   : > { %22812 = vmatmul.mubr.msk.f32.gmra.mrb[8].mxu0 %vm333_vm1, %v29493_v55 }
 0xb03   : > { %22814 = vmatprep.mubr.msk.f32.mxu0 %vm333_vm1, %v28244_v32  ;;  %v16470_v32 = vld [vmem:[#allocation2 + $0x1a9] sm:$0xff] }
 0xb06   : > { %22815 = vmatmul.mubr.msk.f32.gmra.mrb[10].mxu0 %vm333_vm1, %v28248_v52  ;;  %v16471_v52 = vld [vmem:[#allocation2 + $0x1b1] sm:$0xff] }
 0xb07   : > { %22817 = vmatprep.mubr.msk.f32.mxu0 %vm333_vm1, %v28252_v38  ;;  %v16472_v38 = vld [vmem:[#allocation2 + $0x1c9] sm:$0xff] }
 0xb0a   : > { %22818 = vmatmul.mubr.msk.f32.gmra.mrb[12].mxu0 %vm333_vm1, %v28256_v15  ;;  %v16473_v15 = vld [vmem:[#allocation2 + $0x1d1] sm:$0xff] }
 0xb0b   : > { %22820 = vmatprep.mubr.msk.f32.mxu0 %vm333_vm1, %v28260_v57  ;;  %v16474_v57 = vld [vmem:[#allocation2 + $0x1e9] sm:$0xff] }
 0xb0e   : > { %22821 = vmatmul.mubr.msk.f32.gmra.mrb[14].mxu0 %vm333_vm1, %v16467_v61 }
 0xb0f   : > { %22823 = vmatprep.mubr.msk.f32.mxu0 %vm333_vm1, %v16468_v19 }
 0xb12   : > { %22824 = vmatmul.mubr.msk.f32.gmra.mrb[16].mxu0 %vm333_vm1, %v16469_v22 }
 0xb13   : > { %22826 = vmatprep.mubr.msk.f32.mxu0 %vm333_vm1, %v16470_v32  ;;  %v29500_v32 = vld [vmem:[#allocation55_spill] sm:$0xff] }
 0xb16   : > { %22827 = vmatmul.mubr.msk.f32.gmra.mrb[18].mxu0 %vm333_vm1, %v16471_v52 }
 0xb17   : > { %22829 = vmatprep.mubr.msk.f32.mxu0 %vm333_vm1, %v16472_v38 }
 0xb1a   : > { %22830 = vmatmul.mubr.msk.f32.gmra.mrb[20].mxu0 %vm333_vm1, %v16473_v15  ;;  %v29501_v15 = vld [vmem:[#allocation56_spill] sm:$0xff] }
 0xb1b   : > { %22832 = vmatprep.mubr.msk.f32.mxu0 %vm333_vm1, %v16474_v57 }
 0xb1e   : > { %22833 = vmatmul.mubr.msk.f32.gmra.mrb[22].mxu0 %vm333_vm1, %v16475_v40 }
 0xb1f   : > { %22835 = vmatprep.mubr.msk.f32.mxu0 %vm333_vm1, %v28282_v18  ;;  %v16842_v18 = vld [vmem:[#allocation2 + $0x8a] sm:$0xff] }
 0xb22   : > { %22836 = vmatmul.mubr.msk.f32.gmra.mrb[24].mxu0 %vm333_vm1, %v28286_v44  ;;  %v16843_v44 = vld [vmem:[#allocation2 + $0x92] sm:$0xff] }
 0xb23   : > { %22838 = vmatprep.mubr.msk.f32.mxu0 %vm333_vm1, %v16478_v13 }
 0xb26   : > { %22839 = vmatmul.mubr.msk.f32.gmra.mrb[26].mxu0 %vm333_vm1, %v16479_v36 }
 0xb27   : > { %22841 = vmatprep.mubr.msk.f32.mxu0 %vm333_vm1, %v28292_v4  ;;  %v16846_v4 = vld [vmem:[#allocation2 + $0xca] sm:$0xff] }
 0xb2a   : > { %22842 = vmatmul.mubr.msk.f32.gmra.mrb[28].mxu0 %vm333_vm1, %v28298_v42  ;;  %v16847_v42 = vld [vmem:[#allocation2 + $0xd2] sm:$0xff] }
 0xb2b   : > { %22844 = vmatprep.mubr.msk.f32.mxu0 %vm333_vm1, %v16482_v11  ;;  %v29502_v11 = vld [vmem:[#allocation57_spill] sm:$0xff] }
 0xb2e   : > { %22845 = vmatmul.mubr.msk.f32.gmra.mrb[30].mxu0 %vm333_vm1, %v16483_v14 }
 0xb2f   : > { %22849 = vmatprep.mubr.msk.f32.mxu0 %vm333_vm1, %v16842_v18 }
 0xb32   : > { %22850 = vmatmul.mubr.msk.f32.vlgmr.msra.gmra.mrb[0].mxu0 %vm333_vm1, %v16843_v44  ;;  %v29503_v44 = vld [vmem:[#allocation58_spill] sm:$0xff] }
 0xb33   : > { %22852 = vmatprep.mubr.msk.f32.mxu0 %vm333_vm1, %v16844_v9 }
 0xb36   : > { %22853 = vmatmul.mubr.msk.f32.gmra.mrb[2].mxu0 %vm333_vm1, %v16845_v1 }
 0xb37   : > { %22855 = vmatprep.mubr.msk.f32.mxu0 %vm333_vm1, %v16846_v4 }
 0xb3a   : > { %22856 = vmatmul.mubr.msk.f32.gmra.mrb[4].mxu0 %vm333_vm1, %v16847_v42 }
 0xb3b   : > { %22858 = vmatprep.mubr.msk.f32.mxu0 %vm333_vm1, %v16848_v59  ;;  %v29504_v59 = vld [vmem:[#allocation59_spill] sm:$0xff] }
 0xb3e   : > { %22859 = vmatmul.mubr.msk.f32.gmra.mrb[6].mxu0 %vm333_vm1, %v16849_v10 }
 0xb3f   : > { %22861 = vmatprep.mubr.msk.f32.mxu0 %vm333_vm1, %v16850_v3 }
 0xb42   : > { %22862 = vmatmul.mubr.msk.f32.gmra.mrb[8].mxu0 %vm333_vm1, %v16851_v33  ;;  %v29505_v33 = vld [vmem:[#allocation60_spill] sm:$0xff] }
 0xb43   : > { %22864 = vmatprep.mubr.msk.f32.mxu0 %vm333_vm1, %v16852_v50 }
 0xb46   : > { %22865 = vmatmul.mubr.msk.f32.gmra.mrb[10].mxu0 %vm333_vm1, %v16853_v21 }
 0xb47   : > { %22867 = vmatprep.mubr.msk.f32.mxu0 %vm333_vm1, %v16854_v29 }
 0xb4a   : > { %22868 = vmatmul.mubr.msk.f32.gmra.mrb[12].mxu0 %vm333_vm1, %v16855_v28 }
 0xb4b   : > { %22870 = vmatprep.mubr.msk.f32.mxu0 %vm333_vm1, %v16856_v43  ;;  %v29506_v43 = vld [vmem:[#allocation32_spill] sm:$0xff] }
 0xb4e   : > { %22871 = vmatmul.mubr.msk.f32.gmra.mrb[14].mxu0 %vm333_vm1, %v16857_v16 }
 0xb4f   : > { %22873 = vmatprep.mubr.msk.f32.mxu0 %vm333_vm1, %v16858_v34 }
 0xb52   : > { %22874 = vmatmul.mubr.msk.f32.gmra.mrb[16].mxu0 %vm333_vm1, %v16859_v8  ;;  %v29507_v8 = vld [vmem:[#allocation7_spill] sm:$0xff] }
 0xb53   : > { %22876 = vmatprep.mubr.msk.f32.mxu0 %vm333_vm1, %v16860_v63 }
 0xb56   : > { %22877 = vmatmul.mubr.msk.f32.gmra.mrb[18].mxu0 %vm333_vm1, %v16861_v53 }
 0xb57   : > { %22879 = vmatprep.mubr.msk.f32.mxu0 %vm333_vm1, %v16862_v45 }
 0xb5a   : > { %22880 = vmatmul.mubr.msk.f32.gmra.mrb[20].mxu0 %vm333_vm1, %v16863_v26 }
 0xb5b   : > { %22882 = vmatprep.mubr.msk.f32.mxu0 %vm333_vm1, %v16864_v48  ;;  %v29508_v48 = vld [vmem:[#allocation8_spill] sm:$0xff] }
 0xb5e   : > { %22883 = vmatmul.mubr.msk.f32.gmra.mrb[22].mxu0 %vm333_vm1, %v16865_v5 }
 0xb5f   : > { %22885 = vmatprep.mubr.msk.f32.mxu0 %vm333_vm1, %v28359_v47 }
 0xb62   : > { %22886 = vmatmul.mubr.msk.f32.gmra.mrb[24].mxu0 %vm333_vm1, %v28363_v46  ;;  %v29494_v46 = vld [vmem:[#allocation18_spill] sm:$0xff] }
 0xb63   : > { %22888 = vmatprep.mubr.msk.f32.mxu0 %vm333_vm1, %v16868_v6 }
 0xb66   : > { %22889 = vmatmul.mubr.msk.f32.gmra.mrb[26].mxu0 %vm333_vm1, %v16869_v41  ;;  %v29509_v41 = vld [vmem:[#allocation26_spill] sm:$0xff] }
 0xb67   : > { %22891 = vmatprep.mubr.msk.f32.mxu0 %vm333_vm1, %v28369_v39 }
 0xb6a   : > { %22892 = vmatmul.mubr.msk.f32.gmra.mrb[28].mxu0 %vm333_vm1, %v28375_v54 }
 0xb6b   : > { %22894 = vmatprep.mubr.msk.f32.mxu0 %vm333_vm1, %v16872_v49 }
 0xb6e   : > { %22895 = vmatmul.mubr.msk.f32.gmra.mrb[30].mxu0 %vm333_vm1, %v16873_v31 }
 0xc05   : > { %v22851_v47 = vpop.f32.mrb[0].mxu0 }
 0xc06   : > { %v22947_v7 = vadd.f32 %v22851_v47, %v29494_v46  ;;  %v17041_v17 = vpop.f32.mrb[1].mxu0 }
 0xc07   : > { %v22948_v39 = vadd.f32 %v17041_v17, %v29495_v58 }
 0xc08   : > { %v17240_v54 = vadd.f32 %v22947_v7, %v28621_v35  ;;  %v29510_v7 = vld [vmem:[#allocation27_spill] sm:$0xff] }
 0xc09   : > { %v17239_v60 = vadd.f32 %v22948_v39, %v28621_v35  ;;  %v22854_v37 = vpop.f32.mrb[2].mxu0  ;;  %v29511_v39 = vld [vmem:[#allocation29_spill] sm:$0xff] }
 0xc0a   : > { %v22949_v56 = vadd.f32 %v22854_v37, %v29496_v0  ;;  %v17051_v20 = vpop.f32.mrb[3].mxu0 }
 0xc0b   : > { %v22950_v2 = vadd.f32 %v17051_v20, %v29497_v12  ;;  %22899 = vmatprep.mubr.msk.f32.mxu1 %vm333_vm1, %v17239_v60 }
 0xc0c   : > { %22900 = vmatmul.mubr.msk.f32.vlgmr.msra.gmra.mrb[96].mxu1 %vm333_vm1, %v17240_v54  ;;  %v17242_v27 = vadd.f32 %v22949_v56, %v28621_v35  ;;  %v29512_v56 = vld [vmem:[#allocation16_spill] sm:$0xff] }
 0xc0d   : > { %v17241_v25 = vadd.f32 %v22950_v2, %v28621_v35  ;;  %v22857_v24 = vpop.f32.mrb[4].mxu0  ;;  %v29513_v2 = vld [vmem:[#allocation19_spill] sm:$0xff] }
 0xc0e   : > { %v22951_v51 = vadd.f32 %v22857_v24, %v29498_v23  ;;  %v17061_v62 = vpop.f32.mrb[5].mxu0 }
 0xc0f   : > { %v22952_v55 = vadd.f32 %v17061_v62, %v29499_v30  ;;  %22902 = vmatprep.mubr.msk.f32.mxu1 %vm333_vm1, %v17241_v25 }
 0xc10   : > { %22903 = vmatmul.mubr.msk.f32.gmra.mrb[98].mxu1 %vm333_vm1, %v17242_v27  ;;  %v17244_v22 = vadd.f32 %v22951_v51, %v28621_v35  ;;  %v29514_v51 = vld [vmem:[#allocation23_spill] sm:$0xff] }
 0xc11   : > { %v17243_v61 = vadd.f32 %v22952_v55, %v28621_v35  ;;  %v22860_v19 = vpop.f32.mrb[6].mxu0  ;;  %v29515_v55 = vld [vmem:[#allocation61_spill] sm:$0xff] }
 0xc12   : > { %v22953_v52 = vadd.f32 %v22860_v19, %v29500_v32  ;;  %v17071_v38 = vpop.f32.mrb[7].mxu0 }
 0xc13   : > { %v22954_v57 = vadd.f32 %v17071_v38, %v29501_v15  ;;  %22905 = vmatprep.mubr.msk.f32.mxu1 %vm333_vm1, %v17243_v61 }
 0xc14   : > { %22906 = vmatmul.mubr.msk.f32.gmra.mrb[100].mxu1 %vm333_vm1, %v17244_v22  ;;  %v17246_v36 = vadd.f32 %v22953_v52, %v28621_v35  ;;  %v29516_v52 = vld [vmem:[#allocation28_spill] sm:$0xff] }
 0xc15   : > { %v17245_v40 = vadd.f32 %v22954_v57, %v28621_v35  ;;  %v22863_v13 = vpop.f32.mrb[8].mxu0  ;;  %v29517_v57 = vld [vmem:[#allocation62_spill] sm:$0xff] }
 0xc16   : > { %v22955_v14 = vadd.f32 %v22863_v13, %v29502_v11  ;;  %v17081_v18 = vpop.f32.mrb[9].mxu0 }
 0xc17   : > { %v22956_v9 = vadd.f32 %v17081_v18, %v29503_v44  ;;  %22908 = vmatprep.mubr.msk.f32.mxu1 %vm333_vm1, %v17245_v40 }
 0xc18   : > { %22909 = vmatmul.mubr.msk.f32.gmra.mrb[102].mxu1 %vm333_vm1, %v17246_v36  ;;  %v17248_v42 = vadd.f32 %v22955_v14, %v28621_v35  ;;  %v29518_v14 = vld [vmem:[#allocation31_spill] sm:$0xff] }
 0xc19   : > { %v17247_v1 = vadd.f32 %v22956_v9, %v28621_v35  ;;  %v22866_v4 = vpop.f32.mrb[10].mxu0  ;;  %v29519_v9 = vld [vmem:[#allocation3_spill] sm:$0xff] }
 0xc1a   : > { %v22957_v10 = vadd.f32 %v22866_v4, %v29504_v59  ;;  %v17091_v3 = vpop.f32.mrb[11].mxu0 }
 0xc1b   : > { %v22958_v50 = vadd.f32 %v17091_v3, %v29505_v33  ;;  %22911 = vmatprep.mubr.msk.f32.mxu1 %vm333_vm1, %v17247_v1 }
 0xc1c   : > { %22912 = vmatmul.mubr.msk.f32.gmra.mrb[104].mxu1 %vm333_vm1, %v17248_v42  ;;  %v17250_v28 = vadd.f32 %v22957_v10, %v28621_v35  ;;  %v29520_v10 = vld [vmem:[#allocation4_spill] sm:$0xff] }
 0xc1d   : > { %v17249_v21 = vadd.f32 %v22958_v50, %v28621_v35  ;;  %v22869_v29 = vpop.f32.mrb[12].mxu0  ;;  %v29521_v50 = vld [vmem:[#allocation5_spill] sm:$0xff] }
 0xc1e   : > { %v22959_v16 = vadd.f32 %v22869_v29, %v29506_v43  ;;  %v17101_v34 = vpop.f32.mrb[13].mxu0 }
 0xc1f   : > { %v22960_v63 = vadd.f32 %v17101_v34, %v29507_v8  ;;  %22914 = vmatprep.mubr.msk.f32.mxu1 %vm333_vm1, %v17249_v21 }
 0xc20   : > { %22915 = vmatmul.mubr.msk.f32.gmra.mrb[106].mxu1 %vm333_vm1, %v17250_v28  ;;  %v17252_v26 = vadd.f32 %v22959_v16, %v28621_v35  ;;  %v29522_v16 = vld [vmem:[#allocation6_spill] sm:$0xff] }
 0xc21   : > { %v17251_v53 = vadd.f32 %v22960_v63, %v28621_v35  ;;  %v22872_v45 = vpop.f32.mrb[14].mxu0  ;;  %v29523_v63 = vld [vmem:[#allocation33_spill] sm:$0xff] }
 0xc22   : > { %v22961_v5 = vadd.f32 %v22872_v45, %v29508_v48  ;;  %v17111_v6 = vpop.f32.mrb[15].mxu0 }
 0xc23   : > { %v22962_v49 = vadd.f32 %v17111_v6, %v29509_v41  ;;  %22917 = vmatprep.mubr.msk.f32.mxu1 %vm333_vm1, %v17251_v53 }
 0xc24   : > { %22918 = vmatmul.mubr.msk.f32.gmra.mrb[108].mxu1 %vm333_vm1, %v17252_v26  ;;  %v17254_v46 = vadd.f32 %v22961_v5, %v28621_v35  ;;  %v29524_v5 = vld [vmem:[#allocation34_spill] sm:$0xff] }
 0xc25   : > { %v17253_v31 = vadd.f32 %v22962_v49, %v28621_v35  ;;  %v22875_v47 = vpop.f32.mrb[16].mxu0  ;;  %v29525_v49 = vld [vmem:[#allocation9_spill] sm:$0xff] }
 0xc26   : > { %v22963_v17 = vadd.f32 %v22875_v47, %v29510_v7  ;;  %v17121_v58 = vpop.f32.mrb[17].mxu0  ;;  %v28721_v7 = vld [vmem:[%s28869_s8] ss:$0 sm:$0xff] }
 0xc27   : > { %v22964_v60 = vadd.f32 %v17121_v58, %v29511_v39  ;;  %22920 = vmatprep.mubr.msk.f32.mxu1 %vm333_vm1, %v17253_v31  ;;  %v17604_v58 = vld [vmem:[%s24494_s19 + $0x8] sm:$0xff] }
 0xc28   : > { %22921 = vmatmul.mubr.msk.f32.gmra.mrb[110].mxu1 %vm333_vm1, %v17254_v46  ;;  %v17256_v0 = vadd.f32 %v22963_v17, %v28621_v35 }
 0xc29   : > { %v17255_v37 = vadd.f32 %v22964_v60, %v28621_v35  ;;  %v22878_v54 = vpop.f32.mrb[18].mxu0 }
 0xc2a   : > { %v22965_v20 = vadd.f32 %v22878_v54, %v29512_v56  ;;  %v17131_v12 = vpop.f32.mrb[19].mxu0 }
 0xc2b   : > { %v22966_v25 = vadd.f32 %v17131_v12, %v29513_v2  ;;  %22923 = vmatprep.mubr.msk.f32.mxu1 %vm333_vm1, %v17255_v37  ;;  %v17603_v37 = vld [vmem:[%s24494_s19] sm:$0xff] }
 0xc2c   : > { %22924 = vmatmul.mubr.msk.f32.gmra.mrb[112].mxu1 %vm333_vm1, %v17256_v0  ;;  %v17258_v23 = vadd.f32 %v22965_v20, %v28621_v35  ;;  %v17606_v20 = vld [vmem:[%s24494_s19 + $0x18] sm:$0xff] }
 0xc2d   : > { %v17257_v24 = vadd.f32 %v22966_v25, %v28621_v35  ;;  %v22881_v27 = vpop.f32.mrb[20].mxu0 }
 0xc2e   : > { %v22967_v62 = vadd.f32 %v22881_v27, %v29514_v51  ;;  %v17141_v30 = vpop.f32.mrb[21].mxu0 }
 0xc2f   : > { %v22968_v61 = vadd.f32 %v17141_v30, %v29515_v55  ;;  %22926 = vmatprep.mubr.msk.f32.mxu1 %vm333_vm1, %v17257_v24  ;;  %v17605_v24 = vld [vmem:[%s24494_s19 + $0x10] sm:$0xff]  ;;  %v17608_v55 = vld [vmem:[%s24494_s19 + $0x28] sm:$0xff] }
 0xc30   : > { %22927 = vmatmul.mubr.msk.f32.gmra.mrb[114].mxu1 %vm333_vm1, %v17258_v23  ;;  %v17260_v32 = vadd.f32 %v22967_v62, %v28621_v35 }
 0xc31   : > { %v17259_v19 = vadd.f32 %v22968_v61, %v28621_v35  ;;  %v22884_v22 = vpop.f32.mrb[22].mxu0 }
 0xc32   : > { %v22969_v38 = vadd.f32 %v22884_v22, %v29516_v52  ;;  %v17151_v15 = vpop.f32.mrb[23].mxu0 }
 0xc33   : > { %v22970_v40 = vadd.f32 %v17151_v15, %v29517_v57  ;;  %22929 = vmatprep.mubr.msk.f32.mxu1 %vm333_vm1, %v17259_v19 }
 0xc34   : > { %22930 = vmatmul.mubr.msk.f32.gmra.mrb[116].mxu1 %vm333_vm1, %v17260_v32  ;;  %v17262_v11 = vadd.f32 %v22969_v38, %v28621_v35  ;;  %v17607_v32 = vld [vmem:[%s24494_s19 + $0x20] sm:$0xff] }
 0xc35   : > { %v17261_v13 = vadd.f32 %v22970_v40, %v28621_v35  ;;  %v22887_v36 = vpop.f32.mrb[24].mxu0 }
 0xc36   : > { %v22971_v18 = vadd.f32 %v22887_v36, %v29518_v14  ;;  %v17161_v44 = vpop.f32.mrb[25].mxu0 }
 0xc37   : > { %v22972_v1 = vadd.f32 %v17161_v44, %v29519_v9  ;;  %22932 = vmatprep.mubr.msk.f32.mxu1 %vm333_vm1, %v17261_v13  ;;  %v17610_v13 = vld [vmem:[%s24494_s19 + $0x38] sm:$0xff] }
 0xc38   : > { %22933 = vmatmul.mubr.msk.f32.gmra.mrb[118].mxu1 %vm333_vm1, %v17262_v11  ;;  %v17264_v59 = vadd.f32 %v22971_v18, %v28621_v35  ;;  %v17609_v18 = vld [vmem:[%s24494_s19 + $0x30] sm:$0xff] }
 0xc39   : > { %v17263_v4 = vadd.f32 %v22972_v1, %v28621_v35  ;;  %v22890_v42 = vpop.f32.mrb[26].mxu0 }
 0xc3a   : > { %v22973_v3 = vadd.f32 %v22890_v42, %v29520_v10  ;;  %v17171_v33 = vpop.f32.mrb[27].mxu0 }
 0xc3b   : > { %v22974_v21 = vadd.f32 %v17171_v33, %v29521_v50  ;;  %22935 = vmatprep.mubr.msk.f32.mxu1 %vm333_vm1, %v17263_v4  ;;  %v17611_v50 = vld [vmem:[%s24494_s19 + $0x40] sm:$0xff] }
 0xc3c   : > { %22936 = vmatmul.mubr.msk.f32.gmra.mrb[120].mxu1 %vm333_vm1, %v17264_v59  ;;  %v17266_v43 = vadd.f32 %v22973_v3, %v28621_v35  ;;  %v17612_v59 = vld [vmem:[%s24494_s19 + $0x48] sm:$0xff] }
 0xc3d   : > { %v17265_v29 = vadd.f32 %v22974_v21, %v28621_v35  ;;  %v22893_v28 = vpop.f32.mrb[28].mxu0 }
 0xc3e   : > { %v22975_v34 = vadd.f32 %v22893_v28, %v29522_v16  ;;  %v17181_v8 = vpop.f32.mrb[29].mxu0 }
 0xc3f   : > { %v22976_v53 = vadd.f32 %v17181_v8, %v29523_v63  ;;  %22938 = vmatprep.mubr.msk.f32.mxu1 %vm333_vm1, %v17265_v29 }
 0xc40   : > { %22939 = vmatmul.mubr.msk.f32.gmra.mrb[122].mxu1 %vm333_vm1, %v17266_v43  ;;  %v17268_v48 = vadd.f32 %v22975_v34, %v28621_v35  ;;  %v17614_v34 = vld [vmem:[%s24494_s19 + $0x58] sm:$0xff] }
 0xc41   : > { %v17267_v45 = vadd.f32 %v22976_v53, %v28621_v35  ;;  %v22896_v26 = vpop.f32.mrb[30].mxu0 }
 0xc42   : > { %v22977_v6 = vadd.f32 %v22896_v26, %v29524_v5  ;;  %v17191_v41 = vpop.f32.mrb[31].mxu0 }
 0xc43   : > { %v22978_v31 = vadd.f32 %v17191_v41, %v29525_v49  ;;  %22941 = vmatprep.mubr.msk.f32.mxu1 %vm333_vm1, %v17267_v45  ;;  %v17613_v45 = vld [vmem:[%s24494_s19 + $0x50] sm:$0xff]  ;;  %v17616_v49 = vld [vmem:[%s24494_s19 + $0x68] sm:$0xff] }
 0xc44   : > { %22942 = vmatmul.mubr.msk.f32.gmra.mrb[124].mxu1 %vm333_vm1, %v17268_v48  ;;  %v17270_v46 = vadd.f32 %v22977_v6, %v28621_v35 }
 0xc45   : > { %v17269_v47 = vadd.f32 %v22978_v31, %v28621_v35 }
 0xc47   : > { %22944 = vmatprep.mubr.msk.f32.mxu1 %vm333_vm1, %v17269_v47 }
 0xc48   : > { %22945 = vmatmul.mubr.msk.f32.gmra.mrb[126].mxu1 %vm333_vm1, %v17270_v46 }
 0xcdf   : > { %v22901_v17 = vpop.f32.mrb[96].mxu1 }
 0xce0   : > { %v17450_v39 = vadd.f32 %v22901_v17, %v28721_v7  ;;  %v17444_v60 = vpop.f32.mrb[97].mxu1  ;;  %v17615_v17 = vld [vmem:[%s24494_s19 + $0x60] sm:$0xff] }
 0xce1   : > { %v17445_v54 = vadd.f32 %v28721_v7, %v17444_v60 }
 0xce2   : > { %v17636_v0 = vadd.f32 %v17604_v58, %v17450_v39 }
 0xce3   : > { %v17635_v35 = vadd.f32 %v17603_v37, %v17445_v54  ;;  %v22904_v56 = vpop.f32.mrb[98].mxu1 }
 0xce4   : > { %v17668_v12 = vmax.f32 %v17636_v0, 0.0  ;;  %v17460_v2 = vadd.f32 %v22904_v56, %v28721_v7  ;;  %v17454_v25 = vpop.f32.mrb[99].mxu1  ;;  %v17618_v0 = vld [vmem:[%s24494_s19 + $0x78] sm:$0xff] }
 0xce5   : > { %v17667_v27 = vmax.f32 %v17635_v35, 0.0  ;;  %v17455_v23 = vadd.f32 %v28721_v7, %v17454_v25 }
 0xce6   : > { %17700 = vst.msk [vmem:[%s28732_s29 + $0x8] sm:$0xff] %vm333_vm1, %v17668_v12  ;;  %v17638_v51 = vadd.f32 %v17606_v20, %v17460_v2  ;;  %v17617_v12 = vld [vmem:[%s24494_s19 + $0x70] sm:$0xff] }
 0xce7   : > { %17699 = vst.msk [vmem:[%s28732_s29] sm:$0xff] %vm333_vm1, %v17667_v27  ;;  %v17637_v62 = vadd.f32 %v17605_v24, %v17455_v23  ;;  %v22907_v30 = vpop.f32.mrb[100].mxu1 }
 0xce8   : > { %v17670_v61 = vmax.f32 %v17638_v51, 0.0  ;;  %v17470_v19 = vadd.f32 %v22907_v30, %v28721_v7  ;;  %v17464_v22 = vpop.f32.mrb[101].mxu1  ;;  %v17620_v51 = vld [vmem:[%s24494_s19 + $0x88] sm:$0xff] }
 0xce9   : > { %v17669_v52 = vmax.f32 %v17637_v62, 0.0  ;;  %v17465_v38 = vadd.f32 %v28721_v7, %v17464_v22 }
 0xcea   : > { %17702 = vst.msk [vmem:[%s28732_s29 + $0x18] sm:$0xff] %vm333_vm1, %v17670_v61  ;;  %v17640_v15 = vadd.f32 %v17608_v55, %v17470_v19  ;;  %v17619_v61 = vld [vmem:[%s24494_s19 + $0x80] sm:$0xff] }
 0xceb   : > { %17701 = vst.msk [vmem:[%s28732_s29 + $0x10] sm:$0xff] %vm333_vm1, %v17669_v52  ;;  %v17639_v57 = vadd.f32 %v17607_v32, %v17465_v38  ;;  %v22910_v40 = vpop.f32.mrb[102].mxu1 }
 0xcec   : > { %v17672_v36 = vmax.f32 %v17640_v15, 0.0  ;;  %v17480_v11 = vadd.f32 %v22910_v40, %v28721_v7  ;;  %v17474_v14 = vpop.f32.mrb[103].mxu1  ;;  %v17622_v15 = vld [vmem:[%s24494_s19 + $0x98] sm:$0xff] }
 0xced   : > { %v17671_v44 = vmax.f32 %v17639_v57, 0.0  ;;  %v17475_v9 = vadd.f32 %v28721_v7, %v17474_v14 }
 0xcee   : > { %17704 = vst.msk [vmem:[%s28732_s29 + $0x28] sm:$0xff] %vm333_vm1, %v17672_v36  ;;  %v17642_v1 = vadd.f32 %v17610_v13, %v17480_v11  ;;  %v17621_v36 = vld [vmem:[%s24494_s19 + $0x90] sm:$0xff] }
 0xcef   : > { %17703 = vst.msk [vmem:[%s28732_s29 + $0x20] sm:$0xff] %vm333_vm1, %v17671_v44  ;;  %v17641_v4 = vadd.f32 %v17609_v18, %v17475_v9  ;;  %v22913_v42 = vpop.f32.mrb[104].mxu1 }
 0xcf0   : > { %v17674_v10 = vmax.f32 %v17642_v1, 0.0  ;;  %v17490_v3 = vadd.f32 %v22913_v42, %v28721_v7  ;;  %v17484_v33 = vpop.f32.mrb[105].mxu1  ;;  %v17624_v1 = vld [vmem:[%s24494_s19 + $0xa8] sm:$0xff] }
 0xcf1   : > { %v17673_v21 = vmax.f32 %v17641_v4, 0.0  ;;  %v17485_v29 = vadd.f32 %v28721_v7, %v17484_v33 }
 0xcf2   : > { %17706 = vst.msk [vmem:[%s28732_s29 + $0x38] sm:$0xff] %vm333_vm1, %v17674_v10  ;;  %v17644_v28 = vadd.f32 %v17612_v59, %v17490_v3  ;;  %v17623_v10 = vld [vmem:[%s24494_s19 + $0xa0] sm:$0xff] }
 0xcf3   : > { %17705 = vst.msk [vmem:[%s28732_s29 + $0x30] sm:$0xff] %vm333_vm1, %v17673_v21  ;;  %v17643_v43 = vadd.f32 %v17611_v50, %v17485_v29  ;;  %v22916_v16 = vpop.f32.mrb[106].mxu1 }
 0xcf4   : > { %v17676_v8 = vmax.f32 %v17644_v28, 0.0  ;;  %v17500_v63 = vadd.f32 %v22916_v16, %v28721_v7  ;;  %v17494_v53 = vpop.f32.mrb[107].mxu1  ;;  %v17626_v28 = vld [vmem:[%s24494_s19 + $0xb8] sm:$0xff] }
 0xcf5   : > { %v17675_v26 = vmax.f32 %v17643_v43, 0.0  ;;  %v17495_v48 = vadd.f32 %v28721_v7, %v17494_v53 }
 0xcf6   : > { %17708 = vst.msk [vmem:[%s28732_s29 + $0x48] sm:$0xff] %vm333_vm1, %v17676_v8  ;;  %v17646_v5 = vadd.f32 %v17614_v34, %v17500_v63  ;;  %v17625_v8 = vld [vmem:[%s24494_s19 + $0xb0] sm:$0xff] }
 0xcf7   : > { %17707 = vst.msk [vmem:[%s28732_s29 + $0x40] sm:$0xff] %vm333_vm1, %v17675_v26  ;;  %v17645_v6 = vadd.f32 %v17613_v45, %v17495_v48  ;;  %v22919_v41 = vpop.f32.mrb[108].mxu1 }
 0xcf8   : > { %v17678_v31 = vmax.f32 %v17646_v5, 0.0  ;;  %v17510_v47 = vadd.f32 %v22919_v41, %v28721_v7  ;;  %v17504_v46 = vpop.f32.mrb[109].mxu1  ;;  %v17628_v5 = vld [vmem:[%s24494_s19 + $0xc8] sm:$0xff] }
 0xcf9   : > { %v17677_v58 = vmax.f32 %v17645_v6, 0.0  ;;  %v17505_v39 = vadd.f32 %v28721_v7, %v17504_v46 }
 0xcfa   : > { %17710 = vst.msk [vmem:[%s28732_s29 + $0x58] sm:$0xff] %vm333_vm1, %v17678_v31  ;;  %v17648_v60 = vadd.f32 %v17616_v49, %v17510_v47  ;;  %v17627_v31 = vld [vmem:[%s24494_s19 + $0xc0] sm:$0xff] }
 0xcfb   : > { %17709 = vst.msk [vmem:[%s28732_s29 + $0x50] sm:$0xff] %vm333_vm1, %v17677_v58  ;;  %v17647_v37 = vadd.f32 %v17615_v17, %v17505_v39  ;;  %v22922_v54 = vpop.f32.mrb[110].mxu1 }
 0xcfc   : > { %v17680_v35 = vmax.f32 %v17648_v60, 0.0  ;;  %v17520_v56 = vadd.f32 %v22922_v54, %v28721_v7  ;;  %v17514_v20 = vpop.f32.mrb[111].mxu1  ;;  %v17630_v60 = vld [vmem:[%s24494_s19 + $0xd8] sm:$0xff] }
 0xcfd   : > { %v17679_v2 = vmax.f32 %v17647_v37, 0.0  ;;  %v17515_v25 = vadd.f32 %v28721_v7, %v17514_v20 }
 0xcfe   : > { %17712 = vst.msk [vmem:[%s28732_s29 + $0x68] sm:$0xff] %vm333_vm1, %v17680_v35  ;;  %v17650_v24 = vadd.f32 %v17618_v0, %v17520_v56  ;;  %v17629_v35 = vld [vmem:[%s24494_s19 + $0xd0] sm:$0xff] }
 0xcff   : > { %17711 = vst.msk [vmem:[%s28732_s29 + $0x60] sm:$0xff] %vm333_vm1, %v17679_v2  ;;  %v17649_v27 = vadd.f32 %v17617_v12, %v17515_v25  ;;  %v22925_v23 = vpop.f32.mrb[112].mxu1 }
 0xd00   : > { %v17682_v62 = vmax.f32 %v17650_v24, 0.0  ;;  %v17530_v30 = vadd.f32 %v22925_v23, %v28721_v7  ;;  %v17524_v55 = vpop.f32.mrb[113].mxu1  ;;  %v17632_v24 = vld [vmem:[%s24494_s19 + $0xe8] sm:$0xff] }
 0xd01   : > { %v17681_v19 = vmax.f32 %v17649_v27, 0.0  ;;  %v17525_v22 = vadd.f32 %v28721_v7, %v17524_v55 }
 0xd02   : > { %17714 = vst.msk [vmem:[%s28732_s29 + $0x78] sm:$0xff] %vm333_vm1, %v17682_v62  ;;  %v17652_v32 = vadd.f32 %v17620_v51, %v17530_v30  ;;  %v17631_v62 = vld [vmem:[%s24494_s19 + $0xe0] sm:$0xff] }
 0xd03   : > { %17713 = vst.msk [vmem:[%s28732_s29 + $0x70] sm:$0xff] %vm333_vm1, %v17681_v19  ;;  %v17651_v52 = vadd.f32 %v17619_v61, %v17525_v22  ;;  %v22928_v38 = vpop.f32.mrb[114].mxu1 }
 0xd04   : > { %v17684_v57 = vmax.f32 %v17652_v32, 0.0  ;;  %v17540_v40 = vadd.f32 %v22928_v38, %v28721_v7  ;;  %v17534_v13 = vpop.f32.mrb[115].mxu1  ;;  %v17634_v32 = vld [vmem:[%s24494_s19 + $0xf8] sm:$0xff] }
 0xd05   : > { %v17683_v11 = vmax.f32 %v17651_v52, 0.0  ;;  %v17535_v14 = vadd.f32 %v28721_v7, %v17534_v13 }
 0xd06   : > { %17716 = vst.msk [vmem:[%s28732_s29 + $0x88] sm:$0xff] %vm333_vm1, %v17684_v57  ;;  %v17654_v18 = vadd.f32 %v17622_v15, %v17540_v40  ;;  %v17633_v57 = vld [vmem:[%s24494_s19 + $0xf0] sm:$0xff] }
 0xd07   : > { %17715 = vst.msk [vmem:[%s28732_s29 + $0x80] sm:$0xff] %vm333_vm1, %v17683_v11  ;;  %v17653_v44 = vadd.f32 %v17621_v36, %v17535_v14  ;;  %v22931_v9 = vpop.f32.mrb[116].mxu1 }
 0xd08   : > { %v17686_v4 = vmax.f32 %v17654_v18, 0.0  ;;  %v17550_v42 = vadd.f32 %v22931_v9, %v28721_v7  ;;  %v17544_v59 = vpop.f32.mrb[117].mxu1 }
 0xd09   : > { %v17685_v3 = vmax.f32 %v17653_v44, 0.0  ;;  %v17545_v33 = vadd.f32 %v28721_v7, %v17544_v59 }
 0xd0a   : > { %17718 = vst.msk [vmem:[%s28732_s29 + $0x98] sm:$0xff] %vm333_vm1, %v17686_v4  ;;  %v17656_v50 = vadd.f32 %v17624_v1, %v17550_v42 }
 0xd0b   : > { %17717 = vst.msk [vmem:[%s28732_s29 + $0x90] sm:$0xff] %vm333_vm1, %v17685_v3  ;;  %v17655_v21 = vadd.f32 %v17623_v10, %v17545_v33  ;;  %v22934_v29 = vpop.f32.mrb[118].mxu1 }
 0xd0c   : > { %v17688_v43 = vmax.f32 %v17656_v50, 0.0  ;;  %v17560_v16 = vadd.f32 %v22934_v29, %v28721_v7  ;;  %v17554_v34 = vpop.f32.mrb[119].mxu1 }
 0xd0d   : > { %v17687_v63 = vmax.f32 %v17655_v21, 0.0  ;;  %v17555_v53 = vadd.f32 %v28721_v7, %v17554_v34 }
 0xd0e   : > { %17720 = vst.msk [vmem:[%s28732_s29 + $0xa8] sm:$0xff] %vm333_vm1, %v17688_v43  ;;  %v17658_v45 = vadd.f32 %v17626_v28, %v17560_v16 }
 0xd0f   : > { %17719 = vst.msk [vmem:[%s28732_s29 + $0xa0] sm:$0xff] %vm333_vm1, %v17687_v63  ;;  %v17657_v26 = vadd.f32 %v17625_v8, %v17555_v53  ;;  %v22937_v48 = vpop.f32.mrb[120].mxu1 }
 0xd10   : > { %v17690_v6 = vmax.f32 %v17658_v45, 0.0  ;;  %v17570_v41 = vadd.f32 %v22937_v48, %v28721_v7  ;;  %v17564_v49 = vpop.f32.mrb[121].mxu1 }
 0xd11   : > { %v17689_v47 = vmax.f32 %v17657_v26, 0.0  ;;  %v17565_v46 = vadd.f32 %v28721_v7, %v17564_v49 }
 0xd12   : > { %17722 = vst.msk [vmem:[%s28732_s29 + $0xb8] sm:$0xff] %vm333_vm1, %v17690_v6  ;;  %v17660_v17 = vadd.f32 %v17628_v5, %v17570_v41 }
 0xd13   : > { %17721 = vst.msk [vmem:[%s28732_s29 + $0xb0] sm:$0xff] %vm333_vm1, %v17689_v47  ;;  %v17659_v58 = vadd.f32 %v17627_v31, %v17565_v46  ;;  %v22940_v39 = vpop.f32.mrb[122].mxu1 }
 0xd14   : > { %v17692_v37 = vmax.f32 %v17660_v17, 0.0  ;;  %v17580_v54 = vadd.f32 %v22940_v39, %v28721_v7  ;;  %v17574_v0 = vpop.f32.mrb[123].mxu1 }
 0xd15   : > { %v17691_v56 = vmax.f32 %v17659_v58, 0.0  ;;  %v17575_v20 = vadd.f32 %v28721_v7, %v17574_v0 }
 0xd16   : > { %17724 = vst.msk [vmem:[%s28732_s29 + $0xc8] sm:$0xff] %vm333_vm1, %v17692_v37  ;;  %v17662_v12 = vadd.f32 %v17630_v60, %v17580_v54 }
 0xd17   : > { %17723 = vst.msk [vmem:[%s28732_s29 + $0xc0] sm:$0xff] %vm333_vm1, %v17691_v56  ;;  %v17661_v2 = vadd.f32 %v17629_v35, %v17575_v20  ;;  %v22943_v25 = vpop.f32.mrb[124].mxu1 }
 0xd18   : > { %v17694_v27 = vmax.f32 %v17662_v12, 0.0  ;;  %v17590_v23 = vadd.f32 %v22943_v25, %v28721_v7  ;;  %v17584_v51 = vpop.f32.mrb[125].mxu1 }
 0xd19   : > { %v17693_v30 = vmax.f32 %v17661_v2, 0.0  ;;  %v17585_v55 = vadd.f32 %v28721_v7, %v17584_v51 }
 0xd1a   : > { %17726 = vst.msk [vmem:[%s28732_s29 + $0xd8] sm:$0xff] %vm333_vm1, %v17694_v27  ;;  %v17664_v61 = vadd.f32 %v17632_v24, %v17590_v23 }
 0xd1b   : > { %17725 = vst.msk [vmem:[%s28732_s29 + $0xd0] sm:$0xff] %vm333_vm1, %v17693_v30  ;;  %v17663_v19 = vadd.f32 %v17631_v62, %v17585_v55  ;;  %v22946_v22 = vpop.f32.mrb[126].mxu1 }
 0xd1c   : > { %v17696_v52 = vmax.f32 %v17664_v61, 0.0  ;;  %v17600_v38 = vadd.f32 %v22946_v22, %v28721_v7  ;;  %v17594_v15 = vpop.f32.mrb[127].mxu1 }
 0xd1d   : > { %v17695_v40 = vmax.f32 %v17663_v19, 0.0  ;;  %v17595_v13 = vadd.f32 %v28721_v7, %v17594_v15 }
 0xd1e   : > { %17728 = vst.msk [vmem:[%s28732_s29 + $0xe8] sm:$0xff] %vm333_vm1, %v17696_v52  ;;  %v17666_v36 = vadd.f32 %v17634_v32, %v17600_v38 }
 0xd1f   : > { %17727 = vst.msk [vmem:[%s28732_s29 + $0xe0] sm:$0xff] %vm333_vm1, %v17695_v40  ;;  %v17665_v11 = vadd.f32 %v17633_v57, %v17595_v13 }
 0xd20   : > { %v17698_v14 = vmax.f32 %v17666_v36, 0.0 }
 0xd21   : > { %v17697_v18 = vmax.f32 %v17665_v11, 0.0 }
 0xd22   : > { %17730 = vst.msk [vmem:[%s28732_s29 + $0xf8] sm:$0xff] %vm333_vm1, %v17698_v14 }
 0xd23   : > { %17729 = vst.msk [vmem:[%s28732_s29 + $0xf0] sm:$0xff] %vm333_vm1, %v17697_v18 }
 0xd24 PF: > { %s19_s30 = sadd.s32 1, %s24242_s30  }
 0xd25   : > { %p16_p4 = scmp.ge.s32.totalorder %s19_s30, 4  }
 0xd27   :  { %18 = sbr.rel (!%p16_p4) target bundleno = 1 (0x1), region = 130 }

</bundles_post_ra>
